<compile_context>
chip_gen: v5e
topology: v5e:2x2
jax: 0.10.0
libtpu: 0.0.40
codegen_flags: <defaults>
</compile_context>

<pallas_src>
import functools

import jax
import jax.numpy as jnp
from jax.experimental import pallas as pl
from jax.experimental.pallas import tpu as pltpu

BN_EPS = 1e-5  # nn.BatchNorm2d default


# ----------------------------------------------------------------------------
# Tiling heuristics: prefer >= ~2*num_cores+2 grid steps on the parallel axis,
# tiles capped at 256 rows; fall back to the largest clean divisor.
# ----------------------------------------------------------------------------
_MIN_STEPS = 6


def _row_tile(m, min_steps=_MIN_STEPS):
    for t in (256, 128, 64, 32, 16, 8):
        if m % t == 0 and m // t >= min_steps:
            return t
    for t in (256, 128, 64, 32, 16, 8):
        if m % t == 0:
            return t
    return m


def _stats_tile(hw, m, min_steps=_MIN_STEPS):
    """Row tile that divides the per-sample row count hw (so each M-tile's
    partial stats belong to exactly one batch sample) and keeps the grid deep."""
    for t in (256, 128, 64, 32, 16, 8):
        if hw % t == 0 and m // t >= min_steps:
            return t
    for t in (256, 128, 64, 32, 16, 8):
        if hw % t == 0:
            return t
    return hw


def _h_tile(h):
    for t in (64, 32, 16, 8):
        if h % t == 0 and h // t >= 2:
            return t
    return h


# ----------------------------------------------------------------------------
# MXU matmul with fused (optional) ReLU epilogue AND fused per-tile channel
# sum / sum-of-squares (feeds BatchNorm batch stats and the SE average pool).
# bf16 operands, f32 accumulation, bf16 activation output, f32 stats.
# ----------------------------------------------------------------------------
def _matmul_stats_kernel(a_ref, b_ref, o_ref, s_ref, q_ref, *, relu):
    acc = jnp.dot(a_ref[...], b_ref[...], preferred_element_type=jnp.float32)
    if relu:
        acc = jnp.maximum(acc, 0.0)
    o_ref[...] = acc.astype(o_ref.dtype)
    s_ref[...] = jnp.sum(acc, axis=0, keepdims=True)[None]
    q_ref[...] = jnp.sum(acc * acc, axis=0, keepdims=True)[None]


def pallas_matmul_stats(a, bmat, batch, hw, relu=False):
    """(batch*hw, K) @ (K, N) -> ((batch*hw, N) bf16, per-sample sum/ssq (batch, N) f32)."""
    m, k = a.shape
    k2, n = bmat.shape
    assert k == k2 and m == batch * hw
    tm = _stats_tile(hw, m)
    nt = m // tm
    out, s, q = pl.pallas_call(
        functools.partial(_matmul_stats_kernel, relu=relu),
        out_shape=(jax.ShapeDtypeStruct((m, n), jnp.bfloat16),
                   jax.ShapeDtypeStruct((nt, 1, n), jnp.float32),
                   jax.ShapeDtypeStruct((nt, 1, n), jnp.float32)),
        grid=(nt,),
        in_specs=[pl.BlockSpec((tm, k), lambda i: (i, 0)),
                  pl.BlockSpec((k, n), lambda i: (0, 0))],
        out_specs=(pl.BlockSpec((tm, n), lambda i: (i, 0)),
                   pl.BlockSpec((1, 1, n), lambda i: (i, 0, 0)),
                   pl.BlockSpec((1, 1, n), lambda i: (i, 0, 0))),
        compiler_params=pltpu.CompilerParams(dimension_semantics=("parallel",)),
    )(a, bmat)
    tps = hw // tm                                     # tiles per sample
    s = s.reshape(batch, tps, n).sum(axis=1)
    q = q.reshape(batch, tps, n).sum(axis=1)
    return out, s, q


# ----------------------------------------------------------------------------
# Convolutions = im2col (bf16, XLA glue) + Pallas matmul-with-stats
# ----------------------------------------------------------------------------
def _im2col(x, kh, kw, sh, sw, ph, pw):
    n, h, w, c = x.shape
    xp = jnp.pad(x, ((0, 0), (ph, ph), (pw, pw), (0, 0)))
    ho = (h + 2 * ph - kh) // sh + 1
    wo = (w + 2 * pw - kw) // sw + 1
    cols = []
    for i in range(kh):
        for j in range(kw):
            patch = jax.lax.slice(
                xp, (0, i, j, 0),
                (n, i + (ho - 1) * sh + 1, j + (wo - 1) * sw + 1, c),
                (1, sh, sw, 1))
            cols.append(patch.reshape(n * ho * wo, c))
    return jnp.concatenate(cols, axis=-1), ho, wo


def conv2d_mm(x, w_mat, kh, kw, stride, pad, relu=False):
    sh, sw = (stride, stride) if isinstance(stride, int) else stride
    patches, ho, wo = _im2col(x, kh, kw, sh, sw, pad, pad)
    out, s, q = pallas_matmul_stats(patches, w_mat, x.shape[0], ho * wo, relu=relu)
    return out.reshape(x.shape[0], ho, wo, w_mat.shape[1]), s, q


def conv1x1_mm(x, w_mat, stride):
    sh, sw = (stride, stride) if isinstance(stride, int) else stride
    xs = x[:, ::sh, ::sw, :]
    n, ho, wo, c = xs.shape
    out, s, q = pallas_matmul_stats(xs.reshape(n * ho * wo, c), w_mat, n, ho * wo)
    return out.reshape(n, ho, wo, w_mat.shape[1]), s, q


# ----------------------------------------------------------------------------
# BatchNorm (training-mode batch stats, biased variance) folded to y*a + b
# ----------------------------------------------------------------------------
def bn_coeffs(sum_bc, ssq_bc, hw, gamma, beta):
    n_elems = sum_bc.shape[0] * hw
    mean = jnp.sum(sum_bc, axis=0) / n_elems
    var = jnp.maximum(jnp.sum(ssq_bc, axis=0) / n_elems - mean * mean, 0.0)
    inv = jax.lax.rsqrt(var + BN_EPS)
    a = gamma * inv
    b = beta - mean * a
    return a, b


# ----------------------------------------------------------------------------
# Lane-dense per-channel affine (+ optional ReLU).  Operates on (rows, W*C)
# with coefficients pre-tiled to W*C.  Used for the stem BN(+ReLU) and bn1.
# (Folding bn1 into conv2's weights would change border-pixel semantics because
#  conv2 zero-pads AFTER bn1, so a separate pass is kept.)
# ----------------------------------------------------------------------------
def _affine_kernel(y_ref, a_ref, b_ref, o_ref, *, relu):
    y = y_ref[...].astype(jnp.float32) * a_ref[...] + b_ref[...]
    if relu:
        y = jnp.maximum(y, 0.0)
    o_ref[...] = y.astype(o_ref.dtype)


def affine(y2d, a_vec, b_vec, relu):
    m, c = y2d.shape
    tm = _row_tile(m)
    return pl.pallas_call(
        functools.partial(_affine_kernel, relu=relu),
        out_shape=jax.ShapeDtypeStruct((m, c), jnp.bfloat16),
        grid=(m // tm,),
        in_specs=[pl.BlockSpec((tm, c), lambda i: (i, 0)),
                  pl.BlockSpec((1, c), lambda i: (0, 0)),
                  pl.BlockSpec((1, c), lambda i: (0, 0))],
        out_specs=pl.BlockSpec((tm, c), lambda i: (i, 0)),
        compiler_params=pltpu.CompilerParams(dimension_semantics=("parallel",)),
    )(y2d, a_vec.astype(jnp.float32).reshape(1, c),
      b_vec.astype(jnp.float32).reshape(1, c))


# ----------------------------------------------------------------------------
# SE excitation MLP: tiny (B,C)->(B,C/8)->(B,C)+sigmoid -> plain jnp (no launch)
# ----------------------------------------------------------------------------
def se_excite(pooled, w1, b1, w2, b2):
    h = jnp.maximum(pooled @ w1 + b1, 0.0)
    return jax.nn.sigmoid(h @ w2 + b2)


# ----------------------------------------------------------------------------
# Fused block tail (lane-dense, (B, H, W*C) layout):
#   out = relu( BN2(y) * se + BN_ds(residual) )
# For the FINAL block the full activation is never stored; the kernel instead
# emits per-H-tile f32 partial sums which XLA reduces to the head mean (B, W, C).
# ----------------------------------------------------------------------------
def _tail_kernel(y_ref, r_ref, ay_ref, by_ref, se_ref, ar_ref, br_ref, o_ref, *,
                 final):
    y = y_ref[...].astype(jnp.float32) * ay_ref[...] + by_ref[...]
    r = r_ref[...].astype(jnp.float32) * ar_ref[...] + br_ref[...]
    out = jnp.maximum(y * se_ref[...] + r, 0.0)
    if final:
        o_ref[...] = jnp.sum(out, axis=1, keepdims=True)[None]   # (1,1,1,WC)
    else:
        o_ref[...] = out.astype(o_ref.dtype)


def fused_tail(y, r, ay, by, se, ar, br, *, final=False):
    b, h, w, c = y.shape
    wc = w * c
    y2 = y.reshape(b, h, wc)
    r2 = r.reshape(b, h, wc)
    tile_c = lambda v: jnp.tile(v.astype(jnp.float32), w).reshape(1, wc)
    ayt, byt, art, brt = tile_c(ay), tile_c(by), tile_c(ar), tile_c(br)
    set_ = jnp.tile(se.astype(jnp.float32), (1, w)).reshape(b, 1, wc)

    th = _h_tile(h)
    nh = h // th
    in_specs = [pl.BlockSpec((1, th, wc), lambda i, j: (i, j, 0)),
                pl.BlockSpec((1, th, wc), lambda i, j: (i, j, 0)),
                pl.BlockSpec((1, wc), lambda i, j: (0, 0)),
                pl.BlockSpec((1, wc), lambda i, j: (0, 0)),
                pl.BlockSpec((1, 1, wc), lambda i, j: (i, 0, 0)),
                pl.BlockSpec((1, wc), lambda i, j: (0, 0)),
                pl.BlockSpec((1, wc), lambda i, j: (0, 0))]
    if final:
        out_shape = jax.ShapeDtypeStruct((b, nh, 1, wc), jnp.float32)
        out_specs = pl.BlockSpec((1, 1, 1, wc), lambda i, j: (i, j, 0, 0))
    else:
        out_shape = jax.ShapeDtypeStruct((b, h, wc), jnp.bfloat16)
        out_specs = pl.BlockSpec((1, th, wc), lambda i, j: (i, j, 0))

    out = pl.pallas_call(
        functools.partial(_tail_kernel, final=final),
        out_shape=out_shape,
        grid=(b, nh),
        in_specs=in_specs,
        out_specs=out_specs,
        compiler_params=pltpu.CompilerParams(
            dimension_semantics=("parallel", "parallel")),
    )(y2, r2, ayt, byt, set_, art, brt)

    if final:
        head = out.reshape(b, nh, wc).sum(axis=1) / h   # mean over frequency (H)
        return head.reshape(b, w, c)                    # == (B, time, C)
    return out.reshape(b, h, w, c)


# ----------------------------------------------------------------------------
# SEBasicBlock / audioEncoder forward
# ----------------------------------------------------------------------------
def se_basic_block(x, p, stride, *, final=False):
    n = x.shape[0]
    cout = p['bn1_g'].shape[0]

    # conv1 (3x3, stride, pad 1); trailing ReLU + stats fused into the matmul
    y1, s1, q1 = conv2d_mm(x, p['w1'], 3, 3, stride, 1, relu=True)
    _, ho, wo, _ = y1.shape
    hw = ho * wo

    # bn1 (training-mode batch stats) -> lane-dense fused affine
    a1, b1 = bn_coeffs(s1, q1, hw, p['bn1_g'], p['bn1_b'])
    y1n = affine(y1.reshape(n * ho, wo * cout),
                 jnp.tile(a1, wo), jnp.tile(b1, wo),
                 relu=False).reshape(n, ho, wo, cout)

    # conv2 (3x3, stride 1, pad 1); stats feed BOTH bn2 and the SE average pool
    y2, s2, q2 = conv2d_mm(y1n, p['w2'], 3, 3, (1, 1), 1)
    a2, b2 = bn_coeffs(s2, q2, hw, p['bn2_g'], p['bn2_b'])
    pooled = (s2 / hw) * a2 + b2                       # per-(b,c) mean of BN2(y2)
    se = se_excite(pooled, p['se_w1'], p['se_b1'], p['se_w2'], p['se_b2'])

    # residual branch (1x1 conv + BN when downsampling)
    if 'wd' in p:
        r, sr, qr = conv1x1_mm(x, p['wd'], stride)
        ar, br = bn_coeffs(sr, qr, hw, p['bnd_g'], p['bnd_b'])
    else:
        r = x
        ar = jnp.ones((cout,), jnp.float32)
        br = jnp.zeros((cout,), jnp.float32)

    # bn2 + SE scale + downsample-BN + residual add + relu (+ head mean if final)
    return fused_tail(y2, r, a2, b2, se, ar, br, final=final)


def audio_encoder_forward(x_nchw, params, config):
    x = jnp.transpose(x_nchw, (0, 2, 3, 1)).astype(jnp.bfloat16)   # NCHW -> NHWC
    n = x.shape[0]

    # stem: conv 7x7 stride (2,1) pad 3 -> BN (batch stats) -> ReLU  (module order)
    y, s, q = conv2d_mm(x, params['stem_w'], 7, 7, (2, 1), 3)
    _, ho, wo, c0 = y.shape
    hw = ho * wo
    a, b = bn_coeffs(s, q, hw, params['stem_bn_g'], params['stem_bn_b'])
    y = affine(y.reshape(n * ho, wo * c0),
               jnp.tile(a, wo), jnp.tile(b, wo),
               relu=True).reshape(n, ho, wo, c0)

    flat = [(blk, stride)
            for layer_params, layer_cfg in zip(params['layers'], config)
            for blk, stride in zip(layer_params, layer_cfg)]
    for idx, (blk, stride) in enumerate(flat):
        y = se_basic_block(y, blk, stride, final=(idx == len(flat) - 1))
    return y                                           # (B, time, C) f32


# ----------------------------------------------------------------------------
# Deterministic synthetic parameter init (weights pre-reshaped to matmul layout)
# ----------------------------------------------------------------------------
def _conv_w(key, k, cout):
    return (jax.random.normal(key, (k, cout), jnp.float32)
            * jnp.sqrt(2.0 / k)).astype(jnp.bfloat16)


def init_block_params(key, cin, cout, has_ds, reduction=8):
    ks = jax.random.split(key, 5)
    cr = max(cout // reduction, 1)
    p = {
        'w1': _conv_w(ks[0], 9 * cin, cout),
        'w2': _conv_w(ks[1], 9 * cout, cout),
        'bn1_g': jnp.ones((cout,), jnp.float32), 'bn1_b': jnp.zeros((cout,), jnp.float32),
        'bn2_g': jnp.ones((cout,), jnp.float32), 'bn2_b': jnp.zeros((cout,), jnp.float32),
        'se_w1': jax.random.normal(ks[2], (cout, cr), jnp.float32) / jnp.sqrt(float(cout)),
        'se_b1': jnp.zeros((cr,), jnp.float32),
        'se_w2': jax.random.normal(ks[3], (cr, cout), jnp.float32) / jnp.sqrt(float(cr)),
        'se_b2': jnp.zeros((cout,), jnp.float32),
    }
    if has_ds:
        p['wd'] = _conv_w(ks[4], cin, cout)
        p['bnd_g'] = jnp.ones((cout,), jnp.float32)
        p['bnd_b'] = jnp.zeros((cout,), jnp.float32)
    return p


def init_params(key, layers, num_filters):
    keys = jax.random.split(key, 1 + len(layers))
    params = {
        'stem_w': _conv_w(keys[0], 7 * 7 * 1, num_filters[0]),
        'stem_bn_g': jnp.ones((num_filters[0],), jnp.float32),
        'stem_bn_b': jnp.zeros((num_filters[0],), jnp.float32),
        'layers': [],
    }
    strides = [(1, 1), (2, 2), (2, 2), (1, 1)]
    config = []
    inplanes = num_filters[0]
    for li, (nblocks, planes) in enumerate(zip(layers, num_filters)):
        bkeys = jax.random.split(keys[1 + li], nblocks)
        blocks, cfg = [], []
        for bi in range(nblocks):
            stride = strides[li] if bi == 0 else (1, 1)
            # PyTorch: downsample on the first block of layers 2-4 (tuple stride != 1
            # or channel change); layer1 (int stride 1, same channels) has none.
            has_ds = (bi == 0) and (li > 0 or inplanes != planes)
            blocks.append(init_block_params(bkeys[bi], inplanes, planes, has_ds))
            cfg.append(stride)
            inplanes = planes
        params['layers'].append(blocks)
        config.append(tuple(cfg))
    return params, tuple(config)


if __name__ == "__main__":
    key = jax.random.PRNGKey(0)
    kx, kp = jax.random.split(key)

    layers = [1, 1, 1, 1]                 # small config (TalkNet default is [3,4,6,3])
    num_filters = [16, 32, 64, 128]
    x = jax.random.normal(kx, (2, 1, 32, 32), jnp.float32)   # (B, 1, freq, time)

    params, config = init_params(kp, layers, num_filters)
    fwd = jax.jit(functools.partial(audio_encoder_forward, config=config))
    out = jax.block_until_ready(fwd(x, params))

    assert out.shape == (2, 8, 128), out.shape          # (B, time_out, C)
    assert bool(jnp.all(jnp.isfinite(out)))
    print("KERNEL_OK")
</pallas_src>

<mosaic_0001>
module attributes {stable_mosaic.version = 11 : i64} {
  func.func @_matmul_stats_kernel(%arg0: i32, %arg1: memref<128x49xbf16, #tpu.memory_space<vmem>>, %arg2: memref<49x16xbf16, #tpu.memory_space<vmem>>, %arg3: memref<128x16xbf16, #tpu.memory_space<vmem>>, %arg4: memref<1x1x16xf32, #tpu.memory_space<vmem>>, %arg5: memref<1x1x16xf32, #tpu.memory_space<vmem>>) attributes {dimension_semantics = [#tpu.dimension_semantics<parallel>], iteration_bounds = array<i64: 8>, scalar_prefetch = 0 : i64, scratch_operands = 0 : i64, tpu.core_type = #tpu.core_type<tc>, window_params = [{transform_indices = @transform_0, window_bounds = array<i64: 128, 49>}, {pipeline_mode = #tpu.pipeline_mode<synchronous>, transform_indices = @transform_1, window_bounds = array<i64: 49, 16>}, {transform_indices = @transform_2, window_bounds = array<i64: 128, 16>}, {transform_indices = @transform_3, window_bounds = array<i64: 1, 1, 16>}, {transform_indices = @transform_4, window_bounds = array<i64: 1, 1, 16>}]} {
    %c0 = arith.constant 0 : index
    %c0_0 = arith.constant 0 : index
    %0 = vector.load %arg1[%c0, %c0_0] : memref<128x49xbf16, #tpu.memory_space<vmem>>, vector<128x49xbf16>
    %c0_1 = arith.constant 0 : index
    %c0_2 = arith.constant 0 : index
    %1 = vector.load %arg2[%c0_1, %c0_2] : memref<49x16xbf16, #tpu.memory_space<vmem>>, vector<49x16xbf16>
    %cst = arith.constant dense<0.000000e+00> : vector<128x16xf32>
    %2 = tpu.matmul %0, %1, %cst {dimension_numbers = #tpu.dot_dimension_numbers<[1], [0], [0], [1], [0, 0, 1, 1], [], []>} : vector<128x49xbf16>, vector<49x16xbf16>, vector<128x16xf32> -> vector<128x16xf32>
    %3 = arith.truncf %2 : vector<128x16xf32> to vector<128x16xbf16>
    %c0_3 = arith.constant 0 : index
    %c0_4 = arith.constant 0 : index
    %4 = vector.load %arg3[%c0_3, %c0_4] : memref<128x16xbf16, #tpu.memory_space<vmem>>, vector<128x16xbf16>
    tpu.vector_store %arg3[%c0_3, %c0_4], %3 {strides = array<i32>} : memref<128x16xbf16, #tpu.memory_space<vmem>>, vector<128x16xbf16>,
    %cst_5 = arith.constant dense<0.000000e+00> : vector<16xf32>
    %5 = vector.multi_reduction <add>, %2, %cst_5 [0] : vector<128x16xf32> to vector<16xf32>
    %6 = vector.shape_cast %5 : vector<16xf32> to vector<1x16xf32>
    %7 = vector.shape_cast %6 : vector<1x16xf32> to vector<1x1x16xf32>
    %c0_6 = arith.constant 0 : index
    %c0_7 = arith.constant 0 : index
    %c0_8 = arith.constant 0 : index
    %8 = vector.load %arg4[%c0_6, %c0_7, %c0_8] : memref<1x1x16xf32, #tpu.memory_space<vmem>>, vector<1x1x16xf32>
    tpu.vector_store %arg4[%c0_6, %c0_7, %c0_8], %7 {strides = array<i32>} : memref<1x1x16xf32, #tpu.memory_space<vmem>>, vector<1x1x16xf32>,
    %9 = arith.mulf %2, %2 : vector<128x16xf32>
    %cst_9 = arith.constant dense<0.000000e+00> : vector<16xf32>
    %10 = vector.multi_reduction <add>, %9, %cst_9 [0] : vector<128x16xf32> to vector<16xf32>
    %11 = vector.shape_cast %10 : vector<16xf32> to vector<1x16xf32>
    %12 = vector.shape_cast %11 : vector<1x16xf32> to vector<1x1x16xf32>
    %c0_10 = arith.constant 0 : index
    %c0_11 = arith.constant 0 : index
    %c0_12 = arith.constant 0 : index
    %13 = vector.load %arg5[%c0_10, %c0_11, %c0_12] : memref<1x1x16xf32, #tpu.memory_space<vmem>>, vector<1x1x16xf32>
    tpu.vector_store %arg5[%c0_10, %c0_11, %c0_12], %12 {strides = array<i32>} : memref<1x1x16xf32, #tpu.memory_space<vmem>>, vector<1x1x16xf32>,
    return
  }
  func.func @transform_0(%arg0: i32) -> (i32, i32) {
    %c0_i32 = arith.constant 0 : i32
    %c0_i32_0 = arith.constant 0 : i32
    return %arg0, %c0_i32 : i32, i32
  }
  func.func @transform_1(%arg0: i32) -> (i32, i32) {
    %c0_i32 = arith.constant 0 : i32
    %c0_i32_0 = arith.constant 0 : i32
    %c0_i32_1 = arith.constant 0 : i32
    return %c0_i32, %c0_i32_0 : i32, i32
  }
  func.func @transform_2(%arg0: i32) -> (i32, i32) {
    %c0_i32 = arith.constant 0 : i32
    %c0_i32_0 = arith.constant 0 : i32
    return %arg0, %c0_i32 : i32, i32
  }
  func.func @transform_3(%arg0: i32) -> (i32, i32, i32) {
    %c0_i32 = arith.constant 0 : i32
    %c0_i32_0 = arith.constant 0 : i32
    %c0_i32_1 = arith.constant 0 : i32
    return %arg0, %c0_i32, %c0_i32_0 : i32, i32, i32
  }
  func.func @transform_4(%arg0: i32) -> (i32, i32, i32) {
    %c0_i32 = arith.constant 0 : i32
    %c0_i32_0 = arith.constant 0 : i32
    %c0_i32_1 = arith.constant 0 : i32
    return %arg0, %c0_i32, %c0_i32_0 : i32, i32, i32
  }
}

module attributes {stable_mosaic.version = 11 : i64} {
  func.func @_affine_kernel(%arg0: i32, %arg1: memref<32x512xbf16, #tpu.memory_space<vmem>>, %arg2: memref<1x512xf32, #tpu.memory_space<vmem>>, %arg3: memref<1x512xf32, #tpu.memory_space<vmem>>, %arg4: memref<32x512xbf16, #tpu.memory_space<vmem>>) attributes {dimension_semantics = [#tpu.dimension_semantics<parallel>], iteration_bounds = array<i64: 1>, scalar_prefetch = 0 : i64, scratch_operands = 0 : i64, tpu.core_type = #tpu.core_type<tc>, window_params = [{transform_indices = @transform_0, window_bounds = array<i64: 32, 512>}, {pipeline_mode = #tpu.pipeline_mode<synchronous>, transform_indices = @transform_1, window_bounds = array<i64: 1, 512>}, {pipeline_mode = #tpu.pipeline_mode<synchronous>, transform_indices = @transform_2, window_bounds = array<i64: 1, 512>}, {transform_indices = @transform_3, window_bounds = array<i64: 32, 512>}]} {
    %c0 = arith.constant 0 : index
    %c0_0 = arith.constant 0 : index
    %0 = vector.load %arg1[%c0, %c0_0] : memref<32x512xbf16, #tpu.memory_space<vmem>>, vector<32x512xbf16>
    %1 = arith.extf %0 : vector<32x512xbf16> to vector<32x512xf32>
    %c0_1 = arith.constant 0 : index
    %c0_2 = arith.constant 0 : index
    %2 = vector.load %arg2[%c0_1, %c0_2] : memref<1x512xf32, #tpu.memory_space<vmem>>, vector<1x512xf32>
    %3 = vector.broadcast %2 : vector<1x512xf32> to vector<32x512xf32>
    %4 = arith.mulf %1, %3 : vector<32x512xf32>
    %c0_3 = arith.constant 0 : index
    %c0_4 = arith.constant 0 : index
    %5 = vector.load %arg3[%c0_3, %c0_4] : memref<1x512xf32, #tpu.memory_space<vmem>>, vector<1x512xf32>
    %6 = vector.broadcast %5 : vector<1x512xf32> to vector<32x512xf32>
    %7 = arith.addf %4, %6 : vector<32x512xf32>
    %cst = arith.constant 0.000000e+00 : f32
    %8 = vector.broadcast %cst : f32 to vector<32x512xf32>
    %9 = arith.maximumf %7, %8 : vector<32x512xf32>
    %10 = arith.truncf %9 : vector<32x512xf32> to vector<32x512xbf16>
    %c0_5 = arith.constant 0 : index
    %c0_6 = arith.constant 0 : index
    %11 = vector.load %arg4[%c0_5, %c0_6] : memref<32x512xbf16, #tpu.memory_space<vmem>>, vector<32x512xbf16>
    tpu.vector_store %arg4[%c0_5, %c0_6], %10 {strides = array<i32>} : memref<32x512xbf16, #tpu.memory_space<vmem>>, vector<32x512xbf16>,
    return
  }
  func.func @transform_0(%arg0: i32) -> (i32, i32) {
    %c0_i32 = arith.constant 0 : i32
    %c0_i32_0 = arith.constant 0 : i32
    return %arg0, %c0_i32 : i32, i32
  }
  func.func @transform_1(%arg0: i32) -> (i32, i32) {
    %c0_i32 = arith.constant 0 : i32
    %c0_i32_0 = arith.constant 0 : i32
    %c0_i32_1 = arith.constant 0 : i32
    return %c0_i32, %c0_i32_0 : i32, i32
  }
  func.func @transform_2(%arg0: i32) -> (i32, i32) {
    %c0_i32 = arith.constant 0 : i32
    %c0_i32_0 = arith.constant 0 : i32
    %c0_i32_1 = arith.constant 0 : i32
    return %c0_i32, %c0_i32_0 : i32, i32
  }
  func.func @transform_3(%arg0: i32) -> (i32, i32) {
    %c0_i32 = arith.constant 0 : i32
    %c0_i32_0 = arith.constant 0 : i32
    return %arg0, %c0_i32 : i32, i32
  }
}

module attributes {stable_mosaic.version = 11 : i64} {
  func.func @_matmul_stats_kernel(%arg0: i32, %arg1: memref<128x144xbf16, #tpu.memory_space<vmem>>, %arg2: memref<144x16xbf16, #tpu.memory_space<vmem>>, %arg3: memref<128x16xbf16, #tpu.memory_space<vmem>>, %arg4: memref<1x1x16xf32, #tpu.memory_space<vmem>>, %arg5: memref<1x1x16xf32, #tpu.memory_space<vmem>>) attributes {dimension_semantics = [#tpu.dimension_semantics<parallel>], iteration_bounds = array<i64: 8>, scalar_prefetch = 0 : i64, scratch_operands = 0 : i64, tpu.core_type = #tpu.core_type<tc>, window_params = [{transform_indices = @transform_0, window_bounds = array<i64: 128, 144>}, {pipeline_mode = #tpu.pipeline_mode<synchronous>, transform_indices = @transform_1, window_bounds = array<i64: 144, 16>}, {transform_indices = @transform_2, window_bounds = array<i64: 128, 16>}, {transform_indices = @transform_3, window_bounds = array<i64: 1, 1, 16>}, {transform_indices = @transform_4, window_bounds = array<i64: 1, 1, 16>}]} {
    %c0 = arith.constant 0 : index
    %c0_0 = arith.constant 0 : index
    %0 = vector.load %arg1[%c0, %c0_0] : memref<128x144xbf16, #tpu.memory_space<vmem>>, vector<128x144xbf16>
    %c0_1 = arith.constant 0 : index
    %c0_2 = arith.constant 0 : index
    %1 = vector.load %arg2[%c0_1, %c0_2] : memref<144x16xbf16, #tpu.memory_space<vmem>>, vector<144x16xbf16>
    %cst = arith.constant dense<0.000000e+00> : vector<128x16xf32>
    %2 = tpu.matmul %0, %1, %cst {dimension_numbers = #tpu.dot_dimension_numbers<[1], [0], [0], [1], [0, 0, 1, 1], [], []>} : vector<128x144xbf16>, vector<144x16xbf16>, vector<128x16xf32> -> vector<128x16xf32>
    %cst_3 = arith.constant 0.000000e+00 : f32
    %3 = vector.broadcast %cst_3 : f32 to vector<128x16xf32>
    %4 = arith.maximumf %2, %3 : vector<128x16xf32>
    %5 = arith.truncf %4 : vector<128x16xf32> to vector<128x16xbf16>
    %c0_4 = arith.constant 0 : index
    %c0_5 = arith.constant 0 : index
    %6 = vector.load %arg3[%c0_4, %c0_5] : memref<128x16xbf16, #tpu.memory_space<vmem>>, vector<128x16xbf16>
    tpu.vector_store %arg3[%c0_4, %c0_5], %5 {strides = array<i32>} : memref<128x16xbf16, #tpu.memory_space<vmem>>, vector<128x16xbf16>,
    %cst_6 = arith.constant dense<0.000000e+00> : vector<16xf32>
    %7 = vector.multi_reduction <add>, %4, %cst_6 [0] : vector<128x16xf32> to vector<16xf32>
    %8 = vector.shape_cast %7 : vector<16xf32> to vector<1x16xf32>
    %9 = vector.shape_cast %8 : vector<1x16xf32> to vector<1x1x16xf32>
    %c0_7 = arith.constant 0 : index
    %c0_8 = arith.constant 0 : index
    %c0_9 = arith.constant 0 : index
    %10 = vector.load %arg4[%c0_7, %c0_8, %c0_9] : memref<1x1x16xf32, #tpu.memory_space<vmem>>, vector<1x1x16xf32>
    tpu.vector_store %arg4[%c0_7, %c0_8, %c0_9], %9 {strides = array<i32>} : memref<1x1x16xf32, #tpu.memory_space<vmem>>, vector<1x1x16xf32>,
    %11 = arith.mulf %4, %4 : vector<128x16xf32>
    %cst_10 = arith.constant dense<0.000000e+00> : vector<16xf32>
    %12 = vector.multi_reduction <add>, %11, %cst_10 [0] : vector<128x16xf32> to vector<16xf32>
    %13 = vector.shape_cast %12 : vector<16xf32> to vector<1x16xf32>
    %14 = vector.shape_cast %13 : vector<1x16xf32> to vector<1x1x16xf32>
    %c0_11 = arith.constant 0 : index
    %c0_12 = arith.constant 0 : index
    %c0_13 = arith.constant 0 : index
    %15 = vector.load %arg5[%c0_11, %c0_12, %c0_13] : memref<1x1x16xf32, #tpu.memory_space<vmem>>, vector<1x1x16xf32>
    tpu.vector_store %arg5[%c0_11, %c0_12, %c0_13], %14 {strides = array<i32>} : memref<1x1x16xf32, #tpu.memory_space<vmem>>, vector<1x1x16xf32>,
    return
  }
  func.func @transform_0(%arg0: i32) -> (i32, i32) {
    %c0_i32 = arith.constant 0 : i32
    %c0_i32_0 = arith.constant 0 : i32
    return %arg0, %c0_i32 : i32, i32
  }
  func.func @transform_1(%arg0: i32) -> (i32, i32) {
    %c0_i32 = arith.constant 0 : i32
    %c0_i32_0 = arith.constant 0 : i32
    %c0_i32_1 = arith.constant 0 : i32
    return %c0_i32, %c0_i32_0 : i32, i32
  }
  func.func @transform_2(%arg0: i32) -> (i32, i32) {
    %c0_i32 = arith.constant 0 : i32
    %c0_i32_0 = arith.constant 0 : i32
    return %arg0, %c0_i32 : i32, i32
  }
  func.func @transform_3(%arg0: i32) -> (i32, i32, i32) {
    %c0_i32 = arith.constant 0 : i32
    %c0_i32_0 = arith.constant 0 : i32
    %c0_i32_1 = arith.constant 0 : i32
    return %arg0, %c0_i32, %c0_i32_0 : i32, i32, i32
  }
  func.func @transform_4(%arg0: i32) -> (i32, i32, i32) {
    %c0_i32 = arith.constant 0 : i32
    %c0_i32_0 = arith.constant 0 : i32
    %c0_i32_1 = arith.constant 0 : i32
    return %arg0, %c0_i32, %c0_i32_0 : i32, i32, i32
  }
}

module attributes {stable_mosaic.version = 11 : i64} {
  func.func @_affine_kernel(%arg0: i32, %arg1: memref<32x512xbf16, #tpu.memory_space<vmem>>, %arg2: memref<1x512xf32, #tpu.memory_space<vmem>>, %arg3: memref<1x512xf32, #tpu.memory_space<vmem>>, %arg4: memref<32x512xbf16, #tpu.memory_space<vmem>>) attributes {dimension_semantics = [#tpu.dimension_semantics<parallel>], iteration_bounds = array<i64: 1>, scalar_prefetch = 0 : i64, scratch_operands = 0 : i64, tpu.core_type = #tpu.core_type<tc>, window_params = [{transform_indices = @transform_0, window_bounds = array<i64: 32, 512>}, {pipeline_mode = #tpu.pipeline_mode<synchronous>, transform_indices = @transform_1, window_bounds = array<i64: 1, 512>}, {pipeline_mode = #tpu.pipeline_mode<synchronous>, transform_indices = @transform_2, window_bounds = array<i64: 1, 512>}, {transform_indices = @transform_3, window_bounds = array<i64: 32, 512>}]} {
    %c0 = arith.constant 0 : index
    %c0_0 = arith.constant 0 : index
    %0 = vector.load %arg1[%c0, %c0_0] : memref<32x512xbf16, #tpu.memory_space<vmem>>, vector<32x512xbf16>
    %1 = arith.extf %0 : vector<32x512xbf16> to vector<32x512xf32>
    %c0_1 = arith.constant 0 : index
    %c0_2 = arith.constant 0 : index
    %2 = vector.load %arg2[%c0_1, %c0_2] : memref<1x512xf32, #tpu.memory_space<vmem>>, vector<1x512xf32>
    %3 = vector.broadcast %2 : vector<1x512xf32> to vector<32x512xf32>
    %4 = arith.mulf %1, %3 : vector<32x512xf32>
    %c0_3 = arith.constant 0 : index
    %c0_4 = arith.constant 0 : index
    %5 = vector.load %arg3[%c0_3, %c0_4] : memref<1x512xf32, #tpu.memory_space<vmem>>, vector<1x512xf32>
    %6 = vector.broadcast %5 : vector<1x512xf32> to vector<32x512xf32>
    %7 = arith.addf %4, %6 : vector<32x512xf32>
    %8 = arith.truncf %7 : vector<32x512xf32> to vector<32x512xbf16>
    %c0_5 = arith.constant 0 : index
    %c0_6 = arith.constant 0 : index
    %9 = vector.load %arg4[%c0_5, %c0_6] : memref<32x512xbf16, #tpu.memory_space<vmem>>, vector<32x512xbf16>
    tpu.vector_store %arg4[%c0_5, %c0_6], %8 {strides = array<i32>} : memref<32x512xbf16, #tpu.memory_space<vmem>>, vector<32x512xbf16>,
    return
  }
  func.func @transform_0(%arg0: i32) -> (i32, i32) {
    %c0_i32 = arith.constant 0 : i32
    %c0_i32_0 = arith.constant 0 : i32
    return %arg0, %c0_i32 : i32, i32
  }
  func.func @transform_1(%arg0: i32) -> (i32, i32) {
    %c0_i32 = arith.constant 0 : i32
    %c0_i32_0 = arith.constant 0 : i32
    %c0_i32_1 = arith.constant 0 : i32
    return %c0_i32, %c0_i32_0 : i32, i32
  }
  func.func @transform_2(%arg0: i32) -> (i32, i32) {
    %c0_i32 = arith.constant 0 : i32
    %c0_i32_0 = arith.constant 0 : i32
    %c0_i32_1 = arith.constant 0 : i32
    return %c0_i32, %c0_i32_0 : i32, i32
  }
  func.func @transform_3(%arg0: i32) -> (i32, i32) {
    %c0_i32 = arith.constant 0 : i32
    %c0_i32_0 = arith.constant 0 : i32
    return %arg0, %c0_i32 : i32, i32
  }
}

module attributes {stable_mosaic.version = 11 : i64} {
  func.func @_matmul_stats_kernel(%arg0: i32, %arg1: memref<128x144xbf16, #tpu.memory_space<vmem>>, %arg2: memref<144x16xbf16, #tpu.memory_space<vmem>>, %arg3: memref<128x16xbf16, #tpu.memory_space<vmem>>, %arg4: memref<1x1x16xf32, #tpu.memory_space<vmem>>, %arg5: memref<1x1x16xf32, #tpu.memory_space<vmem>>) attributes {dimension_semantics = [#tpu.dimension_semantics<parallel>], iteration_bounds = array<i64: 8>, scalar_prefetch = 0 : i64, scratch_operands = 0 : i64, tpu.core_type = #tpu.core_type<tc>, window_params = [{transform_indices = @transform_0, window_bounds = array<i64: 128, 144>}, {pipeline_mode = #tpu.pipeline_mode<synchronous>, transform_indices = @transform_1, window_bounds = array<i64: 144, 16>}, {transform_indices = @transform_2, window_bounds = array<i64: 128, 16>}, {transform_indices = @transform_3, window_bounds = array<i64: 1, 1, 16>}, {transform_indices = @transform_4, window_bounds = array<i64: 1, 1, 16>}]} {
    %c0 = arith.constant 0 : index
    %c0_0 = arith.constant 0 : index
    %0 = vector.load %arg1[%c0, %c0_0] : memref<128x144xbf16, #tpu.memory_space<vmem>>, vector<128x144xbf16>
    %c0_1 = arith.constant 0 : index
    %c0_2 = arith.constant 0 : index
    %1 = vector.load %arg2[%c0_1, %c0_2] : memref<144x16xbf16, #tpu.memory_space<vmem>>, vector<144x16xbf16>
    %cst = arith.constant dense<0.000000e+00> : vector<128x16xf32>
    %2 = tpu.matmul %0, %1, %cst {dimension_numbers = #tpu.dot_dimension_numbers<[1], [0], [0], [1], [0, 0, 1, 1], [], []>} : vector<128x144xbf16>, vector<144x16xbf16>, vector<128x16xf32> -> vector<128x16xf32>
    %3 = arith.truncf %2 : vector<128x16xf32> to vector<128x16xbf16>
    %c0_3 = arith.constant 0 : index
    %c0_4 = arith.constant 0 : index
    %4 = vector.load %arg3[%c0_3, %c0_4] : memref<128x16xbf16, #tpu.memory_space<vmem>>, vector<128x16xbf16>
    tpu.vector_store %arg3[%c0_3, %c0_4], %3 {strides = array<i32>} : memref<128x16xbf16, #tpu.memory_space<vmem>>, vector<128x16xbf16>,
    %cst_5 = arith.constant dense<0.000000e+00> : vector<16xf32>
    %5 = vector.multi_reduction <add>, %2, %cst_5 [0] : vector<128x16xf32> to vector<16xf32>
    %6 = vector.shape_cast %5 : vector<16xf32> to vector<1x16xf32>
    %7 = vector.shape_cast %6 : vector<1x16xf32> to vector<1x1x16xf32>
    %c0_6 = arith.constant 0 : index
    %c0_7 = arith.constant 0 : index
    %c0_8 = arith.constant 0 : index
    %8 = vector.load %arg4[%c0_6, %c0_7, %c0_8] : memref<1x1x16xf32, #tpu.memory_space<vmem>>, vector<1x1x16xf32>
    tpu.vector_store %arg4[%c0_6, %c0_7, %c0_8], %7 {strides = array<i32>} : memref<1x1x16xf32, #tpu.memory_space<vmem>>, vector<1x1x16xf32>,
    %9 = arith.mulf %2, %2 : vector<128x16xf32>
    %cst_9 = arith.constant dense<0.000000e+00> : vector<16xf32>
    %10 = vector.multi_reduction <add>, %9, %cst_9 [0] : vector<128x16xf32> to vector<16xf32>
    %11 = vector.shape_cast %10 : vector<16xf32> to vector<1x16xf32>
    %12 = vector.shape_cast %11 : vector<1x16xf32> to vector<1x1x16xf32>
    %c0_10 = arith.constant 0 : index
    %c0_11 = arith.constant 0 : index
    %c0_12 = arith.constant 0 : index
    %13 = vector.load %arg5[%c0_10, %c0_11, %c0_12] : memref<1x1x16xf32, #tpu.memory_space<vmem>>, vector<1x1x16xf32>
    tpu.vector_store %arg5[%c0_10, %c0_11, %c0_12], %12 {strides = array<i32>} : memref<1x1x16xf32, #tpu.memory_space<vmem>>, vector<1x1x16xf32>,
    return
  }
  func.func @transform_0(%arg0: i32) -> (i32, i32) {
    %c0_i32 = arith.constant 0 : i32
    %c0_i32_0 = arith.constant 0 : i32
    return %arg0, %c0_i32 : i32, i32
  }
  func.func @transform_1(%arg0: i32) -> (i32, i32) {
    %c0_i32 = arith.constant 0 : i32
    %c0_i32_0 = arith.constant 0 : i32
    %c0_i32_1 = arith.constant 0 : i32
    return %c0_i32, %c0_i32_0 : i32, i32
  }
  func.func @transform_2(%arg0: i32) -> (i32, i32) {
    %c0_i32 = arith.constant 0 : i32
    %c0_i32_0 = arith.constant 0 : i32
    return %arg0, %c0_i32 : i32, i32
  }
  func.func @transform_3(%arg0: i32) -> (i32, i32, i32) {
    %c0_i32 = arith.constant 0 : i32
    %c0_i32_0 = arith.constant 0 : i32
    %c0_i32_1 = arith.constant 0 : i32
    return %arg0, %c0_i32, %c0_i32_0 : i32, i32, i32
  }
  func.func @transform_4(%arg0: i32) -> (i32, i32, i32) {
    %c0_i32 = arith.constant 0 : i32
    %c0_i32_0 = arith.constant 0 : i32
    %c0_i32_1 = arith.constant 0 : i32
    return %arg0, %c0_i32, %c0_i32_0 : i32, i32, i32
  }
}

module attributes {stable_mosaic.version = 11 : i64} {
  func.func @_tail_kernel(%arg0: i32, %arg1: i32, %arg2: memref<1x8x512xbf16, #tpu.memory_space<vmem>>, %arg3: memref<1x8x512xbf16, #tpu.memory_space<vmem>>, %arg4: memref<1x512xf32, #tpu.memory_space<vmem>>, %arg5: memref<1x512xf32, #tpu.memory_space<vmem>>, %arg6: memref<1x1x512xf32, #tpu.memory_space<vmem>>, %arg7: memref<1x512xf32, #tpu.memory_space<vmem>>, %arg8: memref<1x512xf32, #tpu.memory_space<vmem>>, %arg9: memref<1x8x512xbf16, #tpu.memory_space<vmem>>) attributes {dimension_semantics = [#tpu.dimension_semantics<parallel>, #tpu.dimension_semantics<parallel>], iteration_bounds = array<i64: 2, 2>, scalar_prefetch = 0 : i64, scratch_operands = 0 : i64, tpu.core_type = #tpu.core_type<tc>, window_params = [{transform_indices = @transform_0, window_bounds = array<i64: 1, 8, 512>}, {transform_indices = @transform_1, window_bounds = array<i64: 1, 8, 512>}, {pipeline_mode = #tpu.pipeline_mode<synchronous>, transform_indices = @transform_2, window_bounds = array<i64: 1, 512>}, {pipeline_mode = #tpu.pipeline_mode<synchronous>, transform_indices = @transform_3, window_bounds = array<i64: 1, 512>}, {transform_indices = @transform_4, window_bounds = array<i64: 1, 1, 512>}, {pipeline_mode = #tpu.pipeline_mode<synchronous>, transform_indices = @transform_5, window_bounds = array<i64: 1, 512>}, {pipeline_mode = #tpu.pipeline_mode<synchronous>, transform_indices = @transform_6, window_bounds = array<i64: 1, 512>}, {transform_indices = @transform_7, window_bounds = array<i64: 1, 8, 512>}]} {
    %c0 = arith.constant 0 : index
    %c0_0 = arith.constant 0 : index
    %c0_1 = arith.constant 0 : index
    %0 = vector.load %arg2[%c0, %c0_0, %c0_1] : memref<1x8x512xbf16, #tpu.memory_space<vmem>>, vector<1x8x512xbf16>
    %1 = arith.extf %0 : vector<1x8x512xbf16> to vector<1x8x512xf32>
    %c0_2 = arith.constant 0 : index
    %c0_3 = arith.constant 0 : index
    %2 = vector.load %arg4[%c0_2, %c0_3] : memref<1x512xf32, #tpu.memory_space<vmem>>, vector<1x512xf32>
    %3 = vector.shape_cast %2 : vector<1x512xf32> to vector<1x1x512xf32>
    %4 = vector.broadcast %3 : vector<1x1x512xf32> to vector<1x8x512xf32>
    %5 = arith.mulf %1, %4 : vector<1x8x512xf32>
    %c0_4 = arith.constant 0 : index
    %c0_5 = arith.constant 0 : index
    %6 = vector.load %arg5[%c0_4, %c0_5] : memref<1x512xf32, #tpu.memory_space<vmem>>, vector<1x512xf32>
    %7 = vector.shape_cast %6 : vector<1x512xf32> to vector<1x1x512xf32>
    %8 = vector.broadcast %7 : vector<1x1x512xf32> to vector<1x8x512xf32>
    %9 = arith.addf %5, %8 : vector<1x8x512xf32>
    %c0_6 = arith.constant 0 : index
    %c0_7 = arith.constant 0 : index
    %c0_8 = arith.constant 0 : index
    %10 = vector.load %arg3[%c0_6, %c0_7, %c0_8] : memref<1x8x512xbf16, #tpu.memory_space<vmem>>, vector<1x8x512xbf16>
    %11 = arith.extf %10 : vector<1x8x512xbf16> to vector<1x8x512xf32>
    %c0_9 = arith.constant 0 : index
    %c0_10 = arith.constant 0 : index
    %12 = vector.load %arg7[%c0_9, %c0_10] : memref<1x512xf32, #tpu.memory_space<vmem>>, vector<1x512xf32>
    %13 = vector.shape_cast %12 : vector<1x512xf32> to vector<1x1x512xf32>
    %14 = vector.broadcast %13 : vector<1x1x512xf32> to vector<1x8x512xf32>
    %15 = arith.mulf %11, %14 : vector<1x8x512xf32>
    %c0_11 = arith.constant 0 : index
    %c0_12 = arith.constant 0 : index
    %16 = vector.load %arg8[%c0_11, %c0_12] : memref<1x512xf32, #tpu.memory_space<vmem>>, vector<1x512xf32>
    %17 = vector.shape_cast %16 : vector<1x512xf32> to vector<1x1x512xf32>
    %18 = vector.broadcast %17 : vector<1x1x512xf32> to vector<1x8x512xf32>
    %19 = arith.addf %15, %18 : vector<1x8x512xf32>
    %c0_13 = arith.constant 0 : index
    %c0_14 = arith.constant 0 : index
    %c0_15 = arith.constant 0 : index
    %20 = vector.load %arg6[%c0_13, %c0_14, %c0_15] : memref<1x1x512xf32, #tpu.memory_space<vmem>>, vector<1x1x512xf32>
    %21 = vector.broadcast %20 : vector<1x1x512xf32> to vector<1x8x512xf32>
    %22 = arith.mulf %9, %21 : vector<1x8x512xf32>
    %23 = arith.addf %22, %19 : vector<1x8x512xf32>
    %cst = arith.constant 0.000000e+00 : f32
    %24 = vector.broadcast %cst : f32 to vector<1x8x512xf32>
    %25 = arith.maximumf %23, %24 : vector<1x8x512xf32>
    %26 = arith.truncf %25 : vector<1x8x512xf32> to vector<1x8x512xbf16>
    %c0_16 = arith.constant 0 : index
    %c0_17 = arith.constant 0 : index
    %c0_18 = arith.constant 0 : index
    %27 = vector.load %arg9[%c0_16, %c0_17, %c0_18] : memref<1x8x512xbf16, #tpu.memory_space<vmem>>, vector<1x8x512xbf16>
    tpu.vector_store %arg9[%c0_16, %c0_17, %c0_18], %26 {strides = array<i32>} : memref<1x8x512xbf16, #tpu.memory_space<vmem>>, vector<1x8x512xbf16>,
    return
  }
  func.func @transform_0(%arg0: i32, %arg1: i32) -> (i32, i32, i32) {
    %c0_i32 = arith.constant 0 : i32
    %c0_i32_0 = arith.constant 0 : i32
    return %arg0, %arg1, %c0_i32 : i32, i32, i32
  }
  func.func @transform_1(%arg0: i32, %arg1: i32) -> (i32, i32, i32) {
    %c0_i32 = arith.constant 0 : i32
    %c0_i32_0 = arith.constant 0 : i32
    return %arg0, %arg1, %c0_i32 : i32, i32, i32
  }
  func.func @transform_2(%arg0: i32, %arg1: i32) -> (i32, i32) {
    %c0_i32 = arith.constant 0 : i32
    %c0_i32_0 = arith.constant 0 : i32
    %c0_i32_1 = arith.constant 0 : i32
    return %c0_i32, %c0_i32_0 : i32, i32
  }
  func.func @transform_3(%arg0: i32, %arg1: i32) -> (i32, i32) {
    %c0_i32 = arith.constant 0 : i32
    %c0_i32_0 = arith.constant 0 : i32
    %c0_i32_1 = arith.constant 0 : i32
    return %c0_i32, %c0_i32_0 : i32, i32
  }
  func.func @transform_4(%arg0: i32, %arg1: i32) -> (i32, i32, i32) {
    %c0_i32 = arith.constant 0 : i32
    %c0_i32_0 = arith.constant 0 : i32
    %c0_i32_1 = arith.constant 0 : i32
    return %arg0, %c0_i32, %c0_i32_0 : i32, i32, i32
  }
  func.func @transform_5(%arg0: i32, %arg1: i32) -> (i32, i32) {
    %c0_i32 = arith.constant 0 : i32
    %c0_i32_0 = arith.constant 0 : i32
    %c0_i32_1 = arith.constant 0 : i32
    return %c0_i32, %c0_i32_0 : i32, i32
  }
  func.func @transform_6(%arg0: i32, %arg1: i32) -> (i32, i32) {
    %c0_i32 = arith.constant 0 : i32
    %c0_i32_0 = arith.constant 0 : i32
    %c0_i32_1 = arith.constant 0 : i32
    return %c0_i32, %c0_i32_0 : i32, i32
  }
  func.func @transform_7(%arg0: i32, %arg1: i32) -> (i32, i32, i32) {
    %c0_i32 = arith.constant 0 : i32
    %c0_i32_0 = arith.constant 0 : i32
    return %arg0, %arg1, %c0_i32 : i32, i32, i32
  }
}

module attributes {stable_mosaic.version = 11 : i64} {
  func.func @_matmul_stats_kernel(%arg0: i32, %arg1: memref<32x16xbf16, #tpu.memory_space<vmem>>, %arg2: memref<16x32xbf16, #tpu.memory_space<vmem>>, %arg3: memref<32x32xbf16, #tpu.memory_space<vmem>>, %arg4: memref<1x1x32xf32, #tpu.memory_space<vmem>>, %arg5: memref<1x1x32xf32, #tpu.memory_space<vmem>>) attributes {dimension_semantics = [#tpu.dimension_semantics<parallel>], iteration_bounds = array<i64: 8>, scalar_prefetch = 0 : i64, scratch_operands = 0 : i64, tpu.core_type = #tpu.core_type<tc>, window_params = [{transform_indices = @transform_0, window_bounds = array<i64: 32, 16>}, {pipeline_mode = #tpu.pipeline_mode<synchronous>, transform_indices = @transform_1, window_bounds = array<i64: 16, 32>}, {transform_indices = @transform_2, window_bounds = array<i64: 32, 32>}, {transform_indices = @transform_3, window_bounds = array<i64: 1, 1, 32>}, {transform_indices = @transform_4, window_bounds = array<i64: 1, 1, 32>}]} {
    %c0 = arith.constant 0 : index
    %c0_0 = arith.constant 0 : index
    %0 = vector.load %arg1[%c0, %c0_0] : memref<32x16xbf16, #tpu.memory_space<vmem>>, vector<32x16xbf16>
    %c0_1 = arith.constant 0 : index
    %c0_2 = arith.constant 0 : index
    %1 = vector.load %arg2[%c0_1, %c0_2] : memref<16x32xbf16, #tpu.memory_space<vmem>>, vector<16x32xbf16>
    %cst = arith.constant dense<0.000000e+00> : vector<32x32xf32>
    %2 = tpu.matmul %0, %1, %cst {dimension_numbers = #tpu.dot_dimension_numbers<[1], [0], [0], [1], [0, 0, 1, 1], [], []>} : vector<32x16xbf16>, vector<16x32xbf16>, vector<32x32xf32> -> vector<32x32xf32>
    %3 = arith.truncf %2 : vector<32x32xf32> to vector<32x32xbf16>
    %c0_3 = arith.constant 0 : index
    %c0_4 = arith.constant 0 : index
    %4 = vector.load %arg3[%c0_3, %c0_4] : memref<32x32xbf16, #tpu.memory_space<vmem>>, vector<32x32xbf16>
    tpu.vector_store %arg3[%c0_3, %c0_4], %3 {strides = array<i32>} : memref<32x32xbf16, #tpu.memory_space<vmem>>, vector<32x32xbf16>,
    %cst_5 = arith.constant dense<0.000000e+00> : vector<32xf32>
    %5 = vector.multi_reduction <add>, %2, %cst_5 [0] : vector<32x32xf32> to vector<32xf32>
    %6 = vector.shape_cast %5 : vector<32xf32> to vector<1x32xf32>
    %7 = vector.shape_cast %6 : vector<1x32xf32> to vector<1x1x32xf32>
    %c0_6 = arith.constant 0 : index
    %c0_7 = arith.constant 0 : index
    %c0_8 = arith.constant 0 : index
    %8 = vector.load %arg4[%c0_6, %c0_7, %c0_8] : memref<1x1x32xf32, #tpu.memory_space<vmem>>, vector<1x1x32xf32>
    tpu.vector_store %arg4[%c0_6, %c0_7, %c0_8], %7 {strides = array<i32>} : memref<1x1x32xf32, #tpu.memory_space<vmem>>, vector<1x1x32xf32>,
    %9 = arith.mulf %2, %2 : vector<32x32xf32>
    %cst_9 = arith.constant dense<0.000000e+00> : vector<32xf32>
    %10 = vector.multi_reduction <add>, %9, %cst_9 [0] : vector<32x32xf32> to vector<32xf32>
    %11 = vector.shape_cast %10 : vector<32xf32> to vector<1x32xf32>
    %12 = vector.shape_cast %11 : vector<1x32xf32> to vector<1x1x32xf32>
    %c0_10 = arith.constant 0 : index
    %c0_11 = arith.constant 0 : index
    %c0_12 = arith.constant 0 : index
    %13 = vector.load %arg5[%c0_10, %c0_11, %c0_12] : memref<1x1x32xf32, #tpu.memory_space<vmem>>, vector<1x1x32xf32>
    tpu.vector_store %arg5[%c0_10, %c0_11, %c0_12], %12 {strides = array<i32>} : memref<1x1x32xf32, #tpu.memory_space<vmem>>, vector<1x1x32xf32>,
    return
  }
  func.func @transform_0(%arg0: i32) -> (i32, i32) {
    %c0_i32 = arith.constant 0 : i32
    %c0_i32_0 = arith.constant 0 : i32
    return %arg0, %c0_i32 : i32, i32
  }
  func.func @transform_1(%arg0: i32) -> (i32, i32) {
    %c0_i32 = arith.constant 0 : i32
    %c0_i32_0 = arith.constant 0 : i32
    %c0_i32_1 = arith.constant 0 : i32
    return %c0_i32, %c0_i32_0 : i32, i32
  }
  func.func @transform_2(%arg0: i32) -> (i32, i32) {
    %c0_i32 = arith.constant 0 : i32
    %c0_i32_0 = arith.constant 0 : i32
    return %arg0, %c0_i32 : i32, i32
  }
  func.func @transform_3(%arg0: i32) -> (i32, i32, i32) {
    %c0_i32 = arith.constant 0 : i32
    %c0_i32_0 = arith.constant 0 : i32
    %c0_i32_1 = arith.constant 0 : i32
    return %arg0, %c0_i32, %c0_i32_0 : i32, i32, i32
  }
  func.func @transform_4(%arg0: i32) -> (i32, i32, i32) {
    %c0_i32 = arith.constant 0 : i32
    %c0_i32_0 = arith.constant 0 : i32
    %c0_i32_1 = arith.constant 0 : i32
    return %arg0, %c0_i32, %c0_i32_0 : i32, i32, i32
  }
}

module attributes {stable_mosaic.version = 11 : i64} {
  func.func @_matmul_stats_kernel(%arg0: i32, %arg1: memref<32x144xbf16, #tpu.memory_space<vmem>>, %arg2: memref<144x32xbf16, #tpu.memory_space<vmem>>, %arg3: memref<32x32xbf16, #tpu.memory_space<vmem>>, %arg4: memref<1x1x32xf32, #tpu.memory_space<vmem>>, %arg5: memref<1x1x32xf32, #tpu.memory_space<vmem>>) attributes {dimension_semantics = [#tpu.dimension_semantics<parallel>], iteration_bounds = array<i64: 8>, scalar_prefetch = 0 : i64, scratch_operands = 0 : i64, tpu.core_type = #tpu.core_type<tc>, window_params = [{transform_indices = @transform_0, window_bounds = array<i64: 32, 144>}, {pipeline_mode = #tpu.pipeline_mode<synchronous>, transform_indices = @transform_1, window_bounds = array<i64: 144, 32>}, {transform_indices = @transform_2, window_bounds = array<i64: 32, 32>}, {transform_indices = @transform_3, window_bounds = array<i64: 1, 1, 32>}, {transform_indices = @transform_4, window_bounds = array<i64: 1, 1, 32>}]} {
    %c0 = arith.constant 0 : index
    %c0_0 = arith.constant 0 : index
    %0 = vector.load %arg1[%c0, %c0_0] : memref<32x144xbf16, #tpu.memory_space<vmem>>, vector<32x144xbf16>
    %c0_1 = arith.constant 0 : index
    %c0_2 = arith.constant 0 : index
    %1 = vector.load %arg2[%c0_1, %c0_2] : memref<144x32xbf16, #tpu.memory_space<vmem>>, vector<144x32xbf16>
    %cst = arith.constant dense<0.000000e+00> : vector<32x32xf32>
    %2 = tpu.matmul %0, %1, %cst {dimension_numbers = #tpu.dot_dimension_numbers<[1], [0], [0], [1], [0, 0, 1, 1], [], []>} : vector<32x144xbf16>, vector<144x32xbf16>, vector<32x32xf32> -> vector<32x32xf32>
    %cst_3 = arith.constant 0.000000e+00 : f32
    %3 = vector.broadcast %cst_3 : f32 to vector<32x32xf32>
    %4 = arith.maximumf %2, %3 : vector<32x32xf32>
    %5 = arith.truncf %4 : vector<32x32xf32> to vector<32x32xbf16>
    %c0_4 = arith.constant 0 : index
    %c0_5 = arith.constant 0 : index
    %6 = vector.load %arg3[%c0_4, %c0_5] : memref<32x32xbf16, #tpu.memory_space<vmem>>, vector<32x32xbf16>
    tpu.vector_store %arg3[%c0_4, %c0_5], %5 {strides = array<i32>} : memref<32x32xbf16, #tpu.memory_space<vmem>>, vector<32x32xbf16>,
    %cst_6 = arith.constant dense<0.000000e+00> : vector<32xf32>
    %7 = vector.multi_reduction <add>, %4, %cst_6 [0] : vector<32x32xf32> to vector<32xf32>
    %8 = vector.shape_cast %7 : vector<32xf32> to vector<1x32xf32>
    %9 = vector.shape_cast %8 : vector<1x32xf32> to vector<1x1x32xf32>
    %c0_7 = arith.constant 0 : index
    %c0_8 = arith.constant 0 : index
    %c0_9 = arith.constant 0 : index
    %10 = vector.load %arg4[%c0_7, %c0_8, %c0_9] : memref<1x1x32xf32, #tpu.memory_space<vmem>>, vector<1x1x32xf32>
    tpu.vector_store %arg4[%c0_7, %c0_8, %c0_9], %9 {strides = array<i32>} : memref<1x1x32xf32, #tpu.memory_space<vmem>>, vector<1x1x32xf32>,
    %11 = arith.mulf %4, %4 : vector<32x32xf32>
    %cst_10 = arith.constant dense<0.000000e+00> : vector<32xf32>
    %12 = vector.multi_reduction <add>, %11, %cst_10 [0] : vector<32x32xf32> to vector<32xf32>
    %13 = vector.shape_cast %12 : vector<32xf32> to vector<1x32xf32>
    %14 = vector.shape_cast %13 : vector<1x32xf32> to vector<1x1x32xf32>
    %c0_11 = arith.constant 0 : index
    %c0_12 = arith.constant 0 : index
    %c0_13 = arith.constant 0 : index
    %15 = vector.load %arg5[%c0_11, %c0_12, %c0_13] : memref<1x1x32xf32, #tpu.memory_space<vmem>>, vector<1x1x32xf32>
    tpu.vector_store %arg5[%c0_11, %c0_12, %c0_13], %14 {strides = array<i32>} : memref<1x1x32xf32, #tpu.memory_space<vmem>>, vector<1x1x32xf32>,
    return
  }
  func.func @transform_0(%arg0: i32) -> (i32, i32) {
    %c0_i32 = arith.constant 0 : i32
    %c0_i32_0 = arith.constant 0 : i32
    return %arg0, %c0_i32 : i32, i32
  }
  func.func @transform_1(%arg0: i32) -> (i32, i32) {
    %c0_i32 = arith.constant 0 : i32
    %c0_i32_0 = arith.constant 0 : i32
    %c0_i32_1 = arith.constant 0 : i32
    return %c0_i32, %c0_i32_0 : i32, i32
  }
  func.func @transform_2(%arg0: i32) -> (i32, i32) {
    %c0_i32 = arith.constant 0 : i32
    %c0_i32_0 = arith.constant 0 : i32
    return %arg0, %c0_i32 : i32, i32
  }
  func.func @transform_3(%arg0: i32) -> (i32, i32, i32) {
    %c0_i32 = arith.constant 0 : i32
    %c0_i32_0 = arith.constant 0 : i32
    %c0_i32_1 = arith.constant 0 : i32
    return %arg0, %c0_i32, %c0_i32_0 : i32, i32, i32
  }
  func.func @transform_4(%arg0: i32) -> (i32, i32, i32) {
    %c0_i32 = arith.constant 0 : i32
    %c0_i32_0 = arith.constant 0 : i32
    %c0_i32_1 = arith.constant 0 : i32
    return %arg0, %c0_i32, %c0_i32_0 : i32, i32, i32
  }
}

module attributes {stable_mosaic.version = 11 : i64} {
  func.func @_affine_kernel(%arg0: i32, %arg1: memref<16x512xbf16, #tpu.memory_space<vmem>>, %arg2: memref<1x512xf32, #tpu.memory_space<vmem>>, %arg3: memref<1x512xf32, #tpu.memory_space<vmem>>, %arg4: memref<16x512xbf16, #tpu.memory_space<vmem>>) attributes {dimension_semantics = [#tpu.dimension_semantics<parallel>], iteration_bounds = array<i64: 1>, scalar_prefetch = 0 : i64, scratch_operands = 0 : i64, tpu.core_type = #tpu.core_type<tc>, window_params = [{transform_indices = @transform_0, window_bounds = array<i64: 16, 512>}, {pipeline_mode = #tpu.pipeline_mode<synchronous>, transform_indices = @transform_1, window_bounds = array<i64: 1, 512>}, {pipeline_mode = #tpu.pipeline_mode<synchronous>, transform_indices = @transform_2, window_bounds = array<i64: 1, 512>}, {transform_indices = @transform_3, window_bounds = array<i64: 16, 512>}]} {
    %c0 = arith.constant 0 : index
    %c0_0 = arith.constant 0 : index
    %0 = vector.load %arg1[%c0, %c0_0] : memref<16x512xbf16, #tpu.memory_space<vmem>>, vector<16x512xbf16>
    %1 = arith.extf %0 : vector<16x512xbf16> to vector<16x512xf32>
    %c0_1 = arith.constant 0 : index
    %c0_2 = arith.constant 0 : index
    %2 = vector.load %arg2[%c0_1, %c0_2] : memref<1x512xf32, #tpu.memory_space<vmem>>, vector<1x512xf32>
    %3 = vector.broadcast %2 : vector<1x512xf32> to vector<16x512xf32>
    %4 = arith.mulf %1, %3 : vector<16x512xf32>
    %c0_3 = arith.constant 0 : index
    %c0_4 = arith.constant 0 : index
    %5 = vector.load %arg3[%c0_3, %c0_4] : memref<1x512xf32, #tpu.memory_space<vmem>>, vector<1x512xf32>
    %6 = vector.broadcast %5 : vector<1x512xf32> to vector<16x512xf32>
    %7 = arith.addf %4, %6 : vector<16x512xf32>
    %8 = arith.truncf %7 : vector<16x512xf32> to vector<16x512xbf16>
    %c0_5 = arith.constant 0 : index
    %c0_6 = arith.constant 0 : index
    %9 = vector.load %arg4[%c0_5, %c0_6] : memref<16x512xbf16, #tpu.memory_space<vmem>>, vector<16x512xbf16>
    tpu.vector_store %arg4[%c0_5, %c0_6], %8 {strides = array<i32>} : memref<16x512xbf16, #tpu.memory_space<vmem>>, vector<16x512xbf16>,
    return
  }
  func.func @transform_0(%arg0: i32) -> (i32, i32) {
    %c0_i32 = arith.constant 0 : i32
    %c0_i32_0 = arith.constant 0 : i32
    return %arg0, %c0_i32 : i32, i32
  }
  func.func @transform_1(%arg0: i32) -> (i32, i32) {
    %c0_i32 = arith.constant 0 : i32
    %c0_i32_0 = arith.constant 0 : i32
    %c0_i32_1 = arith.constant 0 : i32
    return %c0_i32, %c0_i32_0 : i32, i32
  }
  func.func @transform_2(%arg0: i32) -> (i32, i32) {
    %c0_i32 = arith.constant 0 : i32
    %c0_i32_0 = arith.constant 0 : i32
    %c0_i32_1 = arith.constant 0 : i32
    return %c0_i32, %c0_i32_0 : i32, i32
  }
  func.func @transform_3(%arg0: i32) -> (i32, i32) {
    %c0_i32 = arith.constant 0 : i32
    %c0_i32_0 = arith.constant 0 : i32
    return %arg0, %c0_i32 : i32, i32
  }
}

module attributes {stable_mosaic.version = 11 : i64} {
  func.func @_matmul_stats_kernel(%arg0: i32, %arg1: memref<32x288xbf16, #tpu.memory_space<vmem>>, %arg2: memref<288x32xbf16, #tpu.memory_space<vmem>>, %arg3: memref<32x32xbf16, #tpu.memory_space<vmem>>, %arg4: memref<1x1x32xf32, #tpu.memory_space<vmem>>, %arg5: memref<1x1x32xf32, #tpu.memory_space<vmem>>) attributes {dimension_semantics = [#tpu.dimension_semantics<parallel>], iteration_bounds = array<i64: 8>, scalar_prefetch = 0 : i64, scratch_operands = 0 : i64, tpu.core_type = #tpu.core_type<tc>, window_params = [{transform_indices = @transform_0, window_bounds = array<i64: 32, 288>}, {pipeline_mode = #tpu.pipeline_mode<synchronous>, transform_indices = @transform_1, window_bounds = array<i64: 288, 32>}, {transform_indices = @transform_2, window_bounds = array<i64: 32, 32>}, {transform_indices = @transform_3, window_bounds = array<i64: 1, 1, 32>}, {transform_indices = @transform_4, window_bounds = array<i64: 1, 1, 32>}]} {
    %c0 = arith.constant 0 : index
    %c0_0 = arith.constant 0 : index
    %0 = vector.load %arg1[%c0, %c0_0] : memref<32x288xbf16, #tpu.memory_space<vmem>>, vector<32x288xbf16>
    %c0_1 = arith.constant 0 : index
    %c0_2 = arith.constant 0 : index
    %1 = vector.load %arg2[%c0_1, %c0_2] : memref<288x32xbf16, #tpu.memory_space<vmem>>, vector<288x32xbf16>
    %cst = arith.constant dense<0.000000e+00> : vector<32x32xf32>
    %2 = tpu.matmul %0, %1, %cst {dimension_numbers = #tpu.dot_dimension_numbers<[1], [0], [0], [1], [0, 0, 1, 1], [], []>} : vector<32x288xbf16>, vector<288x32xbf16>, vector<32x32xf32> -> vector<32x32xf32>
    %3 = arith.truncf %2 : vector<32x32xf32> to vector<32x32xbf16>
    %c0_3 = arith.constant 0 : index
    %c0_4 = arith.constant 0 : index
    %4 = vector.load %arg3[%c0_3, %c0_4] : memref<32x32xbf16, #tpu.memory_space<vmem>>, vector<32x32xbf16>
    tpu.vector_store %arg3[%c0_3, %c0_4], %3 {strides = array<i32>} : memref<32x32xbf16, #tpu.memory_space<vmem>>, vector<32x32xbf16>,
    %cst_5 = arith.constant dense<0.000000e+00> : vector<32xf32>
    %5 = vector.multi_reduction <add>, %2, %cst_5 [0] : vector<32x32xf32> to vector<32xf32>
    %6 = vector.shape_cast %5 : vector<32xf32> to vector<1x32xf32>
    %7 = vector.shape_cast %6 : vector<1x32xf32> to vector<1x1x32xf32>
    %c0_6 = arith.constant 0 : index
    %c0_7 = arith.constant 0 : index
    %c0_8 = arith.constant 0 : index
    %8 = vector.load %arg4[%c0_6, %c0_7, %c0_8] : memref<1x1x32xf32, #tpu.memory_space<vmem>>, vector<1x1x32xf32>
    tpu.vector_store %arg4[%c0_6, %c0_7, %c0_8], %7 {strides = array<i32>} : memref<1x1x32xf32, #tpu.memory_space<vmem>>, vector<1x1x32xf32>,
    %9 = arith.mulf %2, %2 : vector<32x32xf32>
    %cst_9 = arith.constant dense<0.000000e+00> : vector<32xf32>
    %10 = vector.multi_reduction <add>, %9, %cst_9 [0] : vector<32x32xf32> to vector<32xf32>
    %11 = vector.shape_cast %10 : vector<32xf32> to vector<1x32xf32>
    %12 = vector.shape_cast %11 : vector<1x32xf32> to vector<1x1x32xf32>
    %c0_10 = arith.constant 0 : index
    %c0_11 = arith.constant 0 : index
    %c0_12 = arith.constant 0 : index
    %13 = vector.load %arg5[%c0_10, %c0_11, %c0_12] : memref<1x1x32xf32, #tpu.memory_space<vmem>>, vector<1x1x32xf32>
    tpu.vector_store %arg5[%c0_10, %c0_11, %c0_12], %12 {strides = array<i32>} : memref<1x1x32xf32, #tpu.memory_space<vmem>>, vector<1x1x32xf32>,
    return
  }
  func.func @transform_0(%arg0: i32) -> (i32, i32) {
    %c0_i32 = arith.constant 0 : i32
    %c0_i32_0 = arith.constant 0 : i32
    return %arg0, %c0_i32 : i32, i32
  }
  func.func @transform_1(%arg0: i32) -> (i32, i32) {
    %c0_i32 = arith.constant 0 : i32
    %c0_i32_0 = arith.constant 0 : i32
    %c0_i32_1 = arith.constant 0 : i32
    return %c0_i32, %c0_i32_0 : i32, i32
  }
  func.func @transform_2(%arg0: i32) -> (i32, i32) {
    %c0_i32 = arith.constant 0 : i32
    %c0_i32_0 = arith.constant 0 : i32
    return %arg0, %c0_i32 : i32, i32
  }
  func.func @transform_3(%arg0: i32) -> (i32, i32, i32) {
    %c0_i32 = arith.constant 0 : i32
    %c0_i32_0 = arith.constant 0 : i32
    %c0_i32_1 = arith.constant 0 : i32
    return %arg0, %c0_i32, %c0_i32_0 : i32, i32, i32
  }
  func.func @transform_4(%arg0: i32) -> (i32, i32, i32) {
    %c0_i32 = arith.constant 0 : i32
    %c0_i32_0 = arith.constant 0 : i32
    %c0_i32_1 = arith.constant 0 : i32
    return %arg0, %c0_i32, %c0_i32_0 : i32, i32, i32
  }
}

module attributes {stable_mosaic.version = 11 : i64} {
  func.func @_tail_kernel(%arg0: i32, %arg1: i32, %arg2: memref<1x8x512xbf16, #tpu.memory_space<vmem>>, %arg3: memref<1x8x512xbf16, #tpu.memory_space<vmem>>, %arg4: memref<1x512xf32, #tpu.memory_space<vmem>>, %arg5: memref<1x512xf32, #tpu.memory_space<vmem>>, %arg6: memref<1x1x512xf32, #tpu.memory_space<vmem>>, %arg7: memref<1x512xf32, #tpu.memory_space<vmem>>, %arg8: memref<1x512xf32, #tpu.memory_space<vmem>>, %arg9: memref<1x8x512xbf16, #tpu.memory_space<vmem>>) attributes {dimension_semantics = [#tpu.dimension_semantics<parallel>, #tpu.dimension_semantics<parallel>], iteration_bounds = array<i64: 2, 1>, scalar_prefetch = 0 : i64, scratch_operands = 0 : i64, tpu.core_type = #tpu.core_type<tc>, window_params = [{transform_indices = @transform_0, window_bounds = array<i64: 1, 8, 512>}, {transform_indices = @transform_1, window_bounds = array<i64: 1, 8, 512>}, {pipeline_mode = #tpu.pipeline_mode<synchronous>, transform_indices = @transform_2, window_bounds = array<i64: 1, 512>}, {pipeline_mode = #tpu.pipeline_mode<synchronous>, transform_indices = @transform_3, window_bounds = array<i64: 1, 512>}, {transform_indices = @transform_4, window_bounds = array<i64: 1, 1, 512>}, {pipeline_mode = #tpu.pipeline_mode<synchronous>, transform_indices = @transform_5, window_bounds = array<i64: 1, 512>}, {pipeline_mode = #tpu.pipeline_mode<synchronous>, transform_indices = @transform_6, window_bounds = array<i64: 1, 512>}, {transform_indices = @transform_7, window_bounds = array<i64: 1, 8, 512>}]} {
    %c0 = arith.constant 0 : index
    %c0_0 = arith.constant 0 : index
    %c0_1 = arith.constant 0 : index
    %0 = vector.load %arg2[%c0, %c0_0, %c0_1] : memref<1x8x512xbf16, #tpu.memory_space<vmem>>, vector<1x8x512xbf16>
    %1 = arith.extf %0 : vector<1x8x512xbf16> to vector<1x8x512xf32>
    %c0_2 = arith.constant 0 : index
    %c0_3 = arith.constant 0 : index
    %2 = vector.load %arg4[%c0_2, %c0_3] : memref<1x512xf32, #tpu.memory_space<vmem>>, vector<1x512xf32>
    %3 = vector.shape_cast %2 : vector<1x512xf32> to vector<1x1x512xf32>
    %4 = vector.broadcast %3 : vector<1x1x512xf32> to vector<1x8x512xf32>
    %5 = arith.mulf %1, %4 : vector<1x8x512xf32>
    %c0_4 = arith.constant 0 : index
    %c0_5 = arith.constant 0 : index
    %6 = vector.load %arg5[%c0_4, %c0_5] : memref<1x512xf32, #tpu.memory_space<vmem>>, vector<1x512xf32>
    %7 = vector.shape_cast %6 : vector<1x512xf32> to vector<1x1x512xf32>
    %8 = vector.broadcast %7 : vector<1x1x512xf32> to vector<1x8x512xf32>
    %9 = arith.addf %5, %8 : vector<1x8x512xf32>
    %c0_6 = arith.constant 0 : index
    %c0_7 = arith.constant 0 : index
    %c0_8 = arith.constant 0 : index
    %10 = vector.load %arg3[%c0_6, %c0_7, %c0_8] : memref<1x8x512xbf16, #tpu.memory_space<vmem>>, vector<1x8x512xbf16>
    %11 = arith.extf %10 : vector<1x8x512xbf16> to vector<1x8x512xf32>
    %c0_9 = arith.constant 0 : index
    %c0_10 = arith.constant 0 : index
    %12 = vector.load %arg7[%c0_9, %c0_10] : memref<1x512xf32, #tpu.memory_space<vmem>>, vector<1x512xf32>
    %13 = vector.shape_cast %12 : vector<1x512xf32> to vector<1x1x512xf32>
    %14 = vector.broadcast %13 : vector<1x1x512xf32> to vector<1x8x512xf32>
    %15 = arith.mulf %11, %14 : vector<1x8x512xf32>
    %c0_11 = arith.constant 0 : index
    %c0_12 = arith.constant 0 : index
    %16 = vector.load %arg8[%c0_11, %c0_12] : memref<1x512xf32, #tpu.memory_space<vmem>>, vector<1x512xf32>
    %17 = vector.shape_cast %16 : vector<1x512xf32> to vector<1x1x512xf32>
    %18 = vector.broadcast %17 : vector<1x1x512xf32> to vector<1x8x512xf32>
    %19 = arith.addf %15, %18 : vector<1x8x512xf32>
    %c0_13 = arith.constant 0 : index
    %c0_14 = arith.constant 0 : index
    %c0_15 = arith.constant 0 : index
    %20 = vector.load %arg6[%c0_13, %c0_14, %c0_15] : memref<1x1x512xf32, #tpu.memory_space<vmem>>, vector<1x1x512xf32>
    %21 = vector.broadcast %20 : vector<1x1x512xf32> to vector<1x8x512xf32>
    %22 = arith.mulf %9, %21 : vector<1x8x512xf32>
    %23 = arith.addf %22, %19 : vector<1x8x512xf32>
    %cst = arith.constant 0.000000e+00 : f32
    %24 = vector.broadcast %cst : f32 to vector<1x8x512xf32>
    %25 = arith.maximumf %23, %24 : vector<1x8x512xf32>
    %26 = arith.truncf %25 : vector<1x8x512xf32> to vector<1x8x512xbf16>
    %c0_16 = arith.constant 0 : index
    %c0_17 = arith.constant 0 : index
    %c0_18 = arith.constant 0 : index
    %27 = vector.load %arg9[%c0_16, %c0_17, %c0_18] : memref<1x8x512xbf16, #tpu.memory_space<vmem>>, vector<1x8x512xbf16>
    tpu.vector_store %arg9[%c0_16, %c0_17, %c0_18], %26 {strides = array<i32>} : memref<1x8x512xbf16, #tpu.memory_space<vmem>>, vector<1x8x512xbf16>,
    return
  }
  func.func @transform_0(%arg0: i32, %arg1: i32) -> (i32, i32, i32) {
    %c0_i32 = arith.constant 0 : i32
    %c0_i32_0 = arith.constant 0 : i32
    return %arg0, %arg1, %c0_i32 : i32, i32, i32
  }
  func.func @transform_1(%arg0: i32, %arg1: i32) -> (i32, i32, i32) {
    %c0_i32 = arith.constant 0 : i32
    %c0_i32_0 = arith.constant 0 : i32
    return %arg0, %arg1, %c0_i32 : i32, i32, i32
  }
  func.func @transform_2(%arg0: i32, %arg1: i32) -> (i32, i32) {
    %c0_i32 = arith.constant 0 : i32
    %c0_i32_0 = arith.constant 0 : i32
    %c0_i32_1 = arith.constant 0 : i32
    return %c0_i32, %c0_i32_0 : i32, i32
  }
  func.func @transform_3(%arg0: i32, %arg1: i32) -> (i32, i32) {
    %c0_i32 = arith.constant 0 : i32
    %c0_i32_0 = arith.constant 0 : i32
    %c0_i32_1 = arith.constant 0 : i32
    return %c0_i32, %c0_i32_0 : i32, i32
  }
  func.func @transform_4(%arg0: i32, %arg1: i32) -> (i32, i32, i32) {
    %c0_i32 = arith.constant 0 : i32
    %c0_i32_0 = arith.constant 0 : i32
    %c0_i32_1 = arith.constant 0 : i32
    return %arg0, %c0_i32, %c0_i32_0 : i32, i32, i32
  }
  func.func @transform_5(%arg0: i32, %arg1: i32) -> (i32, i32) {
    %c0_i32 = arith.constant 0 : i32
    %c0_i32_0 = arith.constant 0 : i32
    %c0_i32_1 = arith.constant 0 : i32
    return %c0_i32, %c0_i32_0 : i32, i32
  }
  func.func @transform_6(%arg0: i32, %arg1: i32) -> (i32, i32) {
    %c0_i32 = arith.constant 0 : i32
    %c0_i32_0 = arith.constant 0 : i32
    %c0_i32_1 = arith.constant 0 : i32
    return %c0_i32, %c0_i32_0 : i32, i32
  }
  func.func @transform_7(%arg0: i32, %arg1: i32) -> (i32, i32, i32) {
    %c0_i32 = arith.constant 0 : i32
    %c0_i32_0 = arith.constant 0 : i32
    return %arg0, %arg1, %c0_i32 : i32, i32, i32
  }
}

module attributes {stable_mosaic.version = 11 : i64} {
  func.func @_matmul_stats_kernel(%arg0: i32, %arg1: memref<8x32xbf16, #tpu.memory_space<vmem>>, %arg2: memref<32x64xbf16, #tpu.memory_space<vmem>>, %arg3: memref<8x64xbf16, #tpu.memory_space<vmem>>, %arg4: memref<1x1x64xf32, #tpu.memory_space<vmem>>, %arg5: memref<1x1x64xf32, #tpu.memory_space<vmem>>) attributes {dimension_semantics = [#tpu.dimension_semantics<parallel>], iteration_bounds = array<i64: 8>, scalar_prefetch = 0 : i64, scratch_operands = 0 : i64, tpu.core_type = #tpu.core_type<tc>, window_params = [{transform_indices = @transform_0, window_bounds = array<i64: 8, 32>}, {pipeline_mode = #tpu.pipeline_mode<synchronous>, transform_indices = @transform_1, window_bounds = array<i64: 32, 64>}, {transform_indices = @transform_2, window_bounds = array<i64: 8, 64>}, {transform_indices = @transform_3, window_bounds = array<i64: 1, 1, 64>}, {transform_indices = @transform_4, window_bounds = array<i64: 1, 1, 64>}]} {
    %c0 = arith.constant 0 : index
    %c0_0 = arith.constant 0 : index
    %0 = vector.load %arg1[%c0, %c0_0] : memref<8x32xbf16, #tpu.memory_space<vmem>>, vector<8x32xbf16>
    %c0_1 = arith.constant 0 : index
    %c0_2 = arith.constant 0 : index
    %1 = vector.load %arg2[%c0_1, %c0_2] : memref<32x64xbf16, #tpu.memory_space<vmem>>, vector<32x64xbf16>
    %cst = arith.constant dense<0.000000e+00> : vector<8x64xf32>
    %2 = tpu.matmul %0, %1, %cst {dimension_numbers = #tpu.dot_dimension_numbers<[1], [0], [0], [1], [0, 0, 1, 1], [], []>} : vector<8x32xbf16>, vector<32x64xbf16>, vector<8x64xf32> -> vector<8x64xf32>
    %3 = arith.truncf %2 : vector<8x64xf32> to vector<8x64xbf16>
    %c0_3 = arith.constant 0 : index
    %c0_4 = arith.constant 0 : index
    %4 = vector.load %arg3[%c0_3, %c0_4] : memref<8x64xbf16, #tpu.memory_space<vmem>>, vector<8x64xbf16>
    tpu.vector_store %arg3[%c0_3, %c0_4], %3 {strides = array<i32>} : memref<8x64xbf16, #tpu.memory_space<vmem>>, vector<8x64xbf16>,
    %cst_5 = arith.constant dense<0.000000e+00> : vector<64xf32>
    %5 = vector.multi_reduction <add>, %2, %cst_5 [0] : vector<8x64xf32> to vector<64xf32>
    %6 = vector.shape_cast %5 : vector<64xf32> to vector<1x64xf32>
    %7 = vector.shape_cast %6 : vector<1x64xf32> to vector<1x1x64xf32>
    %c0_6 = arith.constant 0 : index
    %c0_7 = arith.constant 0 : index
    %c0_8 = arith.constant 0 : index
    %8 = vector.load %arg4[%c0_6, %c0_7, %c0_8] : memref<1x1x64xf32, #tpu.memory_space<vmem>>, vector<1x1x64xf32>
    tpu.vector_store %arg4[%c0_6, %c0_7, %c0_8], %7 {strides = array<i32>} : memref<1x1x64xf32, #tpu.memory_space<vmem>>, vector<1x1x64xf32>,
    %9 = arith.mulf %2, %2 : vector<8x64xf32>
    %cst_9 = arith.constant dense<0.000000e+00> : vector<64xf32>
    %10 = vector.multi_reduction <add>, %9, %cst_9 [0] : vector<8x64xf32> to vector<64xf32>
    %11 = vector.shape_cast %10 : vector<64xf32> to vector<1x64xf32>
    %12 = vector.shape_cast %11 : vector<1x64xf32> to vector<1x1x64xf32>
    %c0_10 = arith.constant 0 : index
    %c0_11 = arith.constant 0 : index
    %c0_12 = arith.constant 0 : index
    %13 = vector.load %arg5[%c0_10, %c0_11, %c0_12] : memref<1x1x64xf32, #tpu.memory_space<vmem>>, vector<1x1x64xf32>
    tpu.vector_store %arg5[%c0_10, %c0_11, %c0_12], %12 {strides = array<i32>} : memref<1x1x64xf32, #tpu.memory_space<vmem>>, vector<1x1x64xf32>,
    return
  }
  func.func @transform_0(%arg0: i32) -> (i32, i32) {
    %c0_i32 = arith.constant 0 : i32
    %c0_i32_0 = arith.constant 0 : i32
    return %arg0, %c0_i32 : i32, i32
  }
  func.func @transform_1(%arg0: i32) -> (i32, i32) {
    %c0_i32 = arith.constant 0 : i32
    %c0_i32_0 = arith.constant 0 : i32
    %c0_i32_1 = arith.constant 0 : i32
    return %c0_i32, %c0_i32_0 : i32, i32
  }
  func.func @transform_2(%arg0: i32) -> (i32, i32) {
    %c0_i32 = arith.constant 0 : i32
    %c0_i32_0 = arith.constant 0 : i32
    return %arg0, %c0_i32 : i32, i32
  }
  func.func @transform_3(%arg0: i32) -> (i32, i32, i32) {
    %c0_i32 = arith.constant 0 : i32
    %c0_i32_0 = arith.constant 0 : i32
    %c0_i32_1 = arith.constant 0 : i32
    return %arg0, %c0_i32, %c0_i32_0 : i32, i32, i32
  }
  func.func @transform_4(%arg0: i32) -> (i32, i32, i32) {
    %c0_i32 = arith.constant 0 : i32
    %c0_i32_0 = arith.constant 0 : i32
    %c0_i32_1 = arith.constant 0 : i32
    return %arg0, %c0_i32, %c0_i32_0 : i32, i32, i32
  }
}

module attributes {stable_mosaic.version = 11 : i64} {
  func.func @_matmul_stats_kernel(%arg0: i32, %arg1: memref<8x288xbf16, #tpu.memory_space<vmem>>, %arg2: memref<288x64xbf16, #tpu.memory_space<vmem>>, %arg3: memref<8x64xbf16, #tpu.memory_space<vmem>>, %arg4: memref<1x1x64xf32, #tpu.memory_space<vmem>>, %arg5: memref<1x1x64xf32, #tpu.memory_space<vmem>>) attributes {dimension_semantics = [#tpu.dimension_semantics<parallel>], iteration_bounds = array<i64: 8>, scalar_prefetch = 0 : i64, scratch_operands = 0 : i64, tpu.core_type = #tpu.core_type<tc>, window_params = [{transform_indices = @transform_0, window_bounds = array<i64: 8, 288>}, {pipeline_mode = #tpu.pipeline_mode<synchronous>, transform_indices = @transform_1, window_bounds = array<i64: 288, 64>}, {transform_indices = @transform_2, window_bounds = array<i64: 8, 64>}, {transform_indices = @transform_3, window_bounds = array<i64: 1, 1, 64>}, {transform_indices = @transform_4, window_bounds = array<i64: 1, 1, 64>}]} {
    %c0 = arith.constant 0 : index
    %c0_0 = arith.constant 0 : index
    %0 = vector.load %arg1[%c0, %c0_0] : memref<8x288xbf16, #tpu.memory_space<vmem>>, vector<8x288xbf16>
    %c0_1 = arith.constant 0 : index
    %c0_2 = arith.constant 0 : index
    %1 = vector.load %arg2[%c0_1, %c0_2] : memref<288x64xbf16, #tpu.memory_space<vmem>>, vector<288x64xbf16>
    %cst = arith.constant dense<0.000000e+00> : vector<8x64xf32>
    %2 = tpu.matmul %0, %1, %cst {dimension_numbers = #tpu.dot_dimension_numbers<[1], [0], [0], [1], [0, 0, 1, 1], [], []>} : vector<8x288xbf16>, vector<288x64xbf16>, vector<8x64xf32> -> vector<8x64xf32>
    %cst_3 = arith.constant 0.000000e+00 : f32
    %3 = vector.broadcast %cst_3 : f32 to vector<8x64xf32>
    %4 = arith.maximumf %2, %3 : vector<8x64xf32>
    %5 = arith.truncf %4 : vector<8x64xf32> to vector<8x64xbf16>
    %c0_4 = arith.constant 0 : index
    %c0_5 = arith.constant 0 : index
    %6 = vector.load %arg3[%c0_4, %c0_5] : memref<8x64xbf16, #tpu.memory_space<vmem>>, vector<8x64xbf16>
    tpu.vector_store %arg3[%c0_4, %c0_5], %5 {strides = array<i32>} : memref<8x64xbf16, #tpu.memory_space<vmem>>, vector<8x64xbf16>,
    %cst_6 = arith.constant dense<0.000000e+00> : vector<64xf32>
    %7 = vector.multi_reduction <add>, %4, %cst_6 [0] : vector<8x64xf32> to vector<64xf32>
    %8 = vector.shape_cast %7 : vector<64xf32> to vector<1x64xf32>
    %9 = vector.shape_cast %8 : vector<1x64xf32> to vector<1x1x64xf32>
    %c0_7 = arith.constant 0 : index
    %c0_8 = arith.constant 0 : index
    %c0_9 = arith.constant 0 : index
    %10 = vector.load %arg4[%c0_7, %c0_8, %c0_9] : memref<1x1x64xf32, #tpu.memory_space<vmem>>, vector<1x1x64xf32>
    tpu.vector_store %arg4[%c0_7, %c0_8, %c0_9], %9 {strides = array<i32>} : memref<1x1x64xf32, #tpu.memory_space<vmem>>, vector<1x1x64xf32>,
    %11 = arith.mulf %4, %4 : vector<8x64xf32>
    %cst_10 = arith.constant dense<0.000000e+00> : vector<64xf32>
    %12 = vector.multi_reduction <add>, %11, %cst_10 [0] : vector<8x64xf32> to vector<64xf32>
    %13 = vector.shape_cast %12 : vector<64xf32> to vector<1x64xf32>
    %14 = vector.shape_cast %13 : vector<1x64xf32> to vector<1x1x64xf32>
    %c0_11 = arith.constant 0 : index
    %c0_12 = arith.constant 0 : index
    %c0_13 = arith.constant 0 : index
    %15 = vector.load %arg5[%c0_11, %c0_12, %c0_13] : memref<1x1x64xf32, #tpu.memory_space<vmem>>, vector<1x1x64xf32>
    tpu.vector_store %arg5[%c0_11, %c0_12, %c0_13], %14 {strides = array<i32>} : memref<1x1x64xf32, #tpu.memory_space<vmem>>, vector<1x1x64xf32>,
    return
  }
  func.func @transform_0(%arg0: i32) -> (i32, i32) {
    %c0_i32 = arith.constant 0 : i32
    %c0_i32_0 = arith.constant 0 : i32
    return %arg0, %c0_i32 : i32, i32
  }
  func.func @transform_1(%arg0: i32) -> (i32, i32) {
    %c0_i32 = arith.constant 0 : i32
    %c0_i32_0 = arith.constant 0 : i32
    %c0_i32_1 = arith.constant 0 : i32
    return %c0_i32, %c0_i32_0 : i32, i32
  }
  func.func @transform_2(%arg0: i32) -> (i32, i32) {
    %c0_i32 = arith.constant 0 : i32
    %c0_i32_0 = arith.constant 0 : i32
    return %arg0, %c0_i32 : i32, i32
  }
  func.func @transform_3(%arg0: i32) -> (i32, i32, i32) {
    %c0_i32 = arith.constant 0 : i32
    %c0_i32_0 = arith.constant 0 : i32
    %c0_i32_1 = arith.constant 0 : i32
    return %arg0, %c0_i32, %c0_i32_0 : i32, i32, i32
  }
  func.func @transform_4(%arg0: i32) -> (i32, i32, i32) {
    %c0_i32 = arith.constant 0 : i32
    %c0_i32_0 = arith.constant 0 : i32
    %c0_i32_1 = arith.constant 0 : i32
    return %arg0, %c0_i32, %c0_i32_0 : i32, i32, i32
  }
}

module attributes {stable_mosaic.version = 11 : i64} {
  func.func @_affine_kernel(%arg0: i32, %arg1: memref<8x512xbf16, #tpu.memory_space<vmem>>, %arg2: memref<1x512xf32, #tpu.memory_space<vmem>>, %arg3: memref<1x512xf32, #tpu.memory_space<vmem>>, %arg4: memref<8x512xbf16, #tpu.memory_space<vmem>>) attributes {dimension_semantics = [#tpu.dimension_semantics<parallel>], iteration_bounds = array<i64: 1>, scalar_prefetch = 0 : i64, scratch_operands = 0 : i64, tpu.core_type = #tpu.core_type<tc>, window_params = [{transform_indices = @transform_0, window_bounds = array<i64: 8, 512>}, {pipeline_mode = #tpu.pipeline_mode<synchronous>, transform_indices = @transform_1, window_bounds = array<i64: 1, 512>}, {pipeline_mode = #tpu.pipeline_mode<synchronous>, transform_indices = @transform_2, window_bounds = array<i64: 1, 512>}, {transform_indices = @transform_3, window_bounds = array<i64: 8, 512>}]} {
    %c0 = arith.constant 0 : index
    %c0_0 = arith.constant 0 : index
    %0 = vector.load %arg1[%c0, %c0_0] : memref<8x512xbf16, #tpu.memory_space<vmem>>, vector<8x512xbf16>
    %1 = arith.extf %0 : vector<8x512xbf16> to vector<8x512xf32>
    %c0_1 = arith.constant 0 : index
    %c0_2 = arith.constant 0 : index
    %2 = vector.load %arg2[%c0_1, %c0_2] : memref<1x512xf32, #tpu.memory_space<vmem>>, vector<1x512xf32>
    %3 = vector.broadcast %2 : vector<1x512xf32> to vector<8x512xf32>
    %4 = arith.mulf %1, %3 : vector<8x512xf32>
    %c0_3 = arith.constant 0 : index
    %c0_4 = arith.constant 0 : index
    %5 = vector.load %arg3[%c0_3, %c0_4] : memref<1x512xf32, #tpu.memory_space<vmem>>, vector<1x512xf32>
    %6 = vector.broadcast %5 : vector<1x512xf32> to vector<8x512xf32>
    %7 = arith.addf %4, %6 : vector<8x512xf32>
    %8 = arith.truncf %7 : vector<8x512xf32> to vector<8x512xbf16>
    %c0_5 = arith.constant 0 : index
    %c0_6 = arith.constant 0 : index
    %9 = vector.load %arg4[%c0_5, %c0_6] : memref<8x512xbf16, #tpu.memory_space<vmem>>, vector<8x512xbf16>
    tpu.vector_store %arg4[%c0_5, %c0_6], %8 {strides = array<i32>} : memref<8x512xbf16, #tpu.memory_space<vmem>>, vector<8x512xbf16>,
    return
  }
  func.func @transform_0(%arg0: i32) -> (i32, i32) {
    %c0_i32 = arith.constant 0 : i32
    %c0_i32_0 = arith.constant 0 : i32
    return %arg0, %c0_i32 : i32, i32
  }
  func.func @transform_1(%arg0: i32) -> (i32, i32) {
    %c0_i32 = arith.constant 0 : i32
    %c0_i32_0 = arith.constant 0 : i32
    %c0_i32_1 = arith.constant 0 : i32
    return %c0_i32, %c0_i32_0 : i32, i32
  }
  func.func @transform_2(%arg0: i32) -> (i32, i32) {
    %c0_i32 = arith.constant 0 : i32
    %c0_i32_0 = arith.constant 0 : i32
    %c0_i32_1 = arith.constant 0 : i32
    return %c0_i32, %c0_i32_0 : i32, i32
  }
  func.func @transform_3(%arg0: i32) -> (i32, i32) {
    %c0_i32 = arith.constant 0 : i32
    %c0_i32_0 = arith.constant 0 : i32
    return %arg0, %c0_i32 : i32, i32
  }
}

module attributes {stable_mosaic.version = 11 : i64} {
  func.func @_matmul_stats_kernel(%arg0: i32, %arg1: memref<8x576xbf16, #tpu.memory_space<vmem>>, %arg2: memref<576x64xbf16, #tpu.memory_space<vmem>>, %arg3: memref<8x64xbf16, #tpu.memory_space<vmem>>, %arg4: memref<1x1x64xf32, #tpu.memory_space<vmem>>, %arg5: memref<1x1x64xf32, #tpu.memory_space<vmem>>) attributes {dimension_semantics = [#tpu.dimension_semantics<parallel>], iteration_bounds = array<i64: 8>, scalar_prefetch = 0 : i64, scratch_operands = 0 : i64, tpu.core_type = #tpu.core_type<tc>, window_params = [{transform_indices = @transform_0, window_bounds = array<i64: 8, 576>}, {pipeline_mode = #tpu.pipeline_mode<synchronous>, transform_indices = @transform_1, window_bounds = array<i64: 576, 64>}, {transform_indices = @transform_2, window_bounds = array<i64: 8, 64>}, {transform_indices = @transform_3, window_bounds = array<i64: 1, 1, 64>}, {transform_indices = @transform_4, window_bounds = array<i64: 1, 1, 64>}]} {
    %c0 = arith.constant 0 : index
    %c0_0 = arith.constant 0 : index
    %0 = vector.load %arg1[%c0, %c0_0] : memref<8x576xbf16, #tpu.memory_space<vmem>>, vector<8x576xbf16>
    %c0_1 = arith.constant 0 : index
    %c0_2 = arith.constant 0 : index
    %1 = vector.load %arg2[%c0_1, %c0_2] : memref<576x64xbf16, #tpu.memory_space<vmem>>, vector<576x64xbf16>
    %cst = arith.constant dense<0.000000e+00> : vector<8x64xf32>
    %2 = tpu.matmul %0, %1, %cst {dimension_numbers = #tpu.dot_dimension_numbers<[1], [0], [0], [1], [0, 0, 1, 1], [], []>} : vector<8x576xbf16>, vector<576x64xbf16>, vector<8x64xf32> -> vector<8x64xf32>
    %3 = arith.truncf %2 : vector<8x64xf32> to vector<8x64xbf16>
    %c0_3 = arith.constant 0 : index
    %c0_4 = arith.constant 0 : index
    %4 = vector.load %arg3[%c0_3, %c0_4] : memref<8x64xbf16, #tpu.memory_space<vmem>>, vector<8x64xbf16>
    tpu.vector_store %arg3[%c0_3, %c0_4], %3 {strides = array<i32>} : memref<8x64xbf16, #tpu.memory_space<vmem>>, vector<8x64xbf16>,
    %cst_5 = arith.constant dense<0.000000e+00> : vector<64xf32>
    %5 = vector.multi_reduction <add>, %2, %cst_5 [0] : vector<8x64xf32> to vector<64xf32>
    %6 = vector.shape_cast %5 : vector<64xf32> to vector<1x64xf32>
    %7 = vector.shape_cast %6 : vector<1x64xf32> to vector<1x1x64xf32>
    %c0_6 = arith.constant 0 : index
    %c0_7 = arith.constant 0 : index
    %c0_8 = arith.constant 0 : index
    %8 = vector.load %arg4[%c0_6, %c0_7, %c0_8] : memref<1x1x64xf32, #tpu.memory_space<vmem>>, vector<1x1x64xf32>
    tpu.vector_store %arg4[%c0_6, %c0_7, %c0_8], %7 {strides = array<i32>} : memref<1x1x64xf32, #tpu.memory_space<vmem>>, vector<1x1x64xf32>,
    %9 = arith.mulf %2, %2 : vector<8x64xf32>
    %cst_9 = arith.constant dense<0.000000e+00> : vector<64xf32>
    %10 = vector.multi_reduction <add>, %9, %cst_9 [0] : vector<8x64xf32> to vector<64xf32>
    %11 = vector.shape_cast %10 : vector<64xf32> to vector<1x64xf32>
    %12 = vector.shape_cast %11 : vector<1x64xf32> to vector<1x1x64xf32>
    %c0_10 = arith.constant 0 : index
    %c0_11 = arith.constant 0 : index
    %c0_12 = arith.constant 0 : index
    %13 = vector.load %arg5[%c0_10, %c0_11, %c0_12] : memref<1x1x64xf32, #tpu.memory_space<vmem>>, vector<1x1x64xf32>
    tpu.vector_store %arg5[%c0_10, %c0_11, %c0_12], %12 {strides = array<i32>} : memref<1x1x64xf32, #tpu.memory_space<vmem>>, vector<1x1x64xf32>,
    return
  }
  func.func @transform_0(%arg0: i32) -> (i32, i32) {
    %c0_i32 = arith.constant 0 : i32
    %c0_i32_0 = arith.constant 0 : i32
    return %arg0, %c0_i32 : i32, i32
  }
  func.func @transform_1(%arg0: i32) -> (i32, i32) {
    %c0_i32 = arith.constant 0 : i32
    %c0_i32_0 = arith.constant 0 : i32
    %c0_i32_1 = arith.constant 0 : i32
    return %c0_i32, %c0_i32_0 : i32, i32
  }
  func.func @transform_2(%arg0: i32) -> (i32, i32) {
    %c0_i32 = arith.constant 0 : i32
    %c0_i32_0 = arith.constant 0 : i32
    return %arg0, %c0_i32 : i32, i32
  }
  func.func @transform_3(%arg0: i32) -> (i32, i32, i32) {
    %c0_i32 = arith.constant 0 : i32
    %c0_i32_0 = arith.constant 0 : i32
    %c0_i32_1 = arith.constant 0 : i32
    return %arg0, %c0_i32, %c0_i32_0 : i32, i32, i32
  }
  func.func @transform_4(%arg0: i32) -> (i32, i32, i32) {
    %c0_i32 = arith.constant 0 : i32
    %c0_i32_0 = arith.constant 0 : i32
    %c0_i32_1 = arith.constant 0 : i32
    return %arg0, %c0_i32, %c0_i32_0 : i32, i32, i32
  }
}

module attributes {stable_mosaic.version = 11 : i64} {
  func.func @_tail_kernel(%arg0: i32, %arg1: i32, %arg2: memref<1x4x512xbf16, #tpu.memory_space<vmem>>, %arg3: memref<1x4x512xbf16, #tpu.memory_space<vmem>>, %arg4: memref<1x512xf32, #tpu.memory_space<vmem>>, %arg5: memref<1x512xf32, #tpu.memory_space<vmem>>, %arg6: memref<1x1x512xf32, #tpu.memory_space<vmem>>, %arg7: memref<1x512xf32, #tpu.memory_space<vmem>>, %arg8: memref<1x512xf32, #tpu.memory_space<vmem>>, %arg9: memref<1x4x512xbf16, #tpu.memory_space<vmem>>) attributes {dimension_semantics = [#tpu.dimension_semantics<parallel>, #tpu.dimension_semantics<parallel>], iteration_bounds = array<i64: 2, 1>, scalar_prefetch = 0 : i64, scratch_operands = 0 : i64, tpu.core_type = #tpu.core_type<tc>, window_params = [{transform_indices = @transform_0, window_bounds = array<i64: 1, 4, 512>}, {transform_indices = @transform_1, window_bounds = array<i64: 1, 4, 512>}, {pipeline_mode = #tpu.pipeline_mode<synchronous>, transform_indices = @transform_2, window_bounds = array<i64: 1, 512>}, {pipeline_mode = #tpu.pipeline_mode<synchronous>, transform_indices = @transform_3, window_bounds = array<i64: 1, 512>}, {transform_indices = @transform_4, window_bounds = array<i64: 1, 1, 512>}, {pipeline_mode = #tpu.pipeline_mode<synchronous>, transform_indices = @transform_5, window_bounds = array<i64: 1, 512>}, {pipeline_mode = #tpu.pipeline_mode<synchronous>, transform_indices = @transform_6, window_bounds = array<i64: 1, 512>}, {transform_indices = @transform_7, window_bounds = array<i64: 1, 4, 512>}]} {
    %c0 = arith.constant 0 : index
    %c0_0 = arith.constant 0 : index
    %c0_1 = arith.constant 0 : index
    %0 = vector.load %arg2[%c0, %c0_0, %c0_1] : memref<1x4x512xbf16, #tpu.memory_space<vmem>>, vector<1x4x512xbf16>
    %1 = arith.extf %0 : vector<1x4x512xbf16> to vector<1x4x512xf32>
    %c0_2 = arith.constant 0 : index
    %c0_3 = arith.constant 0 : index
    %2 = vector.load %arg4[%c0_2, %c0_3] : memref<1x512xf32, #tpu.memory_space<vmem>>, vector<1x512xf32>
    %3 = vector.shape_cast %2 : vector<1x512xf32> to vector<1x1x512xf32>
    %4 = vector.broadcast %3 : vector<1x1x512xf32> to vector<1x4x512xf32>
    %5 = arith.mulf %1, %4 : vector<1x4x512xf32>
    %c0_4 = arith.constant 0 : index
    %c0_5 = arith.constant 0 : index
    %6 = vector.load %arg5[%c0_4, %c0_5] : memref<1x512xf32, #tpu.memory_space<vmem>>, vector<1x512xf32>
    %7 = vector.shape_cast %6 : vector<1x512xf32> to vector<1x1x512xf32>
    %8 = vector.broadcast %7 : vector<1x1x512xf32> to vector<1x4x512xf32>
    %9 = arith.addf %5, %8 : vector<1x4x512xf32>
    %c0_6 = arith.constant 0 : index
    %c0_7 = arith.constant 0 : index
    %c0_8 = arith.constant 0 : index
    %10 = vector.load %arg3[%c0_6, %c0_7, %c0_8] : memref<1x4x512xbf16, #tpu.memory_space<vmem>>, vector<1x4x512xbf16>
    %11 = arith.extf %10 : vector<1x4x512xbf16> to vector<1x4x512xf32>
    %c0_9 = arith.constant 0 : index
    %c0_10 = arith.constant 0 : index
    %12 = vector.load %arg7[%c0_9, %c0_10] : memref<1x512xf32, #tpu.memory_space<vmem>>, vector<1x512xf32>
    %13 = vector.shape_cast %12 : vector<1x512xf32> to vector<1x1x512xf32>
    %14 = vector.broadcast %13 : vector<1x1x512xf32> to vector<1x4x512xf32>
    %15 = arith.mulf %11, %14 : vector<1x4x512xf32>
    %c0_11 = arith.constant 0 : index
    %c0_12 = arith.constant 0 : index
    %16 = vector.load %arg8[%c0_11, %c0_12] : memref<1x512xf32, #tpu.memory_space<vmem>>, vector<1x512xf32>
    %17 = vector.shape_cast %16 : vector<1x512xf32> to vector<1x1x512xf32>
    %18 = vector.broadcast %17 : vector<1x1x512xf32> to vector<1x4x512xf32>
    %19 = arith.addf %15, %18 : vector<1x4x512xf32>
    %c0_13 = arith.constant 0 : index
    %c0_14 = arith.constant 0 : index
    %c0_15 = arith.constant 0 : index
    %20 = vector.load %arg6[%c0_13, %c0_14, %c0_15] : memref<1x1x512xf32, #tpu.memory_space<vmem>>, vector<1x1x512xf32>
    %21 = vector.broadcast %20 : vector<1x1x512xf32> to vector<1x4x512xf32>
    %22 = arith.mulf %9, %21 : vector<1x4x512xf32>
    %23 = arith.addf %22, %19 : vector<1x4x512xf32>
    %cst = arith.constant 0.000000e+00 : f32
    %24 = vector.broadcast %cst : f32 to vector<1x4x512xf32>
    %25 = arith.maximumf %23, %24 : vector<1x4x512xf32>
    %26 = arith.truncf %25 : vector<1x4x512xf32> to vector<1x4x512xbf16>
    %c0_16 = arith.constant 0 : index
    %c0_17 = arith.constant 0 : index
    %c0_18 = arith.constant 0 : index
    %27 = vector.load %arg9[%c0_16, %c0_17, %c0_18] : memref<1x4x512xbf16, #tpu.memory_space<vmem>>, vector<1x4x512xbf16>
    tpu.vector_store %arg9[%c0_16, %c0_17, %c0_18], %26 {strides = array<i32>} : memref<1x4x512xbf16, #tpu.memory_space<vmem>>, vector<1x4x512xbf16>,
    return
  }
  func.func @transform_0(%arg0: i32, %arg1: i32) -> (i32, i32, i32) {
    %c0_i32 = arith.constant 0 : i32
    %c0_i32_0 = arith.constant 0 : i32
    return %arg0, %arg1, %c0_i32 : i32, i32, i32
  }
  func.func @transform_1(%arg0: i32, %arg1: i32) -> (i32, i32, i32) {
    %c0_i32 = arith.constant 0 : i32
    %c0_i32_0 = arith.constant 0 : i32
    return %arg0, %arg1, %c0_i32 : i32, i32, i32
  }
  func.func @transform_2(%arg0: i32, %arg1: i32) -> (i32, i32) {
    %c0_i32 = arith.constant 0 : i32
    %c0_i32_0 = arith.constant 0 : i32
    %c0_i32_1 = arith.constant 0 : i32
    return %c0_i32, %c0_i32_0 : i32, i32
  }
  func.func @transform_3(%arg0: i32, %arg1: i32) -> (i32, i32) {
    %c0_i32 = arith.constant 0 : i32
    %c0_i32_0 = arith.constant 0 : i32
    %c0_i32_1 = arith.constant 0 : i32
    return %c0_i32, %c0_i32_0 : i32, i32
  }
  func.func @transform_4(%arg0: i32, %arg1: i32) -> (i32, i32, i32) {
    %c0_i32 = arith.constant 0 : i32
    %c0_i32_0 = arith.constant 0 : i32
    %c0_i32_1 = arith.constant 0 : i32
    return %arg0, %c0_i32, %c0_i32_0 : i32, i32, i32
  }
  func.func @transform_5(%arg0: i32, %arg1: i32) -> (i32, i32) {
    %c0_i32 = arith.constant 0 : i32
    %c0_i32_0 = arith.constant 0 : i32
    %c0_i32_1 = arith.constant 0 : i32
    return %c0_i32, %c0_i32_0 : i32, i32
  }
  func.func @transform_6(%arg0: i32, %arg1: i32) -> (i32, i32) {
    %c0_i32 = arith.constant 0 : i32
    %c0_i32_0 = arith.constant 0 : i32
    %c0_i32_1 = arith.constant 0 : i32
    return %c0_i32, %c0_i32_0 : i32, i32
  }
  func.func @transform_7(%arg0: i32, %arg1: i32) -> (i32, i32, i32) {
    %c0_i32 = arith.constant 0 : i32
    %c0_i32_0 = arith.constant 0 : i32
    return %arg0, %arg1, %c0_i32 : i32, i32, i32
  }
}

module attributes {stable_mosaic.version = 11 : i64} {
  func.func @_matmul_stats_kernel(%arg0: i32, %arg1: memref<8x64xbf16, #tpu.memory_space<vmem>>, %arg2: memref<64x128xbf16, #tpu.memory_space<vmem>>, %arg3: memref<8x128xbf16, #tpu.memory_space<vmem>>, %arg4: memref<1x1x128xf32, #tpu.memory_space<vmem>>, %arg5: memref<1x1x128xf32, #tpu.memory_space<vmem>>) attributes {dimension_semantics = [#tpu.dimension_semantics<parallel>], iteration_bounds = array<i64: 8>, scalar_prefetch = 0 : i64, scratch_operands = 0 : i64, tpu.core_type = #tpu.core_type<tc>, window_params = [{transform_indices = @transform_0, window_bounds = array<i64: 8, 64>}, {pipeline_mode = #tpu.pipeline_mode<synchronous>, transform_indices = @transform_1, window_bounds = array<i64: 64, 128>}, {transform_indices = @transform_2, window_bounds = array<i64: 8, 128>}, {transform_indices = @transform_3, window_bounds = array<i64: 1, 1, 128>}, {transform_indices = @transform_4, window_bounds = array<i64: 1, 1, 128>}]} {
    %c0 = arith.constant 0 : index
    %c0_0 = arith.constant 0 : index
    %0 = vector.load %arg1[%c0, %c0_0] : memref<8x64xbf16, #tpu.memory_space<vmem>>, vector<8x64xbf16>
    %c0_1 = arith.constant 0 : index
    %c0_2 = arith.constant 0 : index
    %1 = vector.load %arg2[%c0_1, %c0_2] : memref<64x128xbf16, #tpu.memory_space<vmem>>, vector<64x128xbf16>
    %cst = arith.constant dense<0.000000e+00> : vector<8x128xf32>
    %2 = tpu.matmul %0, %1, %cst {dimension_numbers = #tpu.dot_dimension_numbers<[1], [0], [0], [1], [0, 0, 1, 1], [], []>} : vector<8x64xbf16>, vector<64x128xbf16>, vector<8x128xf32> -> vector<8x128xf32>
    %3 = arith.truncf %2 : vector<8x128xf32> to vector<8x128xbf16>
    %c0_3 = arith.constant 0 : index
    %c0_4 = arith.constant 0 : index
    %4 = vector.load %arg3[%c0_3, %c0_4] : memref<8x128xbf16, #tpu.memory_space<vmem>>, vector<8x128xbf16>
    tpu.vector_store %arg3[%c0_3, %c0_4], %3 {strides = array<i32>} : memref<8x128xbf16, #tpu.memory_space<vmem>>, vector<8x128xbf16>,
    %cst_5 = arith.constant dense<0.000000e+00> : vector<128xf32>
    %5 = vector.multi_reduction <add>, %2, %cst_5 [0] : vector<8x128xf32> to vector<128xf32>
    %6 = vector.shape_cast %5 : vector<128xf32> to vector<1x128xf32>
    %7 = vector.shape_cast %6 : vector<1x128xf32> to vector<1x1x128xf32>
    %c0_6 = arith.constant 0 : index
    %c0_7 = arith.constant 0 : index
    %c0_8 = arith.constant 0 : index
    %8 = vector.load %arg4[%c0_6, %c0_7, %c0_8] : memref<1x1x128xf32, #tpu.memory_space<vmem>>, vector<1x1x128xf32>
    tpu.vector_store %arg4[%c0_6, %c0_7, %c0_8], %7 {strides = array<i32>} : memref<1x1x128xf32, #tpu.memory_space<vmem>>, vector<1x1x128xf32>,
    %9 = arith.mulf %2, %2 : vector<8x128xf32>
    %cst_9 = arith.constant dense<0.000000e+00> : vector<128xf32>
    %10 = vector.multi_reduction <add>, %9, %cst_9 [0] : vector<8x128xf32> to vector<128xf32>
    %11 = vector.shape_cast %10 : vector<128xf32> to vector<1x128xf32>
    %12 = vector.shape_cast %11 : vector<1x128xf32> to vector<1x1x128xf32>
    %c0_10 = arith.constant 0 : index
    %c0_11 = arith.constant 0 : index
    %c0_12 = arith.constant 0 : index
    %13 = vector.load %arg5[%c0_10, %c0_11, %c0_12] : memref<1x1x128xf32, #tpu.memory_space<vmem>>, vector<1x1x128xf32>
    tpu.vector_store %arg5[%c0_10, %c0_11, %c0_12], %12 {strides = array<i32>} : memref<1x1x128xf32, #tpu.memory_space<vmem>>, vector<1x1x128xf32>,
    return
  }
  func.func @transform_0(%arg0: i32) -> (i32, i32) {
    %c0_i32 = arith.constant 0 : i32
    %c0_i32_0 = arith.constant 0 : i32
    return %arg0, %c0_i32 : i32, i32
  }
  func.func @transform_1(%arg0: i32) -> (i32, i32) {
    %c0_i32 = arith.constant 0 : i32
    %c0_i32_0 = arith.constant 0 : i32
    %c0_i32_1 = arith.constant 0 : i32
    return %c0_i32, %c0_i32_0 : i32, i32
  }
  func.func @transform_2(%arg0: i32) -> (i32, i32) {
    %c0_i32 = arith.constant 0 : i32
    %c0_i32_0 = arith.constant 0 : i32
    return %arg0, %c0_i32 : i32, i32
  }
  func.func @transform_3(%arg0: i32) -> (i32, i32, i32) {
    %c0_i32 = arith.constant 0 : i32
    %c0_i32_0 = arith.constant 0 : i32
    %c0_i32_1 = arith.constant 0 : i32
    return %arg0, %c0_i32, %c0_i32_0 : i32, i32, i32
  }
  func.func @transform_4(%arg0: i32) -> (i32, i32, i32) {
    %c0_i32 = arith.constant 0 : i32
    %c0_i32_0 = arith.constant 0 : i32
    %c0_i32_1 = arith.constant 0 : i32
    return %arg0, %c0_i32, %c0_i32_0 : i32, i32, i32
  }
}

module attributes {stable_mosaic.version = 11 : i64} {
  func.func @_matmul_stats_kernel(%arg0: i32, %arg1: memref<8x576xbf16, #tpu.memory_space<vmem>>, %arg2: memref<576x128xbf16, #tpu.memory_space<vmem>>, %arg3: memref<8x128xbf16, #tpu.memory_space<vmem>>, %arg4: memref<1x1x128xf32, #tpu.memory_space<vmem>>, %arg5: memref<1x1x128xf32, #tpu.memory_space<vmem>>) attributes {dimension_semantics = [#tpu.dimension_semantics<parallel>], iteration_bounds = array<i64: 8>, scalar_prefetch = 0 : i64, scratch_operands = 0 : i64, tpu.core_type = #tpu.core_type<tc>, window_params = [{transform_indices = @transform_0, window_bounds = array<i64: 8, 576>}, {pipeline_mode = #tpu.pipeline_mode<synchronous>, transform_indices = @transform_1, window_bounds = array<i64: 576, 128>}, {transform_indices = @transform_2, window_bounds = array<i64: 8, 128>}, {transform_indices = @transform_3, window_bounds = array<i64: 1, 1, 128>}, {transform_indices = @transform_4, window_bounds = array<i64: 1, 1, 128>}]} {
    %c0 = arith.constant 0 : index
    %c0_0 = arith.constant 0 : index
    %0 = vector.load %arg1[%c0, %c0_0] : memref<8x576xbf16, #tpu.memory_space<vmem>>, vector<8x576xbf16>
    %c0_1 = arith.constant 0 : index
    %c0_2 = arith.constant 0 : index
    %1 = vector.load %arg2[%c0_1, %c0_2] : memref<576x128xbf16, #tpu.memory_space<vmem>>, vector<576x128xbf16>
    %cst = arith.constant dense<0.000000e+00> : vector<8x128xf32>
    %2 = tpu.matmul %0, %1, %cst {dimension_numbers = #tpu.dot_dimension_numbers<[1], [0], [0], [1], [0, 0, 1, 1], [], []>} : vector<8x576xbf16>, vector<576x128xbf16>, vector<8x128xf32> -> vector<8x128xf32>
    %cst_3 = arith.constant 0.000000e+00 : f32
    %3 = vector.broadcast %cst_3 : f32 to vector<8x128xf32>
    %4 = arith.maximumf %2, %3 : vector<8x128xf32>
    %5 = arith.truncf %4 : vector<8x128xf32> to vector<8x128xbf16>
    %c0_4 = arith.constant 0 : index
    %c0_5 = arith.constant 0 : index
    %6 = vector.load %arg3[%c0_4, %c0_5] : memref<8x128xbf16, #tpu.memory_space<vmem>>, vector<8x128xbf16>
    tpu.vector_store %arg3[%c0_4, %c0_5], %5 {strides = array<i32>} : memref<8x128xbf16, #tpu.memory_space<vmem>>, vector<8x128xbf16>,
    %cst_6 = arith.constant dense<0.000000e+00> : vector<128xf32>
    %7 = vector.multi_reduction <add>, %4, %cst_6 [0] : vector<8x128xf32> to vector<128xf32>
    %8 = vector.shape_cast %7 : vector<128xf32> to vector<1x128xf32>
    %9 = vector.shape_cast %8 : vector<1x128xf32> to vector<1x1x128xf32>
    %c0_7 = arith.constant 0 : index
    %c0_8 = arith.constant 0 : index
    %c0_9 = arith.constant 0 : index
    %10 = vector.load %arg4[%c0_7, %c0_8, %c0_9] : memref<1x1x128xf32, #tpu.memory_space<vmem>>, vector<1x1x128xf32>
    tpu.vector_store %arg4[%c0_7, %c0_8, %c0_9], %9 {strides = array<i32>} : memref<1x1x128xf32, #tpu.memory_space<vmem>>, vector<1x1x128xf32>,
    %11 = arith.mulf %4, %4 : vector<8x128xf32>
    %cst_10 = arith.constant dense<0.000000e+00> : vector<128xf32>
    %12 = vector.multi_reduction <add>, %11, %cst_10 [0] : vector<8x128xf32> to vector<128xf32>
    %13 = vector.shape_cast %12 : vector<128xf32> to vector<1x128xf32>
    %14 = vector.shape_cast %13 : vector<1x128xf32> to vector<1x1x128xf32>
    %c0_11 = arith.constant 0 : index
    %c0_12 = arith.constant 0 : index
    %c0_13 = arith.constant 0 : index
    %15 = vector.load %arg5[%c0_11, %c0_12, %c0_13] : memref<1x1x128xf32, #tpu.memory_space<vmem>>, vector<1x1x128xf32>
    tpu.vector_store %arg5[%c0_11, %c0_12, %c0_13], %14 {strides = array<i32>} : memref<1x1x128xf32, #tpu.memory_space<vmem>>, vector<1x1x128xf32>,
    return
  }
  func.func @transform_0(%arg0: i32) -> (i32, i32) {
    %c0_i32 = arith.constant 0 : i32
    %c0_i32_0 = arith.constant 0 : i32
    return %arg0, %c0_i32 : i32, i32
  }
  func.func @transform_1(%arg0: i32) -> (i32, i32) {
    %c0_i32 = arith.constant 0 : i32
    %c0_i32_0 = arith.constant 0 : i32
    %c0_i32_1 = arith.constant 0 : i32
    return %c0_i32, %c0_i32_0 : i32, i32
  }
  func.func @transform_2(%arg0: i32) -> (i32, i32) {
    %c0_i32 = arith.constant 0 : i32
    %c0_i32_0 = arith.constant 0 : i32
    return %arg0, %c0_i32 : i32, i32
  }
  func.func @transform_3(%arg0: i32) -> (i32, i32, i32) {
    %c0_i32 = arith.constant 0 : i32
    %c0_i32_0 = arith.constant 0 : i32
    %c0_i32_1 = arith.constant 0 : i32
    return %arg0, %c0_i32, %c0_i32_0 : i32, i32, i32
  }
  func.func @transform_4(%arg0: i32) -> (i32, i32, i32) {
    %c0_i32 = arith.constant 0 : i32
    %c0_i32_0 = arith.constant 0 : i32
    %c0_i32_1 = arith.constant 0 : i32
    return %arg0, %c0_i32, %c0_i32_0 : i32, i32, i32
  }
}

module attributes {stable_mosaic.version = 11 : i64} {
  func.func @_affine_kernel(%arg0: i32, %arg1: memref<8x1024xbf16, #tpu.memory_space<vmem>>, %arg2: memref<1x1024xf32, #tpu.memory_space<vmem>>, %arg3: memref<1x1024xf32, #tpu.memory_space<vmem>>, %arg4: memref<8x1024xbf16, #tpu.memory_space<vmem>>) attributes {dimension_semantics = [#tpu.dimension_semantics<parallel>], iteration_bounds = array<i64: 1>, scalar_prefetch = 0 : i64, scratch_operands = 0 : i64, tpu.core_type = #tpu.core_type<tc>, window_params = [{transform_indices = @transform_0, window_bounds = array<i64: 8, 1024>}, {pipeline_mode = #tpu.pipeline_mode<synchronous>, transform_indices = @transform_1, window_bounds = array<i64: 1, 1024>}, {pipeline_mode = #tpu.pipeline_mode<synchronous>, transform_indices = @transform_2, window_bounds = array<i64: 1, 1024>}, {transform_indices = @transform_3, window_bounds = array<i64: 8, 1024>}]} {
    %c0 = arith.constant 0 : index
    %c0_0 = arith.constant 0 : index
    %0 = vector.load %arg1[%c0, %c0_0] : memref<8x1024xbf16, #tpu.memory_space<vmem>>, vector<8x1024xbf16>
    %1 = arith.extf %0 : vector<8x1024xbf16> to vector<8x1024xf32>
    %c0_1 = arith.constant 0 : index
    %c0_2 = arith.constant 0 : index
    %2 = vector.load %arg2[%c0_1, %c0_2] : memref<1x1024xf32, #tpu.memory_space<vmem>>, vector<1x1024xf32>
    %3 = vector.broadcast %2 : vector<1x1024xf32> to vector<8x1024xf32>
    %4 = arith.mulf %1, %3 : vector<8x1024xf32>
    %c0_3 = arith.constant 0 : index
    %c0_4 = arith.constant 0 : index
    %5 = vector.load %arg3[%c0_3, %c0_4] : memref<1x1024xf32, #tpu.memory_space<vmem>>, vector<1x1024xf32>
    %6 = vector.broadcast %5 : vector<1x1024xf32> to vector<8x1024xf32>
    %7 = arith.addf %4, %6 : vector<8x1024xf32>
    %8 = arith.truncf %7 : vector<8x1024xf32> to vector<8x1024xbf16>
    %c0_5 = arith.constant 0 : index
    %c0_6 = arith.constant 0 : index
    %9 = vector.load %arg4[%c0_5, %c0_6] : memref<8x1024xbf16, #tpu.memory_space<vmem>>, vector<8x1024xbf16>
    tpu.vector_store %arg4[%c0_5, %c0_6], %8 {strides = array<i32>} : memref<8x1024xbf16, #tpu.memory_space<vmem>>, vector<8x1024xbf16>,
    return
  }
  func.func @transform_0(%arg0: i32) -> (i32, i32) {
    %c0_i32 = arith.constant 0 : i32
    %c0_i32_0 = arith.constant 0 : i32
    return %arg0, %c0_i32 : i32, i32
  }
  func.func @transform_1(%arg0: i32) -> (i32, i32) {
    %c0_i32 = arith.constant 0 : i32
    %c0_i32_0 = arith.constant 0 : i32
    %c0_i32_1 = arith.constant 0 : i32
    return %c0_i32, %c0_i32_0 : i32, i32
  }
  func.func @transform_2(%arg0: i32) -> (i32, i32) {
    %c0_i32 = arith.constant 0 : i32
    %c0_i32_0 = arith.constant 0 : i32
    %c0_i32_1 = arith.constant 0 : i32
    return %c0_i32, %c0_i32_0 : i32, i32
  }
  func.func @transform_3(%arg0: i32) -> (i32, i32) {
    %c0_i32 = arith.constant 0 : i32
    %c0_i32_0 = arith.constant 0 : i32
    return %arg0, %c0_i32 : i32, i32
  }
}

module attributes {stable_mosaic.version = 11 : i64} {
  func.func @_matmul_stats_kernel(%arg0: i32, %arg1: memref<8x1152xbf16, #tpu.memory_space<vmem>>, %arg2: memref<1152x128xbf16, #tpu.memory_space<vmem>>, %arg3: memref<8x128xbf16, #tpu.memory_space<vmem>>, %arg4: memref<1x1x128xf32, #tpu.memory_space<vmem>>, %arg5: memref<1x1x128xf32, #tpu.memory_space<vmem>>) attributes {dimension_semantics = [#tpu.dimension_semantics<parallel>], iteration_bounds = array<i64: 8>, scalar_prefetch = 0 : i64, scratch_operands = 0 : i64, tpu.core_type = #tpu.core_type<tc>, window_params = [{transform_indices = @transform_0, window_bounds = array<i64: 8, 1152>}, {pipeline_mode = #tpu.pipeline_mode<synchronous>, transform_indices = @transform_1, window_bounds = array<i64: 1152, 128>}, {transform_indices = @transform_2, window_bounds = array<i64: 8, 128>}, {transform_indices = @transform_3, window_bounds = array<i64: 1, 1, 128>}, {transform_indices = @transform_4, window_bounds = array<i64: 1, 1, 128>}]} {
    %c0 = arith.constant 0 : index
    %c0_0 = arith.constant 0 : index
    %0 = vector.load %arg1[%c0, %c0_0] : memref<8x1152xbf16, #tpu.memory_space<vmem>>, vector<8x1152xbf16>
    %c0_1 = arith.constant 0 : index
    %c0_2 = arith.constant 0 : index
    %1 = vector.load %arg2[%c0_1, %c0_2] : memref<1152x128xbf16, #tpu.memory_space<vmem>>, vector<1152x128xbf16>
    %cst = arith.constant dense<0.000000e+00> : vector<8x128xf32>
    %2 = tpu.matmul %0, %1, %cst {dimension_numbers = #tpu.dot_dimension_numbers<[1], [0], [0], [1], [0, 0, 1, 1], [], []>} : vector<8x1152xbf16>, vector<1152x128xbf16>, vector<8x128xf32> -> vector<8x128xf32>
    %3 = arith.truncf %2 : vector<8x128xf32> to vector<8x128xbf16>
    %c0_3 = arith.constant 0 : index
    %c0_4 = arith.constant 0 : index
    %4 = vector.load %arg3[%c0_3, %c0_4] : memref<8x128xbf16, #tpu.memory_space<vmem>>, vector<8x128xbf16>
    tpu.vector_store %arg3[%c0_3, %c0_4], %3 {strides = array<i32>} : memref<8x128xbf16, #tpu.memory_space<vmem>>, vector<8x128xbf16>,
    %cst_5 = arith.constant dense<0.000000e+00> : vector<128xf32>
    %5 = vector.multi_reduction <add>, %2, %cst_5 [0] : vector<8x128xf32> to vector<128xf32>
    %6 = vector.shape_cast %5 : vector<128xf32> to vector<1x128xf32>
    %7 = vector.shape_cast %6 : vector<1x128xf32> to vector<1x1x128xf32>
    %c0_6 = arith.constant 0 : index
    %c0_7 = arith.constant 0 : index
    %c0_8 = arith.constant 0 : index
    %8 = vector.load %arg4[%c0_6, %c0_7, %c0_8] : memref<1x1x128xf32, #tpu.memory_space<vmem>>, vector<1x1x128xf32>
    tpu.vector_store %arg4[%c0_6, %c0_7, %c0_8], %7 {strides = array<i32>} : memref<1x1x128xf32, #tpu.memory_space<vmem>>, vector<1x1x128xf32>,
    %9 = arith.mulf %2, %2 : vector<8x128xf32>
    %cst_9 = arith.constant dense<0.000000e+00> : vector<128xf32>
    %10 = vector.multi_reduction <add>, %9, %cst_9 [0] : vector<8x128xf32> to vector<128xf32>
    %11 = vector.shape_cast %10 : vector<128xf32> to vector<1x128xf32>
    %12 = vector.shape_cast %11 : vector<1x128xf32> to vector<1x1x128xf32>
    %c0_10 = arith.constant 0 : index
    %c0_11 = arith.constant 0 : index
    %c0_12 = arith.constant 0 : index
    %13 = vector.load %arg5[%c0_10, %c0_11, %c0_12] : memref<1x1x128xf32, #tpu.memory_space<vmem>>, vector<1x1x128xf32>
    tpu.vector_store %arg5[%c0_10, %c0_11, %c0_12], %12 {strides = array<i32>} : memref<1x1x128xf32, #tpu.memory_space<vmem>>, vector<1x1x128xf32>,
    return
  }
  func.func @transform_0(%arg0: i32) -> (i32, i32) {
    %c0_i32 = arith.constant 0 : i32
    %c0_i32_0 = arith.constant 0 : i32
    return %arg0, %c0_i32 : i32, i32
  }
  func.func @transform_1(%arg0: i32) -> (i32, i32) {
    %c0_i32 = arith.constant 0 : i32
    %c0_i32_0 = arith.constant 0 : i32
    %c0_i32_1 = arith.constant 0 : i32
    return %c0_i32, %c0_i32_0 : i32, i32
  }
  func.func @transform_2(%arg0: i32) -> (i32, i32) {
    %c0_i32 = arith.constant 0 : i32
    %c0_i32_0 = arith.constant 0 : i32
    return %arg0, %c0_i32 : i32, i32
  }
  func.func @transform_3(%arg0: i32) -> (i32, i32, i32) {
    %c0_i32 = arith.constant 0 : i32
    %c0_i32_0 = arith.constant 0 : i32
    %c0_i32_1 = arith.constant 0 : i32
    return %arg0, %c0_i32, %c0_i32_0 : i32, i32, i32
  }
  func.func @transform_4(%arg0: i32) -> (i32, i32, i32) {
    %c0_i32 = arith.constant 0 : i32
    %c0_i32_0 = arith.constant 0 : i32
    %c0_i32_1 = arith.constant 0 : i32
    return %arg0, %c0_i32, %c0_i32_0 : i32, i32, i32
  }
}

module attributes {stable_mosaic.version = 11 : i64} {
  func.func @_tail_kernel(%arg0: i32, %arg1: i32, %arg2: memref<1x4x1024xbf16, #tpu.memory_space<vmem>>, %arg3: memref<1x4x1024xbf16, #tpu.memory_space<vmem>>, %arg4: memref<1x1024xf32, #tpu.memory_space<vmem>>, %arg5: memref<1x1024xf32, #tpu.memory_space<vmem>>, %arg6: memref<1x1x1024xf32, #tpu.memory_space<vmem>>, %arg7: memref<1x1024xf32, #tpu.memory_space<vmem>>, %arg8: memref<1x1024xf32, #tpu.memory_space<vmem>>, %arg9: memref<1x1x1x1024xf32, #tpu.memory_space<vmem>>) attributes {dimension_semantics = [#tpu.dimension_semantics<parallel>, #tpu.dimension_semantics<parallel>], iteration_bounds = array<i64: 2, 1>, scalar_prefetch = 0 : i64, scratch_operands = 0 : i64, tpu.core_type = #tpu.core_type<tc>, window_params = [{transform_indices = @transform_0, window_bounds = array<i64: 1, 4, 1024>}, {transform_indices = @transform_1, window_bounds = array<i64: 1, 4, 1024>}, {pipeline_mode = #tpu.pipeline_mode<synchronous>, transform_indices = @transform_2, window_bounds = array<i64: 1, 1024>}, {pipeline_mode = #tpu.pipeline_mode<synchronous>, transform_indices = @transform_3, window_bounds = array<i64: 1, 1024>}, {transform_indices = @transform_4, window_bounds = array<i64: 1, 1, 1024>}, {pipeline_mode = #tpu.pipeline_mode<synchronous>, transform_indices = @transform_5, window_bounds = array<i64: 1, 1024>}, {pipeline_mode = #tpu.pipeline_mode<synchronous>, transform_indices = @transform_6, window_bounds = array<i64: 1, 1024>}, {transform_indices = @transform_7, window_bounds = array<i64: 1, 1, 1, 1024>}]} {
    %c0 = arith.constant 0 : index
    %c0_0 = arith.constant 0 : index
    %c0_1 = arith.constant 0 : index
    %0 = vector.load %arg2[%c0, %c0_0, %c0_1] : memref<1x4x1024xbf16, #tpu.memory_space<vmem>>, vector<1x4x1024xbf16>
    %1 = arith.extf %0 : vector<1x4x1024xbf16> to vector<1x4x1024xf32>
    %c0_2 = arith.constant 0 : index
    %c0_3 = arith.constant 0 : index
    %2 = vector.load %arg4[%c0_2, %c0_3] : memref<1x1024xf32, #tpu.memory_space<vmem>>, vector<1x1024xf32>
    %3 = vector.shape_cast %2 : vector<1x1024xf32> to vector<1x1x1024xf32>
    %4 = vector.broadcast %3 : vector<1x1x1024xf32> to vector<1x4x1024xf32>
    %5 = arith.mulf %1, %4 : vector<1x4x1024xf32>
    %c0_4 = arith.constant 0 : index
    %c0_5 = arith.constant 0 : index
    %6 = vector.load %arg5[%c0_4, %c0_5] : memref<1x1024xf32, #tpu.memory_space<vmem>>, vector<1x1024xf32>
    %7 = vector.shape_cast %6 : vector<1x1024xf32> to vector<1x1x1024xf32>
    %8 = vector.broadcast %7 : vector<1x1x1024xf32> to vector<1x4x1024xf32>
    %9 = arith.addf %5, %8 : vector<1x4x1024xf32>
    %c0_6 = arith.constant 0 : index
    %c0_7 = arith.constant 0 : index
    %c0_8 = arith.constant 0 : index
    %10 = vector.load %arg3[%c0_6, %c0_7, %c0_8] : memref<1x4x1024xbf16, #tpu.memory_space<vmem>>, vector<1x4x1024xbf16>
    %11 = arith.extf %10 : vector<1x4x1024xbf16> to vector<1x4x1024xf32>
    %c0_9 = arith.constant 0 : index
    %c0_10 = arith.constant 0 : index
    %12 = vector.load %arg7[%c0_9, %c0_10] : memref<1x1024xf32, #tpu.memory_space<vmem>>, vector<1x1024xf32>
    %13 = vector.shape_cast %12 : vector<1x1024xf32> to vector<1x1x1024xf32>
    %14 = vector.broadcast %13 : vector<1x1x1024xf32> to vector<1x4x1024xf32>
    %15 = arith.mulf %11, %14 : vector<1x4x1024xf32>
    %c0_11 = arith.constant 0 : index
    %c0_12 = arith.constant 0 : index
    %16 = vector.load %arg8[%c0_11, %c0_12] : memref<1x1024xf32, #tpu.memory_space<vmem>>, vector<1x1024xf32>
    %17 = vector.shape_cast %16 : vector<1x1024xf32> to vector<1x1x1024xf32>
    %18 = vector.broadcast %17 : vector<1x1x1024xf32> to vector<1x4x1024xf32>
    %19 = arith.addf %15, %18 : vector<1x4x1024xf32>
    %c0_13 = arith.constant 0 : index
    %c0_14 = arith.constant 0 : index
    %c0_15 = arith.constant 0 : index
    %20 = vector.load %arg6[%c0_13, %c0_14, %c0_15] : memref<1x1x1024xf32, #tpu.memory_space<vmem>>, vector<1x1x1024xf32>
    %21 = vector.broadcast %20 : vector<1x1x1024xf32> to vector<1x4x1024xf32>
    %22 = arith.mulf %9, %21 : vector<1x4x1024xf32>
    %23 = arith.addf %22, %19 : vector<1x4x1024xf32>
    %cst = arith.constant 0.000000e+00 : f32
    %24 = vector.broadcast %cst : f32 to vector<1x4x1024xf32>
    %25 = arith.maximumf %23, %24 : vector<1x4x1024xf32>
    %cst_16 = arith.constant dense<0.000000e+00> : vector<1x1024xf32>
    %26 = vector.multi_reduction <add>, %25, %cst_16 [1] : vector<1x4x1024xf32> to vector<1x1024xf32>
    %27 = vector.shape_cast %26 : vector<1x1024xf32> to vector<1x1x1024xf32>
    %28 = vector.shape_cast %27 : vector<1x1x1024xf32> to vector<1x1x1x1024xf32>
    %c0_17 = arith.constant 0 : index
    %c0_18 = arith.constant 0 : index
    %c0_19 = arith.constant 0 : index
    %c0_20 = arith.constant 0 : index
    %29 = vector.load %arg9[%c0_17, %c0_18, %c0_19, %c0_20] : memref<1x1x1x1024xf32, #tpu.memory_space<vmem>>, vector<1x1x1x1024xf32>
    tpu.vector_store %arg9[%c0_17, %c0_18, %c0_19, %c0_20], %28 {strides = array<i32>} : memref<1x1x1x1024xf32, #tpu.memory_space<vmem>>, vector<1x1x1x1024xf32>,
    return
  }
  func.func @transform_0(%arg0: i32, %arg1: i32) -> (i32, i32, i32) {
    %c0_i32 = arith.constant 0 : i32
    %c0_i32_0 = arith.constant 0 : i32
    return %arg0, %arg1, %c0_i32 : i32, i32, i32
  }
  func.func @transform_1(%arg0: i32, %arg1: i32) -> (i32, i32, i32) {
    %c0_i32 = arith.constant 0 : i32
    %c0_i32_0 = arith.constant 0 : i32
    return %arg0, %arg1, %c0_i32 : i32, i32, i32
  }
  func.func @transform_2(%arg0: i32, %arg1: i32) -> (i32, i32) {
    %c0_i32 = arith.constant 0 : i32
    %c0_i32_0 = arith.constant 0 : i32
    %c0_i32_1 = arith.constant 0 : i32
    return %c0_i32, %c0_i32_0 : i32, i32
  }
  func.func @transform_3(%arg0: i32, %arg1: i32) -> (i32, i32) {
    %c0_i32 = arith.constant 0 : i32
    %c0_i32_0 = arith.constant 0 : i32
    %c0_i32_1 = arith.constant 0 : i32
    return %c0_i32, %c0_i32_0 : i32, i32
  }
  func.func @transform_4(%arg0: i32, %arg1: i32) -> (i32, i32, i32) {
    %c0_i32 = arith.constant 0 : i32
    %c0_i32_0 = arith.constant 0 : i32
    %c0_i32_1 = arith.constant 0 : i32
    return %arg0, %c0_i32, %c0_i32_0 : i32, i32, i32
  }
  func.func @transform_5(%arg0: i32, %arg1: i32) -> (i32, i32) {
    %c0_i32 = arith.constant 0 : i32
    %c0_i32_0 = arith.constant 0 : i32
    %c0_i32_1 = arith.constant 0 : i32
    return %c0_i32, %c0_i32_0 : i32, i32
  }
  func.func @transform_6(%arg0: i32, %arg1: i32) -> (i32, i32) {
    %c0_i32 = arith.constant 0 : i32
    %c0_i32_0 = arith.constant 0 : i32
    %c0_i32_1 = arith.constant 0 : i32
    return %c0_i32, %c0_i32_0 : i32, i32
  }
  func.func @transform_7(%arg0: i32, %arg1: i32) -> (i32, i32, i32, i32) {
    %c0_i32 = arith.constant 0 : i32
    %c0_i32_0 = arith.constant 0 : i32
    %c0_i32_1 = arith.constant 0 : i32
    return %arg0, %arg1, %c0_i32, %c0_i32_0 : i32, i32, i32, i32
  }
}

</mosaic_0001>

<bundles_post_ra>
// kernel: tile.147
= control target key start
LH: loop header
LB: loop body
LE: loop exit
PB: predicated region body
PF: predicated region fallthrough
CT: control target
= control target key end

     0   :  { %s40_s0 = inlined_call_operand.vmem [shape: f32[16], index: 0, kind: input, shape index: {}]   ;;  %s41_s1 = inlined_call_operand.vmem [shape: f32[32,16], index: 1, kind: output, shape index: {}]  }
   0x1   :  { %v4_v0 = vld [vmem:[%s40_s0] ss:$0 sm:$0xff] }
   0x2   :  { %5 = vst [vmem:[%s41_s1] sm:$0xff] %v4_v0 }
   0x3   :  { %12 = vst [vmem:[%s41_s1 + $0x8] sm:$0xff] %v4_v0 }
   0x4   :  { %13 = vst [vmem:[%s41_s1 + $0x10] sm:$0xff] %v4_v0 }
   0x5   :  { %14 = vst [vmem:[%s41_s1 + $0x18] sm:$0xff] %v4_v0 }

// kernel: tile.152
= control target key start
LH: loop header
LB: loop body
LE: loop exit
PB: predicated region body
PF: predicated region fallthrough
CT: control target
= control target key end

     0   :  { %s88_s8 = smov 112   ;;  %s89_s11 = smov 80   ;;  %vm3_vm0 = vcmask 130048   ;;  %vm9_vm1 = vcmask 1048448   ;;  %vm15_vm2 = vcmask 917248   ;;  %vm21_vm3 = vcmask 786048   ;;  %s141_s0 = inlined_call_operand.vmem [shape: f32[32,16], index: 0, kind: input, shape index: {}]   ;;  %s142_s1 = inlined_call_operand.vmem [shape: f32[1,512], index: 1, kind: output, shape index: {}]  }
   0x1   :  { %v71_v0 = vld [vmem:[%s141_s0 + $0x7] ss:$8 sm:$0xf]   ;;  %v73_v1 = vld [vmem:[%s141_s0 + $0x5] ss:$8 sm:$0xf]  }
   0x2   :  { %7 = vrot.lane.b32.xlu0 %v71_v0, %s88_s8  ;;  %19 = vrot.lane.b32.xlu1 %v73_v1, %s89_s11  ;;  %v75_v2 = vld [vmem:[%s141_s0 + $0x3] ss:$8 sm:$0xf]   ;;  %s90_s14 = smov 48   ;;  %s91_s19 = smov 96   ;;  %vm27_vm4 = vcmask 654848  }
   0x3   :  { %31 = vrot.lane.b32.xlu2 %v75_v2, %s90_s14  ;;  %v72_v3 = vld [vmem:[%s141_s0 + $0x6] ss:$8 sm:$0xf]   ;;  %v74_v4 = vld [vmem:[%s141_s0 + $0x4] ss:$8 sm:$0xf]  }
   0x4   :  { %s92_s20 = smov 64   ;;  %v76_v5 = vld [vmem:[%s141_s0 + $0x2] ss:$8 sm:$0xf]   ;;  %s93_s23 = smov 32   ;;  %vm33_vm5 = vcmask 523648  }
   0x5   :  { %v77_v6 = vld [vmem:[%s141_s0 + $0x1] ss:$8 sm:$0xf]   ;;  %s94_s26 = smov 16   ;;  %vm39_vm6 = vcmask 392448   ;;  %vm45_vm7 = vcmask 261248  }
   0x6   :  { %v2_v7 = vld [vmem:[%s141_s0] ss:$8 sm:$0xf]  }
   0x7   :  { %4 = vst.msk [vmem:[#allocation0] ss:$8 sm:$0xf] %vm3_vm0, %v2_v7  }
   0xa   :  { %13 = vrot.lane.b32.xlu0 %v72_v3, %s91_s19  ;;  %25 = vrot.lane.b32.xlu1 %v74_v4, %s92_s20 }
   0xb   :  { %37 = vrot.lane.b32.xlu2 %v76_v5, %s93_s23 }
  0x12   :  { %43 = vrot.lane.b32.xlu0 %v77_v6, %s94_s26 }
  0x5d   :  { %v32_v8 = vpop.permute.xlu2 %31  }
  0x65   :  { %v38_v9 = vpop.permute.xlu2 %37  }
  0x74   :  { %v8_v10 = vpop.permute.xlu0 %7   ;;  %v20_v11 = vpop.permute.xlu1 %19  }
  0x75   :  { %10 = vst.msk [vmem:[#allocation0] ss:$8 sm:$0xf] %vm9_vm1, %v8_v10  }
  0x7c   :  { %v14_v12 = vpop.permute.xlu0 %13   ;;  %v26_v13 = vpop.permute.xlu1 %25  }
  0x7d   :  { %16 = vst.msk [vmem:[#allocation0] ss:$8 sm:$0xf] %vm15_vm2, %v14_v12  }
  0x7e   :  { %22 = vst.msk [vmem:[#allocation0] ss:$8 sm:$0xf] %vm21_vm3, %v20_v11  }
  0x7f   :  { %28 = vst.msk [vmem:[#allocation0] ss:$8 sm:$0xf] %vm27_vm4, %v26_v13  }
  0x80   :  { %34 = vst.msk [vmem:[#allocation0] ss:$8 sm:$0xf] %vm33_vm5, %v32_v8  }
  0x81   :  { %40 = vst.msk [vmem:[#allocation0] ss:$8 sm:$0xf] %vm39_vm6, %v38_v9  }
  0x84   :  { %v44_v14 = vpop.permute.xlu0 %43  }
  0x85   :  { %46 = vst.msk [vmem:[#allocation0] ss:$8 sm:$0xf] %vm45_vm7, %v44_v14  }
  0x8c   :  { %v49_v15 = vld [vmem:[#allocation0] sm:$0x1]  ;;  %v54_v16 = vld [vmem:[#allocation0 + $0x8] sm:$0x1]  ;;  %v60_v17 = vld [vmem:[#allocation0 + $0x10] sm:$0x1] }
  0x8d   :  { %52 = vst [vmem:[%s142_s1] sm:$0x1] %v49_v15  ;;  %v66_v18 = vld [vmem:[#allocation0 + $0x18] sm:$0x1] }
  0x8e   :  { %78 = vst [vmem:[%s142_s1 + $0x1] sm:$0x1] %v54_v16 }
  0x8f   :  { %79 = vst [vmem:[%s142_s1 + $0x2] sm:$0x1] %v60_v17 }
  0x90   :  { %80 = vst [vmem:[%s142_s1 + $0x3] sm:$0x1] %v66_v18 }

// kernel: audio_encoder_forward.22
= control target key start
LH: loop header
LB: loop body
LE: loop exit
PB: predicated region body
PF: predicated region fallthrough
CT: control target
= control target key end

     0   :  { %s248_s0 = inlined_call_operand.vmem [shape: bf16[32,512], index: 0, kind: input, shape index: {}]   ;;  %s249_s1 = inlined_call_operand.vmem [shape: f32[1,512], index: 1, kind: input, shape index: {}]   ;;  %s250_s2 = inlined_call_operand.vmem [shape: f32[1,512], index: 2, kind: input, shape index: {}]   ;;  %s251_s3 = inlined_call_operand.vmem [shape: bf16[32,512], index: 3, kind: output, shape index: {}]  }
   0x1   :  { %v14_v0 = vld [vmem:[%s248_s0] sm:$0xff]  ;;  %v15_v7 = vld [vmem:[%s248_s0 + $0x8] sm:$0xff]  ;;  %v16_v8 = vld [vmem:[%s248_s0 + $0x10] sm:$0xff] }
   0x2   :  { %v38_v1 = vld [vmem:[%s249_s1] sm:$0xf]  ;;  %v22_v3 = vunpack.c.l.bf16 %v14_v0  ;;  %v23_v4 = vunpack.c.h.bf16 %v14_v0  ;;  %v24_v11 = vunpack.c.l.bf16 %v15_v7  ;;  %v25_v12 = vunpack.c.h.bf16 %v15_v7  ;;  %v17_v17 = vld [vmem:[%s248_s0 + $0x18] sm:$0xff]  ;;  %v19_v39 = vld [vmem:[%s248_s0 + $0x28] sm:$0xff] }
   0x3   :  { %v64_v2 = vld [vmem:[%s250_s2] sm:$0xf]  ;;  %v155_v5 = vperm.slane %v38_v1, 0  ;;  %v157_v6 = vperm.slane %v38_v1, 1  ;;  %v171_v15 = vperm.slane %v38_v1, 2  ;;  %v173_v16 = vperm.slane %v38_v1, 3 }
   0x4   :  { %v165_v9 = vperm.slane %v64_v2, 0  ;;  %v167_v10 = vperm.slane %v64_v2, 1  ;;  %v178_v18 = vperm.slane %v64_v2, 2  ;;  %v180_v19 = vperm.slane %v64_v2, 3  ;;  %v18_v30 = vld [vmem:[%s248_s0 + $0x20] sm:$0xff]  ;;  %v20_v48 = vld [vmem:[%s248_s0 + $0x30] sm:$0xff] }
   0x5   :  { %v48_v13 = vmul.f32 %v155_v5, %v22_v3  ;;  %v49_v14 = vmul.f32 %v157_v6, %v23_v4  ;;  %v26_v20 = vunpack.c.l.bf16 %v16_v8  ;;  %v27_v21 = vunpack.c.h.bf16 %v16_v8  ;;  %v21_v53 = vld [vmem:[%s248_s0 + $0x38] sm:$0xff] }
   0x6   :  { %v50_v24 = vmul.f32 %v171_v15, %v24_v11  ;;  %v51_v25 = vmul.f32 %v173_v16, %v25_v12  ;;  %v28_v28 = vunpack.c.l.bf16 %v17_v17  ;;  %v29_v29 = vunpack.c.h.bf16 %v17_v17 }
   0x7   :  { %v74_v22 = vadd.f32 %v165_v9, %v48_v13  ;;  %v75_v23 = vadd.f32 %v167_v10, %v49_v14  ;;  %v52_v26 = vmul.f32 %v155_v5, %v26_v20  ;;  %v53_v27 = vmul.f32 %v157_v6, %v27_v21 }
   0x8   :  { %v76_v33 = vadd.f32 %v178_v18, %v50_v24  ;;  %v77_v34 = vadd.f32 %v180_v19, %v51_v25  ;;  %v54_v37 = vmul.f32 %v171_v15, %v28_v28  ;;  %v55_v38 = vmul.f32 %v173_v16, %v29_v29 }
   0x9   :  { %v90_v31 = vmax.f32 %v74_v22, 0.0  ;;  %v91_v32 = vmax.f32 %v75_v23, 0.0  ;;  %v78_v35 = vadd.f32 %v165_v9, %v52_v26  ;;  %v79_v36 = vadd.f32 %v167_v10, %v53_v27 }
   0xa   :  { %v92_v41 = vmax.f32 %v76_v33, 0.0  ;;  %v93_v42 = vmax.f32 %v77_v34, 0.0  ;;  %v30_v43 = vunpack.c.l.bf16 %v18_v30  ;;  %v80_v46 = vadd.f32 %v178_v18, %v54_v37 }
   0xb   :  { %v106_v40 = vpack.c.bf16 %v91_v32, %v90_v31  ;;  %v94_v44 = vmax.f32 %v78_v35, 0.0  ;;  %v95_v45 = vmax.f32 %v79_v36, 0.0  ;;  %v81_v47 = vadd.f32 %v180_v19, %v55_v38 }
   0xc   :  { %v107_v49 = vpack.c.bf16 %v93_v42, %v92_v41  ;;  %v31_v50 = vunpack.c.h.bf16 %v18_v30  ;;  %v56_v51 = vmul.f32 %v155_v5, %v30_v43  ;;  %v32_v52 = vunpack.c.l.bf16 %v19_v39 }
   0xd   :  { %114 = vst [vmem:[%s251_s3] sm:$0xff] %v106_v40  ;;  %v108_v54 = vpack.c.bf16 %v95_v45, %v94_v44  ;;  %v96_v55 = vmax.f32 %v80_v46, 0.0  ;;  %v97_v56 = vmax.f32 %v81_v47, 0.0  ;;  %v33_v57 = vunpack.c.h.bf16 %v19_v39 }
   0xe   :  { %115 = vst [vmem:[%s251_s3 + $0x8] sm:$0xff] %v107_v49  ;;  %v57_v58 = vmul.f32 %v157_v6, %v31_v50  ;;  %v82_v59 = vadd.f32 %v165_v9, %v56_v51  ;;  %v58_v60 = vmul.f32 %v171_v15, %v32_v52  ;;  %v34_v61 = vunpack.c.l.bf16 %v20_v48 }
   0xf   :  { %116 = vst [vmem:[%s251_s3 + $0x10] sm:$0xff] %v108_v54  ;;  %v109_v62 = vpack.c.bf16 %v97_v56, %v96_v55  ;;  %v59_v63 = vmul.f32 %v173_v16, %v33_v57  ;;  %v35_v0 = vunpack.c.h.bf16 %v20_v48  ;;  %v36_v1 = vunpack.c.l.bf16 %v21_v53 }
  0x10   :  { %v83_v2 = vadd.f32 %v167_v10, %v57_v58  ;;  %v98_v3 = vmax.f32 %v82_v59, 0.0  ;;  %v84_v4 = vadd.f32 %v178_v18, %v58_v60  ;;  %v60_v7 = vmul.f32 %v155_v5, %v34_v61 }
  0x11   :  { %117 = vst [vmem:[%s251_s3 + $0x18] sm:$0xff] %v109_v62  ;;  %v85_v8 = vadd.f32 %v180_v19, %v59_v63  ;;  %v61_v11 = vmul.f32 %v157_v6, %v35_v0  ;;  %v37_v12 = vunpack.c.h.bf16 %v21_v53  ;;  %v62_v13 = vmul.f32 %v171_v15, %v36_v1 }
  0x12   :  { %v99_v14 = vmax.f32 %v83_v2, 0.0  ;;  %v100_v17 = vmax.f32 %v84_v4, 0.0  ;;  %v86_v20 = vadd.f32 %v165_v9, %v60_v7 }
  0x13   :  { %v101_v21 = vmax.f32 %v85_v8, 0.0  ;;  %v87_v22 = vadd.f32 %v167_v10, %v61_v11  ;;  %v63_v5 = vmul.f32 %v173_v16, %v37_v12  ;;  %v88_v23 = vadd.f32 %v178_v18, %v62_v13 }
  0x14   :  { %v110_v24 = vpack.c.bf16 %v99_v14, %v98_v3  ;;  %v102_v25 = vmax.f32 %v86_v20, 0.0 }
  0x15   :  { %v111_v26 = vpack.c.bf16 %v101_v21, %v100_v17  ;;  %v103_v27 = vmax.f32 %v87_v22, 0.0  ;;  %v89_v6 = vadd.f32 %v180_v19, %v63_v5  ;;  %v104_v28 = vmax.f32 %v88_v23, 0.0 }
  0x16   :  { %118 = vst [vmem:[%s251_s3 + $0x20] sm:$0xff] %v110_v24 }
  0x17   :  { %119 = vst [vmem:[%s251_s3 + $0x28] sm:$0xff] %v111_v26  ;;  %v112_v9 = vpack.c.bf16 %v103_v27, %v102_v25  ;;  %v105_v10 = vmax.f32 %v89_v6, 0.0 }
  0x19   :  { %120 = vst [vmem:[%s251_s3 + $0x30] sm:$0xff] %v112_v9  ;;  %v113_v15 = vpack.c.bf16 %v105_v10, %v104_v28 }
  0x1b   :  { %121 = vst [vmem:[%s251_s3 + $0x38] sm:$0xff] %v113_v15 }

// kernel: audio_encoder_forward.21
= control target key start
LH: loop header
LB: loop body
LE: loop exit
PB: predicated region body
PF: predicated region fallthrough
CT: control target
= control target key end

     0   :  { %s745_s15 = smov 0   ;;  %s897_s0 = inlined_call_operand.vmem [shape: bf16[1024,49], index: 0, kind: input, shape index: {}]   ;;  %s898_s1 = inlined_call_operand.vmem [shape: bf16[49,16], index: 1, kind: input, shape index: {}]   ;;  %s899_s2 = inlined_call_operand.vmem [shape: bf16[1024,16], index: 2, kind: output, shape index: {0}]   ;;  %s900_s3 = inlined_call_operand.vmem [shape: f32[8,1,16], index: 3, kind: output, shape index: {1}]   ;;  %s901_s4 = inlined_call_operand.vmem [shape: f32[8,1,16], index: 4, kind: output, shape index: {2}]  }
   0x1 LB: > { %s751_s16 = sadd.s32 4294967295, %s717_s15   ;;  %p620_p0 = scmp.ge.s32.totalorder %s717_s15, 1  ;;  %s717_s15 = sphi %s745_s15, %s15_s15  }
   0x2   : > { %p168_p1 = scmp.lt.s32.totalorder %s717_s15, 9 }
   0x4   : > { %p169_p2 = pnand %p620_p0, %p168_p1 }
   0x5   : > { %s621_s19 = sshll.u32 (!%p169_p2), %s751_s16, 4  ;;  %p212_p4 = scmp.lt.s32.totalorder (!%p169_p2), %s751_s16, 7 }
   0x6   : > { %172 = sbr.rel (%p169_p2) target bundleno = 225 (0xe1), region = 28  ;;  %p201_p3 = scmp.lt.s32.totalorder (!%p169_p2), %s621_s19, 127 }
   0xb   : > { %v241_v0 = vld [vmem:[%s898_s1 + $0x18] sm:$0x1]  ;;  %vm328_vm0 = vcmask 1040384   ;;  %v719_v2 = vmov 0   ;;  %v689_v6 = vld [vmem:[%s898_s1 + $0x10] sm:$0xff]  ;;  %s903_s19 = smov (!%p201_p3, %s621_s19), 127 }
   0xc   : > { %v295_v1 = vunpack.c.l.b16 %v241_v0  ;;  %v330_v3 = vsel %vm328_vm0, 65535, %v719_v2  ;;  %v688_v7 = vld [vmem:[%s898_s1 + $0x8] sm:$0xff]  ;;  %s622_s24 = sshll.u32 %s903_s19, 2  ;;  %v687_v8 = vld [vmem:[%s898_s1] sm:$0xff]  ;;  %vm303_vm1 = vcmask 400384   ;;  %vm399_vm2 = vcmask 125952  }
   0xd   : > { %s204_s29 = scalar_lea.vmem %s897_s0, %s622_s24  ;;  %s785_s6 = scalar_lea.vmem %s899_s2, %s622_s24  ;;  %vm416_vm3 = vcmask 130048   ;;  %vm454_vm4 = vcmask 122880  }
   0xe   : > { %v299_v4 = vpack.c.b16 %v295_v1, %v295_v1  ;;  %v679_v9 = vld [vmem:[%s204_s29] sm:$0xff]  ;;  %v681_v10 = vld [vmem:[%s204_s29 + $0x10] sm:$0xff]  ;;  %v680_v13 = vld [vmem:[%s204_s29 + $0x8] sm:$0xff]  ;;  %s905_s16 = smov (!%p212_p4, %s751_s16), 7 }
   0xf   : > { %v683_v11 = vld [vmem:[%s204_s29 + $0x20] sm:$0xff]  ;;  %v685_v12 = vld [vmem:[%s204_s29 + $0x30] sm:$0xff]  ;;  %v682_v14 = vld [vmem:[%s204_s29 + $0x18] sm:$0xff]  ;;  %s214_s9 = scalar_lea.vmem %s900_s3, %s905_s16  ;;  %s217_s12 = scalar_lea.vmem %s901_s4, %s905_s16 }
  0x10   : > { %v332_v5 = vand.u32 %v330_v3, %v299_v4  ;;  %v684_v15 = vld [vmem:[%s204_s29 + $0x28] sm:$0xff]  ;;  %v686_v16 = vld [vmem:[%s204_s29 + $0x38] sm:$0xff] }
  0x12   : > { %338 = vmatpush.bf16.msra.mxu0 %v332_v5  ;;  %690 = vmatpush.bf16.msra.mxu1 %v332_v5 }
  0x13   : > { %691 = vmatpush.bf16.msra.mxu2 %v332_v5  ;;  %692 = vmatpush.bf16.msra.mxu3 %v332_v5 }
  0x16   : > { %339 = vmatpush.bf16.msra.mxu0 %v689_v6  ;;  %693 = vmatpush.bf16.msra.mxu1 %v689_v6 }
  0x17   : > { %694 = vmatpush.bf16.msra.mxu2 %v689_v6  ;;  %695 = vmatpush.bf16.msra.mxu3 %v689_v6 }
  0x1a   : > { %340 = vmatpush.bf16.msra.mxu0 %v688_v7  ;;  %696 = vmatpush.bf16.msra.mxu1 %v688_v7 }
  0x1b   : > { %697 = vmatpush.bf16.msra.mxu2 %v688_v7  ;;  %698 = vmatpush.bf16.msra.mxu3 %v688_v7 }
  0x1e   : > { %341 = vmatpush.bf16.msra.mxu0 %v687_v8  ;;  %699 = vmatpush.bf16.msra.mxu1 %v687_v8 }
  0x1f   : > { %700 = vmatpush.bf16.msra.mxu2 %v687_v8  ;;  %701 = vmatpush.bf16.msra.mxu3 %v687_v8 }
  0x21   : > { %669 = vmatmul.msk.bf16.vlgmr.msra.gmra.mxu0 %vm303_vm1, %v679_v9  ;;  %671 = vmatmul.msk.bf16.vlgmr.msra.gmra.mxu1 %vm303_vm1, %v681_v10 }
  0x22   : > { %673 = vmatmul.msk.bf16.vlgmr.msra.gmra.mxu2 %vm303_vm1, %v683_v11  ;;  %675 = vmatmul.msk.bf16.vlgmr.msra.gmra.mxu3 %vm303_vm1, %v685_v12 }
  0x31   : > { %670 = vmatmul.msk.bf16.gmra.mxu0 %vm303_vm1, %v680_v13  ;;  %672 = vmatmul.msk.bf16.gmra.mxu1 %vm303_vm1, %v682_v14 }
  0x32   : > { %674 = vmatmul.msk.bf16.gmra.mxu2 %vm303_vm1, %v684_v15  ;;  %676 = vmatmul.msk.bf16.gmra.mxu3 %vm303_vm1, %v686_v16 }
  0x9e   : > { %v343_v17 = vpop.f32.mrf.mxu0  ;;  %v353_v18 = vpop.f32.mrf.mxu1 }
  0x9f   : > { %v383_v19 = vpack.c.bf16 %v343_v17, %v343_v17  ;;  %v387_v20 = vpack.c.bf16 %v353_v18, %v353_v18  ;;  %v456_v38 = vmul.f32 %v343_v17, %v343_v17  ;;  %v417_v41 = vsel %vm416_vm3, %v343_v17, 0.0 }
  0xa0   : > { %v460_v46 = vmul.f32 %v353_v18, %v353_v18  ;;  %v424_v62 = vsel %vm416_vm3, %v353_v18, 0.0 }
  0xa1   : > { %400 = vst.msk [vmem:[%s785_s6] sm:$0xf] %vm399_vm2, %v383_v19  ;;  %v472_v45 = vsel %vm416_vm3, %v456_v38, 0.0 }
  0xa2   : > { %404 = vst.msk [vmem:[%s785_s6 + $0x10] sm:$0xf] %vm399_vm2, %v387_v20  ;;  %v479_v3 = vsel %vm416_vm3, %v460_v46, 0.0 }
  0xa5   : > { %v791_v21 = vpop.f32.mrf.mxu2  ;;  %v793_v22 = vpop.f32.mrf.mxu3 }
  0xa6   : > { %v345_v23 = vpop.f32.mrf.mxu0  ;;  %v355_v24 = vpop.f32.mrf.mxu1  ;;  %v391_v25 = vpack.c.bf16 %v791_v21, %v791_v21  ;;  %v395_v28 = vpack.c.bf16 %v793_v22, %v793_v22  ;;  %v464_v16 = vmul.f32 %v791_v21, %v791_v21 }
  0xa7   : > { %v384_v26 = vpack.c.bf16 %v345_v23, %v345_v23  ;;  %v388_v27 = vpack.c.bf16 %v355_v24, %v355_v24  ;;  %v457_v34 = vmul.f32 %v345_v23, %v345_v23  ;;  %v418_v39 = vsel %vm416_vm3, %v345_v23, 0.0 }
  0xa8   : > { %408 = vst.msk [vmem:[%s785_s6 + $0x20] sm:$0xf] %vm399_vm2, %v391_v25  ;;  %v419_v44 = vadd.f32 %v418_v39, %v417_v41  ;;  %v461_v63 = vmul.f32 %v355_v24, %v355_v24  ;;  %v426_v4 = vsel %vm416_vm3, %v355_v24, 0.0  ;;  %v432_v24 = vsel %vm416_vm3, %v791_v21, 0.0 }
  0xa9   : > { %401 = vst.msk [vmem:[%s785_s6 + $0x4] sm:$0xf] %vm399_vm2, %v384_v26  ;;  %v473_v42 = vsel %vm416_vm3, %v457_v34, 0.0 }
  0xaa   : > { %405 = vst.msk [vmem:[%s785_s6 + $0x14] sm:$0xf] %vm399_vm2, %v388_v27  ;;  %v474_v50 = vadd.f32 %v473_v42, %v472_v45  ;;  %v481_v8 = vsel %vm416_vm3, %v461_v63, 0.0 }
  0xab   : > { %412 = vst.msk [vmem:[%s785_s6 + $0x30] sm:$0xf] %vm399_vm2, %v395_v28 }
  0xad   : > { %v807_v29 = vpop.f32.mrf.mxu2  ;;  %v809_v30 = vpop.f32.mrf.mxu3 }
  0xae   : > { %v348_v31 = vpop.f32.mrf.mxu0  ;;  %v358_v32 = vpop.f32.mrf.mxu1  ;;  %v392_v33 = vpack.c.bf16 %v807_v29, %v807_v29  ;;  %v396_v37 = vpack.c.bf16 %v809_v30, %v809_v30  ;;  %v465_v25 = vmul.f32 %v807_v29, %v807_v29  ;;  %v469_v45 = vmul.f32 %v809_v30, %v809_v30 }
  0xaf   : > { %v385_v35 = vpack.c.bf16 %v348_v31, %v348_v31  ;;  %v389_v36 = vpack.c.bf16 %v358_v32, %v358_v32  ;;  %v458_v40 = vmul.f32 %v348_v31, %v348_v31  ;;  %v420_v43 = vsel %vm416_vm3, %v348_v31, 0.0 }
  0xb0   : > { %409 = vst.msk [vmem:[%s785_s6 + $0x24] sm:$0xf] %vm399_vm2, %v392_v33  ;;  %v421_v51 = vadd.f32 %v420_v43, %v419_v44  ;;  %v462_v5 = vmul.f32 %v358_v32, %v358_v32  ;;  %v428_v9 = vsel %vm416_vm3, %v358_v32, 0.0  ;;  %v487_v31 = vsel %vm416_vm3, %v464_v16, 0.0 }
  0xb1   : > { %402 = vst.msk [vmem:[%s785_s6 + $0x8] sm:$0xf] %vm399_vm2, %v385_v35  ;;  %v475_v47 = vsel %vm416_vm3, %v458_v40, 0.0  ;;  %v434_v32 = vsel %vm416_vm3, %v807_v29, 0.0  ;;  %v468_v40 = vmul.f32 %v793_v22, %v793_v22  ;;  %v440_v29 = vsel %vm416_vm3, %v793_v22, 0.0 }
  0xb2   : > { %406 = vst.msk [vmem:[%s785_s6 + $0x18] sm:$0xf] %vm399_vm2, %v389_v36  ;;  %v476_v60 = vadd.f32 %v475_v47, %v474_v50  ;;  %v483_v17 = vsel %vm416_vm3, %v462_v5, 0.0  ;;  %v489_v36 = vsel %vm416_vm3, %v465_v25, 0.0  ;;  %v497_v22 = vsel %vm416_vm3, %v469_v45, 0.0 }
  0xb3   : > { %413 = vst.msk [vmem:[%s785_s6 + $0x34] sm:$0xf] %vm399_vm2, %v396_v37  ;;  %v495_v50 = vsel %vm416_vm3, %v468_v40, 0.0 }
  0xb5   : > { %v368_v48 = vpop.f32.mrf.mxu2  ;;  %v829_v49 = vpop.f32.mrf.mxu3 }
  0xb6   : > { %v350_v52 = vpop.f32.mrf.mxu0  ;;  %v360_v53 = vpop.f32.mrf.mxu1  ;;  %v393_v54 = vpack.c.bf16 %v368_v48, %v368_v48  ;;  %v397_v55 = vpack.c.bf16 %v829_v49, %v829_v49  ;;  %v466_v33 = vmul.f32 %v368_v48, %v368_v48  ;;  %v436_v21 = vsel %vm416_vm3, %v368_v48, 0.0 }
  0xb7   : > { %v386_v56 = vpack.c.bf16 %v350_v52, %v350_v52  ;;  %v422_v57 = vsel %vm416_vm3, %v350_v52, 0.0  ;;  %v459_v58 = vmul.f32 %v350_v52, %v350_v52  ;;  %v390_v59 = vpack.c.bf16 %v360_v53, %v360_v53 }
  0xb8   : > { %v423_v61 = vadd.f32 %v422_v57, %v421_v51  ;;  %410 = vst.msk [vmem:[%s785_s6 + $0x28] sm:$0xf] %vm399_vm2, %v393_v54  ;;  %v463_v10 = vmul.f32 %v360_v53, %v360_v53  ;;  %v430_v18 = vsel %vm416_vm3, %v360_v53, 0.0  ;;  %v491_v41 = vsel %vm416_vm3, %v466_v33, 0.0 }
  0xb9   : > { %403 = vst.msk [vmem:[%s785_s6 + $0xc] sm:$0xf] %vm399_vm2, %v386_v56  ;;  %v477_v0 = vsel %vm416_vm3, %v459_v58, 0.0  ;;  %v442_v51 = vsel %vm416_vm3, %v809_v30, 0.0  ;;  %v470_v52 = vmul.f32 %v829_v49, %v829_v49 }
  0xba   : > { %v425_v1 = vadd.f32 %v424_v62, %v423_v61  ;;  %v478_v2 = vadd.f32 %v477_v0, %v476_v60  ;;  %407 = vst.msk [vmem:[%s785_s6 + $0x1c] sm:$0xf] %vm399_vm2, %v390_v59  ;;  %v485_v26 = vsel %vm416_vm3, %v463_v10, 0.0 }
  0xbb   : > { %414 = vst.msk [vmem:[%s785_s6 + $0x38] sm:$0xf] %vm399_vm2, %v397_v55  ;;  %v444_v55 = vsel %vm416_vm3, %v829_v49, 0.0  ;;  %v499_v59 = vsel %vm416_vm3, %v470_v52, 0.0 }
  0xbc   : > { %v480_v6 = vadd.f32 %v479_v3, %v478_v2  ;;  %v427_v7 = vadd.f32 %v426_v4, %v425_v1 }
  0xbd   : > { %v370_v11 = vpop.f32.mrf.mxu2  ;;  %v380_v12 = vpop.f32.mrf.mxu3 }
  0xbe   : > { %v429_v13 = vadd.f32 %v428_v9, %v427_v7  ;;  %v482_v14 = vadd.f32 %v481_v8, %v480_v6  ;;  %v394_v15 = vpack.c.bf16 %v370_v11, %v370_v11  ;;  %v398_v19 = vpack.c.bf16 %v380_v12, %v380_v12 }
  0xbf   : > { %v467_v37 = vmul.f32 %v370_v11, %v370_v11  ;;  %v438_v42 = vsel %vm416_vm3, %v370_v11, 0.0  ;;  %v471_v56 = vmul.f32 %v380_v12, %v380_v12  ;;  %v446_v60 = vsel %vm416_vm3, %v380_v12, 0.0 }
  0xc0   : > { %v431_v20 = vadd.f32 %v430_v18, %v429_v13  ;;  %v484_v23 = vadd.f32 %v483_v17, %v482_v14  ;;  %411 = vst.msk [vmem:[%s785_s6 + $0x2c] sm:$0xf] %vm399_vm2, %v394_v15 }
  0xc1   : > { %415 = vst.msk [vmem:[%s785_s6 + $0x3c] sm:$0xf] %vm399_vm2, %v398_v19  ;;  %v493_v46 = vsel %vm416_vm3, %v467_v37, 0.0  ;;  %v501_v62 = vsel %vm416_vm3, %v471_v56, 0.0 }
  0xc2   : > { %v433_v27 = vadd.f32 %v432_v24, %v431_v20  ;;  %v486_v28 = vadd.f32 %v485_v26, %v484_v23 }
  0xc4   : > { %v488_v34 = vadd.f32 %v487_v31, %v486_v28  ;;  %v435_v35 = vadd.f32 %v434_v32, %v433_v27 }
  0xc6   : > { %v437_v38 = vadd.f32 %v436_v21, %v435_v35  ;;  %v490_v39 = vadd.f32 %v489_v36, %v488_v34 }
  0xc8   : > { %v492_v43 = vadd.f32 %v491_v41, %v490_v39  ;;  %v439_v44 = vadd.f32 %v438_v42, %v437_v38 }
  0xca   : > { %v441_v47 = vadd.f32 %v440_v29, %v439_v44  ;;  %v494_v48 = vadd.f32 %v493_v46, %v492_v43 }
  0xcc   : > { %v496_v53 = vadd.f32 %v495_v50, %v494_v48  ;;  %v443_v54 = vadd.f32 %v442_v51, %v441_v47 }
  0xce   : > { %v445_v57 = vadd.f32 %v444_v55, %v443_v54  ;;  %v498_v58 = vadd.f32 %v497_v22, %v496_v53 }
  0xd0   : > { %v500_v30 = vadd.f32 %v499_v59, %v498_v58  ;;  %v447_v61 = vadd.f32 %v446_v60, %v445_v57 }
  0xd2   : > { %v448_v63 = vrot.slane %v447_v61, 4  ;;  %v502_v0 = vadd.f32 %v501_v62, %v500_v30 }
  0xd4   : > { %v449_v1 = vadd.f32 %v448_v63, %v447_v61  ;;  %v503_v2 = vrot.slane %v502_v0, 4 }
  0xd6   : > { %v450_v3 = vrot.slane %v449_v1, 2  ;;  %v504_v4 = vadd.f32 %v503_v2, %v502_v0 }
  0xd8   : > { %v451_v49 = vadd.f32 %v450_v3, %v449_v1  ;;  %v505_v5 = vrot.slane %v504_v4, 2 }
  0xda   : > { %v452_v6 = vrot.slane %v451_v49, 1  ;;  %v506_v7 = vadd.f32 %v505_v5, %v504_v4 }
  0xdc   : > { %v453_v8 = vadd.f32 %v452_v6, %v451_v49  ;;  %v507_v9 = vrot.slane %v506_v7, 1 }
  0xde   : > { %455 = vst.msk [vmem:[%s214_s9] sm:$0x1] %vm454_vm4, %v453_v8  ;;  %v508_v10 = vadd.f32 %v507_v9, %v506_v7 }
  0xe0   : > { %509 = vst.msk [vmem:[%s217_s12] sm:$0x1] %vm454_vm4, %v508_v10 }
  0xe1 PF: > { %s15_s15 = sadd.s32 1, %s717_s15  }
  0xe2   : > { %p12_p5 = scmp.ge.s32.totalorder %s15_s15, 10  }
  0xe4   :  { %14 = sbr.rel (!%p12_p5) target bundleno = 1 (0x1), region = 82 }

// kernel: audio_encoder_forward.23
= control target key start
LH: loop header
LB: loop body
LE: loop exit
PB: predicated region body
PF: predicated region fallthrough
CT: control target
= control target key end

     0   :  { %s949_s15 = smov 0   ;;  %s1161_s0 = inlined_call_operand.vmem [shape: bf16[1024,144], index: 0, kind: input, shape index: {}]   ;;  %s1162_s1 = inlined_call_operand.vmem [shape: bf16[144,16], index: 1, kind: input, shape index: {}]   ;;  %s1163_s2 = inlined_call_operand.vmem [shape: bf16[1024,16], index: 2, kind: output, shape index: {0}]   ;;  %s1164_s3 = inlined_call_operand.vmem [shape: f32[8,1,16], index: 3, kind: output, shape index: {1}]   ;;  %s1165_s4 = inlined_call_operand.vmem [shape: f32[8,1,16], index: 4, kind: output, shape index: {2}]  }
   0x1 LB: > { %s955_s16 = sadd.s32 4294967295, %s922_s15   ;;  %p757_p0 = scmp.ge.s32.totalorder %s922_s15, 1  ;;  %s922_s15 = sphi %s949_s15, %s15_s15  }
   0x2   : > { %p169_p1 = scmp.lt.s32.totalorder %s922_s15, 9 }
   0x4   : > { %p170_p2 = pnand %p757_p0, %p169_p1 }
   0x5   : > { %s758_s21 = sshll.u32 (!%p170_p2), %s955_s16, 4  ;;  %p215_p4 = scmp.lt.s32.totalorder (!%p170_p2), %s955_s16, 7 }
   0x6   : > { %173 = sbr.rel (%p170_p2) target bundleno = 263 (0x107), region = 28  ;;  %p203_p3 = scmp.lt.s32.totalorder (!%p170_p2), %s758_s21, 127 }
   0xb   : > { %v897_v0 = vld [vmem:[%s1162_s1 + $0x38] sm:$0xff]  ;;  %v898_v1 = vld [vmem:[%s1162_s1 + $0x40] sm:$0xff]  ;;  %v896_v2 = vld [vmem:[%s1162_s1 + $0x30] sm:$0xff]  ;;  %s1167_s21 = smov (!%p203_p3, %s758_s21), 127  ;;  %vm382_vm0 = vcmask 130048   ;;  %vm537_vm1 = vcmask 125952  }
   0xc   : > { %407 = vmatpush.bf16.msra.mxu0 %v897_v0  ;;  %899 = vmatpush.bf16.msra.mxu2 %v897_v0  ;;  %s873_s24 = sshll.u32 %s1167_s21, 3  ;;  %v895_v3 = vld [vmem:[%s1162_s1 + $0x28] sm:$0xff]  ;;  %v894_v7 = vld [vmem:[%s1162_s1 + $0x20] sm:$0xff]  ;;  %v893_v8 = vld [vmem:[%s1162_s1 + $0x18] sm:$0xff]  ;;  %s762_s14 = sshll.u32 %s1167_s21, 2  ;;  %vm591_vm2 = vcmask 122880  }
   0xd   : > { %463 = vmatpush.bf16.msra.mxu1 %v898_v1  ;;  %907 = vmatpush.bf16.msra.mxu3 %v898_v1  ;;  %s975_s27 = scalar_lea.vmem %s1161_s0, %s873_s24  ;;  %v892_v11 = vld [vmem:[%s1162_s1 + $0x10] sm:$0xff]  ;;  %v891_v16 = vld [vmem:[%s1162_s1 + $0x8] sm:$0xff]  ;;  %v890_v17 = vld [vmem:[%s1162_s1] sm:$0xff]  ;;  %s1041_s19 = scalar_lea.vmem %s1163_s2, %s762_s14 }
   0xe   : > { %v874_v4 = vld [vmem:[%s975_s27 + $0x4] sm:$0xf]  ;;  %v767_v5 = vld [vmem:[%s975_s27 + $0x8] sm:$0xf0]  ;;  %v884_v9 = vld [vmem:[%s975_s27 + $0x54] sm:$0xf] }
   0xf   : > { %v770_v6 = vor.u32 %v874_v4, %v767_v5  ;;  %v807_v10 = vld [vmem:[%s975_s27 + $0x58] sm:$0xf0]  ;;  %v876_v13 = vld [vmem:[%s975_s27 + $0x14] sm:$0xf]  ;;  %v765_v18 = vld [vmem:[%s975_s27] sm:$0xf] }
  0x10   : > { %408 = vmatpush.bf16.msra.mxu0 %v896_v2  ;;  %900 = vmatpush.bf16.msra.mxu2 %v896_v2  ;;  %v810_v12 = vor.u32 %v884_v9, %v807_v10  ;;  %v775_v14 = vld [vmem:[%s975_s27 + $0x18] sm:$0xf0]  ;;  %v875_v19 = vld [vmem:[%s975_s27 + $0x4] sm:$0xf0]  ;;  %v797_v20 = vld [vmem:[%s975_s27 + $0x40] sm:$0xf] }
  0x11   : > { %863 = vmatmul.msk.bf16.vlgmr.msra.gmra.mxu1 %vm382_vm0, %v770_v6  ;;  %v778_v15 = vor.u32 %v876_v13, %v775_v14  ;;  %v883_v21 = vld [vmem:[%s975_s27 + $0x44] sm:$0xf0]  ;;  %v766_v22 = vor.u32 %v875_v19, %v765_v18  ;;  %v886_v24 = vld [vmem:[%s975_s27 + $0x64] sm:$0xf]  ;;  %v815_v25 = vld [vmem:[%s975_s27 + $0x68] sm:$0xf0] }
  0x12   : > { %868 = vmatmul.msk.bf16.vlgmr.msra.gmra.mxu3 %vm382_vm0, %v810_v12  ;;  %v798_v23 = vor.u32 %v883_v21, %v797_v20  ;;  %v818_v26 = vor.u32 %v886_v24, %v815_v25  ;;  %v878_v27 = vld [vmem:[%s975_s27 + $0x24] sm:$0xf]  ;;  %v783_v28 = vld [vmem:[%s975_s27 + $0x28] sm:$0xf0]  ;;  %v773_v30 = vld [vmem:[%s975_s27 + $0x10] sm:$0xf] }
  0x13   : > { %v786_v29 = vor.u32 %v878_v27, %v783_v28  ;;  %v877_v31 = vld [vmem:[%s975_s27 + $0x14] sm:$0xf0]  ;;  %v805_v32 = vld [vmem:[%s975_s27 + $0x50] sm:$0xf]  ;;  %v888_v36 = vld [vmem:[%s975_s27 + $0x74] sm:$0xf] }
  0x14   : > { %409 = vmatpush.bf16.msra.mxu0 %v895_v3  ;;  %901 = vmatpush.bf16.msra.mxu2 %v895_v3  ;;  %v885_v33 = vld [vmem:[%s975_s27 + $0x54] sm:$0xf0]  ;;  %v774_v34 = vor.u32 %v877_v31, %v773_v30  ;;  %v823_v37 = vld [vmem:[%s975_s27 + $0x78] sm:$0xf0]  ;;  %v880_v39 = vld [vmem:[%s975_s27 + $0x34] sm:$0xf] }
  0x15   : > { %v806_v35 = vor.u32 %v885_v33, %v805_v32  ;;  %v826_v38 = vor.u32 %v888_v36, %v823_v37  ;;  %v791_v40 = vld [vmem:[%s975_s27 + $0x38] sm:$0xf0]  ;;  %v781_v42 = vld [vmem:[%s975_s27 + $0x20] sm:$0xf]  ;;  %v879_v43 = vld [vmem:[%s975_s27 + $0x24] sm:$0xf0] }
  0x16   : > { %v794_v41 = vor.u32 %v880_v39, %v791_v40  ;;  %v813_v44 = vld [vmem:[%s975_s27 + $0x60] sm:$0xf]  ;;  %v887_v45 = vld [vmem:[%s975_s27 + $0x64] sm:$0xf0]  ;;  %v782_v46 = vor.u32 %v879_v43, %v781_v42  ;;  %v882_v48 = vld [vmem:[%s975_s27 + $0x44] sm:$0xf] }
  0x17   : > { %v814_v47 = vor.u32 %v887_v45, %v813_v44  ;;  %v799_v49 = vld [vmem:[%s975_s27 + $0x48] sm:$0xf0]  ;;  %v789_v51 = vld [vmem:[%s975_s27 + $0x30] sm:$0xf]  ;;  %v881_v52 = vld [vmem:[%s975_s27 + $0x34] sm:$0xf0] }
  0x18   : > { %410 = vmatpush.bf16.msra.mxu0 %v894_v7  ;;  %902 = vmatpush.bf16.msra.mxu2 %v894_v7  ;;  %v802_v50 = vor.u32 %v882_v48, %v799_v49  ;;  %v821_v53 = vld [vmem:[%s975_s27 + $0x70] sm:$0xf]  ;;  %v889_v54 = vld [vmem:[%s975_s27 + $0x74] sm:$0xf0]  ;;  %v790_v55 = vor.u32 %v881_v52, %v789_v51  ;;  %s1169_s16 = smov (!%p215_p4, %s955_s16), 7 }
  0x19   : > { %v822_v56 = vor.u32 %v889_v54, %v821_v53  ;;  %s217_s22 = scalar_lea.vmem %s1164_s3, %s1169_s16  ;;  %s220_s25 = scalar_lea.vmem %s1165_s4, %s1169_s16 }
  0x1c   : > { %411 = vmatpush.bf16.msra.mxu0 %v893_v8  ;;  %903 = vmatpush.bf16.msra.mxu2 %v893_v8 }
  0x20   : > { %412 = vmatpush.bf16.msra.mxu0 %v892_v11  ;;  %904 = vmatpush.bf16.msra.mxu2 %v892_v11 }
  0x21   : > { %864 = vmatmul.msk.bf16.gmra.mxu1 %vm382_vm0, %v778_v15 }
  0x22   : > { %869 = vmatmul.msk.bf16.gmra.mxu3 %vm382_vm0, %v818_v26 }
  0x24   : > { %413 = vmatpush.bf16.msra.mxu0 %v891_v16  ;;  %905 = vmatpush.bf16.msra.mxu2 %v891_v16 }
  0x28   : > { %414 = vmatpush.bf16.msra.mxu0 %v890_v17  ;;  %906 = vmatpush.bf16.msra.mxu2 %v890_v17 }
  0x2b   : > { %415 = vmatmul.bf16.vlgmr.msra.gmra.mxu0 %v766_v22  ;;  %435 = vmatmul.bf16.vlgmr.msra.gmra.mxu2 %v798_v23 }
  0x31   : > { %865 = vmatmul.msk.bf16.gmra.mxu1 %vm382_vm0, %v786_v29 }
  0x32   : > { %870 = vmatmul.msk.bf16.gmra.mxu3 %vm382_vm0, %v826_v38 }
  0x3b   : > { %420 = vmatmul.bf16.gmra.mxu0 %v774_v34  ;;  %440 = vmatmul.bf16.gmra.mxu2 %v806_v35 }
  0x41   : > { %866 = vmatmul.msk.bf16.gmra.mxu1 %vm382_vm0, %v794_v41 }
  0x4b   : > { %425 = vmatmul.bf16.gmra.mxu0 %v782_v46  ;;  %445 = vmatmul.bf16.gmra.mxu2 %v814_v47 }
  0x51   : > { %867 = vmatmul.msk.bf16.gmra.mxu1 %vm382_vm0, %v802_v50 }
  0x5b   : > { %430 = vmatmul.bf16.gmra.mxu0 %v790_v55  ;;  %450 = vmatmul.bf16.gmra.mxu2 %v822_v56 }
  0x8e   : > { %v465_v57 = vpop.f32.mrf.mxu1 }
  0x95   : > { %v490_v6 = vpop.f32.mrf.mxu3 }
  0x96   : > { %v467_v58 = vpop.f32.mrf.mxu1 }
  0x9d   : > { %v492_v14 = vpop.f32.mrf.mxu3 }
  0x9e   : > { %v470_v59 = vpop.f32.mrf.mxu1 }
  0xa5   : > { %v495_v25 = vpop.f32.mrf.mxu3 }
  0xa6   : > { %v472_v62 = vpop.f32.mrf.mxu1 }
  0xa8   : > { %v416_v60 = vpop.f32.mrf.mxu0 }
  0xa9   : > { %v466_v61 = vadd.f32 %v465_v57, %v416_v60 }
  0xab   : > { %v1036_v63 = vmax.f32 %v466_v61, 0.0 }
  0xad   : > { %v521_v0 = vpack.c.bf16 %v1036_v63, %v1036_v63  ;;  %v497_v39 = vpop.f32.mrf.mxu3  ;;  %v593_v47 = vmul.f32 %v1036_v63, %v1036_v63  ;;  %v554_v52 = vsel %vm382_vm0, %v1036_v63, 0.0 }
  0xae   : > { %v436_v1 = vpop.f32.mrf.mxu2  ;;  %v475_v4 = vpop.f32.mrf.mxu1 }
  0xaf   : > { %538 = vst.msk [vmem:[%s1041_s19] sm:$0xf] %vm537_vm1, %v521_v0  ;;  %v609_v60 = vsel %vm382_vm0, %v593_v47, 0.0 }
  0xb0   : > { %v418_v2 = vpop.f32.mrf.mxu0 }
  0xb1   : > { %v468_v3 = vadd.f32 %v467_v58, %v418_v2 }
  0xb3   : > { %v506_v5 = vmax.f32 %v468_v3, 0.0 }
  0xb5   : > { %v522_v7 = vpack.c.bf16 %v506_v5, %v506_v5  ;;  %v594_v45 = vmul.f32 %v506_v5, %v506_v5  ;;  %v555_v49 = vsel %vm382_vm0, %v506_v5, 0.0 }
  0xb6   : > { %v438_v8 = vpop.f32.mrf.mxu2  ;;  %v477_v11 = vpop.f32.mrf.mxu1  ;;  %v556_v61 = vadd.f32 %v555_v49, %v554_v52 }
  0xb7   : > { %539 = vst.msk [vmem:[%s1041_s19 + $0x4] sm:$0xf] %vm537_vm1, %v522_v7  ;;  %v610_v55 = vsel %vm382_vm0, %v594_v45, 0.0 }
  0xb8   : > { %v421_v9 = vpop.f32.mrf.mxu0  ;;  %v611_v5 = vadd.f32 %v610_v55, %v609_v60 }
  0xb9   : > { %v471_v10 = vadd.f32 %v470_v59, %v421_v9 }
  0xbb   : > { %v507_v12 = vmax.f32 %v471_v10, 0.0 }
  0xbd   : > { %v523_v13 = vpack.c.bf16 %v507_v12, %v507_v12  ;;  %v595_v50 = vmul.f32 %v507_v12, %v507_v12  ;;  %v557_v56 = vsel %vm382_vm0, %v507_v12, 0.0 }
  0xbe   : > { %v441_v15 = vpop.f32.mrf.mxu2  ;;  %v480_v19 = vpop.f32.mrf.mxu1 }
  0xbf   : > { %540 = vst.msk [vmem:[%s1041_s19 + $0x8] sm:$0xf] %vm537_vm1, %v523_v13  ;;  %v491_v17 = vadd.f32 %v490_v6, %v441_v15  ;;  %v558_v6 = vadd.f32 %v557_v56, %v556_v61 }
  0xc0   : > { %v423_v16 = vpop.f32.mrf.mxu0 }
  0xc1   : > { %v473_v18 = vadd.f32 %v472_v62, %v423_v16  ;;  %v1051_v20 = vmax.f32 %v491_v17, 0.0 }
  0xc3   : > { %v508_v21 = vmax.f32 %v473_v18, 0.0  ;;  %v531_v22 = vpack.c.bf16 %v1051_v20, %v1051_v20 }
  0xc5   : > { %v524_v23 = vpack.c.bf16 %v508_v21, %v508_v21  ;;  %548 = vst.msk [vmem:[%s1041_s19 + $0x28] sm:$0xf] %vm537_vm1, %v531_v22  ;;  %v596_v57 = vmul.f32 %v508_v21, %v508_v21  ;;  %v559_v63 = vsel %vm382_vm0, %v508_v21, 0.0 }
  0xc6   : > { %v443_v24 = vpop.f32.mrf.mxu2  ;;  %v1059_v29 = vpop.f32.mrf.mxu1 }
  0xc7   : > { %541 = vst.msk [vmem:[%s1041_s19 + $0xc] sm:$0xf] %vm537_vm1, %v524_v23  ;;  %v493_v27 = vadd.f32 %v492_v14, %v443_v24  ;;  %v560_v14 = vadd.f32 %v559_v63, %v558_v6 }
  0xc8   : > { %v426_v26 = vpop.f32.mrf.mxu0 }
  0xc9   : > { %v476_v28 = vadd.f32 %v475_v4, %v426_v26  ;;  %v1061_v30 = vmax.f32 %v493_v27, 0.0  ;;  %v500_v4 = vpop.f32.mrf.mxu3 }
  0xcb   : > { %v509_v31 = vmax.f32 %v476_v28, 0.0  ;;  %v532_v32 = vpack.c.bf16 %v1061_v30, %v1061_v30 }
  0xcd   : > { %v525_v33 = vpack.c.bf16 %v509_v31, %v509_v31  ;;  %549 = vst.msk [vmem:[%s1041_s19 + $0x2c] sm:$0xf] %vm537_vm1, %v532_v32  ;;  %v597_v2 = vmul.f32 %v509_v31, %v509_v31  ;;  %v561_v10 = vsel %vm382_vm0, %v509_v31, 0.0 }
  0xce   : > { %v446_v34 = vpop.f32.mrf.mxu2  ;;  %v485_v38 = vpop.f32.mrf.mxu1  ;;  %v562_v22 = vadd.f32 %v561_v10, %v560_v14 }
  0xcf   : > { %542 = vst.msk [vmem:[%s1041_s19 + $0x10] sm:$0xf] %vm537_vm1, %v525_v33  ;;  %v496_v36 = vadd.f32 %v495_v25, %v446_v34  ;;  %v486_v40 = vadd.f32 %v485_v38, %v436_v1  ;;  %v612_v1 = vsel %vm382_vm0, %v595_v50, 0.0  ;;  %v616_v16 = vsel %vm382_vm0, %v597_v2, 0.0 }
  0xd0   : > { %v428_v35 = vpop.f32.mrf.mxu0  ;;  %v613_v13 = vadd.f32 %v612_v1, %v611_v5  ;;  %v575_v2 = vsel %vm382_vm0, %v1061_v30, 0.0 }
  0xd1   : > { %v478_v37 = vadd.f32 %v477_v11, %v428_v35  ;;  %v1069_v41 = vmax.f32 %v496_v36, 0.0  ;;  %v1071_v43 = vmax.f32 %v486_v40, 0.0 }
  0xd3   : > { %v510_v42 = vmax.f32 %v478_v37, 0.0  ;;  %v533_v44 = vpack.c.bf16 %v1069_v41, %v1069_v41  ;;  %v529_v48 = vpack.c.bf16 %v1071_v43, %v1071_v43  ;;  %v601_v38 = vmul.f32 %v1071_v43, %v1071_v43 }
  0xd4   : > { %v577_v6 = vsel %vm382_vm0, %v1069_v41, 0.0 }
  0xd5   : > { %v526_v46 = vpack.c.bf16 %v510_v42, %v510_v42  ;;  %550 = vst.msk [vmem:[%s1041_s19 + $0x30] sm:$0xf] %vm537_vm1, %v533_v44  ;;  %v598_v11 = vmul.f32 %v510_v42, %v510_v42  ;;  %v563_v17 = vsel %vm382_vm0, %v510_v42, 0.0  ;;  %v502_v44 = vpop.f32.mrf.mxu3 }
  0xd6   : > { %v448_v51 = vpop.f32.mrf.mxu2  ;;  %546 = vst.msk [vmem:[%s1041_s19 + $0x20] sm:$0xf] %vm537_vm1, %v529_v48  ;;  %v487_v59 = vpop.f32.mrf.mxu1  ;;  %v564_v31 = vadd.f32 %v563_v17, %v562_v22 }
  0xd7   : > { %543 = vst.msk [vmem:[%s1041_s19 + $0x14] sm:$0xf] %vm537_vm1, %v526_v46  ;;  %v498_v54 = vadd.f32 %v497_v39, %v448_v51  ;;  %v488_v62 = vadd.f32 %v487_v59, %v438_v8  ;;  %v614_v8 = vsel %vm382_vm0, %v596_v57, 0.0  ;;  %v618_v25 = vsel %vm382_vm0, %v598_v11, 0.0 }
  0xd8   : > { %v431_v53 = vpop.f32.mrf.mxu0  ;;  %v615_v21 = vadd.f32 %v614_v8, %v613_v13  ;;  %v569_v46 = vsel %vm382_vm0, %v1071_v43, 0.0  ;;  %v604_v59 = vmul.f32 %v1061_v30, %v1061_v30 }
  0xd9   : > { %v481_v58 = vadd.f32 %v480_v19, %v431_v53  ;;  %v1091_v0 = vmax.f32 %v498_v54, 0.0  ;;  %v514_v7 = vmax.f32 %v488_v62, 0.0  ;;  %v603_v53 = vmul.f32 %v1051_v20, %v1051_v20 }
  0xda   : > { %v617_v28 = vadd.f32 %v616_v16, %v615_v21  ;;  %v624_v54 = vsel %vm382_vm0, %v601_v38, 0.0 }
  0xdb   : > { %v511_v3 = vmax.f32 %v481_v58, 0.0  ;;  %v534_v9 = vpack.c.bf16 %v1091_v0, %v1091_v0  ;;  %v530_v15 = vpack.c.bf16 %v514_v7, %v514_v7  ;;  %v602_v47 = vmul.f32 %v514_v7, %v514_v7 }
  0xdc   : > { %v619_v35 = vadd.f32 %v618_v25, %v617_v28  ;;  %v571_v55 = vsel %vm382_vm0, %v514_v7, 0.0  ;;  %v573_v58 = vsel %vm382_vm0, %v1051_v20, 0.0  ;;  %v628_v63 = vsel %vm382_vm0, %v603_v53, 0.0 }
  0xdd   : > { %v527_v12 = vpack.c.bf16 %v511_v3, %v511_v3  ;;  %551 = vst.msk [vmem:[%s1041_s19 + $0x34] sm:$0xf] %vm537_vm1, %v534_v9  ;;  %v599_v18 = vmul.f32 %v511_v3, %v511_v3  ;;  %v565_v26 = vsel %vm382_vm0, %v511_v3, 0.0  ;;  %v626_v60 = vsel %vm382_vm0, %v602_v47, 0.0 }
  0xde   : > { %v451_v19 = vpop.f32.mrf.mxu2  ;;  %547 = vst.msk [vmem:[%s1041_s19 + $0x24] sm:$0xf] %vm537_vm1, %v530_v15  ;;  %v566_v36 = vadd.f32 %v565_v26, %v564_v31  ;;  %v605_v3 = vmul.f32 %v1069_v41, %v1069_v41  ;;  %v630_v20 = vsel %vm382_vm0, %v604_v59, 0.0  ;;  %v606_v7 = vmul.f32 %v1091_v0, %v1091_v0 }
  0xdf   : > { %544 = vst.msk [vmem:[%s1041_s19 + $0x18] sm:$0xf] %vm537_vm1, %v527_v12  ;;  %v501_v24 = vadd.f32 %v500_v4, %v451_v19  ;;  %v620_v33 = vsel %vm382_vm0, %v599_v18, 0.0  ;;  %v579_v30 = vsel %vm382_vm0, %v1091_v0, 0.0 }
  0xe0   : > { %v433_v23 = vpop.f32.mrf.mxu0  ;;  %v632_v10 = vsel %vm382_vm0, %v605_v3, 0.0  ;;  %v634_v14 = vsel %vm382_vm0, %v606_v7, 0.0 }
  0xe1   : > { %v483_v27 = vadd.f32 %v1059_v29, %v433_v23  ;;  %v519_v32 = vmax.f32 %v501_v24, 0.0  ;;  %v621_v29 = vadd.f32 %v620_v33, %v619_v35 }
  0xe3   : > { %v512_v34 = vmax.f32 %v483_v27, 0.0  ;;  %v535_v37 = vpack.c.bf16 %v519_v32, %v519_v32  ;;  %v607_v11 = vmul.f32 %v519_v32, %v519_v32  ;;  %v581_v15 = vsel %vm382_vm0, %v519_v32, 0.0 }
  0xe5   : > { %v528_v39 = vpack.c.bf16 %v512_v34, %v512_v34  ;;  %v567_v40 = vsel %vm382_vm0, %v512_v34, 0.0  ;;  %v600_v42 = vmul.f32 %v512_v34, %v512_v34  ;;  %552 = vst.msk [vmem:[%s1041_s19 + $0x38] sm:$0xf] %vm537_vm1, %v535_v37  ;;  %v636_v18 = vsel %vm382_vm0, %v607_v11, 0.0 }
  0xe6   : > { %v568_v45 = vadd.f32 %v567_v40, %v566_v36  ;;  %v453_v49 = vpop.f32.mrf.mxu2 }
  0xe7   : > { %545 = vst.msk [vmem:[%s1041_s19 + $0x1c] sm:$0xf] %vm537_vm1, %v528_v39  ;;  %v622_v48 = vsel %vm382_vm0, %v600_v42, 0.0  ;;  %v503_v52 = vadd.f32 %v502_v44, %v453_v49 }
  0xe8   : > { %v570_v50 = vadd.f32 %v569_v46, %v568_v45  ;;  %v623_v51 = vadd.f32 %v622_v48, %v621_v29 }
  0xe9   : > { %v520_v43 = vmax.f32 %v503_v52, 0.0 }
  0xea   : > { %v572_v56 = vadd.f32 %v571_v55, %v570_v50  ;;  %v625_v57 = vadd.f32 %v624_v54, %v623_v51 }
  0xeb   : > { %v536_v1 = vpack.c.bf16 %v520_v43, %v520_v43  ;;  %v608_v41 = vmul.f32 %v520_v43, %v520_v43  ;;  %v583_v19 = vsel %vm382_vm0, %v520_v43, 0.0 }
  0xec   : > { %v574_v61 = vadd.f32 %v573_v58, %v572_v56  ;;  %v627_v62 = vadd.f32 %v626_v60, %v625_v57 }
  0xed   : > { %553 = vst.msk [vmem:[%s1041_s19 + $0x3c] sm:$0xf] %vm537_vm1, %v536_v1  ;;  %v638_v0 = vsel %vm382_vm0, %v608_v41, 0.0 }
  0xee   : > { %v629_v4 = vadd.f32 %v628_v63, %v627_v62  ;;  %v576_v5 = vadd.f32 %v575_v2, %v574_v61 }
  0xf0   : > { %v578_v9 = vadd.f32 %v577_v6, %v576_v5  ;;  %v631_v8 = vadd.f32 %v630_v20, %v629_v4 }
  0xf2   : > { %v580_v12 = vadd.f32 %v579_v30, %v578_v9  ;;  %v633_v13 = vadd.f32 %v632_v10, %v631_v8 }
  0xf4   : > { %v582_v16 = vadd.f32 %v581_v15, %v580_v12  ;;  %v635_v17 = vadd.f32 %v634_v14, %v633_v13 }
  0xf6   : > { %v637_v21 = vadd.f32 %v636_v18, %v635_v17  ;;  %v584_v22 = vadd.f32 %v583_v19, %v582_v16 }
  0xf8   : > { %v585_v23 = vrot.slane %v584_v22, 4  ;;  %v639_v24 = vadd.f32 %v638_v0, %v637_v21 }
  0xfa   : > { %v586_v25 = vadd.f32 %v585_v23, %v584_v22  ;;  %v640_v26 = vrot.slane %v639_v24, 4 }
  0xfc   : > { %v587_v27 = vrot.slane %v586_v25, 2  ;;  %v641_v28 = vadd.f32 %v640_v26, %v639_v24 }
  0xfe   : > { %v588_v31 = vadd.f32 %v587_v27, %v586_v25  ;;  %v642_v32 = vrot.slane %v641_v28, 2 }
 0x100   : > { %v589_v33 = vrot.slane %v588_v31, 1  ;;  %v643_v34 = vadd.f32 %v642_v32, %v641_v28 }
 0x102   : > { %v590_v35 = vadd.f32 %v589_v33, %v588_v31  ;;  %v644_v36 = vrot.slane %v643_v34, 1 }
 0x104   : > { %592 = vst.msk [vmem:[%s217_s22] sm:$0x1] %vm591_vm2, %v590_v35  ;;  %v645_v37 = vadd.f32 %v644_v36, %v643_v34 }
 0x106   : > { %646 = vst.msk [vmem:[%s220_s25] sm:$0x1] %vm591_vm2, %v645_v37 }
 0x107 PF: > { %s15_s15 = sadd.s32 1, %s922_s15  }
 0x108   : > { %p12_p5 = scmp.ge.s32.totalorder %s15_s15, 10  }
 0x10a   :  { %14 = sbr.rel (!%p12_p5) target bundleno = 1 (0x1), region = 82 }

// kernel: audio_encoder_forward.24
= control target key start
LH: loop header
LB: loop body
LE: loop exit
PB: predicated region body
PF: predicated region fallthrough
CT: control target
= control target key end

     0   :  { %s190_s0 = inlined_call_operand.vmem [shape: bf16[32,512], index: 0, kind: input, shape index: {}]   ;;  %s191_s1 = inlined_call_operand.vmem [shape: f32[1,512], index: 1, kind: input, shape index: {}]   ;;  %s192_s2 = inlined_call_operand.vmem [shape: f32[1,512], index: 2, kind: input, shape index: {}]   ;;  %s193_s3 = inlined_call_operand.vmem [shape: bf16[32,512], index: 3, kind: output, shape index: {}]  }
   0x1   :  { %v14_v0 = vld [vmem:[%s190_s0] sm:$0xff]  ;;  %v15_v7 = vld [vmem:[%s190_s0 + $0x8] sm:$0xff]  ;;  %v16_v8 = vld [vmem:[%s190_s0 + $0x10] sm:$0xff] }
   0x2   :  { %v38_v1 = vld [vmem:[%s191_s1] sm:$0xf]  ;;  %v22_v3 = vunpack.c.l.bf16 %v14_v0  ;;  %v23_v4 = vunpack.c.h.bf16 %v14_v0  ;;  %v24_v11 = vunpack.c.l.bf16 %v15_v7  ;;  %v25_v12 = vunpack.c.h.bf16 %v15_v7  ;;  %v17_v17 = vld [vmem:[%s190_s0 + $0x18] sm:$0xff]  ;;  %v19_v31 = vld [vmem:[%s190_s0 + $0x28] sm:$0xff] }
   0x3   :  { %v64_v2 = vld [vmem:[%s192_s2] sm:$0xf]  ;;  %v40_v5 = vperm.slane %v38_v1, 0  ;;  %v41_v6 = vperm.slane %v38_v1, 1  ;;  %v42_v15 = vperm.slane %v38_v1, 2  ;;  %v43_v16 = vperm.slane %v38_v1, 3 }
   0x4   :  { %v66_v9 = vperm.slane %v64_v2, 0  ;;  %v145_v10 = vperm.slane %v64_v2, 1  ;;  %v68_v18 = vperm.slane %v64_v2, 2  ;;  %v69_v19 = vperm.slane %v64_v2, 3  ;;  %v18_v22 = vld [vmem:[%s190_s0 + $0x20] sm:$0xff]  ;;  %v20_v40 = vld [vmem:[%s190_s0 + $0x30] sm:$0xff] }
   0x5   :  { %v48_v13 = vmul.f32 %v40_v5, %v22_v3  ;;  %v49_v14 = vmul.f32 %v41_v6, %v23_v4  ;;  %v26_v20 = vunpack.c.l.bf16 %v16_v8  ;;  %v27_v21 = vunpack.c.h.bf16 %v16_v8  ;;  %v21_v45 = vld [vmem:[%s190_s0 + $0x38] sm:$0xff] }
   0x6   :  { %v50_v25 = vmul.f32 %v42_v15, %v24_v11  ;;  %v51_v26 = vmul.f32 %v43_v16, %v25_v12  ;;  %v28_v29 = vunpack.c.l.bf16 %v17_v17  ;;  %v29_v30 = vunpack.c.h.bf16 %v17_v17 }
   0x7   :  { %v74_v23 = vadd.f32 %v66_v9, %v48_v13  ;;  %v75_v24 = vadd.f32 %v145_v10, %v49_v14  ;;  %v52_v27 = vmul.f32 %v40_v5, %v26_v20  ;;  %v53_v28 = vmul.f32 %v41_v6, %v27_v21 }
   0x8   :  { %v76_v33 = vadd.f32 %v68_v18, %v50_v25  ;;  %v77_v34 = vadd.f32 %v69_v19, %v51_v26  ;;  %v30_v35 = vunpack.c.l.bf16 %v18_v22  ;;  %v54_v38 = vmul.f32 %v42_v15, %v28_v29 }
   0x9   :  { %v90_v32 = vpack.c.bf16 %v75_v24, %v74_v23  ;;  %v78_v36 = vadd.f32 %v66_v9, %v52_v27  ;;  %v79_v37 = vadd.f32 %v145_v10, %v53_v28  ;;  %v55_v39 = vmul.f32 %v43_v16, %v29_v30 }
   0xa   :  { %v91_v41 = vpack.c.bf16 %v77_v34, %v76_v33  ;;  %v31_v42 = vunpack.c.h.bf16 %v18_v22  ;;  %v56_v43 = vmul.f32 %v40_v5, %v30_v35  ;;  %v32_v44 = vunpack.c.l.bf16 %v19_v31 }
   0xb   :  { %98 = vst [vmem:[%s193_s3] sm:$0xff] %v90_v32  ;;  %v92_v46 = vpack.c.bf16 %v79_v37, %v78_v36  ;;  %v80_v47 = vadd.f32 %v68_v18, %v54_v38  ;;  %v81_v48 = vadd.f32 %v69_v19, %v55_v39  ;;  %v33_v49 = vunpack.c.h.bf16 %v19_v31 }
   0xc   :  { %99 = vst [vmem:[%s193_s3 + $0x8] sm:$0xff] %v91_v41  ;;  %v57_v50 = vmul.f32 %v41_v6, %v31_v42  ;;  %v82_v51 = vadd.f32 %v66_v9, %v56_v43  ;;  %v58_v52 = vmul.f32 %v42_v15, %v32_v44  ;;  %v34_v53 = vunpack.c.l.bf16 %v20_v40 }
   0xd   :  { %100 = vst [vmem:[%s193_s3 + $0x10] sm:$0xff] %v92_v46  ;;  %v93_v54 = vpack.c.bf16 %v81_v48, %v80_v47  ;;  %v59_v55 = vmul.f32 %v43_v16, %v33_v49  ;;  %v35_v56 = vunpack.c.h.bf16 %v20_v40  ;;  %v36_v57 = vunpack.c.l.bf16 %v21_v45 }
   0xe   :  { %v83_v58 = vadd.f32 %v145_v10, %v57_v50  ;;  %v84_v59 = vadd.f32 %v68_v18, %v58_v52  ;;  %v60_v60 = vmul.f32 %v40_v5, %v34_v53  ;;  %v37_v61 = vunpack.c.h.bf16 %v21_v45 }
   0xf   :  { %101 = vst [vmem:[%s193_s3 + $0x18] sm:$0xff] %v93_v54  ;;  %v85_v62 = vadd.f32 %v69_v19, %v59_v55  ;;  %v61_v63 = vmul.f32 %v41_v6, %v35_v56  ;;  %v62_v0 = vmul.f32 %v42_v15, %v36_v57 }
  0x10   :  { %v94_v1 = vpack.c.bf16 %v83_v58, %v82_v51  ;;  %v86_v2 = vadd.f32 %v66_v9, %v60_v60  ;;  %v63_v3 = vmul.f32 %v43_v16, %v37_v61 }
  0x11   :  { %v95_v4 = vpack.c.bf16 %v85_v62, %v84_v59  ;;  %v87_v7 = vadd.f32 %v145_v10, %v61_v63  ;;  %v88_v8 = vadd.f32 %v68_v18, %v62_v0 }
  0x12   :  { %102 = vst [vmem:[%s193_s3 + $0x20] sm:$0xff] %v94_v1  ;;  %v89_v5 = vadd.f32 %v69_v19, %v63_v3 }
  0x13   :  { %103 = vst [vmem:[%s193_s3 + $0x28] sm:$0xff] %v95_v4  ;;  %v96_v11 = vpack.c.bf16 %v87_v7, %v86_v2 }
  0x14   :  { %v97_v12 = vpack.c.bf16 %v89_v5, %v88_v8 }
  0x15   :  { %104 = vst [vmem:[%s193_s3 + $0x30] sm:$0xff] %v96_v11 }
  0x16   :  { %105 = vst [vmem:[%s193_s3 + $0x38] sm:$0xff] %v97_v12 }

// kernel: audio_encoder_forward.25
= control target key start
LH: loop header
LB: loop body
LE: loop exit
PB: predicated region body
PF: predicated region fallthrough
CT: control target
= control target key end

     0   :  { %s933_s15 = smov 0   ;;  %s1138_s0 = inlined_call_operand.vmem [shape: bf16[1024,144], index: 0, kind: input, shape index: {}]   ;;  %s1139_s1 = inlined_call_operand.vmem [shape: bf16[144,16], index: 1, kind: input, shape index: {}]   ;;  %s1140_s2 = inlined_call_operand.vmem [shape: bf16[1024,16], index: 2, kind: output, shape index: {0}]   ;;  %s1141_s3 = inlined_call_operand.vmem [shape: f32[8,1,16], index: 3, kind: output, shape index: {1}]   ;;  %s1142_s4 = inlined_call_operand.vmem [shape: f32[8,1,16], index: 4, kind: output, shape index: {2}]  }
   0x1 LB: > { %s939_s16 = sadd.s32 4294967295, %s906_s15   ;;  %p741_p0 = scmp.ge.s32.totalorder %s906_s15, 1  ;;  %s906_s15 = sphi %s933_s15, %s15_s15  }
   0x2   : > { %p169_p1 = scmp.lt.s32.totalorder %s906_s15, 9 }
   0x4   : > { %p170_p2 = pnand %p741_p0, %p169_p1 }
   0x5   : > { %s742_s21 = sshll.u32 (!%p170_p2), %s939_s16, 4  ;;  %p215_p4 = scmp.lt.s32.totalorder (!%p170_p2), %s939_s16, 7 }
   0x6   : > { %173 = sbr.rel (%p170_p2) target bundleno = 261 (0x105), region = 28  ;;  %p203_p3 = scmp.lt.s32.totalorder (!%p170_p2), %s742_s21, 127 }
   0xb   : > { %v881_v0 = vld [vmem:[%s1139_s1 + $0x38] sm:$0xff]  ;;  %v882_v1 = vld [vmem:[%s1139_s1 + $0x40] sm:$0xff]  ;;  %v880_v2 = vld [vmem:[%s1139_s1 + $0x30] sm:$0xff]  ;;  %s1144_s21 = smov (!%p203_p3, %s742_s21), 127  ;;  %vm382_vm0 = vcmask 130048   ;;  %vm521_vm1 = vcmask 125952  }
   0xc   : > { %407 = vmatpush.bf16.msra.mxu0 %v881_v0  ;;  %883 = vmatpush.bf16.msra.mxu2 %v881_v0  ;;  %s857_s24 = sshll.u32 %s1144_s21, 3  ;;  %v879_v3 = vld [vmem:[%s1139_s1 + $0x28] sm:$0xff]  ;;  %v878_v7 = vld [vmem:[%s1139_s1 + $0x20] sm:$0xff]  ;;  %v877_v8 = vld [vmem:[%s1139_s1 + $0x18] sm:$0xff]  ;;  %s746_s14 = sshll.u32 %s1144_s21, 2  ;;  %vm575_vm2 = vcmask 122880  }
   0xd   : > { %463 = vmatpush.bf16.msra.mxu1 %v882_v1  ;;  %891 = vmatpush.bf16.msra.mxu3 %v882_v1  ;;  %s959_s27 = scalar_lea.vmem %s1138_s0, %s857_s24  ;;  %v876_v11 = vld [vmem:[%s1139_s1 + $0x10] sm:$0xff]  ;;  %v875_v16 = vld [vmem:[%s1139_s1 + $0x8] sm:$0xff]  ;;  %v874_v17 = vld [vmem:[%s1139_s1] sm:$0xff]  ;;  %s1023_s19 = scalar_lea.vmem %s1140_s2, %s746_s14 }
   0xe   : > { %v858_v4 = vld [vmem:[%s959_s27 + $0x4] sm:$0xf]  ;;  %v751_v5 = vld [vmem:[%s959_s27 + $0x8] sm:$0xf0]  ;;  %v868_v9 = vld [vmem:[%s959_s27 + $0x54] sm:$0xf] }
   0xf   : > { %v754_v6 = vor.u32 %v858_v4, %v751_v5  ;;  %v791_v10 = vld [vmem:[%s959_s27 + $0x58] sm:$0xf0]  ;;  %v860_v13 = vld [vmem:[%s959_s27 + $0x14] sm:$0xf]  ;;  %v749_v18 = vld [vmem:[%s959_s27] sm:$0xf] }
  0x10   : > { %408 = vmatpush.bf16.msra.mxu0 %v880_v2  ;;  %884 = vmatpush.bf16.msra.mxu2 %v880_v2  ;;  %v794_v12 = vor.u32 %v868_v9, %v791_v10  ;;  %v759_v14 = vld [vmem:[%s959_s27 + $0x18] sm:$0xf0]  ;;  %v859_v19 = vld [vmem:[%s959_s27 + $0x4] sm:$0xf0]  ;;  %v781_v20 = vld [vmem:[%s959_s27 + $0x40] sm:$0xf] }
  0x11   : > { %847 = vmatmul.msk.bf16.vlgmr.msra.gmra.mxu1 %vm382_vm0, %v754_v6  ;;  %v762_v15 = vor.u32 %v860_v13, %v759_v14  ;;  %v867_v21 = vld [vmem:[%s959_s27 + $0x44] sm:$0xf0]  ;;  %v750_v22 = vor.u32 %v859_v19, %v749_v18  ;;  %v870_v24 = vld [vmem:[%s959_s27 + $0x64] sm:$0xf]  ;;  %v799_v25 = vld [vmem:[%s959_s27 + $0x68] sm:$0xf0] }
  0x12   : > { %852 = vmatmul.msk.bf16.vlgmr.msra.gmra.mxu3 %vm382_vm0, %v794_v12  ;;  %v782_v23 = vor.u32 %v867_v21, %v781_v20  ;;  %v802_v26 = vor.u32 %v870_v24, %v799_v25  ;;  %v862_v27 = vld [vmem:[%s959_s27 + $0x24] sm:$0xf]  ;;  %v767_v28 = vld [vmem:[%s959_s27 + $0x28] sm:$0xf0]  ;;  %v757_v30 = vld [vmem:[%s959_s27 + $0x10] sm:$0xf] }
  0x13   : > { %v770_v29 = vor.u32 %v862_v27, %v767_v28  ;;  %v861_v31 = vld [vmem:[%s959_s27 + $0x14] sm:$0xf0]  ;;  %v789_v32 = vld [vmem:[%s959_s27 + $0x50] sm:$0xf]  ;;  %v872_v36 = vld [vmem:[%s959_s27 + $0x74] sm:$0xf] }
  0x14   : > { %409 = vmatpush.bf16.msra.mxu0 %v879_v3  ;;  %885 = vmatpush.bf16.msra.mxu2 %v879_v3  ;;  %v869_v33 = vld [vmem:[%s959_s27 + $0x54] sm:$0xf0]  ;;  %v758_v34 = vor.u32 %v861_v31, %v757_v30  ;;  %v807_v37 = vld [vmem:[%s959_s27 + $0x78] sm:$0xf0]  ;;  %v864_v39 = vld [vmem:[%s959_s27 + $0x34] sm:$0xf] }
  0x15   : > { %v790_v35 = vor.u32 %v869_v33, %v789_v32  ;;  %v810_v38 = vor.u32 %v872_v36, %v807_v37  ;;  %v775_v40 = vld [vmem:[%s959_s27 + $0x38] sm:$0xf0]  ;;  %v765_v42 = vld [vmem:[%s959_s27 + $0x20] sm:$0xf]  ;;  %v863_v43 = vld [vmem:[%s959_s27 + $0x24] sm:$0xf0] }
  0x16   : > { %v778_v41 = vor.u32 %v864_v39, %v775_v40  ;;  %v797_v44 = vld [vmem:[%s959_s27 + $0x60] sm:$0xf]  ;;  %v871_v45 = vld [vmem:[%s959_s27 + $0x64] sm:$0xf0]  ;;  %v766_v46 = vor.u32 %v863_v43, %v765_v42  ;;  %v866_v48 = vld [vmem:[%s959_s27 + $0x44] sm:$0xf] }
  0x17   : > { %v798_v47 = vor.u32 %v871_v45, %v797_v44  ;;  %v783_v49 = vld [vmem:[%s959_s27 + $0x48] sm:$0xf0]  ;;  %v773_v51 = vld [vmem:[%s959_s27 + $0x30] sm:$0xf]  ;;  %v865_v52 = vld [vmem:[%s959_s27 + $0x34] sm:$0xf0] }
  0x18   : > { %410 = vmatpush.bf16.msra.mxu0 %v878_v7  ;;  %886 = vmatpush.bf16.msra.mxu2 %v878_v7  ;;  %v786_v50 = vor.u32 %v866_v48, %v783_v49  ;;  %v805_v53 = vld [vmem:[%s959_s27 + $0x70] sm:$0xf]  ;;  %v873_v54 = vld [vmem:[%s959_s27 + $0x74] sm:$0xf0]  ;;  %v774_v55 = vor.u32 %v865_v52, %v773_v51  ;;  %s1146_s16 = smov (!%p215_p4, %s939_s16), 7 }
  0x19   : > { %v806_v56 = vor.u32 %v873_v54, %v805_v53  ;;  %s217_s22 = scalar_lea.vmem %s1141_s3, %s1146_s16  ;;  %s220_s25 = scalar_lea.vmem %s1142_s4, %s1146_s16 }
  0x1c   : > { %411 = vmatpush.bf16.msra.mxu0 %v877_v8  ;;  %887 = vmatpush.bf16.msra.mxu2 %v877_v8 }
  0x20   : > { %412 = vmatpush.bf16.msra.mxu0 %v876_v11  ;;  %888 = vmatpush.bf16.msra.mxu2 %v876_v11 }
  0x21   : > { %848 = vmatmul.msk.bf16.gmra.mxu1 %vm382_vm0, %v762_v15 }
  0x22   : > { %853 = vmatmul.msk.bf16.gmra.mxu3 %vm382_vm0, %v802_v26 }
  0x24   : > { %413 = vmatpush.bf16.msra.mxu0 %v875_v16  ;;  %889 = vmatpush.bf16.msra.mxu2 %v875_v16 }
  0x28   : > { %414 = vmatpush.bf16.msra.mxu0 %v874_v17  ;;  %890 = vmatpush.bf16.msra.mxu2 %v874_v17 }
  0x2b   : > { %415 = vmatmul.bf16.vlgmr.msra.gmra.mxu0 %v750_v22  ;;  %435 = vmatmul.bf16.vlgmr.msra.gmra.mxu2 %v782_v23 }
  0x31   : > { %849 = vmatmul.msk.bf16.gmra.mxu1 %vm382_vm0, %v770_v29 }
  0x32   : > { %854 = vmatmul.msk.bf16.gmra.mxu3 %vm382_vm0, %v810_v38 }
  0x3b   : > { %420 = vmatmul.bf16.gmra.mxu0 %v758_v34  ;;  %440 = vmatmul.bf16.gmra.mxu2 %v790_v35 }
  0x41   : > { %850 = vmatmul.msk.bf16.gmra.mxu1 %vm382_vm0, %v778_v41 }
  0x4b   : > { %425 = vmatmul.bf16.gmra.mxu0 %v766_v46  ;;  %445 = vmatmul.bf16.gmra.mxu2 %v798_v47 }
  0x51   : > { %851 = vmatmul.msk.bf16.gmra.mxu1 %vm382_vm0, %v786_v50 }
  0x5b   : > { %430 = vmatmul.bf16.gmra.mxu0 %v774_v55  ;;  %450 = vmatmul.bf16.gmra.mxu2 %v806_v56 }
  0x8e   : > { %v465_v57 = vpop.f32.mrf.mxu1 }
  0x95   : > { %v490_v5 = vpop.f32.mrf.mxu3 }
  0x96   : > { %v467_v58 = vpop.f32.mrf.mxu1 }
  0x9d   : > { %v492_v11 = vpop.f32.mrf.mxu3 }
  0x9e   : > { %v470_v59 = vpop.f32.mrf.mxu1 }
  0xa5   : > { %v495_v20 = vpop.f32.mrf.mxu3 }
  0xa6   : > { %v472_v62 = vpop.f32.mrf.mxu1 }
  0xa8   : > { %v416_v60 = vpop.f32.mrf.mxu0 }
  0xa9   : > { %v466_v61 = vadd.f32 %v465_v57, %v416_v60 }
  0xab   : > { %v505_v63 = vpack.c.bf16 %v466_v61, %v466_v61  ;;  %v577_v37 = vmul.f32 %v466_v61, %v466_v61  ;;  %v538_v41 = vsel %vm382_vm0, %v466_v61, 0.0 }
  0xad   : > { %522 = vst.msk [vmem:[%s1023_s19] sm:$0xf] %vm521_vm1, %v505_v63  ;;  %v497_v32 = vpop.f32.mrf.mxu3  ;;  %v593_v46 = vsel %vm382_vm0, %v577_v37, 0.0 }
  0xae   : > { %v436_v0 = vpop.f32.mrf.mxu2  ;;  %v475_v3 = vpop.f32.mrf.mxu1 }
  0xb0   : > { %v418_v1 = vpop.f32.mrf.mxu0 }
  0xb1   : > { %v468_v2 = vadd.f32 %v467_v58, %v418_v1 }
  0xb3   : > { %v506_v4 = vpack.c.bf16 %v468_v2, %v468_v2  ;;  %v578_v35 = vmul.f32 %v468_v2, %v468_v2  ;;  %v539_v39 = vsel %vm382_vm0, %v468_v2, 0.0 }
  0xb4   : > { %v540_v47 = vadd.f32 %v539_v39, %v538_v41 }
  0xb5   : > { %523 = vst.msk [vmem:[%s1023_s19 + $0x4] sm:$0xf] %vm521_vm1, %v506_v4  ;;  %v594_v42 = vsel %vm382_vm0, %v578_v35, 0.0  ;;  %v500_v63 = vpop.f32.mrf.mxu3 }
  0xb6   : > { %v438_v6 = vpop.f32.mrf.mxu2  ;;  %v477_v9 = vpop.f32.mrf.mxu1  ;;  %v595_v55 = vadd.f32 %v594_v42, %v593_v46 }
  0xb8   : > { %v421_v7 = vpop.f32.mrf.mxu0 }
  0xb9   : > { %v471_v8 = vadd.f32 %v470_v59, %v421_v7 }
  0xbb   : > { %v507_v10 = vpack.c.bf16 %v471_v8, %v471_v8  ;;  %v579_v40 = vmul.f32 %v471_v8, %v471_v8  ;;  %v541_v43 = vsel %vm382_vm0, %v471_v8, 0.0 }
  0xbc   : > { %v542_v56 = vadd.f32 %v541_v43, %v540_v47 }
  0xbd   : > { %524 = vst.msk [vmem:[%s1023_s19 + $0x8] sm:$0xf] %vm521_vm1, %v507_v10  ;;  %v596_v50 = vsel %vm382_vm0, %v579_v40, 0.0 }
  0xbe   : > { %v441_v12 = vpop.f32.mrf.mxu2  ;;  %v480_v16 = vpop.f32.mrf.mxu1 }
  0xbf   : > { %v1031_v14 = vadd.f32 %v490_v5, %v441_v12 }
  0xc0   : > { %v423_v13 = vpop.f32.mrf.mxu0 }
  0xc1   : > { %v473_v15 = vadd.f32 %v472_v62, %v423_v13  ;;  %v515_v17 = vpack.c.bf16 %v1031_v14, %v1031_v14  ;;  %v557_v42 = vsel %vm382_vm0, %v1031_v14, 0.0 }
  0xc3   : > { %v508_v18 = vpack.c.bf16 %v473_v15, %v473_v15  ;;  %532 = vst.msk [vmem:[%s1023_s19 + $0x28] sm:$0xf] %vm521_vm1, %v515_v17  ;;  %v580_v44 = vmul.f32 %v473_v15, %v473_v15  ;;  %v543_v51 = vsel %vm382_vm0, %v473_v15, 0.0 }
  0xc4   : > { %v544_v1 = vadd.f32 %v543_v51, %v542_v56 }
  0xc5   : > { %525 = vst.msk [vmem:[%s1023_s19 + $0xc] sm:$0xf] %vm521_vm1, %v508_v18  ;;  %v598_v59 = vsel %vm382_vm0, %v580_v44, 0.0 }
  0xc6   : > { %v443_v19 = vpop.f32.mrf.mxu2  ;;  %v1041_v24 = vpop.f32.mrf.mxu1 }
  0xc7   : > { %v1039_v22 = vadd.f32 %v492_v11, %v443_v19 }
  0xc8   : > { %v426_v21 = vpop.f32.mrf.mxu0 }
  0xc9   : > { %v476_v23 = vadd.f32 %v475_v3, %v426_v21  ;;  %v516_v25 = vpack.c.bf16 %v1039_v22, %v1039_v22  ;;  %v588_v43 = vmul.f32 %v1039_v22, %v1039_v22 }
  0xcb   : > { %v509_v26 = vpack.c.bf16 %v476_v23, %v476_v23  ;;  %533 = vst.msk [vmem:[%s1023_s19 + $0x2c] sm:$0xf] %vm521_vm1, %v516_v25  ;;  %v581_v52 = vmul.f32 %v476_v23, %v476_v23  ;;  %v545_v60 = vsel %vm382_vm0, %v476_v23, 0.0 }
  0xcc   : > { %v546_v7 = vadd.f32 %v545_v60, %v544_v1 }
  0xcd   : > { %526 = vst.msk [vmem:[%s1023_s19 + $0x10] sm:$0xf] %vm521_vm1, %v509_v26  ;;  %v600_v3 = vsel %vm382_vm0, %v581_v52, 0.0 }
  0xce   : > { %v446_v27 = vpop.f32.mrf.mxu2  ;;  %v485_v31 = vpop.f32.mrf.mxu1 }
  0xcf   : > { %v1049_v29 = vadd.f32 %v495_v20, %v446_v27  ;;  %v1051_v33 = vadd.f32 %v485_v31, %v436_v0  ;;  %v597_v0 = vadd.f32 %v596_v50, %v595_v55  ;;  %v559_v50 = vsel %vm382_vm0, %v1039_v22, 0.0 }
  0xd0   : > { %v428_v28 = vpop.f32.mrf.mxu0 }
  0xd1   : > { %v478_v30 = vadd.f32 %v477_v9, %v428_v28  ;;  %v517_v34 = vpack.c.bf16 %v1049_v29, %v1049_v29  ;;  %v513_v38 = vpack.c.bf16 %v1051_v33, %v1051_v33  ;;  %v585_v21 = vmul.f32 %v1051_v33, %v1051_v33 }
  0xd2   : > { %v589_v51 = vmul.f32 %v1049_v29, %v1049_v29 }
  0xd3   : > { %v510_v36 = vpack.c.bf16 %v478_v30, %v478_v30  ;;  %534 = vst.msk [vmem:[%s1023_s19 + $0x30] sm:$0xf] %vm521_vm1, %v517_v34  ;;  %v582_v61 = vmul.f32 %v478_v30, %v478_v30  ;;  %v547_v4 = vsel %vm382_vm0, %v478_v30, 0.0  ;;  %v553_v30 = vsel %vm382_vm0, %v1051_v33, 0.0 }
  0xd4   : > { %530 = vst.msk [vmem:[%s1023_s19 + $0x20] sm:$0xf] %vm521_vm1, %v513_v38  ;;  %v548_v12 = vadd.f32 %v547_v4, %v546_v7  ;;  %v608_v37 = vsel %vm382_vm0, %v585_v21, 0.0 }
  0xd5   : > { %527 = vst.msk [vmem:[%s1023_s19 + $0x14] sm:$0xf] %vm521_vm1, %v510_v36  ;;  %v602_v8 = vsel %vm382_vm0, %v582_v61, 0.0  ;;  %v587_v36 = vmul.f32 %v1031_v14, %v1031_v14  ;;  %v614_v14 = vsel %vm382_vm0, %v588_v43, 0.0 }
  0xd6   : > { %v448_v45 = vpop.f32.mrf.mxu2  ;;  %v487_v54 = vpop.f32.mrf.mxu1 }
  0xd7   : > { %v1068_v49 = vadd.f32 %v497_v32, %v448_v45  ;;  %v488_v57 = vadd.f32 %v487_v54, %v438_v6  ;;  %v599_v6 = vadd.f32 %v598_v59, %v597_v0  ;;  %v502_v32 = vpop.f32.mrf.mxu3  ;;  %v561_v54 = vsel %vm382_vm0, %v1049_v29, 0.0 }
  0xd8   : > { %v431_v48 = vpop.f32.mrf.mxu0 }
  0xd9   : > { %v481_v53 = vadd.f32 %v480_v16, %v431_v48  ;;  %v518_v58 = vpack.c.bf16 %v1068_v49, %v1068_v49  ;;  %v514_v2 = vpack.c.bf16 %v488_v57, %v488_v57  ;;  %v601_v11 = vadd.f32 %v600_v3, %v599_v6 }
  0xda   : > { %v586_v31 = vmul.f32 %v488_v57, %v488_v57  ;;  %v555_v38 = vsel %vm382_vm0, %v488_v57, 0.0  ;;  %v612_v48 = vsel %vm382_vm0, %v587_v36, 0.0  ;;  %v590_v55 = vmul.f32 %v1068_v49, %v1068_v49 }
  0xdb   : > { %v511_v62 = vpack.c.bf16 %v481_v53, %v481_v53  ;;  %535 = vst.msk [vmem:[%s1023_s19 + $0x34] sm:$0xf] %vm521_vm1, %v518_v58  ;;  %v583_v5 = vmul.f32 %v481_v53, %v481_v53  ;;  %v549_v9 = vsel %vm382_vm0, %v481_v53, 0.0  ;;  %v603_v18 = vadd.f32 %v602_v8, %v601_v11 }
  0xdc   : > { %531 = vst.msk [vmem:[%s1023_s19 + $0x24] sm:$0xf] %vm521_vm1, %v514_v2  ;;  %v550_v19 = vadd.f32 %v549_v9, %v548_v12  ;;  %v610_v44 = vsel %vm382_vm0, %v586_v31, 0.0  ;;  %v616_v58 = vsel %vm382_vm0, %v589_v51, 0.0  ;;  %v563_v22 = vsel %vm382_vm0, %v1068_v49, 0.0 }
  0xdd   : > { %528 = vst.msk [vmem:[%s1023_s19 + $0x18] sm:$0xf] %vm521_vm1, %v511_v62  ;;  %v604_v16 = vsel %vm382_vm0, %v583_v5, 0.0  ;;  %v618_v62 = vsel %vm382_vm0, %v590_v55, 0.0 }
  0xde   : > { %v451_v10 = vpop.f32.mrf.mxu2  ;;  %v605_v27 = vadd.f32 %v604_v16, %v603_v18 }
  0xdf   : > { %v501_v15 = vadd.f32 %v500_v63, %v451_v10 }
  0xe0   : > { %v433_v13 = vpop.f32.mrf.mxu0 }
  0xe1   : > { %v483_v17 = vadd.f32 %v1041_v24, %v433_v13  ;;  %v519_v20 = vpack.c.bf16 %v501_v15, %v501_v15  ;;  %v591_v59 = vmul.f32 %v501_v15, %v501_v15  ;;  %v565_v63 = vsel %vm382_vm0, %v501_v15, 0.0 }
  0xe3   : > { %v512_v23 = vpack.c.bf16 %v483_v17, %v483_v17  ;;  %v551_v25 = vsel %vm382_vm0, %v483_v17, 0.0  ;;  %v584_v26 = vmul.f32 %v483_v17, %v483_v17  ;;  %536 = vst.msk [vmem:[%s1023_s19 + $0x38] sm:$0xf] %vm521_vm1, %v519_v20  ;;  %v620_v2 = vsel %vm382_vm0, %v591_v59, 0.0 }
  0xe4   : > { %v552_v28 = vadd.f32 %v551_v25, %v550_v19 }
  0xe5   : > { %529 = vst.msk [vmem:[%s1023_s19 + $0x1c] sm:$0xf] %vm521_vm1, %v512_v23  ;;  %v606_v24 = vsel %vm382_vm0, %v584_v26, 0.0 }
  0xe6   : > { %v554_v34 = vadd.f32 %v553_v30, %v552_v28  ;;  %v607_v35 = vadd.f32 %v606_v24, %v605_v27  ;;  %v453_v39 = vpop.f32.mrf.mxu2 }
  0xe7   : > { %v503_v33 = vadd.f32 %v502_v32, %v453_v39 }
  0xe8   : > { %v556_v40 = vadd.f32 %v555_v38, %v554_v34  ;;  %v609_v41 = vadd.f32 %v608_v37, %v607_v35 }
  0xe9   : > { %v520_v47 = vpack.c.bf16 %v503_v33, %v503_v33  ;;  %v592_v29 = vmul.f32 %v503_v33, %v503_v33  ;;  %v567_v3 = vsel %vm382_vm0, %v503_v33, 0.0 }
  0xea   : > { %v558_v45 = vadd.f32 %v557_v42, %v556_v40  ;;  %v611_v46 = vadd.f32 %v610_v44, %v609_v41 }
  0xeb   : > { %537 = vst.msk [vmem:[%s1023_s19 + $0x3c] sm:$0xf] %vm521_vm1, %v520_v47  ;;  %v622_v49 = vsel %vm382_vm0, %v592_v29, 0.0 }
  0xec   : > { %v613_v52 = vadd.f32 %v612_v48, %v611_v46  ;;  %v560_v53 = vadd.f32 %v559_v50, %v558_v45 }
  0xee   : > { %v562_v56 = vadd.f32 %v561_v54, %v560_v53  ;;  %v615_v57 = vadd.f32 %v614_v14, %v613_v52 }
  0xf0   : > { %v564_v60 = vadd.f32 %v563_v22, %v562_v56  ;;  %v617_v61 = vadd.f32 %v616_v58, %v615_v57 }
  0xf2   : > { %v566_v0 = vadd.f32 %v565_v63, %v564_v60  ;;  %v619_v1 = vadd.f32 %v618_v62, %v617_v61 }
  0xf4   : > { %v621_v4 = vadd.f32 %v620_v2, %v619_v1  ;;  %v568_v5 = vadd.f32 %v567_v3, %v566_v0 }
  0xf6   : > { %v569_v6 = vrot.slane %v568_v5, 4  ;;  %v623_v7 = vadd.f32 %v622_v49, %v621_v4 }
  0xf8   : > { %v570_v8 = vadd.f32 %v569_v6, %v568_v5  ;;  %v624_v9 = vrot.slane %v623_v7, 4 }
  0xfa   : > { %v571_v10 = vrot.slane %v570_v8, 2  ;;  %v625_v11 = vadd.f32 %v624_v9, %v623_v7 }
  0xfc   : > { %v572_v12 = vadd.f32 %v571_v10, %v570_v8  ;;  %v626_v13 = vrot.slane %v625_v11, 2 }
  0xfe   : > { %v573_v15 = vrot.slane %v572_v12, 1  ;;  %v627_v16 = vadd.f32 %v626_v13, %v625_v11 }
 0x100   : > { %v574_v17 = vadd.f32 %v573_v15, %v572_v12  ;;  %v628_v18 = vrot.slane %v627_v16, 1 }
 0x102   : > { %576 = vst.msk [vmem:[%s217_s22] sm:$0x1] %vm575_vm2, %v574_v17  ;;  %v629_v19 = vadd.f32 %v628_v18, %v627_v16 }
 0x104   : > { %630 = vst.msk [vmem:[%s220_s25] sm:$0x1] %vm575_vm2, %v629_v19 }
 0x105 PF: > { %s15_s15 = sadd.s32 1, %s906_s15  }
 0x106   : > { %p12_p5 = scmp.ge.s32.totalorder %s15_s15, 10  }
 0x108   :  { %14 = sbr.rel (!%p12_p5) target bundleno = 1 (0x1), region = 82 }

// kernel: tile.142
= control target key start
LH: loop header
LB: loop body
LE: loop exit
PB: predicated region body
PF: predicated region fallthrough
CT: control target
= control target key end

     0   :  { %s38_s0 = inlined_call_operand.<no memory space> [shape: f32[], index: 0, kind: input, shape index: {}]   ;;  %s39_s1 = inlined_call_operand.vmem [shape: f32[1,512], index: 1, kind: output, shape index: {}]  }
   0x1   :  { %v2_v0 = vstv %s38_s0 }
   0x2   :  { %3 = vst [vmem:[%s39_s1] sm:$0x1] %v2_v0 }
   0x3   :  { %10 = vst [vmem:[%s39_s1 + $0x1] sm:$0x1] %v2_v0 }
   0x4   :  { %11 = vst [vmem:[%s39_s1 + $0x2] sm:$0x1] %v2_v0 }
   0x5   :  { %12 = vst [vmem:[%s39_s1 + $0x3] sm:$0x1] %v2_v0 }

// kernel: audio_encoder_forward.26
= control target key start
LH: loop header
LB: loop body
LE: loop exit
PB: predicated region body
PF: predicated region fallthrough
CT: control target
= control target key end

     0   :  { %s725_s24 = smov 0   ;;  %s727_s25 = smov 0   ;;  %s799_s0 = inlined_call_operand.vmem [shape: bf16[2,16,512], index: 0, kind: input, shape index: {}]   ;;  %s800_s1 = inlined_call_operand.vmem [shape: bf16[2,16,512], index: 1, kind: input, shape index: {}]   ;;  %s801_s2 = inlined_call_operand.vmem [shape: f32[1,512], index: 2, kind: input, shape index: {}]   ;;  %s802_s3 = inlined_call_operand.vmem [shape: f32[1,512], index: 3, kind: input, shape index: {}]   ;;  %s803_s4 = inlined_call_operand.vmem [shape: f32[2,1,512], index: 4, kind: input, shape index: {}]   ;;  %s804_s5 = inlined_call_operand.vmem [shape: f32[1,512], index: 5, kind: input, shape index: {}]   ;;  %s805_s6 = inlined_call_operand.vmem [shape: f32[1,512], index: 6, kind: input, shape index: {}]   ;;  %s806_s7 = inlined_call_operand.vmem [shape: bf16[2,16,512], index: 7, kind: output, shape index: {}]  }
   0x1   :  { %s729_s26 = smov 0   ;;  %s731_s27 = smov 0  }
   0x2   :  { %s733_s28 = smov 0  }
   0x3 LB: > { %s26_s29 = sadd.s32 1, %s675_s26  ;;  %s29_s30 = sadd.s32 1, %s679_s27  ;;  %s683_s28 = sphi %s733_s28, %s17_s28   ;;  %s679_s27 = sphi %s731_s27, %s810_s27   ;;  %s675_s26 = sphi %s729_s26, %s809_s26   ;;  %s671_s25 = sphi %s727_s25, %s808_s25   ;;  %s667_s24 = sphi %s725_s24, %s807_s24  }
   0x4   : > { %p27_p0 = scmp.ge.s32.totalorder %s26_s29, 2  ;;  %p592_p1 = scmp.ge.s32.totalorder %s683_s28, 1 }
   0x5   : > { %p282_p2 = scmp.lt.s32.totalorder %s683_s28, 5 }
   0x6   : > { %s812_s29 = smov (%p27_p0, %s26_s29), 0  ;;  %s814_s30 = smov (!%p27_p0, %s29_s30), %s679_s27 }
   0x7   : > { %p283_p3 = pnand %p592_p1, %p282_p2  ;;  %p31_p4 = scmp.ge.s32.totalorder %s814_s30, 2 }
   0x8   : > { %p335_p5 = scmp.lt.s32.totalorder (!%p283_p3), %s671_s25, 1  ;;  %p337_p6 = scmp.lt.s32.totalorder (!%p283_p3), %s667_s24, 1 }
   0x9   : > { %s816_s30 = smov (%p31_p4, %s814_s30), 0  ;;  %286 = sbr.rel (%p283_p3) target bundleno = 37 (0x25), region = 48 }
   0xe   : > { %v372_v0 = vld [vmem:[%s801_s2] sm:$0xf]  ;;  %s818_s25 = smov (!%p335_p5, %s671_s25), 1  ;;  %s820_s24 = smov (!%p337_p6, %s667_s24), 1 }
   0xf   : > { %v386_v1 = vld [vmem:[%s802_s3] sm:$0xf]  ;;  %s594_s14 = sshll.u32 %s818_s25, 3  ;;  %s599_s15 = sshll.u32 %s818_s25, 2  ;;  %v374_v3 = vperm.slane %v372_v0, 0  ;;  %v375_v5 = vperm.slane %v372_v0, 1 }
  0x10   : > { %v406_v2 = vld [vmem:[%s804_s5] sm:$0xf]  ;;  %s593_s18 = sshll.u32 %s820_s24, 2  ;;  %s356_s21 = scalar_lea.vmem %s803_s4, %s599_s15  ;;  %v376_v6 = vperm.slane %v372_v0, 2  ;;  %v377_v7 = vperm.slane %v372_v0, 3  ;;  %v388_v8 = vperm.slane %v386_v1, 0 }
  0x11   : > { %v420_v4 = vld [vmem:[%s805_s6] sm:$0xf]  ;;  %s341_s22 = sadd.s32 %s594_s14, %s593_s18  ;;  %v389_v9 = vperm.slane %v386_v1, 1  ;;  %v408_v10 = vperm.slane %v406_v2, 0  ;;  %v409_v11 = vperm.slane %v406_v2, 1  ;;  %v390_v13 = vperm.slane %v386_v1, 2 }
  0x12   : > { %v434_v12 = vld [vmem:[%s356_s21] sm:$0xf]  ;;  %s770_s23 = sshll.u32 %s341_s22, 2  ;;  %v422_v14 = vperm.slane %v420_v4, 0  ;;  %v423_v15 = vperm.slane %v420_v4, 1  ;;  %v391_v16 = vperm.slane %v386_v1, 3 }
  0x13   : > { %v410_v17 = vperm.slane %v406_v2, 2  ;;  %s343_s8 = scalar_lea.vmem %s799_s0, %s770_s23  ;;  %s352_s11 = scalar_lea.vmem %s800_s1, %s770_s23  ;;  %v436_v18 = vperm.slane %v434_v12, 0  ;;  %v411_v19 = vperm.slane %v406_v2, 3  ;;  %v424_v20 = vperm.slane %v420_v4, 2 }
  0x14   : > { %v425_v21 = vperm.slane %v420_v4, 3  ;;  %v366_v22 = vld [vmem:[%s343_s8] sm:$0xff]  ;;  %v367_v23 = vld [vmem:[%s343_s8 + $0x8] sm:$0xff]  ;;  %v437_v25 = vperm.slane %v434_v12, 1  ;;  %v438_v26 = vperm.slane %v434_v12, 2  ;;  %v439_v27 = vperm.slane %v434_v12, 3  ;;  %s365_s14 = scalar_lea.vmem %s806_s7, %s770_s23 }
  0x15   : > { %v400_v24 = vld [vmem:[%s352_s11] sm:$0xff]  ;;  %v368_v28 = vunpack.c.l.bf16 %v366_v22  ;;  %v369_v29 = vunpack.c.h.bf16 %v366_v22  ;;  %v370_v30 = vunpack.c.l.bf16 %v367_v23  ;;  %v371_v31 = vunpack.c.h.bf16 %v367_v23  ;;  %v401_v32 = vld [vmem:[%s352_s11 + $0x8] sm:$0xff] }
  0x16   : > { %v402_v33 = vunpack.c.l.bf16 %v400_v24  ;;  %v403_v34 = vunpack.c.h.bf16 %v400_v24  ;;  %v404_v35 = vunpack.c.l.bf16 %v401_v32  ;;  %v405_v36 = vunpack.c.h.bf16 %v401_v32 }
  0x17   : > { %v382_v37 = vmul.f32 %v374_v3, %v368_v28  ;;  %v383_v38 = vmul.f32 %v375_v5, %v369_v29  ;;  %v384_v39 = vmul.f32 %v376_v6, %v370_v30  ;;  %v385_v40 = vmul.f32 %v377_v7, %v371_v31 }
  0x18   : > { %v416_v41 = vmul.f32 %v408_v10, %v402_v33  ;;  %v417_v42 = vmul.f32 %v409_v11, %v403_v34  ;;  %v418_v43 = vmul.f32 %v410_v17, %v404_v35  ;;  %v419_v44 = vmul.f32 %v411_v19, %v405_v36 }
  0x19   : > { %v396_v45 = vadd.f32 %v388_v8, %v382_v37  ;;  %v397_v46 = vadd.f32 %v389_v9, %v383_v38  ;;  %v398_v47 = vadd.f32 %v390_v13, %v384_v39  ;;  %v399_v48 = vadd.f32 %v391_v16, %v385_v40 }
  0x1a   : > { %v430_v49 = vadd.f32 %v422_v14, %v416_v41  ;;  %v431_v50 = vadd.f32 %v423_v15, %v417_v42  ;;  %v432_v51 = vadd.f32 %v424_v20, %v418_v43  ;;  %v433_v52 = vadd.f32 %v425_v21, %v419_v44 }
  0x1b   : > { %v444_v53 = vmul.f32 %v436_v18, %v396_v45  ;;  %v445_v54 = vmul.f32 %v437_v25, %v397_v46  ;;  %v446_v55 = vmul.f32 %v438_v26, %v398_v47  ;;  %v447_v56 = vmul.f32 %v439_v27, %v399_v48 }
  0x1d   : > { %v448_v57 = vadd.f32 %v444_v53, %v430_v49  ;;  %v449_v58 = vadd.f32 %v445_v54, %v431_v50  ;;  %v450_v59 = vadd.f32 %v446_v55, %v432_v51  ;;  %v451_v60 = vadd.f32 %v447_v56, %v433_v52 }
  0x1f   : > { %v452_v61 = vmax.f32 %v448_v57, 0.0  ;;  %v453_v62 = vmax.f32 %v449_v58, 0.0  ;;  %v454_v63 = vmax.f32 %v450_v59, 0.0  ;;  %v455_v0 = vmax.f32 %v451_v60, 0.0 }
  0x21   : > { %v456_v1 = vpack.c.bf16 %v453_v62, %v452_v61  ;;  %v457_v2 = vpack.c.bf16 %v455_v0, %v454_v63 }
  0x23   : > { %458 = vst [vmem:[%s365_s14] sm:$0xff] %v456_v1 }
  0x24   : > { %459 = vst [vmem:[%s365_s14 + $0x8] sm:$0xff] %v457_v2 }
  0x25 PF: > { %s17_s28 = sadd.s32 1, %s683_s28   ;;  %s807_s24 = smov %s675_s26 }
  0x26   : > { %p14_p7 = scmp.ge.s32.totalorder %s17_s28, 6   ;;  %s808_s25 = smov %s679_s27 }
  0x27   : > { %s809_s26 = smov %s812_s29  ;;  %s810_s27 = smov %s816_s30 }
  0x28   :  { %16 = sbr.rel (!%p14_p7) target bundleno = 3 (0x3), region = 84 }

// kernel: tile.202
= control target key start
LH: loop header
LB: loop body
LE: loop exit
PB: predicated region body
PF: predicated region fallthrough
CT: control target
= control target key end

     0   :  { %s28_s0 = inlined_call_operand.vmem [shape: f32[32], index: 0, kind: input, shape index: {}]   ;;  %s29_s1 = inlined_call_operand.vmem [shape: f32[16,32], index: 1, kind: output, shape index: {}]  }
   0x1   :  { %v4_v0 = vld [vmem:[%s28_s0] ss:$0 sm:$0xff] }
   0x2   :  { %5 = vst [vmem:[%s29_s1] sm:$0xff] %v4_v0 }
   0x3   :  { %8 = vst [vmem:[%s29_s1 + $0x8] sm:$0xff] %v4_v0 }

// kernel: tile.203
= control target key start
LH: loop header
LB: loop body
LE: loop exit
PB: predicated region body
PF: predicated region fallthrough
CT: control target
= control target key end

     0   :  { %s56_s8 = smov 96   ;;  %s57_s11 = smov 32   ;;  %vm3_vm0 = vcmask 261120   ;;  %vm9_vm1 = vcmask 1048320   ;;  %vm15_vm2 = vcmask 785920   ;;  %vm21_vm3 = vcmask 523520   ;;  %s93_s0 = inlined_call_operand.vmem [shape: f32[16,32], index: 0, kind: input, shape index: {}]   ;;  %s94_s1 = inlined_call_operand.vmem [shape: f32[1,512], index: 1, kind: output, shape index: {}]  }
   0x1   :  { %v47_v0 = vld [vmem:[%s93_s0 + $0x3] ss:$4 sm:$0xf]   ;;  %v49_v1 = vld [vmem:[%s93_s0 + $0x1] ss:$4 sm:$0xf]  }
   0x2   :  { %7 = vrot.lane.b32.xlu0 %v47_v0, %s56_s8  ;;  %19 = vrot.lane.b32.xlu1 %v49_v1, %s57_s11  ;;  %v48_v2 = vld [vmem:[%s93_s0 + $0x2] ss:$4 sm:$0xf]   ;;  %s58_s14 = smov 64  }
   0x3   :  { %v2_v3 = vld [vmem:[%s93_s0] ss:$4 sm:$0xf]  }
   0x4   :  { %4 = vst.msk [vmem:[#allocation0] ss:$8 sm:$0xf] %vm3_vm0, %v2_v3  }
   0xa   :  { %13 = vrot.lane.b32.xlu0 %v48_v2, %s58_s14 }
  0x74   :  { %v8_v4 = vpop.permute.xlu0 %7   ;;  %v20_v5 = vpop.permute.xlu1 %19  }
  0x75   :  { %10 = vst.msk [vmem:[#allocation0] ss:$8 sm:$0xf] %vm9_vm1, %v8_v4  }
  0x7c   :  { %v14_v6 = vpop.permute.xlu0 %13  }
  0x7d   :  { %16 = vst.msk [vmem:[#allocation0] ss:$8 sm:$0xf] %vm15_vm2, %v14_v6  }
  0x7e   :  { %22 = vst.msk [vmem:[#allocation0] ss:$8 sm:$0xf] %vm21_vm3, %v20_v5  }
  0x85   :  { %v25_v7 = vld [vmem:[#allocation0] sm:$0x1]  ;;  %v30_v8 = vld [vmem:[#allocation0 + $0x8] sm:$0x1]  ;;  %v36_v9 = vld [vmem:[#allocation0 + $0x10] sm:$0x1] }
  0x86   :  { %28 = vst [vmem:[%s94_s1] sm:$0x1] %v25_v7  ;;  %v42_v10 = vld [vmem:[#allocation0 + $0x18] sm:$0x1] }
  0x87   :  { %50 = vst [vmem:[%s94_s1 + $0x1] sm:$0x1] %v30_v8 }
  0x88   :  { %51 = vst [vmem:[%s94_s1 + $0x2] sm:$0x1] %v36_v9 }
  0x89   :  { %52 = vst [vmem:[%s94_s1 + $0x3] sm:$0x1] %v42_v10 }

// kernel: audio_encoder_forward.30
= control target key start
LH: loop header
LB: loop body
LE: loop exit
PB: predicated region body
PF: predicated region fallthrough
CT: control target
= control target key end

     0   :  { %s486_s15 = smov 0   ;;  %s529_s0 = inlined_call_operand.vmem [shape: bf16[256,16], index: 0, kind: input, shape index: {}]   ;;  %s530_s1 = inlined_call_operand.vmem [shape: bf16[16,32], index: 1, kind: input, shape index: {}]   ;;  %s531_s2 = inlined_call_operand.vmem [shape: bf16[256,32], index: 2, kind: output, shape index: {0}]   ;;  %s532_s3 = inlined_call_operand.vmem [shape: f32[8,1,32], index: 3, kind: output, shape index: {1}]   ;;  %s533_s4 = inlined_call_operand.vmem [shape: f32[8,1,32], index: 4, kind: output, shape index: {2}]  }
   0x1 LB: > { %s492_s16 = sadd.s32 4294967295, %s459_s15   ;;  %p420_p0 = scmp.ge.s32.totalorder %s459_s15, 1  ;;  %s459_s15 = sphi %s486_s15, %s15_s15  }
   0x2   : > { %p168_p1 = scmp.lt.s32.totalorder %s459_s15, 9 }
   0x4   : > { %p169_p2 = pnand %p420_p0, %p168_p1 }
   0x5   : > { %s421_s19 = sshll.u32 (!%p169_p2), %s492_s16, 2  ;;  %p212_p4 = scmp.lt.s32.totalorder (!%p169_p2), %s492_s16, 7 }
   0x6   : > { %172 = sbr.rel (%p169_p2) target bundleno = 171 (0xab), region = 28  ;;  %p201_p3 = scmp.lt.s32.totalorder (!%p169_p2), %s421_s19, 31 }
   0xb   : > { %v443_v0 = vld [vmem:[%s530_s1] sm:$0xff]  ;;  %s535_s19 = smov (!%p201_p3, %s421_s19), 31  ;;  %vm241_vm0 = vcmask 130048   ;;  %vm271_vm1 = vcmask 257024   ;;  %vm276_vm2 = vcmask 261120   ;;  %s537_s16 = smov (!%p212_p4, %s492_s16), 7 }
   0xc   : > { %255 = vmatpush.bf16.msra.mxu0 %v443_v0  ;;  %444 = vmatpush.bf16.msra.mxu1 %v443_v0  ;;  %s422_s20 = sshll.u32 %s535_s19, 2  ;;  %s214_s29 = scalar_lea.vmem %s532_s3, %s537_s16  ;;  %vm290_vm3 = vcmask 253952  }
   0xd   : > { %s204_s23 = scalar_lea.vmem %s529_s0, %s422_s20  ;;  %s210_s26 = scalar_lea.vmem %s531_s2, %s422_s20 }
   0xe   : > { %v441_v1 = vld [vmem:[%s204_s23] sm:$0xff]  ;;  %v442_v2 = vld [vmem:[%s204_s23 + $0x8] sm:$0xff]  ;;  %s217_s6 = scalar_lea.vmem %s533_s4, %s537_s16 }
   0xf   : > { %437 = vmatmul.msk.bf16.vlgmr.msra.gmra.mxu0 %vm241_vm0, %v441_v1  ;;  %438 = vmatmul.msk.bf16.vlgmr.msra.gmra.mxu1 %vm241_vm0, %v442_v2 }
  0x8c   : > { %v257_v3 = vpop.f32.mrf.mxu0  ;;  %v262_v4 = vpop.f32.mrf.mxu1 }
  0x8d   : > { %v267_v5 = vpack.c.bf16 %v257_v3, %v257_v3  ;;  %v269_v6 = vpack.c.bf16 %v262_v4, %v262_v4  ;;  %v292_v7 = vmul.f32 %v257_v3, %v257_v3  ;;  %v277_v8 = vsel %vm276_vm2, %v257_v3, 0.0 }
  0x8e   : > { %v294_v9 = vmul.f32 %v262_v4, %v262_v4  ;;  %v280_v18 = vsel %vm276_vm2, %v262_v4, 0.0 }
  0x8f   : > { %272 = vst.msk [vmem:[%s210_s26] sm:$0xf] %vm271_vm1, %v267_v5  ;;  %v296_v17 = vsel %vm276_vm2, %v292_v7, 0.0 }
  0x90   : > { %274 = vst.msk [vmem:[%s210_s26 + $0x8] sm:$0xf] %vm271_vm1, %v269_v6  ;;  %v299_v23 = vsel %vm276_vm2, %v294_v9, 0.0 }
  0x94   : > { %v259_v10 = vpop.f32.mrf.mxu0  ;;  %v264_v11 = vpop.f32.mrf.mxu1 }
  0x95   : > { %v268_v12 = vpack.c.bf16 %v259_v10, %v259_v10  ;;  %v278_v13 = vsel %vm276_vm2, %v259_v10, 0.0  ;;  %v293_v14 = vmul.f32 %v259_v10, %v259_v10  ;;  %v270_v15 = vpack.c.bf16 %v264_v11, %v264_v11 }
  0x96   : > { %v279_v16 = vadd.f32 %v278_v13, %v277_v8  ;;  %v295_v20 = vmul.f32 %v264_v11, %v264_v11  ;;  %v282_v24 = vsel %vm276_vm2, %v264_v11, 0.0 }
  0x97   : > { %273 = vst.msk [vmem:[%s210_s26 + $0x4] sm:$0xf] %vm271_vm1, %v268_v12  ;;  %v297_v19 = vsel %vm276_vm2, %v293_v14, 0.0 }
  0x98   : > { %v298_v21 = vadd.f32 %v297_v19, %v296_v17  ;;  %275 = vst.msk [vmem:[%s210_s26 + $0xc] sm:$0xf] %vm271_vm1, %v270_v15  ;;  %v281_v22 = vadd.f32 %v280_v18, %v279_v16  ;;  %v301_v27 = vsel %vm276_vm2, %v295_v20, 0.0 }
  0x9a   : > { %v283_v25 = vadd.f32 %v282_v24, %v281_v22  ;;  %v300_v26 = vadd.f32 %v299_v23, %v298_v21 }
  0x9c   : > { %v284_v28 = vrot.slane %v283_v25, 4  ;;  %v302_v29 = vadd.f32 %v301_v27, %v300_v26 }
  0x9e   : > { %v285_v30 = vadd.f32 %v284_v28, %v283_v25  ;;  %v303_v31 = vrot.slane %v302_v29, 4 }
  0xa0   : > { %v286_v32 = vrot.slane %v285_v30, 2  ;;  %v304_v33 = vadd.f32 %v303_v31, %v302_v29 }
  0xa2   : > { %v287_v34 = vadd.f32 %v286_v32, %v285_v30  ;;  %v305_v35 = vrot.slane %v304_v33, 2 }
  0xa4   : > { %v288_v36 = vrot.slane %v287_v34, 1  ;;  %v306_v37 = vadd.f32 %v305_v35, %v304_v33 }
  0xa6   : > { %v289_v38 = vadd.f32 %v288_v36, %v287_v34  ;;  %v307_v39 = vrot.slane %v306_v37, 1 }
  0xa8   : > { %291 = vst.msk [vmem:[%s214_s29] sm:$0x1] %vm290_vm3, %v289_v38  ;;  %v308_v40 = vadd.f32 %v307_v39, %v306_v37 }
  0xaa   : > { %309 = vst.msk [vmem:[%s217_s6] sm:$0x1] %vm290_vm3, %v308_v40 }
  0xab PF: > { %s15_s15 = sadd.s32 1, %s459_s15  }
  0xac   : > { %p12_p5 = scmp.ge.s32.totalorder %s15_s15, 10  }
  0xae   :  { %14 = sbr.rel (!%p12_p5) target bundleno = 1 (0x1), region = 82 }

// kernel: audio_encoder_forward.28
= control target key start
LH: loop header
LB: loop body
LE: loop exit
PB: predicated region body
PF: predicated region fallthrough
CT: control target
= control target key end

     0   :  { %s124_s0 = inlined_call_operand.vmem [shape: bf16[16,512], index: 0, kind: input, shape index: {}]   ;;  %s125_s1 = inlined_call_operand.vmem [shape: f32[1,512], index: 1, kind: input, shape index: {}]   ;;  %s126_s2 = inlined_call_operand.vmem [shape: f32[1,512], index: 2, kind: input, shape index: {}]   ;;  %s127_s3 = inlined_call_operand.vmem [shape: bf16[16,512], index: 3, kind: output, shape index: {}]  }
   0x1   :  { %v14_v0 = vld [vmem:[%s124_s0] sm:$0xff]  ;;  %v15_v7 = vld [vmem:[%s124_s0 + $0x8] sm:$0xff]  ;;  %v16_v8 = vld [vmem:[%s124_s0 + $0x10] sm:$0xff] }
   0x2   :  { %v26_v1 = vld [vmem:[%s125_s1] sm:$0xf]  ;;  %v18_v3 = vunpack.c.l.bf16 %v14_v0  ;;  %v19_v4 = vunpack.c.h.bf16 %v14_v0  ;;  %v20_v11 = vunpack.c.l.bf16 %v15_v7  ;;  %v21_v12 = vunpack.c.h.bf16 %v15_v7  ;;  %v17_v17 = vld [vmem:[%s124_s0 + $0x18] sm:$0xff] }
   0x3   :  { %v44_v2 = vld [vmem:[%s126_s2] sm:$0xf]  ;;  %v28_v5 = vperm.slane %v26_v1, 0  ;;  %v29_v6 = vperm.slane %v26_v1, 1  ;;  %v30_v15 = vperm.slane %v26_v1, 2  ;;  %v31_v16 = vperm.slane %v26_v1, 3 }
   0x4   :  { %v46_v9 = vperm.slane %v44_v2, 0  ;;  %v47_v10 = vperm.slane %v44_v2, 1  ;;  %v48_v18 = vperm.slane %v44_v2, 2  ;;  %v49_v19 = vperm.slane %v44_v2, 3 }
   0x5   :  { %v36_v13 = vmul.f32 %v28_v5, %v18_v3  ;;  %v37_v14 = vmul.f32 %v29_v6, %v19_v4  ;;  %v22_v20 = vunpack.c.l.bf16 %v16_v8  ;;  %v23_v21 = vunpack.c.h.bf16 %v16_v8 }
   0x6   :  { %v38_v24 = vmul.f32 %v30_v15, %v20_v11  ;;  %v39_v25 = vmul.f32 %v31_v16, %v21_v12  ;;  %v24_v28 = vunpack.c.l.bf16 %v17_v17  ;;  %v25_v29 = vunpack.c.h.bf16 %v17_v17 }
   0x7   :  { %v54_v22 = vadd.f32 %v46_v9, %v36_v13  ;;  %v55_v23 = vadd.f32 %v47_v10, %v37_v14  ;;  %v40_v26 = vmul.f32 %v28_v5, %v22_v20  ;;  %v41_v27 = vmul.f32 %v29_v6, %v23_v21 }
   0x8   :  { %v56_v31 = vadd.f32 %v48_v18, %v38_v24  ;;  %v57_v32 = vadd.f32 %v49_v19, %v39_v25  ;;  %v42_v35 = vmul.f32 %v30_v15, %v24_v28  ;;  %v43_v36 = vmul.f32 %v31_v16, %v25_v29 }
   0x9   :  { %v62_v30 = vpack.c.bf16 %v55_v23, %v54_v22  ;;  %v58_v33 = vadd.f32 %v46_v9, %v40_v26  ;;  %v59_v34 = vadd.f32 %v47_v10, %v41_v27 }
   0xa   :  { %v63_v37 = vpack.c.bf16 %v57_v32, %v56_v31  ;;  %v60_v39 = vadd.f32 %v48_v18, %v42_v35  ;;  %v61_v40 = vadd.f32 %v49_v19, %v43_v36 }
   0xb   :  { %66 = vst [vmem:[%s127_s3] sm:$0xff] %v62_v30  ;;  %v64_v38 = vpack.c.bf16 %v59_v34, %v58_v33 }
   0xc   :  { %67 = vst [vmem:[%s127_s3 + $0x8] sm:$0xff] %v63_v37  ;;  %v65_v41 = vpack.c.bf16 %v61_v40, %v60_v39 }
   0xd   :  { %68 = vst [vmem:[%s127_s3 + $0x10] sm:$0xff] %v64_v38 }
   0xe   :  { %69 = vst [vmem:[%s127_s3 + $0x18] sm:$0xff] %v65_v41 }

// kernel: audio_encoder_forward.27
= control target key start
LH: loop header
LB: loop body
LE: loop exit
PB: predicated region body
PF: predicated region fallthrough
CT: control target
= control target key end

     0   :  { %s643_s15 = smov 0   ;;  %s722_s0 = inlined_call_operand.vmem [shape: bf16[256,144], index: 0, kind: input, shape index: {}]   ;;  %s723_s1 = inlined_call_operand.vmem [shape: bf16[144,32], index: 1, kind: input, shape index: {}]   ;;  %s724_s2 = inlined_call_operand.vmem [shape: bf16[256,32], index: 2, kind: output, shape index: {0}]   ;;  %s725_s3 = inlined_call_operand.vmem [shape: f32[8,1,32], index: 3, kind: output, shape index: {1}]   ;;  %s726_s4 = inlined_call_operand.vmem [shape: f32[8,1,32], index: 4, kind: output, shape index: {2}]  }
   0x1 LB: > { %s649_s16 = sadd.s32 4294967295, %s616_s15   ;;  %p518_p0 = scmp.ge.s32.totalorder %s616_s15, 1  ;;  %s616_s15 = sphi %s643_s15, %s15_s15  }
   0x2   : > { %p169_p1 = scmp.lt.s32.totalorder %s616_s15, 9 }
   0x4   : > { %p170_p2 = pnand %p518_p0, %p169_p1 }
   0x5   : > { %s519_s19 = sshll.u32 (!%p170_p2), %s649_s16, 2  ;;  %p215_p4 = scmp.lt.s32.totalorder (!%p170_p2), %s649_s16, 7 }
   0x6   : > { %173 = sbr.rel (%p170_p2) target bundleno = 205 (0xcd), region = 28  ;;  %p203_p3 = scmp.lt.s32.totalorder (!%p170_p2), %s519_s19, 31 }
   0xb   : > { %v592_v0 = vld [vmem:[%s723_s1 + $0x38] sm:$0xff]  ;;  %v593_v1 = vld [vmem:[%s723_s1 + $0x40] sm:$0xff]  ;;  %v591_v2 = vld [vmem:[%s723_s1 + $0x30] sm:$0xff]  ;;  %s728_s19 = smov (!%p203_p3, %s519_s19), 31  ;;  %vm316_vm0 = vcmask 130048   ;;  %vm369_vm1 = vcmask 257024  }
   0xc   : > { %323 = vmatpush.bf16.msra.mxu0 %v592_v0  ;;  %594 = vmatpush.bf16.msra.mxu2 %v592_v0  ;;  %s580_s24 = sshll.u32 %s728_s19, 3  ;;  %v590_v3 = vld [vmem:[%s723_s1 + $0x28] sm:$0xff]  ;;  %v589_v7 = vld [vmem:[%s723_s1 + $0x20] sm:$0xff]  ;;  %v588_v8 = vld [vmem:[%s723_s1 + $0x18] sm:$0xff]  ;;  %s523_s14 = sshll.u32 %s728_s19, 2  ;;  %vm374_vm2 = vcmask 261120  }
   0xd   : > { %349 = vmatpush.bf16.msra.mxu1 %v593_v1  ;;  %s207_s29 = scalar_lea.vmem %s722_s0, %s580_s24  ;;  %v587_v9 = vld [vmem:[%s723_s1 + $0x10] sm:$0xff]  ;;  %v586_v12 = vld [vmem:[%s723_s1 + $0x8] sm:$0xff]  ;;  %v585_v14 = vld [vmem:[%s723_s1] sm:$0xff]  ;;  %s693_s20 = scalar_lea.vmem %s724_s2, %s523_s14  ;;  %vm388_vm3 = vcmask 253952  }
   0xe   : > { %v581_v4 = vld [vmem:[%s207_s29 + $0x4] sm:$0xf]  ;;  %v528_v5 = vld [vmem:[%s207_s29 + $0x8] sm:$0xf0]  ;;  %v583_v10 = vld [vmem:[%s207_s29 + $0x14] sm:$0xf] }
   0xf   : > { %v531_v6 = vor.u32 %v581_v4, %v528_v5  ;;  %v536_v11 = vld [vmem:[%s207_s29 + $0x18] sm:$0xf0]  ;;  %v526_v15 = vld [vmem:[%s207_s29] sm:$0xf]  ;;  %v582_v16 = vld [vmem:[%s207_s29 + $0x4] sm:$0xf0] }
  0x10   : > { %324 = vmatpush.bf16.msra.mxu0 %v591_v2  ;;  %595 = vmatpush.bf16.msra.mxu2 %v591_v2  ;;  %v539_v13 = vor.u32 %v583_v10, %v536_v11  ;;  %v534_v17 = vld [vmem:[%s207_s29 + $0x10] sm:$0xf]  ;;  %v584_v18 = vld [vmem:[%s207_s29 + $0x14] sm:$0xf0]  ;;  %v527_v19 = vor.u32 %v582_v16, %v526_v15  ;;  %s730_s16 = smov (!%p215_p4, %s649_s16), 7 }
  0x11   : > { %576 = vmatmul.msk.bf16.vlgmr.msra.gmra.mxu1 %vm316_vm0, %v531_v6  ;;  %v535_v20 = vor.u32 %v584_v18, %v534_v17  ;;  %s217_s22 = scalar_lea.vmem %s725_s3, %s730_s16  ;;  %s220_s25 = scalar_lea.vmem %s726_s4, %s730_s16 }
  0x14   : > { %325 = vmatpush.bf16.msra.mxu0 %v590_v3  ;;  %596 = vmatpush.bf16.msra.mxu2 %v590_v3 }
  0x18   : > { %326 = vmatpush.bf16.msra.mxu0 %v589_v7  ;;  %597 = vmatpush.bf16.msra.mxu2 %v589_v7 }
  0x1c   : > { %327 = vmatpush.bf16.msra.mxu0 %v588_v8  ;;  %598 = vmatpush.bf16.msra.mxu2 %v588_v8 }
  0x20   : > { %328 = vmatpush.bf16.msra.mxu0 %v587_v9  ;;  %599 = vmatpush.bf16.msra.mxu2 %v587_v9 }
  0x21   : > { %577 = vmatmul.msk.bf16.gmra.mxu1 %vm316_vm0, %v539_v13 }
  0x24   : > { %329 = vmatpush.bf16.msra.mxu0 %v586_v12  ;;  %600 = vmatpush.bf16.msra.mxu2 %v586_v12 }
  0x28   : > { %330 = vmatpush.bf16.msra.mxu0 %v585_v14  ;;  %601 = vmatpush.bf16.msra.mxu2 %v585_v14 }
  0x2b   : > { %331 = vmatmul.bf16.vlgmr.msra.gmra.mxu0 %v527_v19  ;;  %336 = vmatmul.bf16.vlgmr.msra.gmra.mxu2 %v535_v20 }
  0x8e   : > { %v351_v21 = vpop.f32.mrf.mxu1 }
  0x96   : > { %v353_v22 = vpop.f32.mrf.mxu1 }
  0x9e   : > { %v356_v26 = vpop.f32.mrf.mxu1 }
  0xa6   : > { %v358_v40 = vpop.f32.mrf.mxu1 }
  0xa8   : > { %v332_v23 = vpop.f32.mrf.mxu0 }
  0xa9   : > { %v352_v24 = vadd.f32 %v351_v21, %v332_v23 }
  0xab   : > { %v361_v25 = vmax.f32 %v352_v24, 0.0 }
  0xad   : > { %v365_v27 = vpack.c.bf16 %v361_v25, %v361_v25  ;;  %v390_v33 = vmul.f32 %v361_v25, %v361_v25  ;;  %v375_v36 = vsel %vm374_vm2, %v361_v25, 0.0 }
  0xae   : > { %v337_v28 = vpop.f32.mrf.mxu2 }
  0xaf   : > { %370 = vst.msk [vmem:[%s693_s20] sm:$0xf] %vm369_vm1, %v365_v27  ;;  %v357_v29 = vadd.f32 %v356_v26, %v337_v28  ;;  %v394_v43 = vsel %vm374_vm2, %v390_v33, 0.0 }
  0xb0   : > { %v334_v30 = vpop.f32.mrf.mxu0 }
  0xb1   : > { %v363_v31 = vmax.f32 %v357_v29, 0.0  ;;  %v354_v32 = vadd.f32 %v353_v22, %v334_v30 }
  0xb3   : > { %v367_v34 = vpack.c.bf16 %v363_v31, %v363_v31  ;;  %v362_v35 = vmax.f32 %v354_v32, 0.0  ;;  %v392_v44 = vmul.f32 %v363_v31, %v363_v31  ;;  %v378_v48 = vsel %vm374_vm2, %v363_v31, 0.0 }
  0xb5   : > { %372 = vst.msk [vmem:[%s693_s20 + $0x8] sm:$0xf] %vm369_vm1, %v367_v34  ;;  %v366_v37 = vpack.c.bf16 %v362_v35, %v362_v35  ;;  %v376_v38 = vsel %vm374_vm2, %v362_v35, 0.0  ;;  %v391_v39 = vmul.f32 %v362_v35, %v362_v35  ;;  %v397_v51 = vsel %vm374_vm2, %v392_v44, 0.0 }
  0xb6   : > { %v377_v41 = vadd.f32 %v376_v38, %v375_v36  ;;  %v339_v42 = vpop.f32.mrf.mxu2 }
  0xb7   : > { %371 = vst.msk [vmem:[%s693_s20 + $0x4] sm:$0xf] %vm369_vm1, %v366_v37  ;;  %v395_v45 = vsel %vm374_vm2, %v391_v39, 0.0  ;;  %v359_v46 = vadd.f32 %v358_v40, %v339_v42 }
  0xb8   : > { %v396_v47 = vadd.f32 %v395_v45, %v394_v43  ;;  %v379_v50 = vadd.f32 %v378_v48, %v377_v41 }
  0xb9   : > { %v364_v49 = vmax.f32 %v359_v46, 0.0 }
  0xba   : > { %v398_v56 = vadd.f32 %v397_v51, %v396_v47 }
  0xbb   : > { %v368_v52 = vpack.c.bf16 %v364_v49, %v364_v49  ;;  %v380_v53 = vsel %vm374_vm2, %v364_v49, 0.0  ;;  %v393_v54 = vmul.f32 %v364_v49, %v364_v49 }
  0xbc   : > { %v381_v55 = vadd.f32 %v380_v53, %v379_v50 }
  0xbd   : > { %373 = vst.msk [vmem:[%s693_s20 + $0xc] sm:$0xf] %vm369_vm1, %v368_v52  ;;  %v399_v57 = vsel %vm374_vm2, %v393_v54, 0.0 }
  0xbe   : > { %v382_v58 = vrot.slane %v381_v55, 4  ;;  %v400_v59 = vadd.f32 %v399_v57, %v398_v56 }
  0xc0   : > { %v383_v60 = vadd.f32 %v382_v58, %v381_v55  ;;  %v401_v61 = vrot.slane %v400_v59, 4 }
  0xc2   : > { %v384_v62 = vrot.slane %v383_v60, 2  ;;  %v402_v63 = vadd.f32 %v401_v61, %v400_v59 }
  0xc4   : > { %v385_v0 = vadd.f32 %v384_v62, %v383_v60  ;;  %v403_v1 = vrot.slane %v402_v63, 2 }
  0xc6   : > { %v386_v2 = vrot.slane %v385_v0, 1  ;;  %v404_v3 = vadd.f32 %v403_v1, %v402_v63 }
  0xc8   : > { %v387_v4 = vadd.f32 %v386_v2, %v385_v0  ;;  %v405_v5 = vrot.slane %v404_v3, 1 }
  0xca   : > { %389 = vst.msk [vmem:[%s217_s22] sm:$0x1] %vm388_vm3, %v387_v4  ;;  %v406_v6 = vadd.f32 %v405_v5, %v404_v3 }
  0xcc   : > { %407 = vst.msk [vmem:[%s220_s25] sm:$0x1] %vm388_vm3, %v406_v6 }
  0xcd PF: > { %s15_s15 = sadd.s32 1, %s616_s15  }
  0xce   : > { %p12_p5 = scmp.ge.s32.totalorder %s15_s15, 10  }
  0xd0   :  { %14 = sbr.rel (!%p12_p5) target bundleno = 1 (0x1), region = 82 }

// kernel: audio_encoder_forward.29
= control target key start
LH: loop header
LB: loop body
LE: loop exit
PB: predicated region body
PF: predicated region fallthrough
CT: control target
= control target key end

     0   :  { %s799_s15 = smov 0   ;;  %s919_s0 = inlined_call_operand.vmem [shape: bf16[256,288], index: 0, kind: input, shape index: {}]   ;;  %s920_s1 = inlined_call_operand.vmem [shape: bf16[288,32], index: 1, kind: input, shape index: {}]   ;;  %s921_s2 = inlined_call_operand.vmem [shape: bf16[256,32], index: 2, kind: output, shape index: {0}]   ;;  %s922_s3 = inlined_call_operand.vmem [shape: f32[8,1,32], index: 3, kind: output, shape index: {1}]   ;;  %s923_s4 = inlined_call_operand.vmem [shape: f32[8,1,32], index: 4, kind: output, shape index: {2}]  }
   0x1 LB: > { %s805_s16 = sadd.s32 4294967295, %s772_s15   ;;  %p620_p0 = scmp.ge.s32.totalorder %s772_s15, 1  ;;  %s772_s15 = sphi %s799_s15, %s15_s15  }
   0x2   : > { %p169_p1 = scmp.lt.s32.totalorder %s772_s15, 9 }
   0x4   : > { %p170_p2 = pnand %p620_p0, %p169_p1 }
   0x5   : > { %s621_s21 = sshll.u32 (!%p170_p2), %s805_s16, 2  ;;  %p215_p4 = scmp.lt.s32.totalorder (!%p170_p2), %s805_s16, 7 }
   0x6   : > { %173 = sbr.rel (%p170_p2) target bundleno = 216 (0xd8), region = 28  ;;  %p203_p3 = scmp.lt.s32.totalorder (!%p170_p2), %s621_s21, 31 }
   0xb   : > { %v738_v0 = vld [vmem:[%s920_s1 + $0x38] sm:$0xff]  ;;  %v737_v2 = vld [vmem:[%s920_s1 + $0x30] sm:$0xff]  ;;  %v748_v4 = vld [vmem:[%s920_s1 + $0x88] sm:$0xff]  ;;  %s925_s21 = smov (!%p203_p3, %s621_s21), 31  ;;  %vm404_vm0 = vcmask 261120   ;;  %vm472_vm1 = vcmask 257024  }
   0xc   : > { %v746_v1 = vld [vmem:[%s920_s1 + $0x78] sm:$0xff]  ;;  %411 = vmatpush.bf16.msra.mxu0 %v738_v0  ;;  %v745_v3 = vld [vmem:[%s920_s1 + $0x70] sm:$0xff]  ;;  %749 = vmatpush.bf16.msra.mxu3 %v738_v0  ;;  %v747_v5 = vld [vmem:[%s920_s1 + $0x80] sm:$0xff]  ;;  %s757_s30 = smul.u32 12, %s925_s21  ;;  %s624_s9 = sshll.u32 %s925_s21, 2  ;;  %vm490_vm2 = vcmask 253952  }
   0xd   : > { %430 = vmatpush.bf16.msra.mxu1 %v746_v1  ;;  %455 = vmatpush.bf16.msra.mxu2 %v748_v4  ;;  %v736_v6 = vld [vmem:[%s920_s1 + $0x28] sm:$0xff]  ;;  %v735_v11 = vld [vmem:[%s920_s1 + $0x20] sm:$0xff]  ;;  %v734_v13 = vld [vmem:[%s920_s1 + $0x18] sm:$0xff]  ;;  %s890_s13 = scalar_lea.vmem %s921_s2, %s624_s9  ;;  %s927_s16 = smov (!%p215_p4, %s805_s16), 7 }
   0xe   : > { %v744_v7 = vld [vmem:[%s920_s1 + $0x68] sm:$0xff]  ;;  %s840_s11 = scalar_lea.vmem %s919_s0, %s757_s30  ;;  %v743_v12 = vld [vmem:[%s920_s1 + $0x60] sm:$0xff]  ;;  %v742_v14 = vld [vmem:[%s920_s1 + $0x58] sm:$0xff]  ;;  %s217_s14 = scalar_lea.vmem %s922_s3, %s927_s16 }
   0xf   : > { %v635_v8 = vld [vmem:[%s840_s11 + $0x8] sm:$0xf]  ;;  %v727_v9 = vld [vmem:[%s840_s11 + $0x10] sm:$0xf0]  ;;  %v647_v17 = vld [vmem:[%s840_s11 + $0x20] sm:$0xf]  ;;  %s220_s19 = scalar_lea.vmem %s923_s4, %s927_s16 }
  0x10   : > { %412 = vmatpush.bf16.msra.mxu0 %v737_v2  ;;  %750 = vmatpush.bf16.msra.mxu3 %v737_v2  ;;  %v636_v10 = vor.u32 %v727_v9, %v635_v8  ;;  %v733_v15 = vld [vmem:[%s920_s1 + $0x10] sm:$0xff]  ;;  %v730_v18 = vld [vmem:[%s840_s11 + $0x28] sm:$0xf0]  ;;  %v731_v22 = vld [vmem:[%s920_s1] sm:$0xff] }
  0x11   : > { %431 = vmatpush.bf16.msra.mxu1 %v745_v3  ;;  %456 = vmatpush.bf16.msra.mxu2 %v747_v5  ;;  %v741_v16 = vld [vmem:[%s920_s1 + $0x50] sm:$0xff]  ;;  %v732_v19 = vld [vmem:[%s920_s1 + $0x8] sm:$0xff]  ;;  %v648_v21 = vor.u32 %v730_v18, %v647_v17  ;;  %v739_v23 = vld [vmem:[%s920_s1 + $0x40] sm:$0xff] }
  0x12   : > { %v740_v20 = vld [vmem:[%s920_s1 + $0x48] sm:$0xff]  ;;  %v627_v24 = vld [vmem:[%s840_s11] sm:$0xf]  ;;  %v725_v26 = vld [vmem:[%s840_s11 + $0x4] sm:$0xf] }
  0x13   : > { %v726_v25 = vld [vmem:[%s840_s11 + $0x8] sm:$0xf0]  ;;  %v629_v27 = vld [vmem:[%s840_s11 + $0xc] sm:$0xf0]  ;;  %v639_v28 = vld [vmem:[%s840_s11 + $0x18] sm:$0xf] }
  0x14   : > { %413 = vmatpush.bf16.msra.mxu0 %v736_v6  ;;  %751 = vmatpush.bf16.msra.mxu3 %v736_v6  ;;  %v729_v29 = vld [vmem:[%s840_s11 + $0x20] sm:$0xf0]  ;;  %v628_v30 = vor.u32 %v726_v25, %v627_v24  ;;  %v632_v31 = vor.u32 %v725_v26, %v629_v27  ;;  %v728_v33 = vld [vmem:[%s840_s11 + $0x1c] sm:$0xf]  ;;  %v641_v34 = vld [vmem:[%s840_s11 + $0x24] sm:$0xf0] }
  0x15   : > { %432 = vmatpush.bf16.msra.mxu1 %v744_v7  ;;  %721 = vmatmul.msk.bf16.vlgmr.msra.gmra.mxu2 %vm404_vm0, %v636_v10  ;;  %v640_v32 = vor.u32 %v729_v29, %v639_v28  ;;  %v644_v35 = vor.u32 %v728_v33, %v641_v34 }
  0x18   : > { %414 = vmatpush.bf16.msra.mxu0 %v735_v11  ;;  %752 = vmatpush.bf16.msra.mxu3 %v735_v11 }
  0x19   : > { %433 = vmatpush.bf16.msra.mxu1 %v743_v12 }
  0x1c   : > { %415 = vmatpush.bf16.msra.mxu0 %v734_v13  ;;  %753 = vmatpush.bf16.msra.mxu3 %v734_v13 }
  0x1d   : > { %434 = vmatpush.bf16.msra.mxu1 %v742_v14 }
  0x20   : > { %416 = vmatpush.bf16.msra.mxu0 %v733_v15  ;;  %754 = vmatpush.bf16.msra.mxu3 %v733_v15 }
  0x21   : > { %435 = vmatpush.bf16.msra.mxu1 %v741_v16 }
  0x24   : > { %417 = vmatpush.bf16.msra.mxu0 %v732_v19  ;;  %755 = vmatpush.bf16.msra.mxu3 %v732_v19 }
  0x25   : > { %436 = vmatpush.bf16.msra.mxu1 %v740_v20  ;;  %722 = vmatmul.msk.bf16.gmra.mxu2 %vm404_vm0, %v648_v21 }
  0x28   : > { %418 = vmatpush.bf16.msra.mxu0 %v731_v22  ;;  %756 = vmatpush.bf16.msra.mxu3 %v731_v22 }
  0x29   : > { %437 = vmatpush.bf16.msra.mxu1 %v739_v23 }
  0x2b   : > { %419 = vmatmul.bf16.vlgmr.msra.gmra.mxu0 %v628_v30  ;;  %424 = vmatmul.bf16.vlgmr.msra.gmra.mxu3 %v640_v32 }
  0x2c   : > { %438 = vmatmul.bf16.vlgmr.msra.gmra.mxu1 %v632_v31 }
  0x3c   : > { %443 = vmatmul.bf16.gmra.mxu1 %v644_v35 }
  0x98   : > { %v458_v36 = vpop.f32.mrf.mxu2 }
  0xa0   : > { %v460_v42 = vpop.f32.mrf.mxu2 }
  0xa8   : > { %v420_v37 = vpop.f32.mrf.mxu0  ;;  %v463_v49 = vpop.f32.mrf.mxu2 }
  0xa9   : > { %v439_v38 = vpop.f32.mrf.mxu1 }
  0xaa   : > { %v440_v39 = vadd.f32 %v439_v38, %v420_v37 }
  0xac   : > { %v459_v40 = vadd.f32 %v458_v36, %v440_v39 }
  0xae   : > { %v468_v41 = vpack.c.bf16 %v459_v40, %v459_v40  ;;  %v425_v48 = vpop.f32.mrf.mxu3  ;;  %v492_v55 = vmul.f32 %v459_v40, %v459_v40  ;;  %v477_v60 = vsel %vm404_vm0, %v459_v40, 0.0 }
  0xb0   : > { %473 = vst.msk [vmem:[%s890_s13] sm:$0xf] %vm472_vm1, %v468_v41  ;;  %v422_v43 = vpop.f32.mrf.mxu0  ;;  %v465_v1 = vpop.f32.mrf.mxu2  ;;  %v496_v2 = vsel %vm404_vm0, %v492_v55, 0.0 }
  0xb1   : > { %v441_v44 = vpop.f32.mrf.mxu1 }
  0xb2   : > { %v442_v45 = vadd.f32 %v441_v44, %v422_v43 }
  0xb4   : > { %v461_v46 = vadd.f32 %v460_v42, %v442_v45 }
  0xb6   : > { %v469_v47 = vpack.c.bf16 %v461_v46, %v461_v46  ;;  %v493_v53 = vmul.f32 %v461_v46, %v461_v46  ;;  %v478_v56 = vsel %vm404_vm0, %v461_v46, 0.0  ;;  %v427_v58 = vpop.f32.mrf.mxu3 }
  0xb7   : > { %v479_v0 = vadd.f32 %v478_v56, %v477_v60 }
  0xb8   : > { %474 = vst.msk [vmem:[%s890_s13 + $0x4] sm:$0xf] %vm472_vm1, %v469_v47  ;;  %v497_v61 = vsel %vm404_vm0, %v493_v53, 0.0 }
  0xb9   : > { %v444_v50 = vpop.f32.mrf.mxu1  ;;  %v498_v5 = vadd.f32 %v497_v61, %v496_v2 }
  0xba   : > { %v445_v51 = vadd.f32 %v444_v50, %v425_v48 }
  0xbc   : > { %v464_v52 = vadd.f32 %v463_v49, %v445_v51 }
  0xbe   : > { %v470_v54 = vpack.c.bf16 %v464_v52, %v464_v52  ;;  %v494_v57 = vmul.f32 %v464_v52, %v464_v52  ;;  %v480_v62 = vsel %vm404_vm0, %v464_v52, 0.0 }
  0xbf   : > { %v481_v6 = vadd.f32 %v480_v62, %v479_v0 }
  0xc0   : > { %475 = vst.msk [vmem:[%s890_s13 + $0x8] sm:$0xf] %vm472_vm1, %v470_v54  ;;  %v499_v3 = vsel %vm404_vm0, %v494_v57, 0.0 }
  0xc1   : > { %v446_v59 = vpop.f32.mrf.mxu1  ;;  %v500_v10 = vadd.f32 %v499_v3, %v498_v5 }
  0xc2   : > { %v447_v63 = vadd.f32 %v446_v59, %v427_v58 }
  0xc4   : > { %v466_v4 = vadd.f32 %v465_v1, %v447_v63 }
  0xc6   : > { %v471_v7 = vpack.c.bf16 %v466_v4, %v466_v4  ;;  %v482_v8 = vsel %vm404_vm0, %v466_v4, 0.0  ;;  %v495_v9 = vmul.f32 %v466_v4, %v466_v4 }
  0xc7   : > { %v483_v11 = vadd.f32 %v482_v8, %v481_v6 }
  0xc8   : > { %476 = vst.msk [vmem:[%s890_s13 + $0xc] sm:$0xf] %vm472_vm1, %v471_v7  ;;  %v501_v12 = vsel %vm404_vm0, %v495_v9, 0.0 }
  0xc9   : > { %v484_v13 = vrot.slane %v483_v11, 4  ;;  %v502_v14 = vadd.f32 %v501_v12, %v500_v10 }
  0xcb   : > { %v485_v15 = vadd.f32 %v484_v13, %v483_v11  ;;  %v503_v16 = vrot.slane %v502_v14, 4 }
  0xcd   : > { %v486_v17 = vrot.slane %v485_v15, 2  ;;  %v504_v18 = vadd.f32 %v503_v16, %v502_v14 }
  0xcf   : > { %v487_v19 = vadd.f32 %v486_v17, %v485_v15  ;;  %v505_v20 = vrot.slane %v504_v18, 2 }
  0xd1   : > { %v488_v21 = vrot.slane %v487_v19, 1  ;;  %v506_v22 = vadd.f32 %v505_v20, %v504_v18 }
  0xd3   : > { %v489_v23 = vadd.f32 %v488_v21, %v487_v19  ;;  %v507_v24 = vrot.slane %v506_v22, 1 }
  0xd5   : > { %491 = vst.msk [vmem:[%s217_s14] sm:$0x1] %vm490_vm2, %v489_v23  ;;  %v508_v25 = vadd.f32 %v507_v24, %v506_v22 }
  0xd7   : > { %509 = vst.msk [vmem:[%s220_s19] sm:$0x1] %vm490_vm2, %v508_v25 }
  0xd8 PF: > { %s15_s15 = sadd.s32 1, %s772_s15  }
  0xd9   : > { %p12_p5 = scmp.ge.s32.totalorder %s15_s15, 10  }
  0xdb   :  { %14 = sbr.rel (!%p12_p5) target bundleno = 1 (0x1), region = 82 }

// kernel: tile.237
= control target key start
LH: loop header
LB: loop body
LE: loop exit
PB: predicated region body
PF: predicated region fallthrough
CT: control target
= control target key end

     0   :  { %s22_s0 = inlined_call_operand.vmem [shape: f32[64], index: 0, kind: input, shape index: {}]   ;;  %s23_s1 = inlined_call_operand.vmem [shape: f32[8,64], index: 1, kind: output, shape index: {}]  }
   0x1   :  { %v4_v0 = vld [vmem:[%s22_s0] ss:$0 sm:$0xff] }
   0x2   :  { %5 = vst [vmem:[%s23_s1] sm:$0xff] %v4_v0 }

// kernel: tile.238
= control target key start
LH: loop header
LB: loop body
LE: loop exit
PB: predicated region body
PF: predicated region fallthrough
CT: control target
= control target key end

     0   :  { %vm3_vm0 = vcmask 523264   ;;  %s40_s8 = smov 64   ;;  %vm9_vm1 = vcmask 1048064   ;;  %s69_s0 = inlined_call_operand.vmem [shape: f32[8,64], index: 0, kind: input, shape index: {}]   ;;  %s70_s1 = inlined_call_operand.vmem [shape: f32[1,512], index: 1, kind: output, shape index: {}]  }
   0x1   :  { %v35_v0 = vld [vmem:[%s69_s0 + $0x1] ss:$2 sm:$0xf]   ;;  %v2_v1 = vld [vmem:[%s69_s0] ss:$2 sm:$0xf]  }
   0x2   :  { %7 = vrot.lane.b32.xlu0 %v35_v0, %s40_s8  ;;  %4 = vst.msk [vmem:[#allocation0] ss:$8 sm:$0xf] %vm3_vm0, %v2_v1  }
  0x74   :  { %v8_v2 = vpop.permute.xlu0 %7  }
  0x75   :  { %10 = vst.msk [vmem:[#allocation0] ss:$8 sm:$0xf] %vm9_vm1, %v8_v2  }
  0x7c   :  { %v13_v3 = vld [vmem:[#allocation0] sm:$0x1]  ;;  %v18_v4 = vld [vmem:[#allocation0 + $0x8] sm:$0x1]  ;;  %v24_v5 = vld [vmem:[#allocation0 + $0x10] sm:$0x1] }
  0x7d   :  { %16 = vst [vmem:[%s70_s1] sm:$0x1] %v13_v3  ;;  %v30_v6 = vld [vmem:[#allocation0 + $0x18] sm:$0x1] }
  0x7e   :  { %36 = vst [vmem:[%s70_s1 + $0x1] sm:$0x1] %v18_v4 }
  0x7f   :  { %37 = vst [vmem:[%s70_s1 + $0x2] sm:$0x1] %v24_v5 }
  0x80   :  { %38 = vst [vmem:[%s70_s1 + $0x3] sm:$0x1] %v30_v6 }

// kernel: audio_encoder_forward.31
= control target key start
LH: loop header
LB: loop body
LE: loop exit
PB: predicated region body
PF: predicated region fallthrough
CT: control target
= control target key end

     0   :  { %s690_s24 = smov 0   ;;  %s692_s25 = smov 0   ;;  %s746_s0 = inlined_call_operand.vmem [shape: bf16[2,8,512], index: 0, kind: input, shape index: {}]   ;;  %s747_s1 = inlined_call_operand.vmem [shape: bf16[2,8,512], index: 1, kind: input, shape index: {}]   ;;  %s748_s2 = inlined_call_operand.vmem [shape: f32[1,512], index: 2, kind: input, shape index: {}]   ;;  %s749_s3 = inlined_call_operand.vmem [shape: f32[1,512], index: 3, kind: input, shape index: {}]   ;;  %s750_s4 = inlined_call_operand.vmem [shape: f32[2,1,512], index: 4, kind: input, shape index: {}]   ;;  %s751_s5 = inlined_call_operand.vmem [shape: f32[1,512], index: 5, kind: input, shape index: {}]   ;;  %s752_s6 = inlined_call_operand.vmem [shape: f32[1,512], index: 6, kind: input, shape index: {}]   ;;  %s753_s7 = inlined_call_operand.vmem [shape: bf16[2,8,512], index: 7, kind: output, shape index: {}]  }
   0x1   :  { %s694_s26 = smov 0  }
   0x2 LB: > { %s29_s27 = sadd.s32 1, %s644_s25  ;;  %p589_p0 = scmp.ge.s32.totalorder %s648_s26, 1  ;;  %s648_s26 = sphi %s694_s26, %s17_s26   ;;  %s644_s25 = sphi %s692_s25, %s755_s25   ;;  %s640_s24 = sphi %s690_s24, %s754_s24  }
   0x3   : > { %p31_p1 = scmp.ge.s32.totalorder %s29_s27, 2  ;;  %p282_p2 = scmp.lt.s32.totalorder %s648_s26, 3 }
   0x5   : > { %s757_s27 = smov (%p31_p1, %s29_s27), 0  ;;  %p283_p3 = pnand %p589_p0, %p282_p2 }
   0x6   : > { %p335_p4 = scmp.lt.s32.totalorder (!%p283_p3), %s640_s24, 1 }
   0x7   : > { %286 = sbr.rel (%p283_p3) target bundleno = 35 (0x23), region = 48 }
   0xc   : > { %v372_v0 = vld [vmem:[%s748_s2] sm:$0xf]  ;;  %s759_s24 = smov (!%p335_p4, %s640_s24), 1 }
   0xd   : > { %v386_v1 = vld [vmem:[%s749_s3] sm:$0xf]  ;;  %v374_v3 = vperm.slane %v372_v0, 0  ;;  %v375_v4 = vperm.slane %v372_v0, 1  ;;  %v376_v5 = vperm.slane %v372_v0, 2  ;;  %v377_v6 = vperm.slane %v372_v0, 3 }
   0xe   : > { %v406_v2 = vld [vmem:[%s751_s5] sm:$0xf]  ;;  %v388_v7 = vperm.slane %v386_v1, 0  ;;  %s720_s13 = sshll.u32 %s759_s24, 4  ;;  %s594_s14 = sshll.u32 %s759_s24, 2  ;;  %v389_v9 = vperm.slane %v386_v1, 1 }
   0xf   : > { %v420_v8 = vld [vmem:[%s752_s6] sm:$0xf]  ;;  %v408_v10 = vperm.slane %v406_v2, 0  ;;  %v409_v11 = vperm.slane %v406_v2, 1  ;;  %v390_v12 = vperm.slane %v386_v1, 2  ;;  %s343_s17 = scalar_lea.vmem %s746_s0, %s720_s13  ;;  %s352_s20 = scalar_lea.vmem %s747_s1, %s720_s13  ;;  %v391_v14 = vperm.slane %v386_v1, 3 }
  0x10   : > { %v422_v13 = vperm.slane %v420_v8, 0  ;;  %v410_v15 = vperm.slane %v406_v2, 2  ;;  %v411_v16 = vperm.slane %v406_v2, 3  ;;  %s356_s23 = scalar_lea.vmem %s750_s4, %s594_s14  ;;  %v366_v17 = vld [vmem:[%s343_s17] sm:$0xff]  ;;  %v367_v18 = vld [vmem:[%s343_s17 + $0x8] sm:$0xff]  ;;  %v423_v20 = vperm.slane %v420_v8, 1  ;;  %s365_s29 = scalar_lea.vmem %s753_s7, %s720_s13 }
  0x11   : > { %v400_v19 = vld [vmem:[%s352_s20] sm:$0xff]  ;;  %v424_v21 = vperm.slane %v420_v8, 2  ;;  %v425_v22 = vperm.slane %v420_v8, 3  ;;  %v368_v23 = vunpack.c.l.bf16 %v366_v17  ;;  %v369_v24 = vunpack.c.h.bf16 %v366_v17  ;;  %v401_v27 = vld [vmem:[%s352_s20 + $0x8] sm:$0xff] }
  0x12   : > { %v370_v25 = vunpack.c.l.bf16 %v367_v18  ;;  %v371_v26 = vunpack.c.h.bf16 %v367_v18  ;;  %v434_v28 = vld [vmem:[%s356_s23] sm:$0xf]  ;;  %v402_v29 = vunpack.c.l.bf16 %v400_v19  ;;  %v403_v30 = vunpack.c.h.bf16 %v400_v19 }
  0x13   : > { %v404_v31 = vunpack.c.l.bf16 %v401_v27  ;;  %v405_v32 = vunpack.c.h.bf16 %v401_v27  ;;  %v382_v33 = vmul.f32 %v374_v3, %v368_v23  ;;  %v383_v34 = vmul.f32 %v375_v4, %v369_v24 }
  0x14   : > { %v384_v35 = vmul.f32 %v376_v5, %v370_v25  ;;  %v385_v36 = vmul.f32 %v377_v6, %v371_v26  ;;  %v416_v37 = vmul.f32 %v408_v10, %v402_v29  ;;  %v417_v38 = vmul.f32 %v409_v11, %v403_v30 }
  0x15   : > { %v436_v39 = vperm.slane %v434_v28, 0  ;;  %v437_v40 = vperm.slane %v434_v28, 1  ;;  %v396_v41 = vadd.f32 %v388_v7, %v382_v33  ;;  %v397_v42 = vadd.f32 %v389_v9, %v383_v34 }
  0x16   : > { %v398_v43 = vadd.f32 %v390_v12, %v384_v35  ;;  %v399_v44 = vadd.f32 %v391_v14, %v385_v36  ;;  %v430_v45 = vadd.f32 %v422_v13, %v416_v37  ;;  %v431_v46 = vadd.f32 %v423_v20, %v417_v38 }
  0x17   : > { %v418_v47 = vmul.f32 %v410_v15, %v404_v31  ;;  %v419_v48 = vmul.f32 %v411_v16, %v405_v32  ;;  %v444_v49 = vmul.f32 %v436_v39, %v396_v41  ;;  %v445_v50 = vmul.f32 %v437_v40, %v397_v42 }
  0x18   : > { %v438_v51 = vperm.slane %v434_v28, 2  ;;  %v439_v52 = vperm.slane %v434_v28, 3 }
  0x19   : > { %v432_v53 = vadd.f32 %v424_v21, %v418_v47  ;;  %v433_v54 = vadd.f32 %v425_v22, %v419_v48  ;;  %v448_v55 = vadd.f32 %v444_v49, %v430_v45  ;;  %v449_v56 = vadd.f32 %v445_v50, %v431_v46 }
  0x1a   : > { %v446_v57 = vmul.f32 %v438_v51, %v398_v43  ;;  %v447_v58 = vmul.f32 %v439_v52, %v399_v44 }
  0x1b   : > { %v452_v59 = vmax.f32 %v448_v55, 0.0  ;;  %v453_v60 = vmax.f32 %v449_v56, 0.0 }
  0x1c   : > { %v450_v61 = vadd.f32 %v446_v57, %v432_v53  ;;  %v451_v62 = vadd.f32 %v447_v58, %v433_v54 }
  0x1d   : > { %v456_v63 = vpack.c.bf16 %v453_v60, %v452_v59 }
  0x1e   : > { %v454_v0 = vmax.f32 %v450_v61, 0.0  ;;  %v455_v1 = vmax.f32 %v451_v62, 0.0 }
  0x1f   : > { %458 = vst [vmem:[%s365_s29] sm:$0xff] %v456_v63 }
  0x20   : > { %v457_v2 = vpack.c.bf16 %v455_v1, %v454_v0 }
  0x22   : > { %459 = vst [vmem:[%s365_s29 + $0x8] sm:$0xff] %v457_v2 }
  0x23 PF: > { %s17_s26 = sadd.s32 1, %s648_s26   ;;  %s754_s24 = smov %s644_s25 }
  0x24   : > { %p14_p5 = scmp.ge.s32.totalorder %s17_s26, 4   ;;  %s755_s25 = smov %s757_s27 }
  0x26   :  { %16 = sbr.rel (!%p14_p5) target bundleno = 2 (0x2), region = 84 }

// kernel: audio_encoder_forward.35
= control target key start
LH: loop header
LB: loop body
LE: loop exit
PB: predicated region body
PF: predicated region fallthrough
CT: control target
= control target key end

     0   :  { %s431_s15 = smov 0   ;;  %s465_s0 = inlined_call_operand.vmem [shape: bf16[64,32], index: 0, kind: input, shape index: {}]   ;;  %s466_s1 = inlined_call_operand.vmem [shape: bf16[32,64], index: 1, kind: input, shape index: {}]   ;;  %s467_s2 = inlined_call_operand.vmem [shape: bf16[64,64], index: 2, kind: output, shape index: {0}]   ;;  %s468_s3 = inlined_call_operand.vmem [shape: f32[8,1,64], index: 3, kind: output, shape index: {1}]   ;;  %s469_s4 = inlined_call_operand.vmem [shape: f32[8,1,64], index: 4, kind: output, shape index: {2}]  }
   0x1 LB: > { %s370_s16 = sadd.s32 4294967295, %s404_s15   ;;  %p374_p0 = scmp.ge.s32.totalorder %s404_s15, 1  ;;  %s404_s15 = sphi %s431_s15, %s15_s15  }
   0x2   : > { %p166_p1 = scmp.lt.s32.totalorder %s404_s15, 9 }
   0x4   : > { %p167_p2 = pnand %p374_p0, %p166_p1 }
   0x5   : > { %p196_p3 = scmp.lt.s32.totalorder (!%p167_p2), %s370_s16, 7 }
   0x6   : > { %170 = sbr.rel (%p167_p2) target bundleno = 161 (0xa1), region = 28 }
   0xb   : > { %v389_v0 = vld [vmem:[%s466_s1 + $0x8] sm:$0xff]  ;;  %v388_v1 = vld [vmem:[%s466_s1] sm:$0xff]  ;;  %s471_s16 = smov (!%p196_p3, %s370_s16), 7  ;;  %vm228_vm0 = vcmask 261120   ;;  %vm248_vm1 = vcmask 523264   ;;  %vm246_vm2 = vcmask 519168  }
   0xc   : > { %238 = vmatpush.bf16.msra.mxu0 %v389_v0  ;;  %s375_s21 = sshll.u32 %s471_s16, 2  ;;  %s206_s30 = scalar_lea.vmem %s468_s3, %s471_s16  ;;  %vm256_vm3 = vcmask 516096  }
   0xd   : > { %s199_s24 = scalar_lea.vmem %s465_s0, %s375_s21  ;;  %s203_s27 = scalar_lea.vmem %s467_s2, %s375_s21 }
   0xe   : > { %v211_v2 = vld [vmem:[%s199_s24] sm:$0xf]  ;;  %s209_s7 = scalar_lea.vmem %s469_s4, %s471_s16 }
  0x10   : > { %239 = vmatpush.bf16.msra.mxu0 %v388_v1 }
  0x13   : > { %385 = vmatmul.msk.bf16.vlgmr.msra.gmra.mxu0 %vm228_vm0, %v211_v2 }
  0x90   : > { %v241_v3 = vpop.f32.mrf.mxu0 }
  0x91   : > { %v245_v4 = vpack.c.bf16 %v241_v3, %v241_v3  ;;  %v249_v5 = vsel %vm248_vm1, %v241_v3, 0.0  ;;  %v258_v6 = vmul.f32 %v241_v3, %v241_v3 }
  0x92   : > { %v250_v7 = vrot.slane %v249_v5, 4 }
  0x93   : > { %247 = vst.msk [vmem:[%s203_s27] sm:$0xf] %vm246_vm2, %v245_v4  ;;  %v259_v8 = vsel %vm248_vm1, %v258_v6, 0.0 }
  0x94   : > { %v251_v9 = vadd.f32 %v250_v7, %v249_v5  ;;  %v260_v10 = vrot.slane %v259_v8, 4 }
  0x96   : > { %v252_v11 = vrot.slane %v251_v9, 2  ;;  %v261_v12 = vadd.f32 %v260_v10, %v259_v8 }
  0x98   : > { %v253_v13 = vadd.f32 %v252_v11, %v251_v9  ;;  %v262_v14 = vrot.slane %v261_v12, 2  ;;  %v243_v15 = vpop.f32.mrf.mxu0 }
  0x9a   : > { %v254_v16 = vrot.slane %v253_v13, 1  ;;  %v263_v17 = vadd.f32 %v262_v14, %v261_v12 }
  0x9c   : > { %v255_v18 = vadd.f32 %v254_v16, %v253_v13  ;;  %v264_v19 = vrot.slane %v263_v17, 1 }
  0x9e   : > { %257 = vst.msk [vmem:[%s206_s30] sm:$0x1] %vm256_vm3, %v255_v18  ;;  %v265_v20 = vadd.f32 %v264_v19, %v263_v17 }
  0xa0   : > { %266 = vst.msk [vmem:[%s209_s7] sm:$0x1] %vm256_vm3, %v265_v20 }
  0xa1 PF: > { %s15_s15 = sadd.s32 1, %s404_s15  }
  0xa2   : > { %p12_p4 = scmp.ge.s32.totalorder %s15_s15, 10  }
  0xa4   :  { %14 = sbr.rel (!%p12_p4) target bundleno = 1 (0x1), region = 82 }

// kernel: audio_encoder_forward.33
= control target key start
LH: loop header
LB: loop body
LE: loop exit
PB: predicated region body
PF: predicated region fallthrough
CT: control target
= control target key end

     0   :  { %s94_s0 = inlined_call_operand.vmem [shape: bf16[8,512], index: 0, kind: input, shape index: {}]   ;;  %s95_s1 = inlined_call_operand.vmem [shape: f32[1,512], index: 1, kind: input, shape index: {}]   ;;  %s96_s2 = inlined_call_operand.vmem [shape: f32[1,512], index: 2, kind: input, shape index: {}]   ;;  %s97_s3 = inlined_call_operand.vmem [shape: bf16[8,512], index: 3, kind: output, shape index: {}]  }
   0x1   :  { %v14_v0 = vld [vmem:[%s94_s0] sm:$0xff]  ;;  %v15_v7 = vld [vmem:[%s94_s0 + $0x8] sm:$0xff] }
   0x2   :  { %v20_v1 = vld [vmem:[%s95_s1] sm:$0xf]  ;;  %v16_v3 = vunpack.c.l.bf16 %v14_v0  ;;  %v17_v4 = vunpack.c.h.bf16 %v14_v0  ;;  %v18_v10 = vunpack.c.l.bf16 %v15_v7  ;;  %v19_v11 = vunpack.c.h.bf16 %v15_v7 }
   0x3   :  { %v34_v2 = vld [vmem:[%s96_s2] sm:$0xf]  ;;  %v22_v5 = vperm.slane %v20_v1, 0  ;;  %v23_v6 = vperm.slane %v20_v1, 1  ;;  %v24_v14 = vperm.slane %v20_v1, 2  ;;  %v25_v15 = vperm.slane %v20_v1, 3 }
   0x4   :  { %v36_v8 = vperm.slane %v34_v2, 0  ;;  %v37_v9 = vperm.slane %v34_v2, 1  ;;  %v38_v16 = vperm.slane %v34_v2, 2  ;;  %v39_v17 = vperm.slane %v34_v2, 3 }
   0x5   :  { %v30_v12 = vmul.f32 %v22_v5, %v16_v3  ;;  %v31_v13 = vmul.f32 %v23_v6, %v17_v4  ;;  %v32_v20 = vmul.f32 %v24_v14, %v18_v10  ;;  %v33_v21 = vmul.f32 %v25_v15, %v19_v11 }
   0x7   :  { %v44_v18 = vadd.f32 %v36_v8, %v30_v12  ;;  %v45_v19 = vadd.f32 %v37_v9, %v31_v13  ;;  %v46_v23 = vadd.f32 %v38_v16, %v32_v20  ;;  %v47_v24 = vadd.f32 %v39_v17, %v33_v21 }
   0x9   :  { %v48_v22 = vpack.c.bf16 %v45_v19, %v44_v18  ;;  %v49_v25 = vpack.c.bf16 %v47_v24, %v46_v23 }
   0xb   :  { %50 = vst [vmem:[%s97_s3] sm:$0xff] %v48_v22 }
   0xc   :  { %51 = vst [vmem:[%s97_s3 + $0x8] sm:$0xff] %v49_v25 }

// kernel: audio_encoder_forward.32
= control target key start
LH: loop header
LB: loop body
LE: loop exit
PB: predicated region body
PF: predicated region fallthrough
CT: control target
= control target key end

     0   :  { %s681_s15 = smov 0   ;;  %s764_s0 = inlined_call_operand.vmem [shape: bf16[64,288], index: 0, kind: input, shape index: {}]   ;;  %s765_s1 = inlined_call_operand.vmem [shape: bf16[288,64], index: 1, kind: input, shape index: {}]   ;;  %s766_s2 = inlined_call_operand.vmem [shape: bf16[64,64], index: 2, kind: output, shape index: {0}]   ;;  %s767_s3 = inlined_call_operand.vmem [shape: f32[8,1,64], index: 3, kind: output, shape index: {1}]   ;;  %s768_s4 = inlined_call_operand.vmem [shape: f32[8,1,64], index: 4, kind: output, shape index: {2}]  }
   0x1 LB: > { %s539_s16 = sadd.s32 4294967295, %s654_s15   ;;  %p543_p0 = scmp.ge.s32.totalorder %s654_s15, 1  ;;  %s654_s15 = sphi %s681_s15, %s15_s15  }
   0x2   : > { %p167_p1 = scmp.lt.s32.totalorder %s654_s15, 9 }
   0x4   : > { %p168_p2 = pnand %p543_p0, %p167_p1 }
   0x5   : > { %p198_p3 = scmp.lt.s32.totalorder (!%p168_p2), %s539_s16, 7 }
   0x6   : > { %171 = sbr.rel (%p168_p2) target bundleno = 192 (0xc0), region = 28 }
   0xb   : > { %v628_v0 = vld [vmem:[%s765_s1 + $0x38] sm:$0xff]  ;;  %v627_v2 = vld [vmem:[%s765_s1 + $0x30] sm:$0xff]  ;;  %v638_v4 = vld [vmem:[%s765_s1 + $0x88] sm:$0xff]  ;;  %s770_s16 = smov (!%p198_p3, %s539_s16), 7  ;;  %vm370_vm0 = vcmask 261120   ;;  %vm417_vm1 = vcmask 523264  }
   0xc   : > { %v636_v1 = vld [vmem:[%s765_s1 + $0x78] sm:$0xff]  ;;  %374 = vmatpush.bf16.msra.mxu0 %v628_v0  ;;  %v635_v3 = vld [vmem:[%s765_s1 + $0x70] sm:$0xff]  ;;  %406 = vmatpush.bf16.msra.mxu2 %v638_v4  ;;  %v637_v5 = vld [vmem:[%s765_s1 + $0x80] sm:$0xff]  ;;  %s639_s29 = smul.u32 12, %s770_s16  ;;  %s545_s7 = sshll.u32 %s770_s16, 2  ;;  %vm415_vm2 = vcmask 519168  }
   0xd   : > { %387 = vmatpush.bf16.msra.mxu1 %v636_v1  ;;  %v626_v6 = vld [vmem:[%s765_s1 + $0x28] sm:$0xff]  ;;  %v625_v10 = vld [vmem:[%s765_s1 + $0x20] sm:$0xff]  ;;  %v624_v13 = vld [vmem:[%s765_s1 + $0x18] sm:$0xff]  ;;  %s209_s13 = scalar_lea.vmem %s767_s3, %s770_s16  ;;  %vm425_vm3 = vcmask 516096   ;;  %s212_s18 = scalar_lea.vmem %s768_s4, %s770_s16 }
   0xe   : > { %v634_v7 = vld [vmem:[%s765_s1 + $0x68] sm:$0xff]  ;;  %s202_s10 = scalar_lea.vmem %s764_s0, %s639_s29  ;;  %v633_v11 = vld [vmem:[%s765_s1 + $0x60] sm:$0xff]  ;;  %v632_v14 = vld [vmem:[%s765_s1 + $0x58] sm:$0xff] }
   0xf   : > { %v215_v8 = vld [vmem:[%s202_s10 + $0x8] sm:$0xf]  ;;  %v623_v15 = vld [vmem:[%s765_s1 + $0x10] sm:$0xff]  ;;  %v214_v19 = vld [vmem:[%s202_s10] sm:$0xff]  ;;  %s206_s10 = scalar_lea.vmem %s766_s2, %s545_s7 }
  0x10   : > { %375 = vmatpush.bf16.msra.mxu0 %v627_v2  ;;  %407 = vmatpush.bf16.msra.mxu2 %v637_v5  ;;  %v256_v9 = vunpack.c.l.b16 %v215_v8  ;;  %v631_v16 = vld [vmem:[%s765_s1 + $0x50] sm:$0xff]  ;;  %v622_v17 = vld [vmem:[%s765_s1 + $0x8] sm:$0xff]  ;;  %v254_v20 = vunpack.c.l.b16 %v214_v19  ;;  %v255_v21 = vunpack.c.h.b16 %v214_v19  ;;  %v621_v22 = vld [vmem:[%s765_s1] sm:$0xff] }
  0x11   : > { %388 = vmatpush.bf16.msra.mxu1 %v635_v3  ;;  %v630_v18 = vld [vmem:[%s765_s1 + $0x48] sm:$0xff]  ;;  %v629_v23 = vld [vmem:[%s765_s1 + $0x40] sm:$0xff] }
  0x12   : > { %v259_v12 = vpack.c.b16 %v256_v9, %v256_v9  ;;  %v257_v24 = vpack.c.b16 %v254_v20, %v254_v20  ;;  %v258_v25 = vpack.c.b16 %v255_v21, %v255_v21 }
  0x14   : > { %376 = vmatpush.bf16.msra.mxu0 %v626_v6  ;;  %618 = vmatmul.msk.bf16.vlgmr.msra.gmra.mxu2 %vm370_vm0, %v259_v12 }
  0x15   : > { %389 = vmatpush.bf16.msra.mxu1 %v634_v7 }
  0x18   : > { %377 = vmatpush.bf16.msra.mxu0 %v625_v10 }
  0x19   : > { %390 = vmatpush.bf16.msra.mxu1 %v633_v11 }
  0x1c   : > { %378 = vmatpush.bf16.msra.mxu0 %v624_v13 }
  0x1d   : > { %391 = vmatpush.bf16.msra.mxu1 %v632_v14 }
  0x20   : > { %379 = vmatpush.bf16.msra.mxu0 %v623_v15 }
  0x21   : > { %392 = vmatpush.bf16.msra.mxu1 %v631_v16 }
  0x24   : > { %380 = vmatpush.bf16.msra.mxu0 %v622_v17 }
  0x25   : > { %393 = vmatpush.bf16.msra.mxu1 %v630_v18 }
  0x28   : > { %381 = vmatpush.bf16.msra.mxu0 %v621_v22 }
  0x29   : > { %394 = vmatpush.bf16.msra.mxu1 %v629_v23 }
  0x2b   : > { %382 = vmatmul.bf16.vlgmr.msra.gmra.mxu0 %v257_v24 }
  0x2c   : > { %395 = vmatmul.bf16.vlgmr.msra.gmra.mxu1 %v258_v25 }
  0x97   : > { %v409_v26 = vpop.f32.mrf.mxu2 }
  0x9f   : > { %v411_v27 = vpop.f32.mrf.mxu2 }
  0xa8   : > { %v383_v28 = vpop.f32.mrf.mxu0 }
  0xa9   : > { %v396_v29 = vpop.f32.mrf.mxu1 }
  0xaa   : > { %v397_v30 = vadd.f32 %v396_v29, %v383_v28 }
  0xac   : > { %v410_v31 = vadd.f32 %v409_v26, %v397_v30 }
  0xae   : > { %v413_v32 = vmax.f32 %v410_v31, 0.0 }
  0xb0   : > { %v414_v33 = vpack.c.bf16 %v413_v32, %v413_v32  ;;  %v418_v34 = vsel %vm417_vm1, %v413_v32, 0.0  ;;  %v427_v35 = vmul.f32 %v413_v32, %v413_v32  ;;  %v385_v37 = vpop.f32.mrf.mxu0 }
  0xb1   : > { %v419_v36 = vrot.slane %v418_v34, 4  ;;  %v398_v38 = vpop.f32.mrf.mxu1 }
  0xb2   : > { %416 = vst.msk [vmem:[%s206_s10] sm:$0xf] %vm415_vm2, %v414_v33  ;;  %v428_v39 = vsel %vm417_vm1, %v427_v35, 0.0 }
  0xb3   : > { %v420_v40 = vadd.f32 %v419_v36, %v418_v34  ;;  %v429_v41 = vrot.slane %v428_v39, 4 }
  0xb5   : > { %v421_v42 = vrot.slane %v420_v40, 2  ;;  %v430_v43 = vadd.f32 %v429_v41, %v428_v39 }
  0xb7   : > { %v422_v44 = vadd.f32 %v421_v42, %v420_v40  ;;  %v431_v45 = vrot.slane %v430_v43, 2 }
  0xb9   : > { %v423_v46 = vrot.slane %v422_v44, 1  ;;  %v432_v47 = vadd.f32 %v431_v45, %v430_v43 }
  0xbb   : > { %v424_v48 = vadd.f32 %v423_v46, %v422_v44  ;;  %v433_v49 = vrot.slane %v432_v47, 1 }
  0xbd   : > { %426 = vst.msk [vmem:[%s209_s13] sm:$0x1] %vm425_vm3, %v424_v48  ;;  %v434_v50 = vadd.f32 %v433_v49, %v432_v47 }
  0xbf   : > { %435 = vst.msk [vmem:[%s212_s18] sm:$0x1] %vm425_vm3, %v434_v50 }
  0xc0 PF: > { %s15_s15 = sadd.s32 1, %s654_s15  }
  0xc1   : > { %p12_p4 = scmp.ge.s32.totalorder %s15_s15, 10  }
  0xc3   :  { %14 = sbr.rel (!%p12_p4) target bundleno = 1 (0x1), region = 82 }

// kernel: tile.272
= control target key start
LH: loop header
LB: loop body
LE: loop exit
PB: predicated region body
PF: predicated region fallthrough
CT: control target
= control target key end

     0   :  { %s22_s0 = inlined_call_operand.vmem [shape: f32[128], index: 0, kind: input, shape index: {}]   ;;  %s23_s1 = inlined_call_operand.vmem [shape: f32[8,128], index: 1, kind: output, shape index: {}]  }
   0x1   :  { %v4_v0 = vld [vmem:[%s22_s0] ss:$0 sm:$0xff] }
   0x2   :  { %5 = vst [vmem:[%s23_s1] sm:$0xff] %v4_v0 }

// kernel: audio_encoder_forward.36
= control target key start
LH: loop header
LB: loop body
LE: loop exit
PB: predicated region body
PF: predicated region fallthrough
CT: control target
= control target key end

     0   :  { %s708_s24 = smov 0   ;;  %s710_s25 = smov 0   ;;  %s775_s0 = inlined_call_operand.vmem [shape: bf16[2,4,512], index: 0, kind: input, shape index: {}]   ;;  %s776_s1 = inlined_call_operand.vmem [shape: bf16[2,4,512], index: 1, kind: input, shape index: {}]   ;;  %s777_s2 = inlined_call_operand.vmem [shape: f32[1,512], index: 2, kind: input, shape index: {}]   ;;  %s778_s3 = inlined_call_operand.vmem [shape: f32[1,512], index: 3, kind: input, shape index: {}]   ;;  %s779_s4 = inlined_call_operand.vmem [shape: f32[2,1,512], index: 4, kind: input, shape index: {}]   ;;  %s780_s5 = inlined_call_operand.vmem [shape: f32[1,512], index: 5, kind: input, shape index: {}]   ;;  %s781_s6 = inlined_call_operand.vmem [shape: f32[1,512], index: 6, kind: input, shape index: {}]   ;;  %s782_s7 = inlined_call_operand.vmem [shape: bf16[2,4,512], index: 7, kind: output, shape index: {}]  }
   0x1   :  { %s712_s26 = smov 0  }
   0x2 LB: > { %s29_s27 = sadd.s32 1, %s662_s25  ;;  %p607_p0 = scmp.ge.s32.totalorder %s666_s26, 1  ;;  %s666_s26 = sphi %s712_s26, %s17_s26   ;;  %s662_s25 = sphi %s710_s25, %s784_s25   ;;  %s658_s24 = sphi %s708_s24, %s783_s24  }
   0x3   : > { %p31_p1 = scmp.ge.s32.totalorder %s29_s27, 2  ;;  %p282_p2 = scmp.lt.s32.totalorder %s666_s26, 3 }
   0x5   : > { %s786_s27 = smov (%p31_p1, %s29_s27), 0  ;;  %p283_p3 = pnand %p607_p0, %p282_p2 }
   0x6   : > { %p335_p4 = scmp.lt.s32.totalorder (!%p283_p3), %s658_s24, 1 }
   0x7   : > { %286 = sbr.rel (%p283_p3) target bundleno = 50 (0x32), region = 48 }
   0xc   : > { %v369_v0 = vld [vmem:[%s777_s2] sm:$0xf]  ;;  %vm377_vm0 = vcmask 1043456   ;;  %s788_s24 = smov (!%p335_p4, %s658_s24), 1  ;;  %vm467_vm1 = vcmask 1041408   ;;  %vm471_vm2 = vcmask 1045508  }
   0xd   : > { %v384_v1 = vld [vmem:[%s778_s3] sm:$0xf]  ;;  %v371_v2 = vperm.slane %v369_v0, 0  ;;  %v372_v3 = vperm.slane %v369_v0, 1  ;;  %v373_v10 = vperm.slane %v369_v0, 2  ;;  %s738_s13 = sshll.u32 %s788_s24, 3 }
   0xe   : > { %v386_v4 = vperm.slane %v384_v1, 0  ;;  %v387_v5 = vperm.slane %v384_v1, 1  ;;  %v401_v6 = vld [vmem:[%s780_s5] sm:$0xf]  ;;  %s612_s14 = sshll.u32 %s788_s24, 2  ;;  %v374_v16 = vperm.slane %v369_v0, 3  ;;  %s343_s17 = scalar_lea.vmem %s775_s0, %s738_s13 }
   0xf   : > { %v403_v7 = vperm.slane %v401_v6, 0  ;;  %v404_v8 = vperm.slane %v401_v6, 1  ;;  %v415_v9 = vld [vmem:[%s781_s6] sm:$0xf]  ;;  %v375_v11 = vrot.slane %v372_v3, 4  ;;  %v388_v17 = vperm.slane %v384_v1, 2  ;;  %s352_s20 = scalar_lea.vmem %s776_s1, %s738_s13  ;;  %s356_s23 = scalar_lea.vmem %s779_s4, %s612_s14 }
  0x10   : > { %v390_v12 = vrot.slane %v387_v5, 4  ;;  %v417_v13 = vperm.slane %v415_v9, 0  ;;  %v418_v14 = vperm.slane %v415_v9, 1  ;;  %v389_v18 = vperm.slane %v384_v1, 3  ;;  %v366_v23 = vld [vmem:[%s343_s17] sm:$0xff]  ;;  %s365_s29 = scalar_lea.vmem %s782_s7, %s738_s13 }
  0x11   : > { %v407_v15 = vrot.slane %v404_v8, 4  ;;  %v378_v19 = vsel %vm377_vm0, %v371_v2, %v375_v11  ;;  %v405_v22 = vperm.slane %v401_v6, 2  ;;  %v398_v24 = vld [vmem:[%s352_s20] sm:$0xff]  ;;  %v376_v26 = vrot.slane %v374_v16, 4 }
  0x12   : > { %v392_v20 = vsel %vm377_vm0, %v386_v4, %v390_v12  ;;  %v421_v21 = vrot.slane %v418_v14, 4  ;;  %v391_v27 = vrot.slane %v389_v18, 4  ;;  %v406_v28 = vperm.slane %v401_v6, 3  ;;  %v429_v32 = vld [vmem:[%s356_s23] sm:$0xf] }
  0x13   : > { %v409_v25 = vsel %vm377_vm0, %v403_v7, %v407_v15  ;;  %v367_v29 = vunpack.c.l.bf16 %v366_v23  ;;  %v399_v30 = vunpack.c.l.bf16 %v398_v24  ;;  %v368_v33 = vunpack.c.h.bf16 %v366_v23 }
  0x14   : > { %v423_v31 = vsel %vm377_vm0, %v417_v13, %v421_v21  ;;  %v431_v34 = vperm.slane %v429_v32, 0  ;;  %v432_v35 = vperm.slane %v429_v32, 1  ;;  %v379_v36 = vsel %vm377_vm0, %v373_v10, %v376_v26 }
  0x15   : > { %v393_v37 = vsel %vm377_vm0, %v388_v17, %v391_v27  ;;  %v382_v38 = vmul.f32 %v378_v19, %v367_v29  ;;  %v413_v39 = vmul.f32 %v409_v25, %v399_v30  ;;  %v383_v40 = vmul.f32 %v379_v36, %v368_v33 }
  0x16   : > { %v400_v41 = vunpack.c.h.bf16 %v398_v24  ;;  %v435_v42 = vrot.slane %v432_v35, 4  ;;  %v408_v43 = vrot.slane %v406_v28, 4  ;;  %v419_v44 = vperm.slane %v415_v9, 2 }
  0x17   : > { %v420_v45 = vperm.slane %v415_v9, 3  ;;  %v396_v46 = vadd.f32 %v392_v20, %v382_v38  ;;  %v427_v47 = vadd.f32 %v423_v31, %v413_v39  ;;  %v433_v48 = vperm.slane %v429_v32, 2 }
  0x18   : > { %v437_v49 = vsel %vm377_vm0, %v431_v34, %v435_v42  ;;  %v410_v50 = vsel %vm377_vm0, %v405_v22, %v408_v43  ;;  %v434_v52 = vperm.slane %v429_v32, 3  ;;  %v397_v54 = vadd.f32 %v393_v37, %v383_v40 }
  0x19   : > { %v422_v51 = vrot.slane %v420_v45, 4  ;;  %v441_v53 = vmul.f32 %v437_v49, %v396_v46  ;;  %v414_v55 = vmul.f32 %v410_v50, %v400_v41 }
  0x1a   : > { %v436_v57 = vrot.slane %v434_v52, 4 }
  0x1b   : > { %v424_v56 = vsel %vm377_vm0, %v419_v44, %v422_v51  ;;  %v443_v58 = vadd.f32 %v441_v53, %v427_v47 }
  0x1c   : > { %v428_v59 = vadd.f32 %v424_v56, %v414_v55  ;;  %v438_v60 = vsel %vm377_vm0, %v433_v48, %v436_v57 }
  0x1d   : > { %v445_v61 = vmax.f32 %v443_v58, 0.0  ;;  %v442_v62 = vmul.f32 %v438_v60, %v397_v54 }
  0x1f   : > { %449 = vst [vmem:[#allocation1] ss:$2 sm:$0xff] %v445_v61  ;;  %v444_v63 = vadd.f32 %v442_v62, %v428_v59 }
  0x21   : > { %v446_v0 = vmax.f32 %v444_v63, 0.0 }
  0x23   : > { %451 = vst [vmem:[#allocation1 + $0x10] ss:$2 sm:$0xff] %v446_v0 }
  0x26   : > { %v452_v1 = vld.sshfl [vmem:[#allocation1] sm:$0xff pattern:$0x75316420]  ;;  %v453_v2 = vld.sshfl [vmem:[#allocation1 + $0x8] sm:$0xff pattern:$0x75316420] }
  0x27   : > { %v460_v3 = vpack.c.bf16 %v453_v2, %v452_v1 }
  0x29   : > { %v464_v4 = vrot.slane %v460_v3, 2 }
  0x2a   : > { %v454_v5 = vld.sshfl [vmem:[#allocation1 + $0x10] sm:$0xff pattern:$0x75316420]  ;;  %v455_v6 = vld.sshfl [vmem:[#allocation1 + $0x18] sm:$0xff pattern:$0x75316420] }
  0x2b   : > { %v461_v7 = vpack.c.bf16 %v455_v6, %v454_v5  ;;  %v470_v10 = vsel %vm467_vm1, %v460_v3, %v464_v4 }
  0x2d   : > { %v465_v8 = vrot.slane %v461_v7, 4  ;;  %v466_v9 = vrot.slane %v461_v7, 6 }
  0x2f   : > { %v474_v11 = vsel %vm471_vm2, %v465_v8, %v466_v9 }
  0x30   : > { %v475_v12 = vsel %vm377_vm0, %v470_v10, %v474_v11 }
  0x31   : > { %477 = vst [vmem:[%s365_s29] sm:$0xff] %v475_v12 }
  0x32 PF: > { %s17_s26 = sadd.s32 1, %s666_s26   ;;  %s783_s24 = smov %s662_s25 }
  0x33   : > { %p14_p5 = scmp.ge.s32.totalorder %s17_s26, 4   ;;  %s784_s25 = smov %s786_s27 }
  0x35   :  { %16 = sbr.rel (!%p14_p5) target bundleno = 2 (0x2), region = 85 }

// kernel: audio_encoder_forward.34
= control target key start
LH: loop header
LB: loop body
LE: loop exit
PB: predicated region body
PF: predicated region fallthrough
CT: control target
= control target key end

     0   :  { %s947_s15 = smov 0   ;;  %s1096_s0 = inlined_call_operand.vmem [shape: bf16[64,576], index: 0, kind: input, shape index: {}]   ;;  %s1097_s1 = inlined_call_operand.vmem [shape: bf16[576,64], index: 1, kind: input, shape index: {}]   ;;  %s1098_s2 = inlined_call_operand.vmem [shape: bf16[64,64], index: 2, kind: output, shape index: {0}]   ;;  %s1099_s3 = inlined_call_operand.vmem [shape: f32[8,1,64], index: 3, kind: output, shape index: {1}]   ;;  %s1100_s4 = inlined_call_operand.vmem [shape: f32[8,1,64], index: 4, kind: output, shape index: {2}]  }
   0x1 LB: > { %s715_s16 = sadd.s32 4294967295, %s920_s15   ;;  %p719_p0 = scmp.ge.s32.totalorder %s920_s15, 1  ;;  %s920_s15 = sphi %s947_s15, %s15_s15  }
   0x2   : > { %p167_p1 = scmp.lt.s32.totalorder %s920_s15, 9 }
   0x4   : > { %p168_p2 = pnand %p719_p0, %p167_p1 }
   0x5   : > { %p198_p3 = scmp.lt.s32.totalorder (!%p168_p2), %s715_s16, 7 }
   0x6   : > { %171 = sbr.rel (%p168_p2) target bundleno = 203 (0xcb), region = 28 }
   0xb   : > { %v876_v0 = vld [vmem:[%s1097_s1 + $0x38] sm:$0xff]  ;;  %v875_v4 = vld [vmem:[%s1097_s1 + $0x30] sm:$0xff]  ;;  %v874_v8 = vld [vmem:[%s1097_s1 + $0x28] sm:$0xff]  ;;  %s1102_s16 = smov (!%p198_p3, %s715_s16), 7  ;;  %vm522_vm0 = vcmask 523264   ;;  %vm592_vm1 = vcmask 519168  }
   0xc   : > { %v884_v1 = vld [vmem:[%s1097_s1 + $0x78] sm:$0xff]  ;;  %526 = vmatpush.bf16.msra.mxu0 %v876_v0  ;;  %v883_v5 = vld [vmem:[%s1097_s1 + $0x70] sm:$0xff]  ;;  %v882_v9 = vld [vmem:[%s1097_s1 + $0x68] sm:$0xff]  ;;  %s905_s7 = smul.u32 20, %s1102_s16  ;;  %s209_s27 = scalar_lea.vmem %s1099_s3, %s1102_s16  ;;  %vm601_vm2 = vcmask 516096  }
   0xd   : > { %v892_v2 = vld [vmem:[%s1097_s1 + $0xb8] sm:$0xff]  ;;  %539 = vmatpush.bf16.msra.mxu1 %v884_v1  ;;  %v891_v6 = vld [vmem:[%s1097_s1 + $0xb0] sm:$0xff]  ;;  %v890_v10 = vld [vmem:[%s1097_s1 + $0xa8] sm:$0xff]  ;;  %s212_s30 = scalar_lea.vmem %s1100_s4, %s1102_s16 }
   0xe   : > { %v900_v3 = vld [vmem:[%s1097_s1 + $0xf8] sm:$0xff]  ;;  %552 = vmatpush.bf16.msra.mxu2 %v892_v2  ;;  %v899_v7 = vld [vmem:[%s1097_s1 + $0xf0] sm:$0xff]  ;;  %v898_v11 = vld [vmem:[%s1097_s1 + $0xe8] sm:$0xff]  ;;  %s1037_s20 = scalar_lea.vmem %s1096_s0, %s905_s7 }
   0xf   : > { %565 = vmatpush.bf16.msra.mxu3 %v900_v3  ;;  %v873_v12 = vld [vmem:[%s1097_s1 + $0x20] sm:$0xff]  ;;  %v872_v16 = vld [vmem:[%s1097_s1 + $0x18] sm:$0xff]  ;;  %v871_v20 = vld [vmem:[%s1097_s1 + $0x10] sm:$0xff] }
  0x10   : > { %527 = vmatpush.bf16.msra.mxu0 %v875_v4  ;;  %v881_v13 = vld [vmem:[%s1097_s1 + $0x60] sm:$0xff]  ;;  %v880_v17 = vld [vmem:[%s1097_s1 + $0x58] sm:$0xff]  ;;  %v879_v21 = vld [vmem:[%s1097_s1 + $0x50] sm:$0xff] }
  0x11   : > { %540 = vmatpush.bf16.msra.mxu1 %v883_v5  ;;  %v889_v14 = vld [vmem:[%s1097_s1 + $0xa0] sm:$0xff]  ;;  %v888_v18 = vld [vmem:[%s1097_s1 + $0x98] sm:$0xff]  ;;  %v887_v22 = vld [vmem:[%s1097_s1 + $0x90] sm:$0xff] }
  0x12   : > { %553 = vmatpush.bf16.msra.mxu2 %v891_v6  ;;  %v897_v15 = vld [vmem:[%s1097_s1 + $0xe0] sm:$0xff]  ;;  %v896_v19 = vld [vmem:[%s1097_s1 + $0xd8] sm:$0xff]  ;;  %v895_v23 = vld [vmem:[%s1097_s1 + $0xd0] sm:$0xff] }
  0x13   : > { %566 = vmatpush.bf16.msra.mxu3 %v899_v7  ;;  %v870_v24 = vld [vmem:[%s1097_s1 + $0x8] sm:$0xff]  ;;  %v214_v26 = vld [vmem:[%s1037_s20] sm:$0xff]  ;;  %v904_v38 = vld [vmem:[%s1097_s1 + $0x118] sm:$0xff] }
  0x14   : > { %528 = vmatpush.bf16.msra.mxu0 %v874_v8  ;;  %v878_v25 = vld [vmem:[%s1097_s1 + $0x48] sm:$0xff]  ;;  %v292_v30 = vunpack.c.l.b16 %v214_v26  ;;  %v293_v31 = vunpack.c.h.b16 %v214_v26  ;;  %v869_v32 = vld [vmem:[%s1097_s1] sm:$0xff]  ;;  %v903_v43 = vld [vmem:[%s1097_s1 + $0x110] sm:$0xff] }
  0x15   : > { %541 = vmatpush.bf16.msra.mxu1 %v882_v9  ;;  %v886_v27 = vld [vmem:[%s1097_s1 + $0x88] sm:$0xff]  ;;  %v877_v33 = vld [vmem:[%s1097_s1 + $0x40] sm:$0xff]  ;;  %v216_v45 = vld [vmem:[%s1037_s20 + $0x10] sm:$0xf] }
  0x16   : > { %554 = vmatpush.bf16.msra.mxu2 %v890_v10  ;;  %v894_v28 = vld [vmem:[%s1097_s1 + $0xc8] sm:$0xff]  ;;  %v885_v36 = vld [vmem:[%s1097_s1 + $0x80] sm:$0xff]  ;;  %v297_v39 = vpack.c.b16 %v292_v30, %v292_v30  ;;  %v298_v40 = vpack.c.b16 %v293_v31, %v293_v31  ;;  %v296_v47 = vunpack.c.l.b16 %v216_v45 }
  0x17   : > { %567 = vmatpush.bf16.msra.mxu3 %v898_v11  ;;  %v215_v29 = vld [vmem:[%s1037_s20 + $0x8] sm:$0xff]  ;;  %v893_v37 = vld [vmem:[%s1097_s1 + $0xc0] sm:$0xff]  ;;  %s721_s20 = sshll.u32 %s1102_s16, 2 }
  0x18   : > { %529 = vmatpush.bf16.msra.mxu0 %v873_v12  ;;  %v294_v34 = vunpack.c.l.b16 %v215_v29  ;;  %v295_v35 = vunpack.c.h.b16 %v215_v29  ;;  %v902_v44 = vld [vmem:[%s1097_s1 + $0x108] sm:$0xff]  ;;  %v901_v46 = vld [vmem:[%s1097_s1 + $0x100] sm:$0xff]  ;;  %v301_v48 = vpack.c.b16 %v296_v47, %v296_v47  ;;  %s206_s24 = scalar_lea.vmem %s1098_s2, %s721_s20 }
  0x19   : > { %542 = vmatpush.bf16.msra.mxu1 %v881_v13 }
  0x1a   : > { %555 = vmatpush.bf16.msra.mxu2 %v889_v14  ;;  %v299_v41 = vpack.c.b16 %v294_v34, %v294_v34  ;;  %v300_v42 = vpack.c.b16 %v295_v35, %v295_v35 }
  0x1b   : > { %568 = vmatpush.bf16.msra.mxu3 %v897_v15 }
  0x1c   : > { %530 = vmatpush.bf16.msra.mxu0 %v872_v16 }
  0x1d   : > { %543 = vmatpush.bf16.msra.mxu1 %v880_v17 }
  0x1e   : > { %556 = vmatpush.bf16.msra.mxu2 %v888_v18 }
  0x1f   : > { %569 = vmatpush.bf16.msra.mxu3 %v896_v19 }
  0x20   : > { %531 = vmatpush.bf16.msra.mxu0 %v871_v20 }
  0x21   : > { %544 = vmatpush.bf16.msra.mxu1 %v879_v21 }
  0x22   : > { %557 = vmatpush.bf16.msra.mxu2 %v887_v22 }
  0x23   : > { %570 = vmatpush.bf16.msra.mxu3 %v895_v23 }
  0x24   : > { %532 = vmatpush.bf16.msra.mxu0 %v870_v24 }
  0x25   : > { %545 = vmatpush.bf16.msra.mxu1 %v878_v25 }
  0x26   : > { %558 = vmatpush.bf16.msra.mxu2 %v886_v27 }
  0x27   : > { %571 = vmatpush.bf16.msra.mxu3 %v894_v28 }
  0x28   : > { %533 = vmatpush.bf16.msra.mxu0 %v869_v32 }
  0x29   : > { %546 = vmatpush.bf16.msra.mxu1 %v877_v33 }
  0x2a   : > { %559 = vmatpush.bf16.msra.mxu2 %v885_v36 }
  0x2b   : > { %572 = vmatpush.bf16.msra.mxu3 %v893_v37  ;;  %534 = vmatmul.bf16.vlgmr.msra.gmra.mxu0 %v297_v39 }
  0x2c   : > { %582 = vmatpush.bf16.msrb.mxu0 %v904_v38  ;;  %547 = vmatmul.bf16.vlgmr.msra.gmra.mxu1 %v298_v40 }
  0x2d   : > { %560 = vmatmul.bf16.vlgmr.msra.gmra.mxu2 %v299_v41 }
  0x2e   : > { %573 = vmatmul.bf16.vlgmr.msra.gmra.mxu3 %v300_v42 }
  0x30   : > { %583 = vmatpush.bf16.msrb.mxu0 %v903_v43 }
  0x34   : > { %584 = vmatpush.bf16.msrb.mxu0 %v902_v44 }
  0x38   : > { %585 = vmatpush.bf16.msrb.mxu0 %v901_v46 }
  0x3b   : > { %866 = vmatmul.msk.bf16.vlgmr.msrb.gmra.mxu0 %vm522_vm0, %v301_v48 }
  0xa8   : > { %v535_v49 = vpop.f32.mrf.mxu0 }
  0xa9   : > { %v548_v50 = vpop.f32.mrf.mxu1 }
  0xaa   : > { %v549_v55 = vadd.f32 %v548_v50, %v535_v49 }
  0xb0   : > { %v561_v51 = vpop.f32.mrf.mxu2  ;;  %v537_v53 = vpop.f32.mrf.mxu0 }
  0xb1   : > { %v574_v52 = vpop.f32.mrf.mxu3  ;;  %v550_v54 = vpop.f32.mrf.mxu1  ;;  %v562_v56 = vadd.f32 %v561_v51, %v549_v55 }
  0xb3   : > { %v575_v57 = vadd.f32 %v574_v52, %v562_v56 }
  0xb8   : > { %v563_v58 = vpop.f32.mrf.mxu2  ;;  %v587_v60 = vpop.f32.mrf.mxu0 }
  0xb9   : > { %v576_v59 = vpop.f32.mrf.mxu3  ;;  %v588_v61 = vadd.f32 %v587_v60, %v575_v57 }
  0xbb   : > { %v591_v62 = vpack.c.bf16 %v588_v61, %v588_v61  ;;  %v594_v63 = vsel %vm522_vm0, %v588_v61, 0.0  ;;  %v603_v0 = vmul.f32 %v588_v61, %v588_v61 }
  0xbc   : > { %v595_v1 = vrot.slane %v594_v63, 4 }
  0xbd   : > { %593 = vst.msk [vmem:[%s206_s24] sm:$0xf] %vm592_vm1, %v591_v62  ;;  %v604_v2 = vsel %vm522_vm0, %v603_v0, 0.0 }
  0xbe   : > { %v596_v3 = vadd.f32 %v595_v1, %v594_v63  ;;  %v605_v4 = vrot.slane %v604_v2, 4 }
  0xc0   : > { %v597_v5 = vrot.slane %v596_v3, 2  ;;  %v606_v6 = vadd.f32 %v605_v4, %v604_v2  ;;  %v589_v7 = vpop.f32.mrf.mxu0 }
  0xc2   : > { %v598_v8 = vadd.f32 %v597_v5, %v596_v3  ;;  %v607_v9 = vrot.slane %v606_v6, 2 }
  0xc4   : > { %v599_v10 = vrot.slane %v598_v8, 1  ;;  %v608_v11 = vadd.f32 %v607_v9, %v606_v6 }
  0xc6   : > { %v600_v12 = vadd.f32 %v599_v10, %v598_v8  ;;  %v609_v13 = vrot.slane %v608_v11, 1 }
  0xc8   : > { %602 = vst.msk [vmem:[%s209_s27] sm:$0x1] %vm601_vm2, %v600_v12  ;;  %v610_v14 = vadd.f32 %v609_v13, %v608_v11 }
  0xca   : > { %611 = vst.msk [vmem:[%s212_s30] sm:$0x1] %vm601_vm2, %v610_v14 }
  0xcb PF: > { %s15_s15 = sadd.s32 1, %s920_s15  }
  0xcc   : > { %p12_p4 = scmp.ge.s32.totalorder %s15_s15, 10  }
  0xce   :  { %14 = sbr.rel (!%p12_p4) target bundleno = 1 (0x1), region = 82 }

// kernel: audio_encoder_forward.40
= control target key start
LH: loop header
LB: loop body
LE: loop exit
PB: predicated region body
PF: predicated region fallthrough
CT: control target
= control target key end

     0   :  { %s452_s15 = smov 0   ;;  %s492_s0 = inlined_call_operand.vmem [shape: bf16[64,64], index: 0, kind: input, shape index: {}]   ;;  %s493_s1 = inlined_call_operand.vmem [shape: bf16[64,128], index: 1, kind: input, shape index: {}]   ;;  %s494_s2 = inlined_call_operand.vmem [shape: bf16[64,128], index: 2, kind: output, shape index: {0}]   ;;  %s495_s3 = inlined_call_operand.vmem [shape: f32[8,1,128], index: 3, kind: output, shape index: {1}]   ;;  %s496_s4 = inlined_call_operand.vmem [shape: f32[8,1,128], index: 4, kind: output, shape index: {2}]  }
   0x1 LB: > { %s381_s16 = sadd.s32 4294967295, %s425_s15   ;;  %p385_p0 = scmp.ge.s32.totalorder %s425_s15, 1  ;;  %s425_s15 = sphi %s452_s15, %s15_s15  }
   0x2   : > { %p166_p1 = scmp.lt.s32.totalorder %s425_s15, 9 }
   0x4   : > { %p167_p2 = pnand %p385_p0, %p166_p1 }
   0x5   : > { %p196_p3 = scmp.lt.s32.totalorder (!%p167_p2), %s381_s16, 7 }
   0x6   : > { %170 = sbr.rel (%p167_p2) target bundleno = 168 (0xa8), region = 28 }
   0xb   : > { %v410_v0 = vld [vmem:[%s493_s1 + $0x18] sm:$0xff]  ;;  %v409_v1 = vld [vmem:[%s493_s1 + $0x10] sm:$0xff]  ;;  %s498_s16 = smov (!%p196_p3, %s381_s16), 7  ;;  %v408_v2 = vld [vmem:[%s493_s1 + $0x8] sm:$0xff]  ;;  %vm244_vm0 = vcmask 523264  }
   0xc   : > { %252 = vmatpush.bf16.msra.mxu0 %v410_v0  ;;  %s386_s23 = sshll.u32 %s498_s16, 2  ;;  %v407_v3 = vld [vmem:[%s493_s1] sm:$0xff]  ;;  %s206_s8 = scalar_lea.vmem %s495_s3, %s498_s16 }
   0xd   : > { %s199_s28 = scalar_lea.vmem %s492_s0, %s386_s23  ;;  %s203_s5 = scalar_lea.vmem %s494_s2, %s386_s23 }
   0xe   : > { %v211_v4 = vld [vmem:[%s199_s28] sm:$0xf]  ;;  %s209_s11 = scalar_lea.vmem %s496_s4, %s498_s16 }
  0x10   : > { %253 = vmatpush.bf16.msra.mxu0 %v409_v1 }
  0x14   : > { %254 = vmatpush.bf16.msra.mxu0 %v408_v2 }
  0x18   : > { %255 = vmatpush.bf16.msra.mxu0 %v407_v3 }
  0x1b   : > { %404 = vmatmul.msk.bf16.vlgmr.msra.gmra.mxu0 %vm244_vm0, %v211_v4 }
  0x98   : > { %v257_v5 = vpop.f32.mrf.mxu0 }
  0x99   : > { %v261_v6 = vpack.c.bf16 %v257_v5, %v257_v5  ;;  %v263_v7 = vrot.slane %v257_v5, 4  ;;  %v270_v8 = vmul.f32 %v257_v5, %v257_v5 }
  0x9b   : > { %262 = vst [vmem:[%s203_s5] sm:$0xf] %v261_v6  ;;  %v264_v9 = vadd.f32 %v263_v7, %v257_v5  ;;  %v271_v10 = vrot.slane %v270_v8, 4 }
  0x9d   : > { %v265_v11 = vrot.slane %v264_v9, 2  ;;  %v272_v12 = vadd.f32 %v271_v10, %v270_v8 }
  0x9f   : > { %v266_v13 = vadd.f32 %v265_v11, %v264_v9  ;;  %v273_v14 = vrot.slane %v272_v12, 2 }
  0xa0   : > { %v259_v15 = vpop.f32.mrf.mxu0 }
  0xa1   : > { %v267_v16 = vrot.slane %v266_v13, 1  ;;  %v274_v17 = vadd.f32 %v273_v14, %v272_v12 }
  0xa3   : > { %v268_v18 = vadd.f32 %v267_v16, %v266_v13  ;;  %v275_v19 = vrot.slane %v274_v17, 1 }
  0xa5   : > { %269 = vst [vmem:[%s206_s8] sm:$0x1] %v268_v18  ;;  %v276_v20 = vadd.f32 %v275_v19, %v274_v17 }
  0xa7   : > { %277 = vst [vmem:[%s209_s11] sm:$0x1] %v276_v20 }
  0xa8 PF: > { %s15_s15 = sadd.s32 1, %s425_s15  }
  0xa9   : > { %p12_p4 = scmp.ge.s32.totalorder %s15_s15, 10  }
  0xab   :  { %14 = sbr.rel (!%p12_p4) target bundleno = 1 (0x1), region = 82 }

// kernel: audio_encoder_forward.37
= control target key start
LH: loop header
LB: loop body
LE: loop exit
PB: predicated region body
PF: predicated region fallthrough
CT: control target
= control target key end

     0   :  { %s944_s15 = smov 0   ;;  %s1090_s0 = inlined_call_operand.vmem [shape: bf16[64,576], index: 0, kind: input, shape index: {}]   ;;  %s1091_s1 = inlined_call_operand.vmem [shape: bf16[576,128], index: 1, kind: input, shape index: {}]   ;;  %s1092_s2 = inlined_call_operand.vmem [shape: bf16[64,128], index: 2, kind: output, shape index: {0}]   ;;  %s1093_s3 = inlined_call_operand.vmem [shape: f32[8,1,128], index: 3, kind: output, shape index: {1}]   ;;  %s1094_s4 = inlined_call_operand.vmem [shape: f32[8,1,128], index: 4, kind: output, shape index: {2}]  }
   0x1 LB: > { %s712_s16 = sadd.s32 4294967295, %s917_s15   ;;  %p716_p0 = scmp.ge.s32.totalorder %s917_s15, 1  ;;  %s917_s15 = sphi %s944_s15, %s15_s15  }
   0x2   : > { %p167_p1 = scmp.lt.s32.totalorder %s917_s15, 9 }
   0x4   : > { %p168_p2 = pnand %p716_p0, %p167_p1 }
   0x5   : > { %p198_p3 = scmp.lt.s32.totalorder (!%p168_p2), %s712_s16, 7 }
   0x6   : > { %171 = sbr.rel (%p168_p2) target bundleno = 204 (0xcc), region = 28 }
   0xb   : > { %v873_v0 = vld [vmem:[%s1091_s1 + $0x38] sm:$0xff]  ;;  %v872_v4 = vld [vmem:[%s1091_s1 + $0x30] sm:$0xff]  ;;  %v871_v8 = vld [vmem:[%s1091_s1 + $0x28] sm:$0xff]  ;;  %s1096_s16 = smov (!%p198_p3, %s712_s16), 7  ;;  %vm522_vm0 = vcmask 523264  }
   0xc   : > { %v881_v1 = vld [vmem:[%s1091_s1 + $0x78] sm:$0xff]  ;;  %526 = vmatpush.bf16.msra.mxu0 %v873_v0  ;;  %v880_v5 = vld [vmem:[%s1091_s1 + $0x70] sm:$0xff]  ;;  %v879_v9 = vld [vmem:[%s1091_s1 + $0x68] sm:$0xff]  ;;  %s902_s7 = smul.u32 20, %s1096_s16  ;;  %s209_s27 = scalar_lea.vmem %s1093_s3, %s1096_s16 }
   0xd   : > { %v889_v2 = vld [vmem:[%s1091_s1 + $0xb8] sm:$0xff]  ;;  %539 = vmatpush.bf16.msra.mxu1 %v881_v1  ;;  %v888_v6 = vld [vmem:[%s1091_s1 + $0xb0] sm:$0xff]  ;;  %v887_v10 = vld [vmem:[%s1091_s1 + $0xa8] sm:$0xff]  ;;  %s212_s30 = scalar_lea.vmem %s1094_s4, %s1096_s16 }
   0xe   : > { %v897_v3 = vld [vmem:[%s1091_s1 + $0xf8] sm:$0xff]  ;;  %552 = vmatpush.bf16.msra.mxu2 %v889_v2  ;;  %v896_v7 = vld [vmem:[%s1091_s1 + $0xf0] sm:$0xff]  ;;  %v895_v11 = vld [vmem:[%s1091_s1 + $0xe8] sm:$0xff]  ;;  %s1034_s20 = scalar_lea.vmem %s1090_s0, %s902_s7 }
   0xf   : > { %565 = vmatpush.bf16.msra.mxu3 %v897_v3  ;;  %v870_v12 = vld [vmem:[%s1091_s1 + $0x20] sm:$0xff]  ;;  %v869_v16 = vld [vmem:[%s1091_s1 + $0x18] sm:$0xff]  ;;  %v868_v20 = vld [vmem:[%s1091_s1 + $0x10] sm:$0xff] }
  0x10   : > { %527 = vmatpush.bf16.msra.mxu0 %v872_v4  ;;  %v878_v13 = vld [vmem:[%s1091_s1 + $0x60] sm:$0xff]  ;;  %v877_v17 = vld [vmem:[%s1091_s1 + $0x58] sm:$0xff]  ;;  %v876_v21 = vld [vmem:[%s1091_s1 + $0x50] sm:$0xff] }
  0x11   : > { %540 = vmatpush.bf16.msra.mxu1 %v880_v5  ;;  %v886_v14 = vld [vmem:[%s1091_s1 + $0xa0] sm:$0xff]  ;;  %v885_v18 = vld [vmem:[%s1091_s1 + $0x98] sm:$0xff]  ;;  %v884_v22 = vld [vmem:[%s1091_s1 + $0x90] sm:$0xff] }
  0x12   : > { %553 = vmatpush.bf16.msra.mxu2 %v888_v6  ;;  %v894_v15 = vld [vmem:[%s1091_s1 + $0xe0] sm:$0xff]  ;;  %v893_v19 = vld [vmem:[%s1091_s1 + $0xd8] sm:$0xff]  ;;  %v892_v23 = vld [vmem:[%s1091_s1 + $0xd0] sm:$0xff] }
  0x13   : > { %566 = vmatpush.bf16.msra.mxu3 %v896_v7  ;;  %v867_v24 = vld [vmem:[%s1091_s1 + $0x8] sm:$0xff]  ;;  %v214_v26 = vld [vmem:[%s1034_s20] sm:$0xff]  ;;  %v901_v38 = vld [vmem:[%s1091_s1 + $0x118] sm:$0xff] }
  0x14   : > { %528 = vmatpush.bf16.msra.mxu0 %v871_v8  ;;  %v875_v25 = vld [vmem:[%s1091_s1 + $0x48] sm:$0xff]  ;;  %v292_v30 = vunpack.c.l.b16 %v214_v26  ;;  %v293_v31 = vunpack.c.h.b16 %v214_v26  ;;  %v866_v32 = vld [vmem:[%s1091_s1] sm:$0xff]  ;;  %v900_v43 = vld [vmem:[%s1091_s1 + $0x110] sm:$0xff] }
  0x15   : > { %541 = vmatpush.bf16.msra.mxu1 %v879_v9  ;;  %v883_v27 = vld [vmem:[%s1091_s1 + $0x88] sm:$0xff]  ;;  %v874_v33 = vld [vmem:[%s1091_s1 + $0x40] sm:$0xff]  ;;  %v216_v45 = vld [vmem:[%s1034_s20 + $0x10] sm:$0xf] }
  0x16   : > { %554 = vmatpush.bf16.msra.mxu2 %v887_v10  ;;  %v891_v28 = vld [vmem:[%s1091_s1 + $0xc8] sm:$0xff]  ;;  %v882_v36 = vld [vmem:[%s1091_s1 + $0x80] sm:$0xff]  ;;  %v297_v39 = vpack.c.b16 %v292_v30, %v292_v30  ;;  %v298_v40 = vpack.c.b16 %v293_v31, %v293_v31  ;;  %v296_v47 = vunpack.c.l.b16 %v216_v45 }
  0x17   : > { %567 = vmatpush.bf16.msra.mxu3 %v895_v11  ;;  %v215_v29 = vld [vmem:[%s1034_s20 + $0x8] sm:$0xff]  ;;  %v890_v37 = vld [vmem:[%s1091_s1 + $0xc0] sm:$0xff]  ;;  %s718_s20 = sshll.u32 %s1096_s16, 2 }
  0x18   : > { %529 = vmatpush.bf16.msra.mxu0 %v870_v12  ;;  %v294_v34 = vunpack.c.l.b16 %v215_v29  ;;  %v295_v35 = vunpack.c.h.b16 %v215_v29  ;;  %v899_v44 = vld [vmem:[%s1091_s1 + $0x108] sm:$0xff]  ;;  %v898_v46 = vld [vmem:[%s1091_s1 + $0x100] sm:$0xff]  ;;  %v301_v48 = vpack.c.b16 %v296_v47, %v296_v47  ;;  %s206_s24 = scalar_lea.vmem %s1092_s2, %s718_s20 }
  0x19   : > { %542 = vmatpush.bf16.msra.mxu1 %v878_v13 }
  0x1a   : > { %555 = vmatpush.bf16.msra.mxu2 %v886_v14  ;;  %v299_v41 = vpack.c.b16 %v294_v34, %v294_v34  ;;  %v300_v42 = vpack.c.b16 %v295_v35, %v295_v35 }
  0x1b   : > { %568 = vmatpush.bf16.msra.mxu3 %v894_v15 }
  0x1c   : > { %530 = vmatpush.bf16.msra.mxu0 %v869_v16 }
  0x1d   : > { %543 = vmatpush.bf16.msra.mxu1 %v877_v17 }
  0x1e   : > { %556 = vmatpush.bf16.msra.mxu2 %v885_v18 }
  0x1f   : > { %569 = vmatpush.bf16.msra.mxu3 %v893_v19 }
  0x20   : > { %531 = vmatpush.bf16.msra.mxu0 %v868_v20 }
  0x21   : > { %544 = vmatpush.bf16.msra.mxu1 %v876_v21 }
  0x22   : > { %557 = vmatpush.bf16.msra.mxu2 %v884_v22 }
  0x23   : > { %570 = vmatpush.bf16.msra.mxu3 %v892_v23 }
  0x24   : > { %532 = vmatpush.bf16.msra.mxu0 %v867_v24 }
  0x25   : > { %545 = vmatpush.bf16.msra.mxu1 %v875_v25 }
  0x26   : > { %558 = vmatpush.bf16.msra.mxu2 %v883_v27 }
  0x27   : > { %571 = vmatpush.bf16.msra.mxu3 %v891_v28 }
  0x28   : > { %533 = vmatpush.bf16.msra.mxu0 %v866_v32 }
  0x29   : > { %546 = vmatpush.bf16.msra.mxu1 %v874_v33 }
  0x2a   : > { %559 = vmatpush.bf16.msra.mxu2 %v882_v36 }
  0x2b   : > { %572 = vmatpush.bf16.msra.mxu3 %v890_v37  ;;  %534 = vmatmul.bf16.vlgmr.msra.gmra.mxu0 %v297_v39 }
  0x2c   : > { %582 = vmatpush.bf16.msrb.mxu0 %v901_v38  ;;  %547 = vmatmul.bf16.vlgmr.msra.gmra.mxu1 %v298_v40 }
  0x2d   : > { %560 = vmatmul.bf16.vlgmr.msra.gmra.mxu2 %v299_v41 }
  0x2e   : > { %573 = vmatmul.bf16.vlgmr.msra.gmra.mxu3 %v300_v42 }
  0x30   : > { %583 = vmatpush.bf16.msrb.mxu0 %v900_v43 }
  0x34   : > { %584 = vmatpush.bf16.msrb.mxu0 %v899_v44 }
  0x38   : > { %585 = vmatpush.bf16.msrb.mxu0 %v898_v46 }
  0x3b   : > { %863 = vmatmul.msk.bf16.vlgmr.msrb.gmra.mxu0 %vm522_vm0, %v301_v48 }
  0xa8   : > { %v535_v49 = vpop.f32.mrf.mxu0 }
  0xa9   : > { %v548_v50 = vpop.f32.mrf.mxu1 }
  0xaa   : > { %v549_v55 = vadd.f32 %v548_v50, %v535_v49 }
  0xb0   : > { %v561_v51 = vpop.f32.mrf.mxu2  ;;  %v537_v53 = vpop.f32.mrf.mxu0 }
  0xb1   : > { %v574_v52 = vpop.f32.mrf.mxu3  ;;  %v550_v54 = vpop.f32.mrf.mxu1  ;;  %v562_v56 = vadd.f32 %v561_v51, %v549_v55 }
  0xb3   : > { %v575_v57 = vadd.f32 %v574_v52, %v562_v56 }
  0xb8   : > { %v563_v58 = vpop.f32.mrf.mxu2  ;;  %v587_v60 = vpop.f32.mrf.mxu0 }
  0xb9   : > { %v576_v59 = vpop.f32.mrf.mxu3  ;;  %v588_v61 = vadd.f32 %v587_v60, %v575_v57 }
  0xbb   : > { %v591_v62 = vmax.f32 %v588_v61, 0.0 }
  0xbd   : > { %v592_v63 = vpack.c.bf16 %v591_v62, %v591_v62  ;;  %v594_v0 = vrot.slane %v591_v62, 4  ;;  %v601_v1 = vmul.f32 %v591_v62, %v591_v62 }
  0xbf   : > { %593 = vst [vmem:[%s206_s24] sm:$0xf] %v592_v63  ;;  %v595_v2 = vadd.f32 %v594_v0, %v591_v62  ;;  %v602_v3 = vrot.slane %v601_v1, 4 }
  0xc0   : > { %v589_v4 = vpop.f32.mrf.mxu0 }
  0xc1   : > { %v596_v5 = vrot.slane %v595_v2, 2  ;;  %v603_v6 = vadd.f32 %v602_v3, %v601_v1 }
  0xc3   : > { %v597_v7 = vadd.f32 %v596_v5, %v595_v2  ;;  %v604_v8 = vrot.slane %v603_v6, 2 }
  0xc5   : > { %v598_v9 = vrot.slane %v597_v7, 1  ;;  %v605_v10 = vadd.f32 %v604_v8, %v603_v6 }
  0xc7   : > { %v599_v11 = vadd.f32 %v598_v9, %v597_v7  ;;  %v606_v12 = vrot.slane %v605_v10, 1 }
  0xc9   : > { %600 = vst [vmem:[%s209_s27] sm:$0x1] %v599_v11  ;;  %v607_v13 = vadd.f32 %v606_v12, %v605_v10 }
  0xcb   : > { %608 = vst [vmem:[%s212_s30] sm:$0x1] %v607_v13 }
  0xcc PF: > { %s15_s15 = sadd.s32 1, %s917_s15  }
  0xcd   : > { %p12_p4 = scmp.ge.s32.totalorder %s15_s15, 10  }
  0xcf   :  { %14 = sbr.rel (!%p12_p4) target bundleno = 1 (0x1), region = 82 }

// kernel: audio_encoder_forward.38
= control target key start
LH: loop header
LB: loop body
LE: loop exit
PB: predicated region body
PF: predicated region fallthrough
CT: control target
= control target key end

     0   :  { %s140_s0 = inlined_call_operand.vmem [shape: bf16[8,1024], index: 0, kind: input, shape index: {}]   ;;  %s141_s1 = inlined_call_operand.vmem [shape: f32[1,1024], index: 1, kind: input, shape index: {}]   ;;  %s142_s2 = inlined_call_operand.vmem [shape: f32[1,1024], index: 2, kind: input, shape index: {}]   ;;  %s143_s3 = inlined_call_operand.vmem [shape: bf16[8,1024], index: 3, kind: output, shape index: {}]  }
   0x1   :  { %v14_v0 = vld [vmem:[%s140_s0] sm:$0xff]  ;;  %v15_v7 = vld [vmem:[%s140_s0 + $0x8] sm:$0xff]  ;;  %v16_v8 = vld [vmem:[%s140_s0 + $0x10] sm:$0xff] }
   0x2   :  { %v26_v1 = vld [vmem:[%s141_s1] sm:$0xff]  ;;  %v18_v3 = vunpack.c.l.bf16 %v14_v0  ;;  %v19_v4 = vunpack.c.h.bf16 %v14_v0  ;;  %v20_v11 = vunpack.c.l.bf16 %v15_v7  ;;  %v21_v12 = vunpack.c.h.bf16 %v15_v7  ;;  %v17_v21 = vld [vmem:[%s140_s0 + $0x18] sm:$0xff] }
   0x3   :  { %v52_v2 = vld [vmem:[%s142_s2] sm:$0xff]  ;;  %v28_v5 = vperm.slane %v26_v1, 0  ;;  %v29_v6 = vperm.slane %v26_v1, 1  ;;  %v30_v15 = vperm.slane %v26_v1, 2  ;;  %v31_v16 = vperm.slane %v26_v1, 3 }
   0x4   :  { %v54_v9 = vperm.slane %v52_v2, 0  ;;  %v55_v10 = vperm.slane %v52_v2, 1  ;;  %v56_v17 = vperm.slane %v52_v2, 2  ;;  %v57_v18 = vperm.slane %v52_v2, 3 }
   0x5   :  { %v44_v13 = vmul.f32 %v28_v5, %v18_v3  ;;  %v45_v14 = vmul.f32 %v29_v6, %v19_v4  ;;  %v22_v19 = vunpack.c.l.bf16 %v16_v8  ;;  %v23_v20 = vunpack.c.h.bf16 %v16_v8 }
   0x6   :  { %v46_v24 = vmul.f32 %v30_v15, %v20_v11  ;;  %v47_v25 = vmul.f32 %v31_v16, %v21_v12  ;;  %v32_v26 = vperm.slane %v26_v1, 4  ;;  %v33_v27 = vperm.slane %v26_v1, 5 }
   0x7   :  { %v70_v22 = vadd.f32 %v54_v9, %v44_v13  ;;  %v71_v23 = vadd.f32 %v55_v10, %v45_v14  ;;  %v58_v28 = vperm.slane %v52_v2, 4  ;;  %v59_v29 = vperm.slane %v52_v2, 5 }
   0x8   :  { %v72_v31 = vadd.f32 %v56_v17, %v46_v24  ;;  %v73_v32 = vadd.f32 %v57_v18, %v47_v25  ;;  %v24_v33 = vunpack.c.l.bf16 %v17_v21  ;;  %v48_v34 = vmul.f32 %v32_v26, %v22_v19 }
   0x9   :  { %v78_v30 = vpack.c.bf16 %v71_v23, %v70_v22  ;;  %v49_v35 = vmul.f32 %v33_v27, %v23_v20  ;;  %v25_v36 = vunpack.c.h.bf16 %v17_v21  ;;  %v34_v37 = vperm.slane %v26_v1, 6 }
   0xa   :  { %v79_v38 = vpack.c.bf16 %v73_v32, %v72_v31  ;;  %v35_v39 = vperm.slane %v26_v1, 7  ;;  %v60_v40 = vperm.slane %v52_v2, 6  ;;  %v61_v41 = vperm.slane %v52_v2, 7 }
   0xb   :  { %82 = vst [vmem:[%s143_s3] sm:$0xff] %v78_v30  ;;  %v74_v42 = vadd.f32 %v58_v28, %v48_v34  ;;  %v75_v43 = vadd.f32 %v59_v29, %v49_v35  ;;  %v50_v44 = vmul.f32 %v34_v37, %v24_v33 }
   0xc   :  { %83 = vst [vmem:[%s143_s3 + $0x8] sm:$0xff] %v79_v38  ;;  %v51_v45 = vmul.f32 %v35_v39, %v25_v36 }
   0xd   :  { %v80_v46 = vpack.c.bf16 %v75_v43, %v74_v42  ;;  %v76_v47 = vadd.f32 %v60_v40, %v50_v44 }
   0xe   :  { %v77_v48 = vadd.f32 %v61_v41, %v51_v45 }
   0xf   :  { %84 = vst [vmem:[%s143_s3 + $0x10] sm:$0xff] %v80_v46 }
  0x10   :  { %v81_v49 = vpack.c.bf16 %v77_v48, %v76_v47 }
  0x12   :  { %85 = vst [vmem:[%s143_s3 + $0x18] sm:$0xff] %v81_v49 }

// kernel: audio_encoder_forward.41
= control target key start
LH: loop header
LB: loop body
LE: loop exit
PB: predicated region body
PF: predicated region fallthrough
CT: control target
= control target key end

     0   :  { %s850_s24 = smov 0   ;;  %s852_s25 = smov 0   ;;  %s1000_s0 = inlined_call_operand.vmem [shape: bf16[2,4,1024], index: 0, kind: input, shape index: {}]   ;;  %s1001_s1 = inlined_call_operand.vmem [shape: bf16[2,4,1024], index: 1, kind: input, shape index: {}]   ;;  %s1002_s2 = inlined_call_operand.vmem [shape: f32[1,1024], index: 2, kind: input, shape index: {}]   ;;  %s1003_s3 = inlined_call_operand.vmem [shape: f32[1,1024], index: 3, kind: input, shape index: {}]   ;;  %s1004_s4 = inlined_call_operand.vmem [shape: f32[2,1,1024], index: 4, kind: input, shape index: {}]   ;;  %s1005_s5 = inlined_call_operand.vmem [shape: f32[1,1024], index: 5, kind: input, shape index: {}]   ;;  %s1006_s6 = inlined_call_operand.vmem [shape: f32[1,1024], index: 6, kind: input, shape index: {}]   ;;  %s1007_s7 = inlined_call_operand.vmem [shape: f32[2,1,1,1024], index: 7, kind: output, shape index: {}]  }
   0x1   :  { %s854_s26 = smov 0  }
   0x2 LB: > { %s29_s27 = sadd.s32 1, %s804_s25  ;;  %p751_p0 = scmp.ge.s32.totalorder %s808_s26, 1  ;;  %s808_s26 = sphi %s854_s26, %s17_s26   ;;  %s804_s25 = sphi %s852_s25, %s1009_s25   ;;  %s800_s24 = sphi %s850_s24, %s1008_s24  }
   0x3   : > { %p31_p1 = scmp.ge.s32.totalorder %s29_s27, 2  ;;  %p282_p2 = scmp.lt.s32.totalorder %s808_s26, 3 }
   0x5   : > { %s1011_s27 = smov (%p31_p1, %s29_s27), 0  ;;  %p283_p3 = pnand %p751_p0, %p282_p2 }
   0x6   : > { %p334_p4 = scmp.lt.s32.totalorder (!%p283_p3), %s800_s24, 1 }
   0x7   : > { %286 = sbr.rel (%p283_p3) target bundleno = 76 (0x4c), region = 48 }
   0xc   : > { %v871_v0 = vld [vmem:[%s1002_s2] sm:$0xff]  ;;  %vm384_vm0 = vcmask 1043456   ;;  %s1013_s24 = smov (!%p334_p4, %s800_s24), 1  ;;  %vm613_vm1 = vcmask 1040384   ;;  %vm615_vm2 = vcmask 1042434   ;;  %vm617_vm3 = vcmask 1041408  }
   0xd   : > { %v876_v1 = vld [vmem:[%s1003_s3] sm:$0xff]  ;;  %v372_v3 = vperm.slane %v871_v0, 0  ;;  %v373_v4 = vperm.slane %v871_v0, 1  ;;  %v374_v14 = vperm.slane %v871_v0, 2  ;;  %v375_v15 = vperm.slane %v871_v0, 3  ;;  %s760_s13 = sshll.u32 %s1013_s24, 4 }
   0xe   : > { %v881_v2 = vld [vmem:[%s1005_s5] sm:$0xff]  ;;  %v399_v5 = vperm.slane %v876_v1, 0  ;;  %v400_v6 = vperm.slane %v876_v1, 1  ;;  %s756_s14 = sshll.u32 %s1013_s24, 3  ;;  %v401_v18 = vperm.slane %v876_v1, 2  ;;  %v402_v19 = vperm.slane %v876_v1, 3  ;;  %s342_s17 = scalar_lea.vmem %s1000_s0, %s760_s13 }
   0xf   : > { %v890_v7 = vld [vmem:[%s1006_s6] sm:$0xff]  ;;  %v431_v8 = vperm.slane %v881_v2, 0  ;;  %v432_v9 = vperm.slane %v881_v2, 1  ;;  %v380_v12 = vrot.slane %v373_v4, 4  ;;  %s910_s20 = scalar_lea.vmem %s1001_s1, %s760_s13  ;;  %v381_v22 = vrot.slane %v375_v15, 4  ;;  %s355_s23 = scalar_lea.vmem %s1004_s4, %s756_s14  ;;  %v933_v47 = vld [vmem:[%s342_s17 + $0x8] sm:$0xff] }
  0x10   : > { %v457_v10 = vperm.slane %v890_v7, 0  ;;  %v458_v11 = vperm.slane %v890_v7, 1  ;;  %v407_v13 = vrot.slane %v400_v6, 4  ;;  %v433_v23 = vperm.slane %v881_v2, 2  ;;  %v364_v24 = vld [vmem:[%s342_s17] sm:$0xff]  ;;  %v939_v56 = vld [vmem:[%s910_s20 + $0x8] sm:$0xff]  ;;  %s363_s30 = scalar_lea.vmem %s1007_s7, %s756_s14 }
  0x11   : > { %v439_v16 = vrot.slane %v432_v9, 4  ;;  %v385_v20 = vsel %vm384_vm0, %v372_v3, %v380_v12  ;;  %v423_v25 = vld [vmem:[%s910_s20] sm:$0xff]  ;;  %v408_v28 = vrot.slane %v402_v19, 4  ;;  %v434_v29 = vperm.slane %v881_v2, 3 }
  0x12   : > { %v465_v17 = vrot.slane %v458_v11, 4  ;;  %v411_v21 = vsel %vm384_vm0, %v399_v5, %v407_v13  ;;  %v366_v30 = vunpack.c.l.bf16 %v364_v24  ;;  %v425_v31 = vunpack.c.l.bf16 %v423_v25  ;;  %v924_v32 = vld [vmem:[%s355_s23] sm:$0xff] }
  0x13   : > { %v443_v26 = vsel %vm384_vm0, %v431_v8, %v439_v16  ;;  %v367_v33 = vunpack.c.h.bf16 %v364_v24  ;;  %v386_v34 = vsel %vm384_vm0, %v374_v14, %v381_v22  ;;  %v483_v35 = vperm.slane %v924_v32, 0 }
  0x14   : > { %v469_v27 = vsel %vm384_vm0, %v457_v10, %v465_v17  ;;  %v484_v36 = vperm.slane %v924_v32, 1  ;;  %v412_v37 = vsel %vm384_vm0, %v401_v18, %v408_v28  ;;  %v426_v38 = vunpack.c.h.bf16 %v423_v25 }
  0x15   : > { %v393_v39 = vmul.f32 %v385_v20, %v366_v30  ;;  %v451_v40 = vmul.f32 %v443_v26, %v425_v31  ;;  %v394_v41 = vmul.f32 %v386_v34, %v367_v33  ;;  %v440_v42 = vrot.slane %v434_v29, 4 }
  0x16   : > { %v491_v43 = vrot.slane %v484_v36, 4  ;;  %v459_v44 = vperm.slane %v890_v7, 2  ;;  %v460_v45 = vperm.slane %v890_v7, 3  ;;  %v485_v46 = vperm.slane %v924_v32, 2 }
  0x17   : > { %v419_v48 = vadd.f32 %v411_v21, %v393_v39  ;;  %v477_v49 = vadd.f32 %v469_v27, %v451_v40  ;;  %v420_v50 = vadd.f32 %v412_v37, %v394_v41  ;;  %v444_v51 = vsel %vm384_vm0, %v433_v23, %v440_v42 }
  0x18   : > { %v495_v52 = vsel %vm384_vm0, %v483_v35, %v491_v43  ;;  %v452_v53 = vmul.f32 %v444_v51, %v426_v38  ;;  %v466_v54 = vrot.slane %v460_v45, 4  ;;  %v486_v55 = vperm.slane %v924_v32, 3 }
  0x19   : > { %v503_v57 = vmul.f32 %v495_v52, %v419_v48  ;;  %v368_v58 = vunpack.c.l.bf16 %v933_v47  ;;  %v376_v59 = vperm.slane %v871_v0, 4  ;;  %v377_v60 = vperm.slane %v871_v0, 5 }
  0x1a   : > { %v470_v61 = vsel %vm384_vm0, %v459_v44, %v466_v54  ;;  %v492_v62 = vrot.slane %v486_v55, 4  ;;  %v403_v63 = vperm.slane %v876_v1, 4  ;;  %v404_v3 = vperm.slane %v876_v1, 5 }
  0x1b   : > { %v507_v4 = vadd.f32 %v503_v57, %v477_v49  ;;  %v478_v5 = vadd.f32 %v470_v61, %v452_v53  ;;  %v382_v6 = vrot.slane %v377_v60, 4  ;;  %v427_v8 = vunpack.c.l.bf16 %v939_v56 }
  0x1c   : > { %v496_v9 = vsel %vm384_vm0, %v485_v46, %v492_v62  ;;  %v409_v10 = vrot.slane %v404_v3, 4  ;;  %v435_v11 = vperm.slane %v881_v2, 4  ;;  %v436_v12 = vperm.slane %v881_v2, 5 }
  0x1d   : > { %v511_v13 = vmax.f32 %v507_v4, 0.0  ;;  %v504_v14 = vmul.f32 %v496_v9, %v420_v50  ;;  %v387_v15 = vsel %vm384_vm0, %v376_v59, %v382_v6  ;;  %v461_v16 = vperm.slane %v890_v7, 4 }
  0x1e   : > { %v395_v17 = vmul.f32 %v387_v15, %v368_v58  ;;  %v413_v18 = vsel %vm384_vm0, %v403_v63, %v409_v10  ;;  %v441_v19 = vrot.slane %v436_v12, 4  ;;  %v462_v20 = vperm.slane %v890_v7, 5 }
  0x1f   : > { %519 = vst [vmem:[#allocation1] ss:$2 sm:$0xff] %v511_v13  ;;  %v508_v21 = vadd.f32 %v504_v14, %v478_v5  ;;  %v487_v22 = vperm.slane %v924_v32, 4  ;;  %v488_v23 = vperm.slane %v924_v32, 5  ;;  %v369_v24 = vunpack.c.h.bf16 %v933_v47 }
  0x20   : > { %v421_v25 = vadd.f32 %v413_v18, %v395_v17  ;;  %v445_v26 = vsel %vm384_vm0, %v435_v11, %v441_v19  ;;  %v467_v27 = vrot.slane %v462_v20, 4  ;;  %v378_v28 = vperm.slane %v871_v0, 6 }
  0x21   : > { %v512_v29 = vmax.f32 %v508_v21, 0.0  ;;  %v453_v30 = vmul.f32 %v445_v26, %v427_v8  ;;  %v493_v31 = vrot.slane %v488_v23, 4  ;;  %v379_v33 = vperm.slane %v871_v0, 7 }
  0x22   : > { %v471_v34 = vsel %vm384_vm0, %v461_v16, %v467_v27  ;;  %v405_v35 = vperm.slane %v876_v1, 6  ;;  %v406_v36 = vperm.slane %v876_v1, 7  ;;  %v428_v37 = vunpack.c.h.bf16 %v939_v56 }
  0x23   : > { %521 = vst [vmem:[#allocation1 + $0x10] ss:$2 sm:$0xff] %v512_v29  ;;  %v479_v38 = vadd.f32 %v471_v34, %v453_v30  ;;  %v497_v39 = vsel %vm384_vm0, %v487_v22, %v493_v31  ;;  %v383_v40 = vrot.slane %v379_v33, 4  ;;  %v437_v41 = vperm.slane %v881_v2, 6 }
  0x24   : > { %v505_v42 = vmul.f32 %v497_v39, %v421_v25  ;;  %v410_v43 = vrot.slane %v406_v36, 4  ;;  %v438_v44 = vperm.slane %v881_v2, 7  ;;  %v463_v0 = vperm.slane %v890_v7, 6 }
  0x25   : > { %v388_v45 = vsel %vm384_vm0, %v378_v28, %v383_v40  ;;  %v464_v46 = vperm.slane %v890_v7, 7  ;;  %v489_v1 = vperm.slane %v924_v32, 6  ;;  %v490_v47 = vperm.slane %v924_v32, 7 }
  0x26   : > { %v509_v48 = vadd.f32 %v505_v42, %v479_v38  ;;  %v396_v49 = vmul.f32 %v388_v45, %v369_v24  ;;  %v414_v50 = vsel %vm384_vm0, %v405_v35, %v410_v43  ;;  %v442_v51 = vrot.slane %v438_v44, 4  ;;  %v526_v52 = vld.sshfl [vmem:[#allocation1] sm:$0xff pattern:$0x75316420] }
  0x27   : > { %v468_v53 = vrot.slane %v464_v46, 4  ;;  %v494_v54 = vrot.slane %v490_v47, 4  ;;  %v527_v55 = vld.sshfl [vmem:[#allocation1 + $0x8] sm:$0xff pattern:$0x75316420]  ;;  %v542_v58 = vsel %vm384_vm0, %v526_v52, 0.0 }
  0x28   : > { %v513_v2 = vmax.f32 %v509_v48, 0.0  ;;  %v422_v56 = vadd.f32 %v414_v50, %v396_v49  ;;  %v446_v57 = vsel %vm384_vm0, %v437_v41, %v442_v51  ;;  %v549_v60 = vsel %vm384_vm0, %v527_v55, 0.0 }
  0x29   : > { %v454_v7 = vmul.f32 %v446_v57, %v428_v37  ;;  %v472_v59 = vsel %vm384_vm0, %v463_v0, %v468_v53  ;;  %v498_v32 = vsel %vm384_vm0, %v489_v1, %v494_v54  ;;  %v550_v63 = vrot.slane %v549_v60, 4 }
  0x2a   : > { %523 = vst [vmem:[#allocation1 + $0x20] ss:$2 sm:$0xff] %v513_v2  ;;  %v506_v61 = vmul.f32 %v498_v32, %v422_v56  ;;  %v528_v62 = vld.sshfl [vmem:[#allocation1 + $0x10] sm:$0xff pattern:$0x75316420]  ;;  %v543_v6 = vrot.slane %v542_v58, 4 }
  0x2b   : > { %v480_v3 = vadd.f32 %v472_v59, %v454_v7  ;;  %v529_v4 = vld.sshfl [vmem:[#allocation1 + $0x18] sm:$0xff pattern:$0x75316420]  ;;  %v556_v5 = vsel %vm384_vm0, %v528_v62, 0.0  ;;  %v551_v8 = vadd.f32 %v550_v63, %v549_v60  ;;  %vm619_vm4 = vcmask 1044484  }
  0x2c   : > { %v557_v9 = vrot.slane %v556_v5, 4  ;;  %v563_v10 = vsel %vm384_vm0, %v529_v4, 0.0  ;;  %v544_v17 = vadd.f32 %v543_v6, %v542_v58  ;;  %vm621_vm5 = vcmask 1046534  }
  0x2d   : > { %v510_v11 = vadd.f32 %v506_v61, %v480_v3  ;;  %v564_v12 = vrot.slane %v563_v10, 4  ;;  %v552_v13 = vrot.slane %v551_v8, 2  ;;  %vm623_vm6 = vcmask 1045508  }
  0x2e   : > { %v558_v14 = vadd.f32 %v557_v9, %v556_v5  ;;  %v545_v28 = vrot.slane %v544_v17, 2 }
  0x2f   : > { %v514_v15 = vmax.f32 %v510_v11, 0.0  ;;  %v565_v16 = vadd.f32 %v564_v12, %v563_v10  ;;  %v553_v22 = vadd.f32 %v552_v13, %v551_v8 }
  0x30   : > { %v559_v18 = vrot.slane %v558_v14, 2  ;;  %v546_v39 = vadd.f32 %v545_v28, %v544_v17 }
  0x31   : > { %525 = vst [vmem:[#allocation1 + $0x30] ss:$2 sm:$0xff] %v514_v15  ;;  %v530_v19 = vld.sshfl [vmem:[#allocation1 + $0x20] sm:$0xff pattern:$0x75316420]  ;;  %v566_v20 = vrot.slane %v565_v16, 2 }
  0x32   : > { %v531_v21 = vld.sshfl [vmem:[#allocation1 + $0x28] sm:$0xff pattern:$0x75316420]  ;;  %v570_v23 = vsel %vm384_vm0, %v530_v19, 0.0  ;;  %v560_v24 = vadd.f32 %v559_v18, %v558_v14  ;;  %v554_v33 = vrot.slane %v553_v22, 1  ;;  %v547_v51 = vrot.slane %v546_v39, 1 }
  0x33   : > { %v567_v25 = vadd.f32 %v566_v20, %v565_v16  ;;  %v571_v26 = vrot.slane %v570_v23, 4  ;;  %v577_v27 = vsel %vm384_vm0, %v531_v21, 0.0 }
  0x34   : > { %v578_v29 = vrot.slane %v577_v27, 4  ;;  %v561_v34 = vrot.slane %v560_v24, 1  ;;  %v555_v45 = vadd.f32 %v554_v33, %v553_v22  ;;  %v548_v32 = vadd.f32 %v547_v51, %v546_v39 }
  0x35   : > { %v572_v30 = vadd.f32 %v571_v26, %v570_v23  ;;  %v568_v35 = vrot.slane %v567_v25, 1 }
  0x36   : > { %v579_v31 = vadd.f32 %v578_v29, %v577_v27  ;;  %v562_v47 = vadd.f32 %v561_v34, %v560_v24  ;;  %v606_v56 = vrot.slane %v555_v45, 7 }
  0x37   : > { %v573_v36 = vrot.slane %v572_v30, 2  ;;  %v569_v48 = vadd.f32 %v568_v35, %v567_v25 }
  0x38   : > { %v532_v37 = vld.sshfl [vmem:[#allocation1 + $0x30] sm:$0xff pattern:$0x75316420]  ;;  %v533_v38 = vld.sshfl [vmem:[#allocation1 + $0x38] sm:$0xff pattern:$0x75316420]  ;;  %v614_v5 = vsel %vm613_vm1, %v548_v32, %v606_v56 }
  0x39   : > { %v574_v40 = vadd.f32 %v573_v36, %v572_v30  ;;  %v580_v41 = vrot.slane %v579_v31, 2  ;;  %v584_v42 = vsel %vm384_vm0, %v532_v37, 0.0  ;;  %v591_v43 = vsel %vm384_vm0, %v533_v38, 0.0 }
  0x3a   : > { %v585_v44 = vrot.slane %v584_v42, 4  ;;  %v592_v0 = vrot.slane %v591_v43, 4  ;;  %v607_v7 = vrot.slane %v562_v47, 6  ;;  %v608_v59 = vrot.slane %v569_v48, 5 }
  0x3b   : > { %v575_v46 = vrot.slane %v574_v40, 1  ;;  %v581_v1 = vadd.f32 %v580_v41, %v579_v31 }
  0x3c   : > { %v586_v49 = vadd.f32 %v585_v44, %v584_v42  ;;  %v593_v50 = vadd.f32 %v592_v0, %v591_v43  ;;  %v616_v6 = vsel %vm615_vm2, %v607_v7, %v608_v59 }
  0x3d   : > { %v582_v52 = vrot.slane %v581_v1, 1  ;;  %v576_v53 = vadd.f32 %v575_v46, %v574_v40  ;;  %v618_v11 = vsel %vm617_vm3, %v614_v5, %v616_v6 }
  0x3e   : > { %v587_v54 = vrot.slane %v586_v49, 2  ;;  %v594_v55 = vrot.slane %v593_v50, 2 }
  0x3f   : > { %v583_v2 = vadd.f32 %v582_v52, %v581_v1  ;;  %v609_v62 = vrot.slane %v576_v53, 4 }
  0x40   : > { %v588_v57 = vadd.f32 %v587_v54, %v586_v49  ;;  %v595_v58 = vadd.f32 %v594_v55, %v593_v50 }
  0x41   : > { %v610_v63 = vrot.slane %v583_v2, 3 }
  0x42   : > { %v589_v60 = vrot.slane %v588_v57, 1  ;;  %v596_v61 = vrot.slane %v595_v58, 1 }
  0x43   : > { %v620_v10 = vsel %vm619_vm4, %v609_v62, %v610_v63 }
  0x44   : > { %v590_v3 = vadd.f32 %v589_v60, %v588_v57  ;;  %v597_v4 = vadd.f32 %v596_v61, %v595_v58 }
  0x46   : > { %v611_v8 = vrot.slane %v590_v3, 2  ;;  %v612_v9 = vrot.slane %v597_v4, 1 }
  0x48   : > { %v622_v12 = vsel %vm621_vm5, %v611_v8, %v612_v9 }
  0x49   : > { %v624_v13 = vsel %vm623_vm6, %v620_v10, %v622_v12 }
  0x4a   : > { %v625_v14 = vsel %vm384_vm0, %v618_v11, %v624_v13 }
  0x4b   : > { %627 = vst [vmem:[%s363_s30] sm:$0xff] %v625_v14 }
  0x4c PF: > { %s17_s26 = sadd.s32 1, %s808_s26   ;;  %s1008_s24 = smov %s804_s25 }
  0x4d   : > { %p14_p5 = scmp.ge.s32.totalorder %s17_s26, 4   ;;  %s1009_s25 = smov %s1011_s27 }
  0x4f   :  { %16 = sbr.rel (!%p14_p5) target bundleno = 2 (0x2), region = 87 }

// kernel: audio_encoder_forward.39
= control target key start
LH: loop header
LB: loop body
LE: loop exit
PB: predicated region body
PF: predicated region fallthrough
CT: control target
= control target key end

     0   :  { %s1474_s15 = smov 0   ;;  %s1730_s0 = inlined_call_operand.vmem [shape: bf16[64,1152], index: 0, kind: input, shape index: {}]   ;;  %s1731_s1 = inlined_call_operand.vmem [shape: bf16[1152,128], index: 1, kind: input, shape index: {}]   ;;  %s1732_s2 = inlined_call_operand.vmem [shape: bf16[64,128], index: 2, kind: output, shape index: {0}]   ;;  %s1733_s3 = inlined_call_operand.vmem [shape: f32[8,1,128], index: 3, kind: output, shape index: {1}]   ;;  %s1734_s4 = inlined_call_operand.vmem [shape: f32[8,1,128], index: 4, kind: output, shape index: {2}]  }
   0x1 LB: > { %s1063_s16 = sadd.s32 4294967295, %s1447_s15   ;;  %p1067_p0 = scmp.ge.s32.totalorder %s1447_s15, 1  ;;  %s1447_s15 = sphi %s1474_s15, %s15_s15  }
   0x2   : > { %p167_p1 = scmp.lt.s32.totalorder %s1447_s15, 9 }
   0x4   : > { %p168_p2 = pnand %p1067_p0, %p167_p1 }
   0x5   : > { %p198_p3 = scmp.lt.s32.totalorder (!%p168_p2), %s1063_s16, 7 }
   0x6   : > { %171 = sbr.rel (%p168_p2) target bundleno = 250 (0xfa), region = 28 }
   0xb   : > { %v1367_v0 = vld [vmem:[%s1731_s1 + $0x38] sm:$0xff]  ;;  %v1366_v4 = vld [vmem:[%s1731_s1 + $0x30] sm:$0xff]  ;;  %v1365_v8 = vld [vmem:[%s1731_s1 + $0x28] sm:$0xff]  ;;  %s1736_s16 = smov (!%p198_p3, %s1063_s16), 7 }
   0xc   : > { %v1383_v1 = vld [vmem:[%s1731_s1 + $0xb8] sm:$0xff]  ;;  %826 = vmatpush.bf16.msra.mxu0 %v1367_v0  ;;  %v1382_v5 = vld [vmem:[%s1731_s1 + $0xb0] sm:$0xff]  ;;  %v1381_v9 = vld [vmem:[%s1731_s1 + $0xa8] sm:$0xff]  ;;  %s1432_s7 = smul.u32 36, %s1736_s16  ;;  %s209_s30 = scalar_lea.vmem %s1733_s3, %s1736_s16 }
   0xd   : > { %v1391_v2 = vld [vmem:[%s1731_s1 + $0xf8] sm:$0xff]  ;;  %852 = vmatpush.bf16.msra.mxu2 %v1383_v1  ;;  %v1390_v6 = vld [vmem:[%s1731_s1 + $0xf0] sm:$0xff]  ;;  %v1389_v10 = vld [vmem:[%s1731_s1 + $0xe8] sm:$0xff] }
   0xe   : > { %v1375_v3 = vld [vmem:[%s1731_s1 + $0x78] sm:$0xff]  ;;  %865 = vmatpush.bf16.msra.mxu3 %v1391_v2  ;;  %v1374_v7 = vld [vmem:[%s1731_s1 + $0x70] sm:$0xff]  ;;  %v1373_v11 = vld [vmem:[%s1731_s1 + $0x68] sm:$0xff]  ;;  %s1564_s20 = scalar_lea.vmem %s1730_s0, %s1432_s7  ;;  %s212_s7 = scalar_lea.vmem %s1734_s4, %s1736_s16 }
   0xf   : > { %839 = vmatpush.bf16.msra.mxu1 %v1375_v3  ;;  %v1364_v12 = vld [vmem:[%s1731_s1 + $0x20] sm:$0xff]  ;;  %v1363_v16 = vld [vmem:[%s1731_s1 + $0x18] sm:$0xff]  ;;  %v1362_v20 = vld [vmem:[%s1731_s1 + $0x10] sm:$0xff] }
  0x10   : > { %827 = vmatpush.bf16.msra.mxu0 %v1366_v4  ;;  %v1380_v13 = vld [vmem:[%s1731_s1 + $0xa0] sm:$0xff]  ;;  %v1379_v17 = vld [vmem:[%s1731_s1 + $0x98] sm:$0xff]  ;;  %v1378_v21 = vld [vmem:[%s1731_s1 + $0x90] sm:$0xff] }
  0x11   : > { %853 = vmatpush.bf16.msra.mxu2 %v1382_v5  ;;  %v1388_v14 = vld [vmem:[%s1731_s1 + $0xe0] sm:$0xff]  ;;  %v1387_v18 = vld [vmem:[%s1731_s1 + $0xd8] sm:$0xff]  ;;  %v1386_v22 = vld [vmem:[%s1731_s1 + $0xd0] sm:$0xff] }
  0x12   : > { %866 = vmatpush.bf16.msra.mxu3 %v1390_v6  ;;  %v1372_v15 = vld [vmem:[%s1731_s1 + $0x60] sm:$0xff]  ;;  %v1371_v19 = vld [vmem:[%s1731_s1 + $0x58] sm:$0xff]  ;;  %v1370_v23 = vld [vmem:[%s1731_s1 + $0x50] sm:$0xff] }
  0x13   : > { %840 = vmatpush.bf16.msra.mxu1 %v1374_v7  ;;  %v1361_v24 = vld [vmem:[%s1731_s1 + $0x8] sm:$0xff]  ;;  %v213_v29 = vld [vmem:[%s1564_s20] sm:$0xff]  ;;  %v1399_v34 = vld [vmem:[%s1731_s1 + $0x138] sm:$0xff] }
  0x14   : > { %828 = vmatpush.bf16.msra.mxu0 %v1365_v8  ;;  %v1377_v25 = vld [vmem:[%s1731_s1 + $0x88] sm:$0xff]  ;;  %v1360_v30 = vld [vmem:[%s1731_s1] sm:$0xff]  ;;  %v367_v33 = vunpack.c.l.b16 %v213_v29  ;;  %v1415_v35 = vld [vmem:[%s1731_s1 + $0x1b8] sm:$0xff]  ;;  %v368_v39 = vunpack.c.h.b16 %v213_v29 }
  0x15   : > { %854 = vmatpush.bf16.msra.mxu2 %v1381_v9  ;;  %v1385_v26 = vld [vmem:[%s1731_s1 + $0xc8] sm:$0xff]  ;;  %v1376_v31 = vld [vmem:[%s1731_s1 + $0x80] sm:$0xff]  ;;  %v1423_v40 = vld [vmem:[%s1731_s1 + $0x1f8] sm:$0xff] }
  0x16   : > { %867 = vmatpush.bf16.msra.mxu3 %v1389_v10  ;;  %v1369_v27 = vld [vmem:[%s1731_s1 + $0x48] sm:$0xff]  ;;  %v1384_v36 = vld [vmem:[%s1731_s1 + $0xc0] sm:$0xff]  ;;  %v1407_v41 = vld [vmem:[%s1731_s1 + $0x178] sm:$0xff]  ;;  %v376_v43 = vpack.c.b16 %v367_v33, %v367_v33  ;;  %v377_v47 = vpack.c.b16 %v368_v39, %v368_v39 }
  0x17   : > { %841 = vmatpush.bf16.msra.mxu1 %v1373_v11  ;;  %v214_v28 = vld [vmem:[%s1564_s20 + $0x8] sm:$0xff]  ;;  %v1368_v37 = vld [vmem:[%s1731_s1 + $0x40] sm:$0xff]  ;;  %v1398_v44 = vld [vmem:[%s1731_s1 + $0x130] sm:$0xff] }
  0x18   : > { %829 = vmatpush.bf16.msra.mxu0 %v1364_v12  ;;  %v369_v32 = vunpack.c.l.b16 %v214_v28  ;;  %v370_v38 = vunpack.c.h.b16 %v214_v28  ;;  %v1414_v45 = vld [vmem:[%s1731_s1 + $0x1b0] sm:$0xff]  ;;  %v1397_v50 = vld [vmem:[%s1731_s1 + $0x128] sm:$0xff]  ;;  %v1396_v54 = vld [vmem:[%s1731_s1 + $0x120] sm:$0xff] }
  0x19   : > { %855 = vmatpush.bf16.msra.mxu2 %v1380_v13  ;;  %v1422_v48 = vld [vmem:[%s1731_s1 + $0x1f0] sm:$0xff]  ;;  %v1413_v51 = vld [vmem:[%s1731_s1 + $0x1a8] sm:$0xff]  ;;  %v1412_v55 = vld [vmem:[%s1731_s1 + $0x1a0] sm:$0xff] }
  0x1a   : > { %868 = vmatpush.bf16.msra.mxu3 %v1388_v14  ;;  %v378_v42 = vpack.c.b16 %v369_v32, %v369_v32  ;;  %v379_v46 = vpack.c.b16 %v370_v38, %v370_v38  ;;  %v1406_v49 = vld [vmem:[%s1731_s1 + $0x170] sm:$0xff]  ;;  %v1421_v52 = vld [vmem:[%s1731_s1 + $0x1e8] sm:$0xff]  ;;  %v1420_v56 = vld [vmem:[%s1731_s1 + $0x1e0] sm:$0xff] }
  0x1b   : > { %842 = vmatpush.bf16.msra.mxu1 %v1372_v15  ;;  %v1405_v53 = vld [vmem:[%s1731_s1 + $0x168] sm:$0xff]  ;;  %v1404_v57 = vld [vmem:[%s1731_s1 + $0x160] sm:$0xff]  ;;  %v1395_v58 = vld [vmem:[%s1731_s1 + $0x118] sm:$0xff] }
  0x1c   : > { %830 = vmatpush.bf16.msra.mxu0 %v1363_v16  ;;  %v1411_v59 = vld [vmem:[%s1731_s1 + $0x198] sm:$0xff]  ;;  %v1394_v62 = vld [vmem:[%s1731_s1 + $0x110] sm:$0xff]  ;;  %v1393_v2 = vld [vmem:[%s1731_s1 + $0x108] sm:$0xff] }
  0x1d   : > { %856 = vmatpush.bf16.msra.mxu2 %v1379_v17  ;;  %v1419_v60 = vld [vmem:[%s1731_s1 + $0x1d8] sm:$0xff]  ;;  %v1410_v63 = vld [vmem:[%s1731_s1 + $0x190] sm:$0xff]  ;;  %v1409_v3 = vld [vmem:[%s1731_s1 + $0x188] sm:$0xff] }
  0x1e   : > { %869 = vmatpush.bf16.msra.mxu3 %v1387_v18  ;;  %v1403_v61 = vld [vmem:[%s1731_s1 + $0x158] sm:$0xff]  ;;  %v1418_v0 = vld [vmem:[%s1731_s1 + $0x1d0] sm:$0xff]  ;;  %v1417_v6 = vld [vmem:[%s1731_s1 + $0x1c8] sm:$0xff] }
  0x1f   : > { %843 = vmatpush.bf16.msra.mxu1 %v1371_v19  ;;  %v1402_v1 = vld [vmem:[%s1731_s1 + $0x150] sm:$0xff]  ;;  %v216_v4 = vld [vmem:[%s1564_s20 + $0x18] sm:$0xff]  ;;  %v1401_v7 = vld [vmem:[%s1731_s1 + $0x148] sm:$0xff] }
  0x20   : > { %831 = vmatpush.bf16.msra.mxu0 %v1362_v20  ;;  %v215_v5 = vld [vmem:[%s1564_s20 + $0x10] sm:$0xff]  ;;  %v373_v8 = vunpack.c.l.b16 %v216_v4  ;;  %v1392_v10 = vld [vmem:[%s1731_s1 + $0x100] sm:$0xff]  ;;  %v1431_v12 = vld [vmem:[%s1731_s1 + $0x238] sm:$0xff]  ;;  %v374_v13 = vunpack.c.h.b16 %v216_v4 }
  0x21   : > { %857 = vmatpush.bf16.msra.mxu2 %v1378_v21  ;;  %v371_v9 = vunpack.c.l.b16 %v215_v5  ;;  %v1408_v11 = vld [vmem:[%s1731_s1 + $0x180] sm:$0xff]  ;;  %v372_v16 = vunpack.c.h.b16 %v215_v5  ;;  %v1430_v19 = vld [vmem:[%s1731_s1 + $0x230] sm:$0xff] }
  0x22   : > { %870 = vmatpush.bf16.msra.mxu3 %v1386_v22  ;;  %v1416_v14 = vld [vmem:[%s1731_s1 + $0x1c0] sm:$0xff]  ;;  %v382_v17 = vpack.c.b16 %v373_v8, %v373_v8  ;;  %v383_v20 = vpack.c.b16 %v374_v13, %v374_v13  ;;  %v1429_v22 = vld [vmem:[%s1731_s1 + $0x228] sm:$0xff] }
  0x23   : > { %844 = vmatpush.bf16.msra.mxu1 %v1370_v23  ;;  %v1400_v15 = vld [vmem:[%s1731_s1 + $0x140] sm:$0xff]  ;;  %v380_v18 = vpack.c.b16 %v371_v9, %v371_v9  ;;  %v381_v21 = vpack.c.b16 %v372_v16, %v372_v16 }
  0x24   : > { %832 = vmatpush.bf16.msra.mxu0 %v1361_v24  ;;  %v1428_v23 = vld [vmem:[%s1731_s1 + $0x220] sm:$0xff]  ;;  %v1427_v24 = vld [vmem:[%s1731_s1 + $0x218] sm:$0xff] }
  0x25   : > { %858 = vmatpush.bf16.msra.mxu2 %v1377_v25  ;;  %v1426_v25 = vld [vmem:[%s1731_s1 + $0x210] sm:$0xff]  ;;  %v1424_v29 = vld [vmem:[%s1731_s1 + $0x200] sm:$0xff] }
  0x26   : > { %871 = vmatpush.bf16.msra.mxu3 %v1385_v26  ;;  %v1425_v26 = vld [vmem:[%s1731_s1 + $0x208] sm:$0xff] }
  0x27   : > { %845 = vmatpush.bf16.msra.mxu1 %v1369_v27  ;;  %v217_v27 = vld [vmem:[%s1564_s20 + $0x20] sm:$0xf]  ;;  %s1069_s20 = sshll.u32 %s1736_s16, 2 }
  0x28   : > { %833 = vmatpush.bf16.msra.mxu0 %v1360_v30  ;;  %v375_v28 = vunpack.c.l.b16 %v217_v27  ;;  %s206_s27 = scalar_lea.vmem %s1732_s2, %s1069_s20 }
  0x29   : > { %859 = vmatpush.bf16.msra.mxu2 %v1376_v31 }
  0x2a   : > { %872 = vmatpush.bf16.msra.mxu3 %v1384_v36  ;;  %v384_v30 = vpack.c.b16 %v375_v28, %v375_v28 }
  0x2b   : > { %846 = vmatpush.bf16.msra.mxu1 %v1368_v37  ;;  %834 = vmatmul.bf16.vlgmr.msra.gmra.mxu0 %v376_v43 }
  0x2c   : > { %878 = vmatpush.bf16.msrb.mxu0 %v1399_v34  ;;  %860 = vmatmul.bf16.vlgmr.msra.gmra.mxu2 %v378_v42 }
  0x2d   : > { %904 = vmatpush.bf16.msrb.mxu2 %v1415_v35  ;;  %873 = vmatmul.bf16.vlgmr.msra.gmra.mxu3 %v379_v46 }
  0x2e   : > { %917 = vmatpush.bf16.msrb.mxu3 %v1423_v40  ;;  %847 = vmatmul.bf16.vlgmr.msra.gmra.mxu1 %v377_v47 }
  0x2f   : > { %891 = vmatpush.bf16.msrb.mxu1 %v1407_v41 }
  0x30   : > { %879 = vmatpush.bf16.msrb.mxu0 %v1398_v44 }
  0x31   : > { %905 = vmatpush.bf16.msrb.mxu2 %v1414_v45 }
  0x32   : > { %918 = vmatpush.bf16.msrb.mxu3 %v1422_v48 }
  0x33   : > { %892 = vmatpush.bf16.msrb.mxu1 %v1406_v49 }
  0x34   : > { %880 = vmatpush.bf16.msrb.mxu0 %v1397_v50 }
  0x35   : > { %906 = vmatpush.bf16.msrb.mxu2 %v1413_v51 }
  0x36   : > { %919 = vmatpush.bf16.msrb.mxu3 %v1421_v52 }
  0x37   : > { %893 = vmatpush.bf16.msrb.mxu1 %v1405_v53 }
  0x38   : > { %881 = vmatpush.bf16.msrb.mxu0 %v1396_v54 }
  0x39   : > { %907 = vmatpush.bf16.msrb.mxu2 %v1412_v55 }
  0x3a   : > { %920 = vmatpush.bf16.msrb.mxu3 %v1420_v56 }
  0x3b   : > { %894 = vmatpush.bf16.msrb.mxu1 %v1404_v57 }
  0x3c   : > { %882 = vmatpush.bf16.msrb.mxu0 %v1395_v58 }
  0x3d   : > { %908 = vmatpush.bf16.msrb.mxu2 %v1411_v59 }
  0x3e   : > { %921 = vmatpush.bf16.msrb.mxu3 %v1419_v60 }
  0x3f   : > { %895 = vmatpush.bf16.msrb.mxu1 %v1403_v61 }
  0x40   : > { %883 = vmatpush.bf16.msrb.mxu0 %v1394_v62 }
  0x41   : > { %909 = vmatpush.bf16.msrb.mxu2 %v1410_v63 }
  0x42   : > { %922 = vmatpush.bf16.msrb.mxu3 %v1418_v0 }
  0x43   : > { %896 = vmatpush.bf16.msrb.mxu1 %v1402_v1 }
  0x44   : > { %884 = vmatpush.bf16.msrb.mxu0 %v1393_v2 }
  0x45   : > { %910 = vmatpush.bf16.msrb.mxu2 %v1409_v3 }
  0x46   : > { %923 = vmatpush.bf16.msrb.mxu3 %v1417_v6 }
  0x47   : > { %897 = vmatpush.bf16.msrb.mxu1 %v1401_v7 }
  0x48   : > { %885 = vmatpush.bf16.msrb.mxu0 %v1392_v10 }
  0x49   : > { %911 = vmatpush.bf16.msrb.mxu2 %v1408_v11 }
  0x4a   : > { %924 = vmatpush.bf16.msrb.mxu3 %v1416_v14 }
  0x4b   : > { %898 = vmatpush.bf16.msrb.mxu1 %v1400_v15  ;;  %886 = vmatmul.bf16.vlgmr.msrb.gmra.mxu0 %v380_v18 }
  0x4c   : > { %930 = vmatpush.bf16.msra.mxu0 %v1431_v12  ;;  %912 = vmatmul.bf16.vlgmr.msrb.gmra.mxu2 %v382_v17 }
  0x4d   : > { %925 = vmatmul.bf16.vlgmr.msrb.gmra.mxu3 %v383_v20 }
  0x4e   : > { %899 = vmatmul.bf16.vlgmr.msrb.gmra.mxu1 %v381_v21 }
  0x50   : > { %931 = vmatpush.bf16.msra.mxu0 %v1430_v19 }
  0x54   : > { %932 = vmatpush.bf16.msra.mxu0 %v1429_v22 }
  0x58   : > { %933 = vmatpush.bf16.msra.mxu0 %v1428_v23 }
  0x5c   : > { %934 = vmatpush.bf16.msra.mxu0 %v1427_v24 }
  0x60   : > { %935 = vmatpush.bf16.msra.mxu0 %v1426_v25 }
  0x64   : > { %936 = vmatpush.bf16.msra.mxu0 %v1425_v26 }
  0x68   : > { %937 = vmatpush.bf16.msra.mxu0 %v1424_v29 }
  0x6b   : > { %938 = vmatmul.bf16.vlgmr.msra.gmra.mxu0 %v384_v30 }
  0xa8   : > { %v835_v31 = vpop.f32.mrf.mxu0 }
  0xab   : > { %v848_v32 = vpop.f32.mrf.mxu1 }
  0xac   : > { %v849_v41 = vadd.f32 %v848_v32, %v835_v31 }
  0xaf   : > { %v861_v33 = vpop.f32.mrf.mxu2 }
  0xb0   : > { %v874_v34 = vpop.f32.mrf.mxu3  ;;  %v837_v35 = vpop.f32.mrf.mxu0  ;;  %v862_v43 = vadd.f32 %v861_v33, %v849_v41 }
  0xb2   : > { %v875_v47 = vadd.f32 %v874_v34, %v862_v43 }
  0xb3   : > { %v850_v36 = vpop.f32.mrf.mxu1 }
  0xb7   : > { %v863_v37 = vpop.f32.mrf.mxu2 }
  0xb8   : > { %v876_v38 = vpop.f32.mrf.mxu3 }
  0xc8   : > { %v887_v39 = vpop.f32.mrf.mxu0 }
  0xc9   : > { %v888_v49 = vadd.f32 %v887_v39, %v875_v47 }
  0xcb   : > { %v900_v40 = vpop.f32.mrf.mxu1 }
  0xcc   : > { %v901_v51 = vadd.f32 %v900_v40, %v888_v49 }
  0xcf   : > { %v913_v42 = vpop.f32.mrf.mxu2 }
  0xd0   : > { %v926_v44 = vpop.f32.mrf.mxu3  ;;  %v889_v45 = vpop.f32.mrf.mxu0  ;;  %v914_v52 = vadd.f32 %v913_v42, %v901_v51 }
  0xd2   : > { %v927_v53 = vadd.f32 %v926_v44, %v914_v52 }
  0xd3   : > { %v902_v46 = vpop.f32.mrf.mxu1 }
  0xd7   : > { %v915_v48 = vpop.f32.mrf.mxu2 }
  0xd8   : > { %v928_v50 = vpop.f32.mrf.mxu3 }
  0xe8   : > { %v939_v54 = vpop.f32.mrf.mxu0 }
  0xe9   : > { %v940_v55 = vadd.f32 %v939_v54, %v927_v53 }
  0xeb   : > { %v943_v56 = vpack.c.bf16 %v940_v55, %v940_v55  ;;  %v945_v57 = vrot.slane %v940_v55, 4  ;;  %v952_v58 = vmul.f32 %v940_v55, %v940_v55 }
  0xed   : > { %944 = vst [vmem:[%s206_s27] sm:$0xf] %v943_v56  ;;  %v946_v59 = vadd.f32 %v945_v57, %v940_v55  ;;  %v953_v60 = vrot.slane %v952_v58, 4 }
  0xef   : > { %v947_v61 = vrot.slane %v946_v59, 2  ;;  %v954_v62 = vadd.f32 %v953_v60, %v952_v58 }
  0xf0   : > { %v941_v63 = vpop.f32.mrf.mxu0 }
  0xf1   : > { %v948_v0 = vadd.f32 %v947_v61, %v946_v59  ;;  %v955_v1 = vrot.slane %v954_v62, 2 }
  0xf3   : > { %v949_v2 = vrot.slane %v948_v0, 1  ;;  %v956_v3 = vadd.f32 %v955_v1, %v954_v62 }
  0xf5   : > { %v950_v4 = vadd.f32 %v949_v2, %v948_v0  ;;  %v957_v5 = vrot.slane %v956_v3, 1 }
  0xf7   : > { %951 = vst [vmem:[%s209_s30] sm:$0x1] %v950_v4  ;;  %v958_v6 = vadd.f32 %v957_v5, %v956_v3 }
  0xf9   : > { %959 = vst [vmem:[%s212_s7] sm:$0x1] %v958_v6 }
  0xfa PF: > { %s15_s15 = sadd.s32 1, %s1447_s15  }
  0xfb   : > { %p12_p4 = scmp.ge.s32.totalorder %s15_s15, 10  }
  0xfd   :  { %14 = sbr.rel (!%p12_p4) target bundleno = 1 (0x1), region = 82 }

</bundles_post_ra>
